<compile_context>
chip_gen: v6e
topology: v6e:2x2x1
jax: 0.10.0
libtpu: 0.0.40
codegen_flags: <defaults>
</compile_context>

<pallas_src>
import functools

import jax
import jax.numpy as jnp
from jax import lax
from jax.experimental import pallas as pl
from jax.experimental.pallas import tpu as pltpu


# ----------------------- in-kernel math helpers (traced) ----------------------- #

def _rcp(x):
    # EUP approximate reciprocal: moves divides off the VALU (perf review item 5).
    return pl.reciprocal(x, approx=True)


def _linear(x3, w, b):
    """x3: (G, L, K) @ w: (K, N) + b: (1, N) -> (G, L, N) via one 2-D MXU matmul."""
    G, L, K = x3.shape
    y = jnp.dot(x3.reshape(G * L, K), w, preferred_element_type=jnp.float32) + b
    return y.reshape(G, L, w.shape[1])


def _erf(z):
    # Abramowitz & Stegun 7.1.26 (|err| < 1.5e-7): only exp / mul / add / where.
    a1, a2, a3, a4, a5 = 0.254829592, -0.284496736, 1.421413741, -1.453152027, 1.061405429
    p = 0.3275911
    az = jnp.abs(z)
    t = _rcp(1.0 + p * az)
    poly = ((((a5 * t + a4) * t + a3) * t + a2) * t + a1) * t
    e = 1.0 - poly * jnp.exp(-az * az)
    return jnp.where(z >= 0, e, -e)


def _gelu(x):
    # exact (erf-based) GELU, matching nn.GELU() default, via the approximation above.
    return 0.5 * x * (1.0 + _erf(x * 0.7071067811865476))


def _add_layernorm(x, y, g, b):
    s = x + y
    mu = jnp.mean(s, axis=-1, keepdims=True)
    var = jnp.mean((s - mu) ** 2, axis=-1, keepdims=True)
    return (s - mu) * lax.rsqrt(var + 1e-5) * g + b


def _widen(t, num_heads, head_mask):
    """(G, Lk, E) -> head-masked (G, H*Lk, E).

    Head h's key/value block lives at widened positions [h*Lk, (h+1)*Lk) and is
    nonzero only on head h's lanes.  One concatenate + one multiply replaces the
    per-head lane-slice / concat relayouts of v1."""
    return jnp.concatenate([t] * num_heads, axis=1) * head_mask[None]


def _wide_attention(q, k_wide, v_wide, head_mask, scale, bias=None):
    """Multi-head attention with heads folded into a widened key axis.

    q: (G, Lq, E) un-sliced (heads stay on lanes); k_wide/v_wide: (G, H*Lk, E)
    head-masked (_widen); head_mask: (H*Lk, E) 0/1, reused to broadcast each head's
    softmax denominator back onto that head's lanes via one 2-D matmul; bias:
    optional (Lq, H*Lk) additive score bias.  Result: (G, Lq, E), identical to
    per-head SDPA with heads interleaved on lanes (PyTorch's permute+reshape)."""
    G, Lq, E = q.shape
    n_wide = k_wide.shape[1]
    s = jnp.einsum("gld,gnd->gln", q * scale, k_wide,
                   preferred_element_type=jnp.float32)
    if bias is not None:
        s = s + bias[None, :, :]
    # Global row max is a valid stabiliser for every head block (softmax is shift
    # invariant); exp of masked (-1e30-biased) entries underflows to exactly 0.
    p = jnp.exp(s - jnp.max(s, axis=-1, keepdims=True))
    out = jnp.einsum("gln,gne->gle", p, v_wide, preferred_element_type=jnp.float32)
    den = jnp.dot(p.reshape(G * Lq, n_wide), head_mask,
                  preferred_element_type=jnp.float32).reshape(G, Lq, E)
    return out * _rcp(jnp.maximum(den, 1e-20))


def _ca_branch(qp, kp, vp, bias_row, mask_ca, band_bias, num_heads, tau, scale):
    """CABlock intent: causal tau-window attention on PRE-PROJECTED q/k/v.

    Query t attends to padded key positions [t, t+tau) == original [t-tau, t-1];
    the tau zero-pad rows, once projected, equal the projection bias and stay
    unmasked (faithful to the reference's pad-then-project)."""
    G, _, E = qp.shape
    pad = jnp.broadcast_to(bias_row.reshape(1, 1, E), (G, tau, E))
    k_wide = jnp.concatenate([pad, kp] * num_heads, axis=1) * mask_ca[None]
    v_wide = (k_wide if vp is kp
              else jnp.concatenate([pad, vp] * num_heads, axis=1) * mask_ca[None])
    return _wide_attention(qp, k_wide, v_wide, mask_ca, scale, bias=band_bias)


def _ctx_attention_block(query, key_value, w_ref, b_ref, mask_ca, band_bias,
                         mask_tok, num_heads, tau, scale, same):
    """ContextAttentionBlock: two CA branches + v_proj + outer token attention."""
    wq, wk, wv = w_ref[0], w_ref[1], w_ref[2]
    bq, bk, bv = b_ref[0], b_ref[1], b_ref[2]
    pq_q = _linear(query, wq, bq)                       # proj_q(query)
    pk_q = _linear(query, wk, bk)                       # proj_k(query)
    if same:                                            # query is key is value
        pq_kv, pk_kv = pq_q, pk_q
    else:
        pq_kv = _linear(key_value, wq, bq)              # proj_q(key == value)
        pk_kv = _linear(key_value, wk, bk)              # proj_k(key == value)
    v = _linear(key_value, wv, bv)                      # v_proj(value)
    # q_transform(query, key, value) / k_transform(key, query, value), shared proj.
    q_ca = _ca_branch(pq_q, pq_kv, pq_kv, bq, mask_ca, band_bias, num_heads, tau, scale)
    k_ca = _ca_branch(pk_kv, pk_q, pk_kv, bk, mask_ca, band_bias, num_heads, tau, scale)
    # NOTE: the reference defines output_proj but never applies it in forward.
    return _wide_attention(q_ca, _widen(k_ca, num_heads, mask_tok),
                           _widen(v, num_heads, mask_tok), mask_tok, scale)


def _rel_attention(h, in_w_ref, in_b_ref, out_w, out_b, perm, perm_t, mask_asset,
                   num_heads, scale):
    """nn.MultiheadAttention, batch_first=False: attention across the ASSET axis,
    batched over time.  The (asset,time)<->(time,asset) layout change is a single
    permutation matmul each way (replaces v1's stacked-slice transpose).  Only the
    attention output is used (reference adds the returned tuple)."""
    G, T, E = h.shape
    hp = jnp.dot(perm, h.reshape(G * T, E), preferred_element_type=jnp.float32)

    def proj(i):
        y = jnp.dot(hp, in_w_ref[i], preferred_element_type=jnp.float32) + in_b_ref[i]
        return y.reshape(T, G, E)

    q, k, v = proj(0), proj(1), proj(2)
    o = _wide_attention(q, _widen(k, num_heads, mask_asset),
                        _widen(v, num_heads, mask_asset), mask_asset, scale)
    of = jnp.dot(o.reshape(T * G, E), out_w, preferred_element_type=jnp.float32) + out_b
    of = jnp.dot(perm_t, of, preferred_element_type=jnp.float32)
    return of.reshape(G, T, E)


# --------------------------------- fused kernel -------------------------------- #

def _rat_kernel(
    x_ref,
    # host-built constants
    mask_ca_ref, band_ref, mask_tok_ref, mask_ast_ref, perm_ref, perm_t_ref,
    # encoder
    e_pos_ref, e_ctx_w_ref, e_ctx_b_ref,
    e_rin_w_ref, e_rin_b_ref, e_rout_w_ref, e_rout_b_ref,
    e_ln1g_ref, e_ln1b_ref,
    e_mw1_ref, e_mb1_ref, e_mw2_ref, e_mb2_ref,
    e_ln2g_ref, e_ln2b_ref,
    # decoder
    d_pos_ref, d_ctx1_w_ref, d_ctx1_b_ref,
    d_rin_w_ref, d_rin_b_ref, d_rout_w_ref, d_rout_b_ref,
    d_ln1g_ref, d_ln1b_ref,
    d_ctx2_w_ref, d_ctx2_b_ref,
    d_ln2g_ref, d_ln2b_ref,
    d_mw1_ref, d_mb1_ref, d_mw2_ref, d_mb2_ref,
    d_ln3g_ref, d_ln3b_ref,
    # decision head
    dec_w_ref, dec_b_ref,
    # outputs
    act_ref, emb_ref, logits_ref,
    *, num_heads, tau,
):
    x = x_ref[0]                                    # (assets, window, embed)
    B, T, E = x.shape
    H = num_heads
    scale = (E // H) ** -0.5

    # Constants hoisted to the host and loaded once (perf review item 3).
    mask_ca = mask_ca_ref[...]
    band = band_ref[...]
    mask_tok = mask_tok_ref[...]
    mask_ast = mask_ast_ref[...]
    perm = perm_ref[...]
    perm_t = perm_t_ref[...]

    def ctx(query, key_value, w_ref, b_ref, same):
        return _ctx_attention_block(query, key_value, w_ref, b_ref, mask_ca, band,
                                    mask_tok, H, tau, scale, same)

    def rel(h, in_w_ref, in_b_ref, out_w_ref, out_b_ref):
        return _rel_attention(h, in_w_ref, in_b_ref, out_w_ref[...], out_b_ref[...],
                              perm, perm_t, mask_ast, H, scale)

    # ------------------------------ encoder layer ------------------------------ #
    xe = x + e_pos_ref[...][None]
    x1 = ctx(xe, xe, e_ctx_w_ref, e_ctx_b_ref, same=True)
    x2 = rel(x1, e_rin_w_ref, e_rin_b_ref, e_rout_w_ref, e_rout_b_ref)
    xe = _add_layernorm(xe, x2, e_ln1g_ref[...], e_ln1b_ref[...])
    x3 = _linear(_gelu(_linear(xe, e_mw1_ref[...], e_mb1_ref[...])),
                 e_mw2_ref[...], e_mb2_ref[...])
    enc_out = _add_layernorm(xe, x3, e_ln2g_ref[...], e_ln2b_ref[...])

    # ------------------------------ decoder layer ------------------------------ #
    xd = x + d_pos_ref[...][None]
    x1 = ctx(xd, xd, d_ctx1_w_ref, d_ctx1_b_ref, same=True)
    x2 = rel(x1, d_rin_w_ref, d_rin_b_ref, d_rout_w_ref, d_rout_b_ref)
    xd = _add_layernorm(xd, x2, d_ln1g_ref[...], d_ln1b_ref[...])
    x3 = ctx(xd, enc_out, d_ctx2_w_ref, d_ctx2_b_ref, same=False)
    xd = _add_layernorm(xd, x3, d_ln2g_ref[...], d_ln2b_ref[...])
    x4 = _linear(_gelu(_linear(xd, d_mw1_ref[...], d_mb1_ref[...])),
                 d_mw2_ref[...], d_mb2_ref[...])
    xd = _add_layernorm(xd, x4, d_ln3g_ref[...], d_ln3b_ref[...])
    # TODO(synk): reference RATDecoderLayer.forward lacks a `return`; we use x per intent.

    emb_ref[0] = xd

    # ------------------------------ decision layer ----------------------------- #
    # Three Linear(E, 1) heads packed into one (E, 3) matmul.  Each reference softmax
    # is over a size-1 dim and is identically 1.0, so action = 1 - 1 + 1 = 1
    # (constant-folded per perf review); the logits are returned for validation.
    logits_ref[0] = _linear(xd, dec_w_ref[...], dec_b_ref[...])
    act_ref[0] = jnp.ones((B, T, 1), jnp.float32)


# --------------------------- host-side constant builders ----------------------- #

def _head_select_mask(block_len, num_heads, head_dim):
    """(H*block_len, H*head_dim) f32: 1 iff the widened-key block and the output
    lane belong to the same head."""
    n_head = jnp.arange(num_heads * block_len)[:, None] // block_len
    e_head = jnp.arange(num_heads * head_dim)[None, :] // head_dim
    return (n_head == e_head).astype(jnp.float32)


def _band_bias_wide(window, tau, num_heads):
    """(T, H*(T+tau)) additive score bias (0 inside the causal tau-window, -1e30 out)."""
    row = jnp.arange(window)[:, None]
    col = jnp.arange(window + tau)[None, :]
    band = (col >= row) & (col < row + tau)
    return jnp.where(jnp.tile(band, (1, num_heads)), 0.0, -1e30).astype(jnp.float32)


def _asset_time_permutation(num_assets, window):
    """(T*B, B*T) permutation matrix: row-major (asset, time) -> (time, asset)."""
    src = jnp.arange(num_assets * window)
    dst = (src % window) * num_assets + src // window
    return jnp.zeros((window * num_assets, num_assets * window),
                     jnp.float32).at[dst, src].set(1.0)


# --------------------------------- entry point --------------------------------- #

def relation_aware_transformer(x, params, num_heads, tau):
    """x: (num_windows, num_assets, window_size, embed_dim) or a single
    (num_assets, window_size, embed_dim) window.
    Returns (action, decoder_embedding, decision_logits)."""
    squeeze = x.ndim == 3
    if squeeze:
        x = x[None]
    N, B, T, E = x.shape
    assert E % num_heads == 0
    Dh = E // num_heads

    perm = _asset_time_permutation(B, T)
    enc, dec, dcs = params["encoder"], params["decoder"], params["decision"]
    operands = (
        _head_select_mask(T + tau, num_heads, Dh),      # CA-branch head mask
        _band_bias_wide(T, tau, num_heads),             # CA-branch band bias
        _head_select_mask(T, num_heads, Dh),            # outer (token) head mask
        _head_select_mask(B, num_heads, Dh),            # rel-attn (asset) head mask
        perm, perm.T,                                   # (asset,time)<->(time,asset)
        enc["pos_enc"], enc["seq_attn"]["w"], enc["seq_attn"]["b"],
        enc["rel_attn"]["in_w"], enc["rel_attn"]["in_b"],
        enc["rel_attn"]["out_w"], enc["rel_attn"]["out_b"],
        enc["ln1_g"], enc["ln1_b"],
        enc["mlp"]["w1"], enc["mlp"]["b1"], enc["mlp"]["w2"], enc["mlp"]["b2"],
        enc["ln2_g"], enc["ln2_b"],
        dec["pos_enc"], dec["seq_attn_1"]["w"], dec["seq_attn_1"]["b"],
        dec["rel_attn"]["in_w"], dec["rel_attn"]["in_b"],
        dec["rel_attn"]["out_w"], dec["rel_attn"]["out_b"],
        dec["ln1_g"], dec["ln1_b"],
        dec["seq_attn_2"]["w"], dec["seq_attn_2"]["b"],
        dec["ln2_g"], dec["ln2_b"],
        dec["mlp"]["w1"], dec["mlp"]["b1"], dec["mlp"]["w2"], dec["mlp"]["b2"],
        dec["ln3_g"], dec["ln3_b"],
        dcs["w"], dcs["b"],
    )

    per_window = pl.BlockSpec((1, B, T, E), lambda n: (n, 0, 0, 0))
    # Constant index_maps => weights/constants DMA'd once, resident across the grid.
    resident = [pl.BlockSpec(a.shape, lambda n, r=a.ndim: (0,) * r) for a in operands]
    out_shape = (
        jax.ShapeDtypeStruct((N, B, T, 1), jnp.float32),    # action
        jax.ShapeDtypeStruct((N, B, T, E), jnp.float32),    # decoder embedding (aux)
        jax.ShapeDtypeStruct((N, B, T, 3), jnp.float32),    # decision logits (aux)
    )
    out_specs = [
        pl.BlockSpec((1, B, T, 1), lambda n: (n, 0, 0, 0)),
        pl.BlockSpec((1, B, T, E), lambda n: (n, 0, 0, 0)),
        pl.BlockSpec((1, B, T, 3), lambda n: (n, 0, 0, 0)),
    ]

    action, emb, logits = pl.pallas_call(
        functools.partial(_rat_kernel, num_heads=num_heads, tau=tau),
        out_shape=out_shape,
        grid_spec=pltpu.PrefetchScalarGridSpec(
            num_scalar_prefetch=0,
            grid=(N,),
            in_specs=[per_window] + resident,
            out_specs=out_specs,
        ),
        compiler_params=pltpu.CompilerParams(dimension_semantics=("parallel",)),
    )(x, *operands)

    if squeeze:
        action, emb, logits = action[0], emb[0], logits[0]
    return action, emb, logits


# -------------------------------- parameter init ------------------------------- #

def init_params(key, embed_dim, num_heads, window_size, tau):
    del num_heads, tau  # layout does not depend on them
    E = embed_dim
    keys = iter(jax.random.split(key, 64))

    def lin(fan_in, fan_out):
        kw, kb = jax.random.split(next(keys))
        w = jax.random.normal(kw, (fan_in, fan_out), jnp.float32) / jnp.sqrt(fan_in)
        b = 0.01 * jax.random.normal(kb, (1, fan_out), jnp.float32)
        return w, b

    def stacked(n):
        ws, bs = zip(*(lin(E, E) for _ in range(n)))
        return jnp.stack(ws), jnp.stack(bs)              # (n, E, E), (n, 1, E)

    def ctx_attn():
        # [proj_q | proj_k | v_proj] stacked on a LEADING axis: the kernel reads
        # w_ref[i] instead of slicing lanes of a packed (E,3E) output (review item 4).
        # output_proj is defined but unused in the reference forward.
        w, b = stacked(3)
        return dict(w=w, b=b)

    def mha():
        in_w, in_b = stacked(3)                          # q / k / v in-projections
        out_w, out_b = lin(E, E)
        return dict(in_w=in_w, in_b=in_b, out_w=out_w, out_b=out_b)

    def mlp_p():
        w1, b1 = lin(E, 4 * E)
        w2, b2 = lin(4 * E, E)
        return dict(w1=w1, b1=b1, w2=w2, b2=b2)

    ones = jnp.ones((1, E), jnp.float32)
    zeros = jnp.zeros((1, E), jnp.float32)

    encoder = dict(
        pos_enc=jax.random.normal(next(keys), (window_size, E), jnp.float32),
        seq_attn=ctx_attn(), rel_attn=mha(), mlp=mlp_p(),
        ln1_g=ones, ln1_b=zeros, ln2_g=ones, ln2_b=zeros,
    )
    decoder = dict(
        pos_enc=jax.random.normal(next(keys), (window_size, E), jnp.float32),
        seq_attn_1=ctx_attn(), rel_attn=mha(), seq_attn_2=ctx_attn(), mlp=mlp_p(),
        ln1_g=ones, ln1_b=zeros, ln2_g=ones, ln2_b=zeros, ln3_g=ones, ln3_b=zeros,
    )
    # TODO(synk): reference DecisionLayer declares Linear(emb_dim + 1, 1), incompatible
    # with its emb_dim-wide input; we use Linear(emb_dim, 1), packed into one (E, 3).
    wi, bi = lin(E, 1)
    ws_, bs_ = lin(E, 1)
    wr, br = lin(E, 1)
    decision = dict(w=jnp.concatenate([wi, ws_, wr], axis=1),
                    b=jnp.concatenate([bi, bs_, br], axis=1))
    return dict(encoder=encoder, decoder=decoder, decision=decision)


# ------------------------- pure-JAX reference (validation) --------------------- #

def reference_forward(x, params, num_heads, tau):
    """Independent non-Pallas implementation of the same interpreted semantics
    (per-head reshape/transpose attention, exact softmax, exact erf GELU)."""
    E = x.shape[-1]
    H = num_heads
    Dh = E // H
    scale = Dh ** -0.5

    def linear(v, w, b):
        return v @ w + b

    def mha(q, k, v, allow=None):
        G, Lq, _ = q.shape
        Lk = k.shape[1]
        qs, ks, vs = (t.reshape(t.shape[0], t.shape[1], H, Dh) for t in (q, k, v))
        s = jnp.einsum("glhd,gmhd->ghlm", qs, ks) * scale
        if allow is not None:
            s = jnp.where(allow[None, None], s, -jnp.inf)
        p = jax.nn.softmax(s, axis=-1)
        o = jnp.einsum("ghlm,gmhd->glhd", p, vs)
        return o.reshape(G, Lq, E)

    def ca_branch(q_in, k_in, v_in, w, b):
        qp, kp, vp = linear(q_in, w, b), linear(k_in, w, b), linear(v_in, w, b)
        G, T_, _ = qp.shape
        pad = jnp.broadcast_to(b.reshape(1, 1, E), (G, tau, E))
        kpad = jnp.concatenate([pad, kp], axis=1)
        vpad = jnp.concatenate([pad, vp], axis=1)
        row = jnp.arange(T_)[:, None]
        col = jnp.arange(T_ + tau)[None, :]
        allow = (col >= row) & (col < row + tau)
        return mha(qp, kpad, vpad, allow)

    def ctx_block(query, key, value, p):
        q = ca_branch(query, key, value, p["w"][0], p["b"][0])
        k = ca_branch(key, query, value, p["w"][1], p["b"][1])
        v = linear(value, p["w"][2], p["b"][2])
        return mha(q, k, v)

    def rel_attn(h, p):
        q = linear(h, p["in_w"][0], p["in_b"][0])
        k = linear(h, p["in_w"][1], p["in_b"][1])
        v = linear(h, p["in_w"][2], p["in_b"][2])
        qT, kT, vT = (jnp.swapaxes(t, 0, 1) for t in (q, k, v))
        o = jnp.swapaxes(mha(qT, kT, vT), 0, 1)
        return linear(o, p["out_w"], p["out_b"])

    def ln(v, g, b):
        mu = v.mean(-1, keepdims=True)
        var = ((v - mu) ** 2).mean(-1, keepdims=True)
        return (v - mu) / jnp.sqrt(var + 1e-5) * g + b

    def mlp(v, p):
        h = jax.nn.gelu(linear(v, p["w1"], p["b1"]), approximate=False)
        return linear(h, p["w2"], p["b2"])

    enc, dec, dcs = params["encoder"], params["decoder"], params["decision"]
    xe = x + enc["pos_enc"][None]
    x1 = ctx_block(xe, xe, xe, enc["seq_attn"])
    x2 = rel_attn(x1, enc["rel_attn"])
    xe = ln(xe + x2, enc["ln1_g"], enc["ln1_b"])
    xe = ln(xe + mlp(xe, enc["mlp"]), enc["ln2_g"], enc["ln2_b"])

    xd = x + dec["pos_enc"][None]
    x1 = ctx_block(xd, xd, xd, dec["seq_attn_1"])
    x2 = rel_attn(x1, dec["rel_attn"])
    xd = ln(xd + x2, dec["ln1_g"], dec["ln1_b"])
    x3 = ctx_block(xd, xe, xe, dec["seq_attn_2"])
    xd = ln(xd + x3, dec["ln2_g"], dec["ln2_b"])
    xd = ln(xd + mlp(xd, dec["mlp"]), dec["ln3_g"], dec["ln3_b"])

    logits = linear(xd, dcs["w"], dcs["b"])
    action = (jax.nn.softmax(logits[..., 0:1], axis=-1)
              - jax.nn.softmax(logits[..., 1:2], axis=-1)
              + jax.nn.softmax(logits[..., 2:3], axis=-1))
    return action, xd, logits


# ------------------------------------- main ------------------------------------ #

if __name__ == "__main__":
    # windows (grid axis), assets, window_size, embed_dim, heads, context window
    N, B, T, E, H, TAU = 4, 4, 8, 32, 4, 4
    key = jax.random.PRNGKey(0)
    kx, kp = jax.random.split(key)
    x = jax.random.normal(kx, (N, B, T, E), jnp.float32)
    params = init_params(kp, E, H, T, TAU)

    fwd = jax.jit(functools.partial(relation_aware_transformer, num_heads=H, tau=TAU))
    action, emb, logits = fwd(x, params)
    jax.block_until_ready((action, emb, logits))

    ref = jax.jit(jax.vmap(functools.partial(
        reference_forward, params=params, num_heads=H, tau=TAU)))
    ref_action, ref_emb, ref_logits = ref(x)

    assert action.shape == (N, B, T, 1) and emb.shape == (N, B, T, E)
    assert bool(jnp.all(jnp.isfinite(emb))) and bool(jnp.all(jnp.isfinite(logits)))
    # Intermediate-tensor check of the attention/MLP path (perf-review correctness
    # concern).  Tolerance covers TPU default-precision matmuls and the approximate
    # EUP reciprocal; structural bugs show up as O(1) deviations.
    assert bool(jnp.allclose(emb, ref_emb, atol=0.1, rtol=0.1)), \
        float(jnp.max(jnp.abs(emb - ref_emb)))
    assert bool(jnp.allclose(logits, ref_logits, atol=0.1, rtol=0.1)), \
        float(jnp.max(jnp.abs(logits - ref_logits)))
    # Faithful to the reference: softmax over a size-1 dim is 1, so action == 1.
    assert bool(jnp.allclose(action, 1.0)) and bool(jnp.allclose(ref_action, 1.0))
    print("KERNEL_OK")
</pallas_src>

<mosaic_0001>
module attributes {stable_mosaic.version = 11 : i64} {
  func.func @_rat_kernel(%arg0: i32, %arg1: memref<1x4x8x32xf32, #tpu.memory_space<vmem>>, %arg2: memref<48x32xf32, #tpu.memory_space<vmem>>, %arg3: memref<8x48xf32, #tpu.memory_space<vmem>>, %arg4: memref<32x32xf32, #tpu.memory_space<vmem>>, %arg5: memref<16x32xf32, #tpu.memory_space<vmem>>, %arg6: memref<32x32xf32, #tpu.memory_space<vmem>>, %arg7: memref<32x32xf32, #tpu.memory_space<vmem>>, %arg8: memref<8x32xf32, #tpu.memory_space<vmem>>, %arg9: memref<3x32x32xf32, #tpu.memory_space<vmem>>, %arg10: memref<3x1x32xf32, #tpu.memory_space<vmem>>, %arg11: memref<3x32x32xf32, #tpu.memory_space<vmem>>, %arg12: memref<3x1x32xf32, #tpu.memory_space<vmem>>, %arg13: memref<32x32xf32, #tpu.memory_space<vmem>>, %arg14: memref<1x32xf32, #tpu.memory_space<vmem>>, %arg15: memref<1x32xf32, #tpu.memory_space<vmem>>, %arg16: memref<1x32xf32, #tpu.memory_space<vmem>>, %arg17: memref<32x128xf32, #tpu.memory_space<vmem>>, %arg18: memref<1x128xf32, #tpu.memory_space<vmem>>, %arg19: memref<128x32xf32, #tpu.memory_space<vmem>>, %arg20: memref<1x32xf32, #tpu.memory_space<vmem>>, %arg21: memref<1x32xf32, #tpu.memory_space<vmem>>, %arg22: memref<1x32xf32, #tpu.memory_space<vmem>>, %arg23: memref<8x32xf32, #tpu.memory_space<vmem>>, %arg24: memref<3x32x32xf32, #tpu.memory_space<vmem>>, %arg25: memref<3x1x32xf32, #tpu.memory_space<vmem>>, %arg26: memref<3x32x32xf32, #tpu.memory_space<vmem>>, %arg27: memref<3x1x32xf32, #tpu.memory_space<vmem>>, %arg28: memref<32x32xf32, #tpu.memory_space<vmem>>, %arg29: memref<1x32xf32, #tpu.memory_space<vmem>>, %arg30: memref<1x32xf32, #tpu.memory_space<vmem>>, %arg31: memref<1x32xf32, #tpu.memory_space<vmem>>, %arg32: memref<3x32x32xf32, #tpu.memory_space<vmem>>, %arg33: memref<3x1x32xf32, #tpu.memory_space<vmem>>, %arg34: memref<1x32xf32, #tpu.memory_space<vmem>>, %arg35: memref<1x32xf32, #tpu.memory_space<vmem>>, %arg36: memref<32x128xf32, #tpu.memory_space<vmem>>, %arg37: memref<1x128xf32, #tpu.memory_space<vmem>>, %arg38: memref<128x32xf32, #tpu.memory_space<vmem>>, %arg39: memref<1x32xf32, #tpu.memory_space<vmem>>, %arg40: memref<1x32xf32, #tpu.memory_space<vmem>>, %arg41: memref<1x32xf32, #tpu.memory_space<vmem>>, %arg42: memref<32x3xf32, #tpu.memory_space<vmem>>, %arg43: memref<1x3xf32, #tpu.memory_space<vmem>>, %arg44: memref<1x4x8x1xf32, #tpu.memory_space<vmem>>, %arg45: memref<1x4x8x32xf32, #tpu.memory_space<vmem>>, %arg46: memref<1x4x8x3xf32, #tpu.memory_space<vmem>>) attributes {dimension_semantics = [#tpu.dimension_semantics<parallel>], iteration_bounds = array<i64: 4>, scalar_prefetch = 0 : i64, scratch_operands = 0 : i64, tpu.core_type = #tpu.core_type<tc>, window_params = [{transform_indices = @transform_0, window_bounds = array<i64: 1, 4, 8, 32>}, {pipeline_mode = #tpu.pipeline_mode<synchronous>, transform_indices = @transform_1, window_bounds = array<i64: 48, 32>}, {pipeline_mode = #tpu.pipeline_mode<synchronous>, transform_indices = @transform_2, window_bounds = array<i64: 8, 48>}, {pipeline_mode = #tpu.pipeline_mode<synchronous>, transform_indices = @transform_3, window_bounds = array<i64: 32, 32>}, {pipeline_mode = #tpu.pipeline_mode<synchronous>, transform_indices = @transform_4, window_bounds = array<i64: 16, 32>}, {pipeline_mode = #tpu.pipeline_mode<synchronous>, transform_indices = @transform_5, window_bounds = array<i64: 32, 32>}, {pipeline_mode = #tpu.pipeline_mode<synchronous>, transform_indices = @transform_6, window_bounds = array<i64: 32, 32>}, {pipeline_mode = #tpu.pipeline_mode<synchronous>, transform_indices = @transform_7, window_bounds = array<i64: 8, 32>}, {pipeline_mode = #tpu.pipeline_mode<synchronous>, transform_indices = @transform_8, window_bounds = array<i64: 3, 32, 32>}, {pipeline_mode = #tpu.pipeline_mode<synchronous>, transform_indices = @transform_9, window_bounds = array<i64: 3, 1, 32>}, {pipeline_mode = #tpu.pipeline_mode<synchronous>, transform_indices = @transform_10, window_bounds = array<i64: 3, 32, 32>}, {pipeline_mode = #tpu.pipeline_mode<synchronous>, transform_indices = @transform_11, window_bounds = array<i64: 3, 1, 32>}, {pipeline_mode = #tpu.pipeline_mode<synchronous>, transform_indices = @transform_12, window_bounds = array<i64: 32, 32>}, {pipeline_mode = #tpu.pipeline_mode<synchronous>, transform_indices = @transform_13, window_bounds = array<i64: 1, 32>}, {pipeline_mode = #tpu.pipeline_mode<synchronous>, transform_indices = @transform_14, window_bounds = array<i64: 1, 32>}, {pipeline_mode = #tpu.pipeline_mode<synchronous>, transform_indices = @transform_15, window_bounds = array<i64: 1, 32>}, {pipeline_mode = #tpu.pipeline_mode<synchronous>, transform_indices = @transform_16, window_bounds = array<i64: 32, 128>}, {pipeline_mode = #tpu.pipeline_mode<synchronous>, transform_indices = @transform_17, window_bounds = array<i64: 1, 128>}, {pipeline_mode = #tpu.pipeline_mode<synchronous>, transform_indices = @transform_18, window_bounds = array<i64: 128, 32>}, {pipeline_mode = #tpu.pipeline_mode<synchronous>, transform_indices = @transform_19, window_bounds = array<i64: 1, 32>}, {pipeline_mode = #tpu.pipeline_mode<synchronous>, transform_indices = @transform_20, window_bounds = array<i64: 1, 32>}, {pipeline_mode = #tpu.pipeline_mode<synchronous>, transform_indices = @transform_21, window_bounds = array<i64: 1, 32>}, {pipeline_mode = #tpu.pipeline_mode<synchronous>, transform_indices = @transform_22, window_bounds = array<i64: 8, 32>}, {pipeline_mode = #tpu.pipeline_mode<synchronous>, transform_indices = @transform_23, window_bounds = array<i64: 3, 32, 32>}, {pipeline_mode = #tpu.pipeline_mode<synchronous>, transform_indices = @transform_24, window_bounds = array<i64: 3, 1, 32>}, {pipeline_mode = #tpu.pipeline_mode<synchronous>, transform_indices = @transform_25, window_bounds = array<i64: 3, 32, 32>}, {pipeline_mode = #tpu.pipeline_mode<synchronous>, transform_indices = @transform_26, window_bounds = array<i64: 3, 1, 32>}, {pipeline_mode = #tpu.pipeline_mode<synchronous>, transform_indices = @transform_27, window_bounds = array<i64: 32, 32>}, {pipeline_mode = #tpu.pipeline_mode<synchronous>, transform_indices = @transform_28, window_bounds = array<i64: 1, 32>}, {pipeline_mode = #tpu.pipeline_mode<synchronous>, transform_indices = @transform_29, window_bounds = array<i64: 1, 32>}, {pipeline_mode = #tpu.pipeline_mode<synchronous>, transform_indices = @transform_30, window_bounds = array<i64: 1, 32>}, {pipeline_mode = #tpu.pipeline_mode<synchronous>, transform_indices = @transform_31, window_bounds = array<i64: 3, 32, 32>}, {pipeline_mode = #tpu.pipeline_mode<synchronous>, transform_indices = @transform_32, window_bounds = array<i64: 3, 1, 32>}, {pipeline_mode = #tpu.pipeline_mode<synchronous>, transform_indices = @transform_33, window_bounds = array<i64: 1, 32>}, {pipeline_mode = #tpu.pipeline_mode<synchronous>, transform_indices = @transform_34, window_bounds = array<i64: 1, 32>}, {pipeline_mode = #tpu.pipeline_mode<synchronous>, transform_indices = @transform_35, window_bounds = array<i64: 32, 128>}, {pipeline_mode = #tpu.pipeline_mode<synchronous>, transform_indices = @transform_36, window_bounds = array<i64: 1, 128>}, {pipeline_mode = #tpu.pipeline_mode<synchronous>, transform_indices = @transform_37, window_bounds = array<i64: 128, 32>}, {pipeline_mode = #tpu.pipeline_mode<synchronous>, transform_indices = @transform_38, window_bounds = array<i64: 1, 32>}, {pipeline_mode = #tpu.pipeline_mode<synchronous>, transform_indices = @transform_39, window_bounds = array<i64: 1, 32>}, {pipeline_mode = #tpu.pipeline_mode<synchronous>, transform_indices = @transform_40, window_bounds = array<i64: 1, 32>}, {pipeline_mode = #tpu.pipeline_mode<synchronous>, transform_indices = @transform_41, window_bounds = array<i64: 32, 3>}, {pipeline_mode = #tpu.pipeline_mode<synchronous>, transform_indices = @transform_42, window_bounds = array<i64: 1, 3>}, {transform_indices = @transform_43, window_bounds = array<i64: 1, 4, 8, 1>}, {transform_indices = @transform_44, window_bounds = array<i64: 1, 4, 8, 32>}, {transform_indices = @transform_45, window_bounds = array<i64: 1, 4, 8, 3>}]} {
    %c0 = arith.constant 0 : index
    %c0_0 = arith.constant 0 : index
    %c0_1 = arith.constant 0 : index
    %c0_2 = arith.constant 0 : index
    %0 = vector.load %arg1[%c0, %c0_0, %c0_1, %c0_2] : memref<1x4x8x32xf32, #tpu.memory_space<vmem>>, vector<1x4x8x32xf32>
    %1 = vector.shape_cast %0 : vector<1x4x8x32xf32> to vector<4x8x32xf32>
    %c0_3 = arith.constant 0 : index
    %c0_4 = arith.constant 0 : index
    %2 = vector.load %arg2[%c0_3, %c0_4] : memref<48x32xf32, #tpu.memory_space<vmem>>, vector<48x32xf32>
    %c0_5 = arith.constant 0 : index
    %c0_6 = arith.constant 0 : index
    %3 = vector.load %arg3[%c0_5, %c0_6] : memref<8x48xf32, #tpu.memory_space<vmem>>, vector<8x48xf32>
    %c0_7 = arith.constant 0 : index
    %c0_8 = arith.constant 0 : index
    %4 = vector.load %arg4[%c0_7, %c0_8] : memref<32x32xf32, #tpu.memory_space<vmem>>, vector<32x32xf32>
    %c0_9 = arith.constant 0 : index
    %c0_10 = arith.constant 0 : index
    %5 = vector.load %arg5[%c0_9, %c0_10] : memref<16x32xf32, #tpu.memory_space<vmem>>, vector<16x32xf32>
    %c0_11 = arith.constant 0 : index
    %c0_12 = arith.constant 0 : index
    %6 = vector.load %arg6[%c0_11, %c0_12] : memref<32x32xf32, #tpu.memory_space<vmem>>, vector<32x32xf32>
    %c0_13 = arith.constant 0 : index
    %c0_14 = arith.constant 0 : index
    %7 = vector.load %arg7[%c0_13, %c0_14] : memref<32x32xf32, #tpu.memory_space<vmem>>, vector<32x32xf32>
    %c0_15 = arith.constant 0 : index
    %c0_16 = arith.constant 0 : index
    %8 = vector.load %arg8[%c0_15, %c0_16] : memref<8x32xf32, #tpu.memory_space<vmem>>, vector<8x32xf32>
    %9 = vector.shape_cast %8 : vector<8x32xf32> to vector<1x8x32xf32>
    %10 = vector.broadcast %9 : vector<1x8x32xf32> to vector<4x8x32xf32>
    %11 = arith.addf %1, %10 : vector<4x8x32xf32>
    %c0_17 = arith.constant 0 : index
    %c0_18 = arith.constant 0 : index
    %c0_19 = arith.constant 0 : index
    %12 = vector.load %arg9[%c0_17, %c0_18, %c0_19] : memref<3x32x32xf32, #tpu.memory_space<vmem>>, vector<1x32x32xf32>
    %13 = vector.shape_cast %12 : vector<1x32x32xf32> to vector<32x32xf32>
    %c1 = arith.constant 1 : index
    %c0_20 = arith.constant 0 : index
    %c0_21 = arith.constant 0 : index
    %14 = vector.load %arg9[%c1, %c0_20, %c0_21] : memref<3x32x32xf32, #tpu.memory_space<vmem>>, vector<1x32x32xf32>
    %15 = vector.shape_cast %14 : vector<1x32x32xf32> to vector<32x32xf32>
    %c2 = arith.constant 2 : index
    %c0_22 = arith.constant 0 : index
    %c0_23 = arith.constant 0 : index
    %16 = vector.load %arg9[%c2, %c0_22, %c0_23] : memref<3x32x32xf32, #tpu.memory_space<vmem>>, vector<1x32x32xf32>
    %17 = vector.shape_cast %16 : vector<1x32x32xf32> to vector<32x32xf32>
    %c0_24 = arith.constant 0 : index
    %c0_25 = arith.constant 0 : index
    %c0_26 = arith.constant 0 : index
    %18 = vector.load %arg10[%c0_24, %c0_25, %c0_26] : memref<3x1x32xf32, #tpu.memory_space<vmem>>, vector<1x1x32xf32>
    %19 = vector.shape_cast %18 : vector<1x1x32xf32> to vector<1x32xf32>
    %c1_27 = arith.constant 1 : index
    %c0_28 = arith.constant 0 : index
    %c0_29 = arith.constant 0 : index
    %20 = vector.load %arg10[%c1_27, %c0_28, %c0_29] : memref<3x1x32xf32, #tpu.memory_space<vmem>>, vector<1x1x32xf32>
    %21 = vector.shape_cast %20 : vector<1x1x32xf32> to vector<1x32xf32>
    %c2_30 = arith.constant 2 : index
    %c0_31 = arith.constant 0 : index
    %c0_32 = arith.constant 0 : index
    %22 = vector.load %arg10[%c2_30, %c0_31, %c0_32] : memref<3x1x32xf32, #tpu.memory_space<vmem>>, vector<1x1x32xf32>
    %23 = vector.shape_cast %22 : vector<1x1x32xf32> to vector<1x32xf32>
    %24 = vector.shape_cast %11 : vector<4x8x32xf32> to vector<32x32xf32>
    %cst = arith.constant dense<0.000000e+00> : vector<32x32xf32>
    %25 = tpu.matmul %24, %13, %cst {dimension_numbers = #tpu.dot_dimension_numbers<[1], [0], [0], [1], [0, 0, 1, 1], [], []>} : vector<32x32xf32>, vector<32x32xf32>, vector<32x32xf32> -> vector<32x32xf32>
    %26 = vector.broadcast %19 : vector<1x32xf32> to vector<32x32xf32>
    %27 = arith.addf %25, %26 : vector<32x32xf32>
    %28 = vector.shape_cast %27 : vector<32x32xf32> to vector<4x8x32xf32>
    %29 = vector.shape_cast %11 : vector<4x8x32xf32> to vector<32x32xf32>
    %cst_33 = arith.constant dense<0.000000e+00> : vector<32x32xf32>
    %30 = tpu.matmul %29, %15, %cst_33 {dimension_numbers = #tpu.dot_dimension_numbers<[1], [0], [0], [1], [0, 0, 1, 1], [], []>} : vector<32x32xf32>, vector<32x32xf32>, vector<32x32xf32> -> vector<32x32xf32>
    %31 = vector.broadcast %21 : vector<1x32xf32> to vector<32x32xf32>
    %32 = arith.addf %30, %31 : vector<32x32xf32>
    %33 = vector.shape_cast %32 : vector<32x32xf32> to vector<4x8x32xf32>
    %34 = vector.shape_cast %11 : vector<4x8x32xf32> to vector<32x32xf32>
    %cst_34 = arith.constant dense<0.000000e+00> : vector<32x32xf32>
    %35 = tpu.matmul %34, %17, %cst_34 {dimension_numbers = #tpu.dot_dimension_numbers<[1], [0], [0], [1], [0, 0, 1, 1], [], []>} : vector<32x32xf32>, vector<32x32xf32>, vector<32x32xf32> -> vector<32x32xf32>
    %36 = vector.broadcast %23 : vector<1x32xf32> to vector<32x32xf32>
    %37 = arith.addf %35, %36 : vector<32x32xf32>
    %38 = vector.shape_cast %37 : vector<32x32xf32> to vector<4x8x32xf32>
    %39 = vector.shape_cast %19 : vector<1x32xf32> to vector<1x1x32xf32>
    %40 = vector.shape_cast %39 : vector<1x1x32xf32> to vector<1x1x32xf32>
    %41 = vector.broadcast %40 : vector<1x1x32xf32> to vector<4x4x32xf32>
    %42 = tpu.concatenate %41, %28, %41, %28, %41, %28, %41, %28 in 1 : vector<4x4x32xf32>, vector<4x8x32xf32>, vector<4x4x32xf32>, vector<4x8x32xf32>, vector<4x4x32xf32>, vector<4x8x32xf32>, vector<4x4x32xf32>, vector<4x8x32xf32> -> vector<4x48x32xf32>
    %43 = vector.shape_cast %2 : vector<48x32xf32> to vector<1x48x32xf32>
    %44 = vector.broadcast %43 : vector<1x48x32xf32> to vector<4x48x32xf32>
    %45 = arith.mulf %42, %44 : vector<4x48x32xf32>
    %cst_35 = arith.constant 0.353553385 : f32
    %46 = vector.broadcast %cst_35 : f32 to vector<4x8x32xf32>
    %47 = arith.mulf %28, %46 : vector<4x8x32xf32>
    "tpu.trace_start"() <{level = 10 : i32, message = "gld,gnd->gln"}> : () -> ()
    %cst_36 = arith.constant dense<0.000000e+00> : vector<4x8x48xf32>
    %48 = tpu.matmul %47, %45, %cst_36 {dimension_numbers = #tpu.dot_dimension_numbers<[2], [2], [1], [1], [0, 0, 0, 1, 1, 1], [0], [0]>} : vector<4x8x32xf32>, vector<4x48x32xf32>, vector<4x8x48xf32> -> vector<4x8x48xf32>
    "tpu.trace_stop"() : () -> ()
    %49 = vector.shape_cast %3 : vector<8x48xf32> to vector<1x8x48xf32>
    %50 = vector.broadcast %49 : vector<1x8x48xf32> to vector<4x8x48xf32>
    %51 = arith.addf %48, %50 : vector<4x8x48xf32>
    %cst_37 = arith.constant dense<0xFF800000> : vector<4x8xf32>
    %52 = vector.multi_reduction <maximumf>, %51, %cst_37 [2] : vector<4x8x48xf32> to vector<4x8xf32>
    %53 = vector.shape_cast %52 : vector<4x8xf32> to vector<4x8x1xf32>
    %54 = vector.broadcast %53 : vector<4x8x1xf32> to vector<4x8x48xf32>
    %55 = arith.subf %51, %54 : vector<4x8x48xf32>
    %56 = math.exp %55 : vector<4x8x48xf32>
    "tpu.trace_start"() <{level = 10 : i32, message = "gln,gne->gle"}> : () -> ()
    %cst_38 = arith.constant dense<0.000000e+00> : vector<4x8x32xf32>
    %57 = tpu.matmul %56, %45, %cst_38 {dimension_numbers = #tpu.dot_dimension_numbers<[2], [1], [1], [2], [0, 0, 0, 1, 1, 2], [0], [0]>} : vector<4x8x48xf32>, vector<4x48x32xf32>, vector<4x8x32xf32> -> vector<4x8x32xf32>
    "tpu.trace_stop"() : () -> ()
    %58 = vector.shape_cast %56 : vector<4x8x48xf32> to vector<32x48xf32>
    %cst_39 = arith.constant dense<0.000000e+00> : vector<32x32xf32>
    %59 = tpu.matmul %58, %2, %cst_39 {dimension_numbers = #tpu.dot_dimension_numbers<[1], [0], [0], [1], [0, 0, 1, 1], [], []>} : vector<32x48xf32>, vector<48x32xf32>, vector<32x32xf32> -> vector<32x32xf32>
    %60 = vector.shape_cast %59 : vector<32x32xf32> to vector<4x8x32xf32>
    %cst_40 = arith.constant 9.99999968E-21 : f32
    %61 = vector.broadcast %cst_40 : f32 to vector<4x8x32xf32>
    %62 = arith.maximumf %60, %61 : vector<4x8x32xf32>
    %63 = tpu.reciprocal %62 {approx = true} : vector<4x8x32xf32> -> vector<4x8x32xf32>
    %64 = arith.mulf %57, %63 : vector<4x8x32xf32>
    %65 = vector.shape_cast %21 : vector<1x32xf32> to vector<1x1x32xf32>
    %66 = vector.shape_cast %65 : vector<1x1x32xf32> to vector<1x1x32xf32>
    %67 = vector.broadcast %66 : vector<1x1x32xf32> to vector<4x4x32xf32>
    %68 = tpu.concatenate %67, %33, %67, %33, %67, %33, %67, %33 in 1 : vector<4x4x32xf32>, vector<4x8x32xf32>, vector<4x4x32xf32>, vector<4x8x32xf32>, vector<4x4x32xf32>, vector<4x8x32xf32>, vector<4x4x32xf32>, vector<4x8x32xf32> -> vector<4x48x32xf32>
    %69 = vector.shape_cast %2 : vector<48x32xf32> to vector<1x48x32xf32>
    %70 = vector.broadcast %69 : vector<1x48x32xf32> to vector<4x48x32xf32>
    %71 = arith.mulf %68, %70 : vector<4x48x32xf32>
    %cst_41 = arith.constant 0.353553385 : f32
    %72 = vector.broadcast %cst_41 : f32 to vector<4x8x32xf32>
    %73 = arith.mulf %33, %72 : vector<4x8x32xf32>
    "tpu.trace_start"() <{level = 10 : i32, message = "gld,gnd->gln"}> : () -> ()
    %cst_42 = arith.constant dense<0.000000e+00> : vector<4x8x48xf32>
    %74 = tpu.matmul %73, %71, %cst_42 {dimension_numbers = #tpu.dot_dimension_numbers<[2], [2], [1], [1], [0, 0, 0, 1, 1, 1], [0], [0]>} : vector<4x8x32xf32>, vector<4x48x32xf32>, vector<4x8x48xf32> -> vector<4x8x48xf32>
    "tpu.trace_stop"() : () -> ()
    %75 = vector.shape_cast %3 : vector<8x48xf32> to vector<1x8x48xf32>
    %76 = vector.broadcast %75 : vector<1x8x48xf32> to vector<4x8x48xf32>
    %77 = arith.addf %74, %76 : vector<4x8x48xf32>
    %cst_43 = arith.constant dense<0xFF800000> : vector<4x8xf32>
    %78 = vector.multi_reduction <maximumf>, %77, %cst_43 [2] : vector<4x8x48xf32> to vector<4x8xf32>
    %79 = vector.shape_cast %78 : vector<4x8xf32> to vector<4x8x1xf32>
    %80 = vector.broadcast %79 : vector<4x8x1xf32> to vector<4x8x48xf32>
    %81 = arith.subf %77, %80 : vector<4x8x48xf32>
    %82 = math.exp %81 : vector<4x8x48xf32>
    "tpu.trace_start"() <{level = 10 : i32, message = "gln,gne->gle"}> : () -> ()
    %cst_44 = arith.constant dense<0.000000e+00> : vector<4x8x32xf32>
    %83 = tpu.matmul %82, %71, %cst_44 {dimension_numbers = #tpu.dot_dimension_numbers<[2], [1], [1], [2], [0, 0, 0, 1, 1, 2], [0], [0]>} : vector<4x8x48xf32>, vector<4x48x32xf32>, vector<4x8x32xf32> -> vector<4x8x32xf32>
    "tpu.trace_stop"() : () -> ()
    %84 = vector.shape_cast %82 : vector<4x8x48xf32> to vector<32x48xf32>
    %cst_45 = arith.constant dense<0.000000e+00> : vector<32x32xf32>
    %85 = tpu.matmul %84, %2, %cst_45 {dimension_numbers = #tpu.dot_dimension_numbers<[1], [0], [0], [1], [0, 0, 1, 1], [], []>} : vector<32x48xf32>, vector<48x32xf32>, vector<32x32xf32> -> vector<32x32xf32>
    %86 = vector.shape_cast %85 : vector<32x32xf32> to vector<4x8x32xf32>
    %cst_46 = arith.constant 9.99999968E-21 : f32
    %87 = vector.broadcast %cst_46 : f32 to vector<4x8x32xf32>
    %88 = arith.maximumf %86, %87 : vector<4x8x32xf32>
    %89 = tpu.reciprocal %88 {approx = true} : vector<4x8x32xf32> -> vector<4x8x32xf32>
    %90 = arith.mulf %83, %89 : vector<4x8x32xf32>
    %91 = tpu.concatenate %90, %90, %90, %90 in 1 : vector<4x8x32xf32>, vector<4x8x32xf32>, vector<4x8x32xf32>, vector<4x8x32xf32> -> vector<4x32x32xf32>
    %92 = vector.shape_cast %4 : vector<32x32xf32> to vector<1x32x32xf32>
    %93 = vector.broadcast %92 : vector<1x32x32xf32> to vector<4x32x32xf32>
    %94 = arith.mulf %91, %93 : vector<4x32x32xf32>
    %95 = tpu.concatenate %38, %38, %38, %38 in 1 : vector<4x8x32xf32>, vector<4x8x32xf32>, vector<4x8x32xf32>, vector<4x8x32xf32> -> vector<4x32x32xf32>
    %96 = vector.shape_cast %4 : vector<32x32xf32> to vector<1x32x32xf32>
    %97 = vector.broadcast %96 : vector<1x32x32xf32> to vector<4x32x32xf32>
    %98 = arith.mulf %95, %97 : vector<4x32x32xf32>
    %cst_47 = arith.constant 0.353553385 : f32
    %99 = vector.broadcast %cst_47 : f32 to vector<4x8x32xf32>
    %100 = arith.mulf %64, %99 : vector<4x8x32xf32>
    "tpu.trace_start"() <{level = 10 : i32, message = "gld,gnd->gln"}> : () -> ()
    %cst_48 = arith.constant dense<0.000000e+00> : vector<4x8x32xf32>
    %101 = tpu.matmul %100, %94, %cst_48 {dimension_numbers = #tpu.dot_dimension_numbers<[2], [2], [1], [1], [0, 0, 0, 1, 1, 1], [0], [0]>} : vector<4x8x32xf32>, vector<4x32x32xf32>, vector<4x8x32xf32> -> vector<4x8x32xf32>
    "tpu.trace_stop"() : () -> ()
    %cst_49 = arith.constant dense<0xFF800000> : vector<4x8xf32>
    %102 = vector.multi_reduction <maximumf>, %101, %cst_49 [2] : vector<4x8x32xf32> to vector<4x8xf32>
    %103 = vector.shape_cast %102 : vector<4x8xf32> to vector<4x8x1xf32>
    %104 = vector.broadcast %103 : vector<4x8x1xf32> to vector<4x8x32xf32>
    %105 = arith.subf %101, %104 : vector<4x8x32xf32>
    %106 = math.exp %105 : vector<4x8x32xf32>
    "tpu.trace_start"() <{level = 10 : i32, message = "gln,gne->gle"}> : () -> ()
    %cst_50 = arith.constant dense<0.000000e+00> : vector<4x8x32xf32>
    %107 = tpu.matmul %106, %98, %cst_50 {dimension_numbers = #tpu.dot_dimension_numbers<[2], [1], [1], [2], [0, 0, 0, 1, 1, 2], [0], [0]>} : vector<4x8x32xf32>, vector<4x32x32xf32>, vector<4x8x32xf32> -> vector<4x8x32xf32>
    "tpu.trace_stop"() : () -> ()
    %108 = vector.shape_cast %106 : vector<4x8x32xf32> to vector<32x32xf32>
    %cst_51 = arith.constant dense<0.000000e+00> : vector<32x32xf32>
    %109 = tpu.matmul %108, %4, %cst_51 {dimension_numbers = #tpu.dot_dimension_numbers<[1], [0], [0], [1], [0, 0, 1, 1], [], []>} : vector<32x32xf32>, vector<32x32xf32>, vector<32x32xf32> -> vector<32x32xf32>
    %110 = vector.shape_cast %109 : vector<32x32xf32> to vector<4x8x32xf32>
    %cst_52 = arith.constant 9.99999968E-21 : f32
    %111 = vector.broadcast %cst_52 : f32 to vector<4x8x32xf32>
    %112 = arith.maximumf %110, %111 : vector<4x8x32xf32>
    %113 = tpu.reciprocal %112 {approx = true} : vector<4x8x32xf32> -> vector<4x8x32xf32>
    %114 = arith.mulf %107, %113 : vector<4x8x32xf32>
    %c0_53 = arith.constant 0 : index
    %c0_54 = arith.constant 0 : index
    %115 = vector.load %arg13[%c0_53, %c0_54] : memref<32x32xf32, #tpu.memory_space<vmem>>, vector<32x32xf32>
    %c0_55 = arith.constant 0 : index
    %c0_56 = arith.constant 0 : index
    %116 = vector.load %arg14[%c0_55, %c0_56] : memref<1x32xf32, #tpu.memory_space<vmem>>, vector<1x32xf32>
    %117 = vector.shape_cast %114 : vector<4x8x32xf32> to vector<32x32xf32>
    %cst_57 = arith.constant dense<0.000000e+00> : vector<32x32xf32>
    %118 = tpu.matmul %6, %117, %cst_57 {dimension_numbers = #tpu.dot_dimension_numbers<[1], [0], [0], [1], [0, 0, 1, 1], [], []>} : vector<32x32xf32>, vector<32x32xf32>, vector<32x32xf32> -> vector<32x32xf32>
    %c0_58 = arith.constant 0 : index
    %c0_59 = arith.constant 0 : index
    %c0_60 = arith.constant 0 : index
    %119 = vector.load %arg11[%c0_58, %c0_59, %c0_60] : memref<3x32x32xf32, #tpu.memory_space<vmem>>, vector<1x32x32xf32>
    %120 = vector.shape_cast %119 : vector<1x32x32xf32> to vector<32x32xf32>
    %cst_61 = arith.constant dense<0.000000e+00> : vector<32x32xf32>
    %121 = tpu.matmul %118, %120, %cst_61 {dimension_numbers = #tpu.dot_dimension_numbers<[1], [0], [0], [1], [0, 0, 1, 1], [], []>} : vector<32x32xf32>, vector<32x32xf32>, vector<32x32xf32> -> vector<32x32xf32>
    %c0_62 = arith.constant 0 : index
    %c0_63 = arith.constant 0 : index
    %c0_64 = arith.constant 0 : index
    %122 = vector.load %arg12[%c0_62, %c0_63, %c0_64] : memref<3x1x32xf32, #tpu.memory_space<vmem>>, vector<1x1x32xf32>
    %123 = vector.shape_cast %122 : vector<1x1x32xf32> to vector<1x32xf32>
    %124 = vector.broadcast %123 : vector<1x32xf32> to vector<32x32xf32>
    %125 = arith.addf %121, %124 : vector<32x32xf32>
    %126 = vector.shape_cast %125 : vector<32x32xf32> to vector<8x4x32xf32>
    %c1_65 = arith.constant 1 : index
    %c0_66 = arith.constant 0 : index
    %c0_67 = arith.constant 0 : index
    %127 = vector.load %arg11[%c1_65, %c0_66, %c0_67] : memref<3x32x32xf32, #tpu.memory_space<vmem>>, vector<1x32x32xf32>
    %128 = vector.shape_cast %127 : vector<1x32x32xf32> to vector<32x32xf32>
    %cst_68 = arith.constant dense<0.000000e+00> : vector<32x32xf32>
    %129 = tpu.matmul %118, %128, %cst_68 {dimension_numbers = #tpu.dot_dimension_numbers<[1], [0], [0], [1], [0, 0, 1, 1], [], []>} : vector<32x32xf32>, vector<32x32xf32>, vector<32x32xf32> -> vector<32x32xf32>
    %c1_69 = arith.constant 1 : index
    %c0_70 = arith.constant 0 : index
    %c0_71 = arith.constant 0 : index
    %130 = vector.load %arg12[%c1_69, %c0_70, %c0_71] : memref<3x1x32xf32, #tpu.memory_space<vmem>>, vector<1x1x32xf32>
    %131 = vector.shape_cast %130 : vector<1x1x32xf32> to vector<1x32xf32>
    %132 = vector.broadcast %131 : vector<1x32xf32> to vector<32x32xf32>
    %133 = arith.addf %129, %132 : vector<32x32xf32>
    %134 = vector.shape_cast %133 : vector<32x32xf32> to vector<8x4x32xf32>
    %c2_72 = arith.constant 2 : index
    %c0_73 = arith.constant 0 : index
    %c0_74 = arith.constant 0 : index
    %135 = vector.load %arg11[%c2_72, %c0_73, %c0_74] : memref<3x32x32xf32, #tpu.memory_space<vmem>>, vector<1x32x32xf32>
    %136 = vector.shape_cast %135 : vector<1x32x32xf32> to vector<32x32xf32>
    %cst_75 = arith.constant dense<0.000000e+00> : vector<32x32xf32>
    %137 = tpu.matmul %118, %136, %cst_75 {dimension_numbers = #tpu.dot_dimension_numbers<[1], [0], [0], [1], [0, 0, 1, 1], [], []>} : vector<32x32xf32>, vector<32x32xf32>, vector<32x32xf32> -> vector<32x32xf32>
    %c2_76 = arith.constant 2 : index
    %c0_77 = arith.constant 0 : index
    %c0_78 = arith.constant 0 : index
    %138 = vector.load %arg12[%c2_76, %c0_77, %c0_78] : memref<3x1x32xf32, #tpu.memory_space<vmem>>, vector<1x1x32xf32>
    %139 = vector.shape_cast %138 : vector<1x1x32xf32> to vector<1x32xf32>
    %140 = vector.broadcast %139 : vector<1x32xf32> to vector<32x32xf32>
    %141 = arith.addf %137, %140 : vector<32x32xf32>
    %142 = vector.shape_cast %141 : vector<32x32xf32> to vector<8x4x32xf32>
    %143 = tpu.concatenate %134, %134, %134, %134 in 1 : vector<8x4x32xf32>, vector<8x4x32xf32>, vector<8x4x32xf32>, vector<8x4x32xf32> -> vector<8x16x32xf32>
    %144 = vector.shape_cast %5 : vector<16x32xf32> to vector<1x16x32xf32>
    %145 = vector.broadcast %144 : vector<1x16x32xf32> to vector<8x16x32xf32>
    %146 = arith.mulf %143, %145 : vector<8x16x32xf32>
    %147 = tpu.concatenate %142, %142, %142, %142 in 1 : vector<8x4x32xf32>, vector<8x4x32xf32>, vector<8x4x32xf32>, vector<8x4x32xf32> -> vector<8x16x32xf32>
    %148 = vector.shape_cast %5 : vector<16x32xf32> to vector<1x16x32xf32>
    %149 = vector.broadcast %148 : vector<1x16x32xf32> to vector<8x16x32xf32>
    %150 = arith.mulf %147, %149 : vector<8x16x32xf32>
    %cst_79 = arith.constant 0.353553385 : f32
    %151 = vector.broadcast %cst_79 : f32 to vector<8x4x32xf32>
    %152 = arith.mulf %126, %151 : vector<8x4x32xf32>
    "tpu.trace_start"() <{level = 10 : i32, message = "gld,gnd->gln"}> : () -> ()
    %cst_80 = arith.constant dense<0.000000e+00> : vector<8x4x16xf32>
    %153 = tpu.matmul %152, %146, %cst_80 {dimension_numbers = #tpu.dot_dimension_numbers<[2], [2], [1], [1], [0, 0, 0, 1, 1, 1], [0], [0]>} : vector<8x4x32xf32>, vector<8x16x32xf32>, vector<8x4x16xf32> -> vector<8x4x16xf32>
    "tpu.trace_stop"() : () -> ()
    %cst_81 = arith.constant dense<0xFF800000> : vector<8x4xf32>
    %154 = vector.multi_reduction <maximumf>, %153, %cst_81 [2] : vector<8x4x16xf32> to vector<8x4xf32>
    %155 = vector.shape_cast %154 : vector<8x4xf32> to vector<8x4x1xf32>
    %156 = vector.broadcast %155 : vector<8x4x1xf32> to vector<8x4x16xf32>
    %157 = arith.subf %153, %156 : vector<8x4x16xf32>
    %158 = math.exp %157 : vector<8x4x16xf32>
    "tpu.trace_start"() <{level = 10 : i32, message = "gln,gne->gle"}> : () -> ()
    %cst_82 = arith.constant dense<0.000000e+00> : vector<8x4x32xf32>
    %159 = tpu.matmul %158, %150, %cst_82 {dimension_numbers = #tpu.dot_dimension_numbers<[2], [1], [1], [2], [0, 0, 0, 1, 1, 2], [0], [0]>} : vector<8x4x16xf32>, vector<8x16x32xf32>, vector<8x4x32xf32> -> vector<8x4x32xf32>
    "tpu.trace_stop"() : () -> ()
    %160 = vector.shape_cast %158 : vector<8x4x16xf32> to vector<32x16xf32>
    %cst_83 = arith.constant dense<0.000000e+00> : vector<32x32xf32>
    %161 = tpu.matmul %160, %5, %cst_83 {dimension_numbers = #tpu.dot_dimension_numbers<[1], [0], [0], [1], [0, 0, 1, 1], [], []>} : vector<32x16xf32>, vector<16x32xf32>, vector<32x32xf32> -> vector<32x32xf32>
    %162 = vector.shape_cast %161 : vector<32x32xf32> to vector<8x4x32xf32>
    %cst_84 = arith.constant 9.99999968E-21 : f32
    %163 = vector.broadcast %cst_84 : f32 to vector<8x4x32xf32>
    %164 = arith.maximumf %162, %163 : vector<8x4x32xf32>
    %165 = tpu.reciprocal %164 {approx = true} : vector<8x4x32xf32> -> vector<8x4x32xf32>
    %166 = arith.mulf %159, %165 : vector<8x4x32xf32>
    %167 = vector.shape_cast %166 : vector<8x4x32xf32> to vector<32x32xf32>
    %cst_85 = arith.constant dense<0.000000e+00> : vector<32x32xf32>
    %168 = tpu.matmul %167, %115, %cst_85 {dimension_numbers = #tpu.dot_dimension_numbers<[1], [0], [0], [1], [0, 0, 1, 1], [], []>} : vector<32x32xf32>, vector<32x32xf32>, vector<32x32xf32> -> vector<32x32xf32>
    %169 = vector.broadcast %116 : vector<1x32xf32> to vector<32x32xf32>
    %170 = arith.addf %168, %169 : vector<32x32xf32>
    %cst_86 = arith.constant dense<0.000000e+00> : vector<32x32xf32>
    %171 = tpu.matmul %7, %170, %cst_86 {dimension_numbers = #tpu.dot_dimension_numbers<[1], [0], [0], [1], [0, 0, 1, 1], [], []>} : vector<32x32xf32>, vector<32x32xf32>, vector<32x32xf32> -> vector<32x32xf32>
    %172 = vector.shape_cast %171 : vector<32x32xf32> to vector<4x8x32xf32>
    %c0_87 = arith.constant 0 : index
    %c0_88 = arith.constant 0 : index
    %173 = vector.load %arg15[%c0_87, %c0_88] : memref<1x32xf32, #tpu.memory_space<vmem>>, vector<1x32xf32>
    %c0_89 = arith.constant 0 : index
    %c0_90 = arith.constant 0 : index
    %174 = vector.load %arg16[%c0_89, %c0_90] : memref<1x32xf32, #tpu.memory_space<vmem>>, vector<1x32xf32>
    %175 = arith.addf %11, %172 : vector<4x8x32xf32>
    %cst_91 = arith.constant dense<0.000000e+00> : vector<4x8xf32>
    %176 = vector.multi_reduction <add>, %175, %cst_91 [2] : vector<4x8x32xf32> to vector<4x8xf32>
    %177 = vector.shape_cast %176 : vector<4x8xf32> to vector<4x8x1xf32>
    %cst_92 = arith.constant 3.200000e+01 : f32
    %178 = vector.broadcast %cst_92 : f32 to vector<4x8x1xf32>
    %179 = arith.divf %177, %178 : vector<4x8x1xf32>
    %180 = vector.broadcast %179 : vector<4x8x1xf32> to vector<4x8x32xf32>
    %181 = arith.subf %175, %180 : vector<4x8x32xf32>
    %182 = arith.mulf %181, %181 : vector<4x8x32xf32>
    %cst_93 = arith.constant dense<0.000000e+00> : vector<4x8xf32>
    %183 = vector.multi_reduction <add>, %182, %cst_93 [2] : vector<4x8x32xf32> to vector<4x8xf32>
    %184 = vector.shape_cast %183 : vector<4x8xf32> to vector<4x8x1xf32>
    %cst_94 = arith.constant 3.200000e+01 : f32
    %185 = vector.broadcast %cst_94 : f32 to vector<4x8x1xf32>
    %186 = arith.divf %184, %185 : vector<4x8x1xf32>
    %187 = vector.broadcast %179 : vector<4x8x1xf32> to vector<4x8x32xf32>
    %188 = arith.subf %175, %187 : vector<4x8x32xf32>
    %cst_95 = arith.constant 9.99999974E-6 : f32
    %189 = vector.broadcast %cst_95 : f32 to vector<4x8x1xf32>
    %190 = arith.addf %186, %189 : vector<4x8x1xf32>
    %191 = math.rsqrt %190 : vector<4x8x1xf32>
    %192 = vector.broadcast %191 : vector<4x8x1xf32> to vector<4x8x32xf32>
    %193 = arith.mulf %188, %192 : vector<4x8x32xf32>
    %194 = vector.shape_cast %173 : vector<1x32xf32> to vector<1x1x32xf32>
    %195 = vector.broadcast %194 : vector<1x1x32xf32> to vector<4x8x32xf32>
    %196 = arith.mulf %193, %195 : vector<4x8x32xf32>
    %197 = vector.shape_cast %174 : vector<1x32xf32> to vector<1x1x32xf32>
    %198 = vector.broadcast %197 : vector<1x1x32xf32> to vector<4x8x32xf32>
    %199 = arith.addf %196, %198 : vector<4x8x32xf32>
    %c0_96 = arith.constant 0 : index
    %c0_97 = arith.constant 0 : index
    %200 = vector.load %arg17[%c0_96, %c0_97] : memref<32x128xf32, #tpu.memory_space<vmem>>, vector<32x128xf32>
    %c0_98 = arith.constant 0 : index
    %c0_99 = arith.constant 0 : index
    %201 = vector.load %arg18[%c0_98, %c0_99] : memref<1x128xf32, #tpu.memory_space<vmem>>, vector<1x128xf32>
    %202 = vector.shape_cast %199 : vector<4x8x32xf32> to vector<32x32xf32>
    %cst_100 = arith.constant dense<0.000000e+00> : vector<32x128xf32>
    %203 = tpu.matmul %202, %200, %cst_100 {dimension_numbers = #tpu.dot_dimension_numbers<[1], [0], [0], [1], [0, 0, 1, 1], [], []>} : vector<32x32xf32>, vector<32x128xf32>, vector<32x128xf32> -> vector<32x128xf32>
    %204 = vector.broadcast %201 : vector<1x128xf32> to vector<32x128xf32>
    %205 = arith.addf %203, %204 : vector<32x128xf32>
    %206 = vector.shape_cast %205 : vector<32x128xf32> to vector<4x8x128xf32>
    %cst_101 = arith.constant 5.000000e-01 : f32
    %207 = vector.broadcast %cst_101 : f32 to vector<4x8x128xf32>
    %208 = arith.mulf %207, %206 : vector<4x8x128xf32>
    %cst_102 = arith.constant 0.707106769 : f32
    %209 = vector.broadcast %cst_102 : f32 to vector<4x8x128xf32>
    %210 = arith.mulf %206, %209 : vector<4x8x128xf32>
    %211 = math.absf %210 : vector<4x8x128xf32>
    %cst_103 = arith.constant 0.327591091 : f32
    %212 = vector.broadcast %cst_103 : f32 to vector<4x8x128xf32>
    %213 = arith.mulf %212, %211 : vector<4x8x128xf32>
    %cst_104 = arith.constant 1.000000e+00 : f32
    %214 = vector.broadcast %cst_104 : f32 to vector<4x8x128xf32>
    %215 = arith.addf %214, %213 : vector<4x8x128xf32>
    %216 = tpu.reciprocal %215 {approx = true} : vector<4x8x128xf32> -> vector<4x8x128xf32>
    %cst_105 = arith.constant 1.06140542 : f32
    %217 = vector.broadcast %cst_105 : f32 to vector<4x8x128xf32>
    %218 = arith.mulf %217, %216 : vector<4x8x128xf32>
    %cst_106 = arith.constant -1.45315206 : f32
    %219 = vector.broadcast %cst_106 : f32 to vector<4x8x128xf32>
    %220 = arith.addf %218, %219 : vector<4x8x128xf32>
    %221 = arith.mulf %220, %216 : vector<4x8x128xf32>
    %cst_107 = arith.constant 1.42141378 : f32
    %222 = vector.broadcast %cst_107 : f32 to vector<4x8x128xf32>
    %223 = arith.addf %221, %222 : vector<4x8x128xf32>
    %224 = arith.mulf %223, %216 : vector<4x8x128xf32>
    %cst_108 = arith.constant -0.284496725 : f32
    %225 = vector.broadcast %cst_108 : f32 to vector<4x8x128xf32>
    %226 = arith.addf %224, %225 : vector<4x8x128xf32>
    %227 = arith.mulf %226, %216 : vector<4x8x128xf32>
    %cst_109 = arith.constant 0.254829586 : f32
    %228 = vector.broadcast %cst_109 : f32 to vector<4x8x128xf32>
    %229 = arith.addf %227, %228 : vector<4x8x128xf32>
    %230 = arith.mulf %229, %216 : vector<4x8x128xf32>
    %cst_110 = arith.constant 0.000000e+00 : f32
    %231 = vector.broadcast %cst_110 : f32 to vector<4x8x128xf32>
    %232 = arith.subf %231, %211 : vector<4x8x128xf32>
    %233 = arith.mulf %232, %211 : vector<4x8x128xf32>
    %234 = math.exp %233 : vector<4x8x128xf32>
    %235 = arith.mulf %230, %234 : vector<4x8x128xf32>
    %cst_111 = arith.constant 1.000000e+00 : f32
    %236 = vector.broadcast %cst_111 : f32 to vector<4x8x128xf32>
    %237 = arith.subf %236, %235 : vector<4x8x128xf32>
    %cst_112 = arith.constant 0.000000e+00 : f32
    %238 = vector.broadcast %cst_112 : f32 to vector<4x8x128xf32>
    %239 = arith.cmpf oge, %210, %238 : vector<4x8x128xf32>
    %cst_113 = arith.constant 0.000000e+00 : f32
    %240 = vector.broadcast %cst_113 : f32 to vector<4x8x128xf32>
    %241 = arith.subf %240, %237 : vector<4x8x128xf32>
    %242 = arith.select %239, %237, %241 : vector<4x8x128xi1>, vector<4x8x128xf32>
    %cst_114 = arith.constant 1.000000e+00 : f32
    %243 = vector.broadcast %cst_114 : f32 to vector<4x8x128xf32>
    %244 = arith.addf %243, %242 : vector<4x8x128xf32>
    %245 = arith.mulf %208, %244 : vector<4x8x128xf32>
    %c0_115 = arith.constant 0 : index
    %c0_116 = arith.constant 0 : index
    %246 = vector.load %arg19[%c0_115, %c0_116] : memref<128x32xf32, #tpu.memory_space<vmem>>, vector<128x32xf32>
    %c0_117 = arith.constant 0 : index
    %c0_118 = arith.constant 0 : index
    %247 = vector.load %arg20[%c0_117, %c0_118] : memref<1x32xf32, #tpu.memory_space<vmem>>, vector<1x32xf32>
    %248 = vector.shape_cast %245 : vector<4x8x128xf32> to vector<32x128xf32>
    %cst_119 = arith.constant dense<0.000000e+00> : vector<32x32xf32>
    %249 = tpu.matmul %248, %246, %cst_119 {dimension_numbers = #tpu.dot_dimension_numbers<[1], [0], [0], [1], [0, 0, 1, 1], [], []>} : vector<32x128xf32>, vector<128x32xf32>, vector<32x32xf32> -> vector<32x32xf32>
    %250 = vector.broadcast %247 : vector<1x32xf32> to vector<32x32xf32>
    %251 = arith.addf %249, %250 : vector<32x32xf32>
    %252 = vector.shape_cast %251 : vector<32x32xf32> to vector<4x8x32xf32>
    %c0_120 = arith.constant 0 : index
    %c0_121 = arith.constant 0 : index
    %253 = vector.load %arg21[%c0_120, %c0_121] : memref<1x32xf32, #tpu.memory_space<vmem>>, vector<1x32xf32>
    %c0_122 = arith.constant 0 : index
    %c0_123 = arith.constant 0 : index
    %254 = vector.load %arg22[%c0_122, %c0_123] : memref<1x32xf32, #tpu.memory_space<vmem>>, vector<1x32xf32>
    %255 = arith.addf %199, %252 : vector<4x8x32xf32>
    %cst_124 = arith.constant dense<0.000000e+00> : vector<4x8xf32>
    %256 = vector.multi_reduction <add>, %255, %cst_124 [2] : vector<4x8x32xf32> to vector<4x8xf32>
    %257 = vector.shape_cast %256 : vector<4x8xf32> to vector<4x8x1xf32>
    %cst_125 = arith.constant 3.200000e+01 : f32
    %258 = vector.broadcast %cst_125 : f32 to vector<4x8x1xf32>
    %259 = arith.divf %257, %258 : vector<4x8x1xf32>
    %260 = vector.broadcast %259 : vector<4x8x1xf32> to vector<4x8x32xf32>
    %261 = arith.subf %255, %260 : vector<4x8x32xf32>
    %262 = arith.mulf %261, %261 : vector<4x8x32xf32>
    %cst_126 = arith.constant dense<0.000000e+00> : vector<4x8xf32>
    %263 = vector.multi_reduction <add>, %262, %cst_126 [2] : vector<4x8x32xf32> to vector<4x8xf32>
    %264 = vector.shape_cast %263 : vector<4x8xf32> to vector<4x8x1xf32>
    %cst_127 = arith.constant 3.200000e+01 : f32
    %265 = vector.broadcast %cst_127 : f32 to vector<4x8x1xf32>
    %266 = arith.divf %264, %265 : vector<4x8x1xf32>
    %267 = vector.broadcast %259 : vector<4x8x1xf32> to vector<4x8x32xf32>
    %268 = arith.subf %255, %267 : vector<4x8x32xf32>
    %cst_128 = arith.constant 9.99999974E-6 : f32
    %269 = vector.broadcast %cst_128 : f32 to vector<4x8x1xf32>
    %270 = arith.addf %266, %269 : vector<4x8x1xf32>
    %271 = math.rsqrt %270 : vector<4x8x1xf32>
    %272 = vector.broadcast %271 : vector<4x8x1xf32> to vector<4x8x32xf32>
    %273 = arith.mulf %268, %272 : vector<4x8x32xf32>
    %274 = vector.shape_cast %253 : vector<1x32xf32> to vector<1x1x32xf32>
    %275 = vector.broadcast %274 : vector<1x1x32xf32> to vector<4x8x32xf32>
    %276 = arith.mulf %273, %275 : vector<4x8x32xf32>
    %277 = vector.shape_cast %254 : vector<1x32xf32> to vector<1x1x32xf32>
    %278 = vector.broadcast %277 : vector<1x1x32xf32> to vector<4x8x32xf32>
    %279 = arith.addf %276, %278 : vector<4x8x32xf32>
    %c0_129 = arith.constant 0 : index
    %c0_130 = arith.constant 0 : index
    %280 = vector.load %arg23[%c0_129, %c0_130] : memref<8x32xf32, #tpu.memory_space<vmem>>, vector<8x32xf32>
    %281 = vector.shape_cast %280 : vector<8x32xf32> to vector<1x8x32xf32>
    %282 = vector.broadcast %281 : vector<1x8x32xf32> to vector<4x8x32xf32>
    %283 = arith.addf %1, %282 : vector<4x8x32xf32>
    %c0_131 = arith.constant 0 : index
    %c0_132 = arith.constant 0 : index
    %c0_133 = arith.constant 0 : index
    %284 = vector.load %arg24[%c0_131, %c0_132, %c0_133] : memref<3x32x32xf32, #tpu.memory_space<vmem>>, vector<1x32x32xf32>
    %285 = vector.shape_cast %284 : vector<1x32x32xf32> to vector<32x32xf32>
    %c1_134 = arith.constant 1 : index
    %c0_135 = arith.constant 0 : index
    %c0_136 = arith.constant 0 : index
    %286 = vector.load %arg24[%c1_134, %c0_135, %c0_136] : memref<3x32x32xf32, #tpu.memory_space<vmem>>, vector<1x32x32xf32>
    %287 = vector.shape_cast %286 : vector<1x32x32xf32> to vector<32x32xf32>
    %c2_137 = arith.constant 2 : index
    %c0_138 = arith.constant 0 : index
    %c0_139 = arith.constant 0 : index
    %288 = vector.load %arg24[%c2_137, %c0_138, %c0_139] : memref<3x32x32xf32, #tpu.memory_space<vmem>>, vector<1x32x32xf32>
    %289 = vector.shape_cast %288 : vector<1x32x32xf32> to vector<32x32xf32>
    %c0_140 = arith.constant 0 : index
    %c0_141 = arith.constant 0 : index
    %c0_142 = arith.constant 0 : index
    %290 = vector.load %arg25[%c0_140, %c0_141, %c0_142] : memref<3x1x32xf32, #tpu.memory_space<vmem>>, vector<1x1x32xf32>
    %291 = vector.shape_cast %290 : vector<1x1x32xf32> to vector<1x32xf32>
    %c1_143 = arith.constant 1 : index
    %c0_144 = arith.constant 0 : index
    %c0_145 = arith.constant 0 : index
    %292 = vector.load %arg25[%c1_143, %c0_144, %c0_145] : memref<3x1x32xf32, #tpu.memory_space<vmem>>, vector<1x1x32xf32>
    %293 = vector.shape_cast %292 : vector<1x1x32xf32> to vector<1x32xf32>
    %c2_146 = arith.constant 2 : index
    %c0_147 = arith.constant 0 : index
    %c0_148 = arith.constant 0 : index
    %294 = vector.load %arg25[%c2_146, %c0_147, %c0_148] : memref<3x1x32xf32, #tpu.memory_space<vmem>>, vector<1x1x32xf32>
    %295 = vector.shape_cast %294 : vector<1x1x32xf32> to vector<1x32xf32>
    %296 = vector.shape_cast %283 : vector<4x8x32xf32> to vector<32x32xf32>
    %cst_149 = arith.constant dense<0.000000e+00> : vector<32x32xf32>
    %297 = tpu.matmul %296, %285, %cst_149 {dimension_numbers = #tpu.dot_dimension_numbers<[1], [0], [0], [1], [0, 0, 1, 1], [], []>} : vector<32x32xf32>, vector<32x32xf32>, vector<32x32xf32> -> vector<32x32xf32>
    %298 = vector.broadcast %291 : vector<1x32xf32> to vector<32x32xf32>
    %299 = arith.addf %297, %298 : vector<32x32xf32>
    %300 = vector.shape_cast %299 : vector<32x32xf32> to vector<4x8x32xf32>
    %301 = vector.shape_cast %283 : vector<4x8x32xf32> to vector<32x32xf32>
    %cst_150 = arith.constant dense<0.000000e+00> : vector<32x32xf32>
    %302 = tpu.matmul %301, %287, %cst_150 {dimension_numbers = #tpu.dot_dimension_numbers<[1], [0], [0], [1], [0, 0, 1, 1], [], []>} : vector<32x32xf32>, vector<32x32xf32>, vector<32x32xf32> -> vector<32x32xf32>
    %303 = vector.broadcast %293 : vector<1x32xf32> to vector<32x32xf32>
    %304 = arith.addf %302, %303 : vector<32x32xf32>
    %305 = vector.shape_cast %304 : vector<32x32xf32> to vector<4x8x32xf32>
    %306 = vector.shape_cast %283 : vector<4x8x32xf32> to vector<32x32xf32>
    %cst_151 = arith.constant dense<0.000000e+00> : vector<32x32xf32>
    %307 = tpu.matmul %306, %289, %cst_151 {dimension_numbers = #tpu.dot_dimension_numbers<[1], [0], [0], [1], [0, 0, 1, 1], [], []>} : vector<32x32xf32>, vector<32x32xf32>, vector<32x32xf32> -> vector<32x32xf32>
    %308 = vector.broadcast %295 : vector<1x32xf32> to vector<32x32xf32>
    %309 = arith.addf %307, %308 : vector<32x32xf32>
    %310 = vector.shape_cast %309 : vector<32x32xf32> to vector<4x8x32xf32>
    %311 = vector.shape_cast %291 : vector<1x32xf32> to vector<1x1x32xf32>
    %312 = vector.shape_cast %311 : vector<1x1x32xf32> to vector<1x1x32xf32>
    %313 = vector.broadcast %312 : vector<1x1x32xf32> to vector<4x4x32xf32>
    %314 = tpu.concatenate %313, %300, %313, %300, %313, %300, %313, %300 in 1 : vector<4x4x32xf32>, vector<4x8x32xf32>, vector<4x4x32xf32>, vector<4x8x32xf32>, vector<4x4x32xf32>, vector<4x8x32xf32>, vector<4x4x32xf32>, vector<4x8x32xf32> -> vector<4x48x32xf32>
    %315 = vector.shape_cast %2 : vector<48x32xf32> to vector<1x48x32xf32>
    %316 = vector.broadcast %315 : vector<1x48x32xf32> to vector<4x48x32xf32>
    %317 = arith.mulf %314, %316 : vector<4x48x32xf32>
    %cst_152 = arith.constant 0.353553385 : f32
    %318 = vector.broadcast %cst_152 : f32 to vector<4x8x32xf32>
    %319 = arith.mulf %300, %318 : vector<4x8x32xf32>
    "tpu.trace_start"() <{level = 10 : i32, message = "gld,gnd->gln"}> : () -> ()
    %cst_153 = arith.constant dense<0.000000e+00> : vector<4x8x48xf32>
    %320 = tpu.matmul %319, %317, %cst_153 {dimension_numbers = #tpu.dot_dimension_numbers<[2], [2], [1], [1], [0, 0, 0, 1, 1, 1], [0], [0]>} : vector<4x8x32xf32>, vector<4x48x32xf32>, vector<4x8x48xf32> -> vector<4x8x48xf32>
    "tpu.trace_stop"() : () -> ()
    %321 = vector.shape_cast %3 : vector<8x48xf32> to vector<1x8x48xf32>
    %322 = vector.broadcast %321 : vector<1x8x48xf32> to vector<4x8x48xf32>
    %323 = arith.addf %320, %322 : vector<4x8x48xf32>
    %cst_154 = arith.constant dense<0xFF800000> : vector<4x8xf32>
    %324 = vector.multi_reduction <maximumf>, %323, %cst_154 [2] : vector<4x8x48xf32> to vector<4x8xf32>
    %325 = vector.shape_cast %324 : vector<4x8xf32> to vector<4x8x1xf32>
    %326 = vector.broadcast %325 : vector<4x8x1xf32> to vector<4x8x48xf32>
    %327 = arith.subf %323, %326 : vector<4x8x48xf32>
    %328 = math.exp %327 : vector<4x8x48xf32>
    "tpu.trace_start"() <{level = 10 : i32, message = "gln,gne->gle"}> : () -> ()
    %cst_155 = arith.constant dense<0.000000e+00> : vector<4x8x32xf32>
    %329 = tpu.matmul %328, %317, %cst_155 {dimension_numbers = #tpu.dot_dimension_numbers<[2], [1], [1], [2], [0, 0, 0, 1, 1, 2], [0], [0]>} : vector<4x8x48xf32>, vector<4x48x32xf32>, vector<4x8x32xf32> -> vector<4x8x32xf32>
    "tpu.trace_stop"() : () -> ()
    %330 = vector.shape_cast %328 : vector<4x8x48xf32> to vector<32x48xf32>
    %cst_156 = arith.constant dense<0.000000e+00> : vector<32x32xf32>
    %331 = tpu.matmul %330, %2, %cst_156 {dimension_numbers = #tpu.dot_dimension_numbers<[1], [0], [0], [1], [0, 0, 1, 1], [], []>} : vector<32x48xf32>, vector<48x32xf32>, vector<32x32xf32> -> vector<32x32xf32>
    %332 = vector.shape_cast %331 : vector<32x32xf32> to vector<4x8x32xf32>
    %cst_157 = arith.constant 9.99999968E-21 : f32
    %333 = vector.broadcast %cst_157 : f32 to vector<4x8x32xf32>
    %334 = arith.maximumf %332, %333 : vector<4x8x32xf32>
    %335 = tpu.reciprocal %334 {approx = true} : vector<4x8x32xf32> -> vector<4x8x32xf32>
    %336 = arith.mulf %329, %335 : vector<4x8x32xf32>
    %337 = vector.shape_cast %293 : vector<1x32xf32> to vector<1x1x32xf32>
    %338 = vector.shape_cast %337 : vector<1x1x32xf32> to vector<1x1x32xf32>
    %339 = vector.broadcast %338 : vector<1x1x32xf32> to vector<4x4x32xf32>
    %340 = tpu.concatenate %339, %305, %339, %305, %339, %305, %339, %305 in 1 : vector<4x4x32xf32>, vector<4x8x32xf32>, vector<4x4x32xf32>, vector<4x8x32xf32>, vector<4x4x32xf32>, vector<4x8x32xf32>, vector<4x4x32xf32>, vector<4x8x32xf32> -> vector<4x48x32xf32>
    %341 = vector.shape_cast %2 : vector<48x32xf32> to vector<1x48x32xf32>
    %342 = vector.broadcast %341 : vector<1x48x32xf32> to vector<4x48x32xf32>
    %343 = arith.mulf %340, %342 : vector<4x48x32xf32>
    %cst_158 = arith.constant 0.353553385 : f32
    %344 = vector.broadcast %cst_158 : f32 to vector<4x8x32xf32>
    %345 = arith.mulf %305, %344 : vector<4x8x32xf32>
    "tpu.trace_start"() <{level = 10 : i32, message = "gld,gnd->gln"}> : () -> ()
    %cst_159 = arith.constant dense<0.000000e+00> : vector<4x8x48xf32>
    %346 = tpu.matmul %345, %343, %cst_159 {dimension_numbers = #tpu.dot_dimension_numbers<[2], [2], [1], [1], [0, 0, 0, 1, 1, 1], [0], [0]>} : vector<4x8x32xf32>, vector<4x48x32xf32>, vector<4x8x48xf32> -> vector<4x8x48xf32>
    "tpu.trace_stop"() : () -> ()
    %347 = vector.shape_cast %3 : vector<8x48xf32> to vector<1x8x48xf32>
    %348 = vector.broadcast %347 : vector<1x8x48xf32> to vector<4x8x48xf32>
    %349 = arith.addf %346, %348 : vector<4x8x48xf32>
    %cst_160 = arith.constant dense<0xFF800000> : vector<4x8xf32>
    %350 = vector.multi_reduction <maximumf>, %349, %cst_160 [2] : vector<4x8x48xf32> to vector<4x8xf32>
    %351 = vector.shape_cast %350 : vector<4x8xf32> to vector<4x8x1xf32>
    %352 = vector.broadcast %351 : vector<4x8x1xf32> to vector<4x8x48xf32>
    %353 = arith.subf %349, %352 : vector<4x8x48xf32>
    %354 = math.exp %353 : vector<4x8x48xf32>
    "tpu.trace_start"() <{level = 10 : i32, message = "gln,gne->gle"}> : () -> ()
    %cst_161 = arith.constant dense<0.000000e+00> : vector<4x8x32xf32>
    %355 = tpu.matmul %354, %343, %cst_161 {dimension_numbers = #tpu.dot_dimension_numbers<[2], [1], [1], [2], [0, 0, 0, 1, 1, 2], [0], [0]>} : vector<4x8x48xf32>, vector<4x48x32xf32>, vector<4x8x32xf32> -> vector<4x8x32xf32>
    "tpu.trace_stop"() : () -> ()
    %356 = vector.shape_cast %354 : vector<4x8x48xf32> to vector<32x48xf32>
    %cst_162 = arith.constant dense<0.000000e+00> : vector<32x32xf32>
    %357 = tpu.matmul %356, %2, %cst_162 {dimension_numbers = #tpu.dot_dimension_numbers<[1], [0], [0], [1], [0, 0, 1, 1], [], []>} : vector<32x48xf32>, vector<48x32xf32>, vector<32x32xf32> -> vector<32x32xf32>
    %358 = vector.shape_cast %357 : vector<32x32xf32> to vector<4x8x32xf32>
    %cst_163 = arith.constant 9.99999968E-21 : f32
    %359 = vector.broadcast %cst_163 : f32 to vector<4x8x32xf32>
    %360 = arith.maximumf %358, %359 : vector<4x8x32xf32>
    %361 = tpu.reciprocal %360 {approx = true} : vector<4x8x32xf32> -> vector<4x8x32xf32>
    %362 = arith.mulf %355, %361 : vector<4x8x32xf32>
    %363 = tpu.concatenate %362, %362, %362, %362 in 1 : vector<4x8x32xf32>, vector<4x8x32xf32>, vector<4x8x32xf32>, vector<4x8x32xf32> -> vector<4x32x32xf32>
    %364 = vector.shape_cast %4 : vector<32x32xf32> to vector<1x32x32xf32>
    %365 = vector.broadcast %364 : vector<1x32x32xf32> to vector<4x32x32xf32>
    %366 = arith.mulf %363, %365 : vector<4x32x32xf32>
    %367 = tpu.concatenate %310, %310, %310, %310 in 1 : vector<4x8x32xf32>, vector<4x8x32xf32>, vector<4x8x32xf32>, vector<4x8x32xf32> -> vector<4x32x32xf32>
    %368 = vector.shape_cast %4 : vector<32x32xf32> to vector<1x32x32xf32>
    %369 = vector.broadcast %368 : vector<1x32x32xf32> to vector<4x32x32xf32>
    %370 = arith.mulf %367, %369 : vector<4x32x32xf32>
    %cst_164 = arith.constant 0.353553385 : f32
    %371 = vector.broadcast %cst_164 : f32 to vector<4x8x32xf32>
    %372 = arith.mulf %336, %371 : vector<4x8x32xf32>
    "tpu.trace_start"() <{level = 10 : i32, message = "gld,gnd->gln"}> : () -> ()
    %cst_165 = arith.constant dense<0.000000e+00> : vector<4x8x32xf32>
    %373 = tpu.matmul %372, %366, %cst_165 {dimension_numbers = #tpu.dot_dimension_numbers<[2], [2], [1], [1], [0, 0, 0, 1, 1, 1], [0], [0]>} : vector<4x8x32xf32>, vector<4x32x32xf32>, vector<4x8x32xf32> -> vector<4x8x32xf32>
    "tpu.trace_stop"() : () -> ()
    %cst_166 = arith.constant dense<0xFF800000> : vector<4x8xf32>
    %374 = vector.multi_reduction <maximumf>, %373, %cst_166 [2] : vector<4x8x32xf32> to vector<4x8xf32>
    %375 = vector.shape_cast %374 : vector<4x8xf32> to vector<4x8x1xf32>
    %376 = vector.broadcast %375 : vector<4x8x1xf32> to vector<4x8x32xf32>
    %377 = arith.subf %373, %376 : vector<4x8x32xf32>
    %378 = math.exp %377 : vector<4x8x32xf32>
    "tpu.trace_start"() <{level = 10 : i32, message = "gln,gne->gle"}> : () -> ()
    %cst_167 = arith.constant dense<0.000000e+00> : vector<4x8x32xf32>
    %379 = tpu.matmul %378, %370, %cst_167 {dimension_numbers = #tpu.dot_dimension_numbers<[2], [1], [1], [2], [0, 0, 0, 1, 1, 2], [0], [0]>} : vector<4x8x32xf32>, vector<4x32x32xf32>, vector<4x8x32xf32> -> vector<4x8x32xf32>
    "tpu.trace_stop"() : () -> ()
    %380 = vector.shape_cast %378 : vector<4x8x32xf32> to vector<32x32xf32>
    %cst_168 = arith.constant dense<0.000000e+00> : vector<32x32xf32>
    %381 = tpu.matmul %380, %4, %cst_168 {dimension_numbers = #tpu.dot_dimension_numbers<[1], [0], [0], [1], [0, 0, 1, 1], [], []>} : vector<32x32xf32>, vector<32x32xf32>, vector<32x32xf32> -> vector<32x32xf32>
    %382 = vector.shape_cast %381 : vector<32x32xf32> to vector<4x8x32xf32>
    %cst_169 = arith.constant 9.99999968E-21 : f32
    %383 = vector.broadcast %cst_169 : f32 to vector<4x8x32xf32>
    %384 = arith.maximumf %382, %383 : vector<4x8x32xf32>
    %385 = tpu.reciprocal %384 {approx = true} : vector<4x8x32xf32> -> vector<4x8x32xf32>
    %386 = arith.mulf %379, %385 : vector<4x8x32xf32>
    %c0_170 = arith.constant 0 : index
    %c0_171 = arith.constant 0 : index
    %387 = vector.load %arg28[%c0_170, %c0_171] : memref<32x32xf32, #tpu.memory_space<vmem>>, vector<32x32xf32>
    %c0_172 = arith.constant 0 : index
    %c0_173 = arith.constant 0 : index
    %388 = vector.load %arg29[%c0_172, %c0_173] : memref<1x32xf32, #tpu.memory_space<vmem>>, vector<1x32xf32>
    %389 = vector.shape_cast %386 : vector<4x8x32xf32> to vector<32x32xf32>
    %cst_174 = arith.constant dense<0.000000e+00> : vector<32x32xf32>
    %390 = tpu.matmul %6, %389, %cst_174 {dimension_numbers = #tpu.dot_dimension_numbers<[1], [0], [0], [1], [0, 0, 1, 1], [], []>} : vector<32x32xf32>, vector<32x32xf32>, vector<32x32xf32> -> vector<32x32xf32>
    %c0_175 = arith.constant 0 : index
    %c0_176 = arith.constant 0 : index
    %c0_177 = arith.constant 0 : index
    %391 = vector.load %arg26[%c0_175, %c0_176, %c0_177] : memref<3x32x32xf32, #tpu.memory_space<vmem>>, vector<1x32x32xf32>
    %392 = vector.shape_cast %391 : vector<1x32x32xf32> to vector<32x32xf32>
    %cst_178 = arith.constant dense<0.000000e+00> : vector<32x32xf32>
    %393 = tpu.matmul %390, %392, %cst_178 {dimension_numbers = #tpu.dot_dimension_numbers<[1], [0], [0], [1], [0, 0, 1, 1], [], []>} : vector<32x32xf32>, vector<32x32xf32>, vector<32x32xf32> -> vector<32x32xf32>
    %c0_179 = arith.constant 0 : index
    %c0_180 = arith.constant 0 : index
    %c0_181 = arith.constant 0 : index
    %394 = vector.load %arg27[%c0_179, %c0_180, %c0_181] : memref<3x1x32xf32, #tpu.memory_space<vmem>>, vector<1x1x32xf32>
    %395 = vector.shape_cast %394 : vector<1x1x32xf32> to vector<1x32xf32>
    %396 = vector.broadcast %395 : vector<1x32xf32> to vector<32x32xf32>
    %397 = arith.addf %393, %396 : vector<32x32xf32>
    %398 = vector.shape_cast %397 : vector<32x32xf32> to vector<8x4x32xf32>
    %c1_182 = arith.constant 1 : index
    %c0_183 = arith.constant 0 : index
    %c0_184 = arith.constant 0 : index
    %399 = vector.load %arg26[%c1_182, %c0_183, %c0_184] : memref<3x32x32xf32, #tpu.memory_space<vmem>>, vector<1x32x32xf32>
    %400 = vector.shape_cast %399 : vector<1x32x32xf32> to vector<32x32xf32>
    %cst_185 = arith.constant dense<0.000000e+00> : vector<32x32xf32>
    %401 = tpu.matmul %390, %400, %cst_185 {dimension_numbers = #tpu.dot_dimension_numbers<[1], [0], [0], [1], [0, 0, 1, 1], [], []>} : vector<32x32xf32>, vector<32x32xf32>, vector<32x32xf32> -> vector<32x32xf32>
    %c1_186 = arith.constant 1 : index
    %c0_187 = arith.constant 0 : index
    %c0_188 = arith.constant 0 : index
    %402 = vector.load %arg27[%c1_186, %c0_187, %c0_188] : memref<3x1x32xf32, #tpu.memory_space<vmem>>, vector<1x1x32xf32>
    %403 = vector.shape_cast %402 : vector<1x1x32xf32> to vector<1x32xf32>
    %404 = vector.broadcast %403 : vector<1x32xf32> to vector<32x32xf32>
    %405 = arith.addf %401, %404 : vector<32x32xf32>
    %406 = vector.shape_cast %405 : vector<32x32xf32> to vector<8x4x32xf32>
    %c2_189 = arith.constant 2 : index
    %c0_190 = arith.constant 0 : index
    %c0_191 = arith.constant 0 : index
    %407 = vector.load %arg26[%c2_189, %c0_190, %c0_191] : memref<3x32x32xf32, #tpu.memory_space<vmem>>, vector<1x32x32xf32>
    %408 = vector.shape_cast %407 : vector<1x32x32xf32> to vector<32x32xf32>
    %cst_192 = arith.constant dense<0.000000e+00> : vector<32x32xf32>
    %409 = tpu.matmul %390, %408, %cst_192 {dimension_numbers = #tpu.dot_dimension_numbers<[1], [0], [0], [1], [0, 0, 1, 1], [], []>} : vector<32x32xf32>, vector<32x32xf32>, vector<32x32xf32> -> vector<32x32xf32>
    %c2_193 = arith.constant 2 : index
    %c0_194 = arith.constant 0 : index
    %c0_195 = arith.constant 0 : index
    %410 = vector.load %arg27[%c2_193, %c0_194, %c0_195] : memref<3x1x32xf32, #tpu.memory_space<vmem>>, vector<1x1x32xf32>
    %411 = vector.shape_cast %410 : vector<1x1x32xf32> to vector<1x32xf32>
    %412 = vector.broadcast %411 : vector<1x32xf32> to vector<32x32xf32>
    %413 = arith.addf %409, %412 : vector<32x32xf32>
    %414 = vector.shape_cast %413 : vector<32x32xf32> to vector<8x4x32xf32>
    %415 = tpu.concatenate %406, %406, %406, %406 in 1 : vector<8x4x32xf32>, vector<8x4x32xf32>, vector<8x4x32xf32>, vector<8x4x32xf32> -> vector<8x16x32xf32>
    %416 = vector.shape_cast %5 : vector<16x32xf32> to vector<1x16x32xf32>
    %417 = vector.broadcast %416 : vector<1x16x32xf32> to vector<8x16x32xf32>
    %418 = arith.mulf %415, %417 : vector<8x16x32xf32>
    %419 = tpu.concatenate %414, %414, %414, %414 in 1 : vector<8x4x32xf32>, vector<8x4x32xf32>, vector<8x4x32xf32>, vector<8x4x32xf32> -> vector<8x16x32xf32>
    %420 = vector.shape_cast %5 : vector<16x32xf32> to vector<1x16x32xf32>
    %421 = vector.broadcast %420 : vector<1x16x32xf32> to vector<8x16x32xf32>
    %422 = arith.mulf %419, %421 : vector<8x16x32xf32>
    %cst_196 = arith.constant 0.353553385 : f32
    %423 = vector.broadcast %cst_196 : f32 to vector<8x4x32xf32>
    %424 = arith.mulf %398, %423 : vector<8x4x32xf32>
    "tpu.trace_start"() <{level = 10 : i32, message = "gld,gnd->gln"}> : () -> ()
    %cst_197 = arith.constant dense<0.000000e+00> : vector<8x4x16xf32>
    %425 = tpu.matmul %424, %418, %cst_197 {dimension_numbers = #tpu.dot_dimension_numbers<[2], [2], [1], [1], [0, 0, 0, 1, 1, 1], [0], [0]>} : vector<8x4x32xf32>, vector<8x16x32xf32>, vector<8x4x16xf32> -> vector<8x4x16xf32>
    "tpu.trace_stop"() : () -> ()
    %cst_198 = arith.constant dense<0xFF800000> : vector<8x4xf32>
    %426 = vector.multi_reduction <maximumf>, %425, %cst_198 [2] : vector<8x4x16xf32> to vector<8x4xf32>
    %427 = vector.shape_cast %426 : vector<8x4xf32> to vector<8x4x1xf32>
    %428 = vector.broadcast %427 : vector<8x4x1xf32> to vector<8x4x16xf32>
    %429 = arith.subf %425, %428 : vector<8x4x16xf32>
    %430 = math.exp %429 : vector<8x4x16xf32>
    "tpu.trace_start"() <{level = 10 : i32, message = "gln,gne->gle"}> : () -> ()
    %cst_199 = arith.constant dense<0.000000e+00> : vector<8x4x32xf32>
    %431 = tpu.matmul %430, %422, %cst_199 {dimension_numbers = #tpu.dot_dimension_numbers<[2], [1], [1], [2], [0, 0, 0, 1, 1, 2], [0], [0]>} : vector<8x4x16xf32>, vector<8x16x32xf32>, vector<8x4x32xf32> -> vector<8x4x32xf32>
    "tpu.trace_stop"() : () -> ()
    %432 = vector.shape_cast %430 : vector<8x4x16xf32> to vector<32x16xf32>
    %cst_200 = arith.constant dense<0.000000e+00> : vector<32x32xf32>
    %433 = tpu.matmul %432, %5, %cst_200 {dimension_numbers = #tpu.dot_dimension_numbers<[1], [0], [0], [1], [0, 0, 1, 1], [], []>} : vector<32x16xf32>, vector<16x32xf32>, vector<32x32xf32> -> vector<32x32xf32>
    %434 = vector.shape_cast %433 : vector<32x32xf32> to vector<8x4x32xf32>
    %cst_201 = arith.constant 9.99999968E-21 : f32
    %435 = vector.broadcast %cst_201 : f32 to vector<8x4x32xf32>
    %436 = arith.maximumf %434, %435 : vector<8x4x32xf32>
    %437 = tpu.reciprocal %436 {approx = true} : vector<8x4x32xf32> -> vector<8x4x32xf32>
    %438 = arith.mulf %431, %437 : vector<8x4x32xf32>
    %439 = vector.shape_cast %438 : vector<8x4x32xf32> to vector<32x32xf32>
    %cst_202 = arith.constant dense<0.000000e+00> : vector<32x32xf32>
    %440 = tpu.matmul %439, %387, %cst_202 {dimension_numbers = #tpu.dot_dimension_numbers<[1], [0], [0], [1], [0, 0, 1, 1], [], []>} : vector<32x32xf32>, vector<32x32xf32>, vector<32x32xf32> -> vector<32x32xf32>
    %441 = vector.broadcast %388 : vector<1x32xf32> to vector<32x32xf32>
    %442 = arith.addf %440, %441 : vector<32x32xf32>
    %cst_203 = arith.constant dense<0.000000e+00> : vector<32x32xf32>
    %443 = tpu.matmul %7, %442, %cst_203 {dimension_numbers = #tpu.dot_dimension_numbers<[1], [0], [0], [1], [0, 0, 1, 1], [], []>} : vector<32x32xf32>, vector<32x32xf32>, vector<32x32xf32> -> vector<32x32xf32>
    %444 = vector.shape_cast %443 : vector<32x32xf32> to vector<4x8x32xf32>
    %c0_204 = arith.constant 0 : index
    %c0_205 = arith.constant 0 : index
    %445 = vector.load %arg30[%c0_204, %c0_205] : memref<1x32xf32, #tpu.memory_space<vmem>>, vector<1x32xf32>
    %c0_206 = arith.constant 0 : index
    %c0_207 = arith.constant 0 : index
    %446 = vector.load %arg31[%c0_206, %c0_207] : memref<1x32xf32, #tpu.memory_space<vmem>>, vector<1x32xf32>
    %447 = arith.addf %283, %444 : vector<4x8x32xf32>
    %cst_208 = arith.constant dense<0.000000e+00> : vector<4x8xf32>
    %448 = vector.multi_reduction <add>, %447, %cst_208 [2] : vector<4x8x32xf32> to vector<4x8xf32>
    %449 = vector.shape_cast %448 : vector<4x8xf32> to vector<4x8x1xf32>
    %cst_209 = arith.constant 3.200000e+01 : f32
    %450 = vector.broadcast %cst_209 : f32 to vector<4x8x1xf32>
    %451 = arith.divf %449, %450 : vector<4x8x1xf32>
    %452 = vector.broadcast %451 : vector<4x8x1xf32> to vector<4x8x32xf32>
    %453 = arith.subf %447, %452 : vector<4x8x32xf32>
    %454 = arith.mulf %453, %453 : vector<4x8x32xf32>
    %cst_210 = arith.constant dense<0.000000e+00> : vector<4x8xf32>
    %455 = vector.multi_reduction <add>, %454, %cst_210 [2] : vector<4x8x32xf32> to vector<4x8xf32>
    %456 = vector.shape_cast %455 : vector<4x8xf32> to vector<4x8x1xf32>
    %cst_211 = arith.constant 3.200000e+01 : f32
    %457 = vector.broadcast %cst_211 : f32 to vector<4x8x1xf32>
    %458 = arith.divf %456, %457 : vector<4x8x1xf32>
    %459 = vector.broadcast %451 : vector<4x8x1xf32> to vector<4x8x32xf32>
    %460 = arith.subf %447, %459 : vector<4x8x32xf32>
    %cst_212 = arith.constant 9.99999974E-6 : f32
    %461 = vector.broadcast %cst_212 : f32 to vector<4x8x1xf32>
    %462 = arith.addf %458, %461 : vector<4x8x1xf32>
    %463 = math.rsqrt %462 : vector<4x8x1xf32>
    %464 = vector.broadcast %463 : vector<4x8x1xf32> to vector<4x8x32xf32>
    %465 = arith.mulf %460, %464 : vector<4x8x32xf32>
    %466 = vector.shape_cast %445 : vector<1x32xf32> to vector<1x1x32xf32>
    %467 = vector.broadcast %466 : vector<1x1x32xf32> to vector<4x8x32xf32>
    %468 = arith.mulf %465, %467 : vector<4x8x32xf32>
    %469 = vector.shape_cast %446 : vector<1x32xf32> to vector<1x1x32xf32>
    %470 = vector.broadcast %469 : vector<1x1x32xf32> to vector<4x8x32xf32>
    %471 = arith.addf %468, %470 : vector<4x8x32xf32>
    %c0_213 = arith.constant 0 : index
    %c0_214 = arith.constant 0 : index
    %c0_215 = arith.constant 0 : index
    %472 = vector.load %arg32[%c0_213, %c0_214, %c0_215] : memref<3x32x32xf32, #tpu.memory_space<vmem>>, vector<1x32x32xf32>
    %473 = vector.shape_cast %472 : vector<1x32x32xf32> to vector<32x32xf32>
    %c1_216 = arith.constant 1 : index
    %c0_217 = arith.constant 0 : index
    %c0_218 = arith.constant 0 : index
    %474 = vector.load %arg32[%c1_216, %c0_217, %c0_218] : memref<3x32x32xf32, #tpu.memory_space<vmem>>, vector<1x32x32xf32>
    %475 = vector.shape_cast %474 : vector<1x32x32xf32> to vector<32x32xf32>
    %c2_219 = arith.constant 2 : index
    %c0_220 = arith.constant 0 : index
    %c0_221 = arith.constant 0 : index
    %476 = vector.load %arg32[%c2_219, %c0_220, %c0_221] : memref<3x32x32xf32, #tpu.memory_space<vmem>>, vector<1x32x32xf32>
    %477 = vector.shape_cast %476 : vector<1x32x32xf32> to vector<32x32xf32>
    %c0_222 = arith.constant 0 : index
    %c0_223 = arith.constant 0 : index
    %c0_224 = arith.constant 0 : index
    %478 = vector.load %arg33[%c0_222, %c0_223, %c0_224] : memref<3x1x32xf32, #tpu.memory_space<vmem>>, vector<1x1x32xf32>
    %479 = vector.shape_cast %478 : vector<1x1x32xf32> to vector<1x32xf32>
    %c1_225 = arith.constant 1 : index
    %c0_226 = arith.constant 0 : index
    %c0_227 = arith.constant 0 : index
    %480 = vector.load %arg33[%c1_225, %c0_226, %c0_227] : memref<3x1x32xf32, #tpu.memory_space<vmem>>, vector<1x1x32xf32>
    %481 = vector.shape_cast %480 : vector<1x1x32xf32> to vector<1x32xf32>
    %c2_228 = arith.constant 2 : index
    %c0_229 = arith.constant 0 : index
    %c0_230 = arith.constant 0 : index
    %482 = vector.load %arg33[%c2_228, %c0_229, %c0_230] : memref<3x1x32xf32, #tpu.memory_space<vmem>>, vector<1x1x32xf32>
    %483 = vector.shape_cast %482 : vector<1x1x32xf32> to vector<1x32xf32>
    %484 = vector.shape_cast %471 : vector<4x8x32xf32> to vector<32x32xf32>
    %cst_231 = arith.constant dense<0.000000e+00> : vector<32x32xf32>
    %485 = tpu.matmul %484, %473, %cst_231 {dimension_numbers = #tpu.dot_dimension_numbers<[1], [0], [0], [1], [0, 0, 1, 1], [], []>} : vector<32x32xf32>, vector<32x32xf32>, vector<32x32xf32> -> vector<32x32xf32>
    %486 = vector.broadcast %479 : vector<1x32xf32> to vector<32x32xf32>
    %487 = arith.addf %485, %486 : vector<32x32xf32>
    %488 = vector.shape_cast %487 : vector<32x32xf32> to vector<4x8x32xf32>
    %489 = vector.shape_cast %471 : vector<4x8x32xf32> to vector<32x32xf32>
    %cst_232 = arith.constant dense<0.000000e+00> : vector<32x32xf32>
    %490 = tpu.matmul %489, %475, %cst_232 {dimension_numbers = #tpu.dot_dimension_numbers<[1], [0], [0], [1], [0, 0, 1, 1], [], []>} : vector<32x32xf32>, vector<32x32xf32>, vector<32x32xf32> -> vector<32x32xf32>
    %491 = vector.broadcast %481 : vector<1x32xf32> to vector<32x32xf32>
    %492 = arith.addf %490, %491 : vector<32x32xf32>
    %493 = vector.shape_cast %492 : vector<32x32xf32> to vector<4x8x32xf32>
    %494 = vector.shape_cast %279 : vector<4x8x32xf32> to vector<32x32xf32>
    %cst_233 = arith.constant dense<0.000000e+00> : vector<32x32xf32>
    %495 = tpu.matmul %494, %473, %cst_233 {dimension_numbers = #tpu.dot_dimension_numbers<[1], [0], [0], [1], [0, 0, 1, 1], [], []>} : vector<32x32xf32>, vector<32x32xf32>, vector<32x32xf32> -> vector<32x32xf32>
    %496 = vector.broadcast %479 : vector<1x32xf32> to vector<32x32xf32>
    %497 = arith.addf %495, %496 : vector<32x32xf32>
    %498 = vector.shape_cast %497 : vector<32x32xf32> to vector<4x8x32xf32>
    %499 = vector.shape_cast %279 : vector<4x8x32xf32> to vector<32x32xf32>
    %cst_234 = arith.constant dense<0.000000e+00> : vector<32x32xf32>
    %500 = tpu.matmul %499, %475, %cst_234 {dimension_numbers = #tpu.dot_dimension_numbers<[1], [0], [0], [1], [0, 0, 1, 1], [], []>} : vector<32x32xf32>, vector<32x32xf32>, vector<32x32xf32> -> vector<32x32xf32>
    %501 = vector.broadcast %481 : vector<1x32xf32> to vector<32x32xf32>
    %502 = arith.addf %500, %501 : vector<32x32xf32>
    %503 = vector.shape_cast %502 : vector<32x32xf32> to vector<4x8x32xf32>
    %504 = vector.shape_cast %279 : vector<4x8x32xf32> to vector<32x32xf32>
    %cst_235 = arith.constant dense<0.000000e+00> : vector<32x32xf32>
    %505 = tpu.matmul %504, %477, %cst_235 {dimension_numbers = #tpu.dot_dimension_numbers<[1], [0], [0], [1], [0, 0, 1, 1], [], []>} : vector<32x32xf32>, vector<32x32xf32>, vector<32x32xf32> -> vector<32x32xf32>
    %506 = vector.broadcast %483 : vector<1x32xf32> to vector<32x32xf32>
    %507 = arith.addf %505, %506 : vector<32x32xf32>
    %508 = vector.shape_cast %507 : vector<32x32xf32> to vector<4x8x32xf32>
    %509 = vector.shape_cast %479 : vector<1x32xf32> to vector<1x1x32xf32>
    %510 = vector.shape_cast %509 : vector<1x1x32xf32> to vector<1x1x32xf32>
    %511 = vector.broadcast %510 : vector<1x1x32xf32> to vector<4x4x32xf32>
    %512 = tpu.concatenate %511, %498, %511, %498, %511, %498, %511, %498 in 1 : vector<4x4x32xf32>, vector<4x8x32xf32>, vector<4x4x32xf32>, vector<4x8x32xf32>, vector<4x4x32xf32>, vector<4x8x32xf32>, vector<4x4x32xf32>, vector<4x8x32xf32> -> vector<4x48x32xf32>
    %513 = vector.shape_cast %2 : vector<48x32xf32> to vector<1x48x32xf32>
    %514 = vector.broadcast %513 : vector<1x48x32xf32> to vector<4x48x32xf32>
    %515 = arith.mulf %512, %514 : vector<4x48x32xf32>
    %cst_236 = arith.constant 0.353553385 : f32
    %516 = vector.broadcast %cst_236 : f32 to vector<4x8x32xf32>
    %517 = arith.mulf %488, %516 : vector<4x8x32xf32>
    "tpu.trace_start"() <{level = 10 : i32, message = "gld,gnd->gln"}> : () -> ()
    %cst_237 = arith.constant dense<0.000000e+00> : vector<4x8x48xf32>
    %518 = tpu.matmul %517, %515, %cst_237 {dimension_numbers = #tpu.dot_dimension_numbers<[2], [2], [1], [1], [0, 0, 0, 1, 1, 1], [0], [0]>} : vector<4x8x32xf32>, vector<4x48x32xf32>, vector<4x8x48xf32> -> vector<4x8x48xf32>
    "tpu.trace_stop"() : () -> ()
    %519 = vector.shape_cast %3 : vector<8x48xf32> to vector<1x8x48xf32>
    %520 = vector.broadcast %519 : vector<1x8x48xf32> to vector<4x8x48xf32>
    %521 = arith.addf %518, %520 : vector<4x8x48xf32>
    %cst_238 = arith.constant dense<0xFF800000> : vector<4x8xf32>
    %522 = vector.multi_reduction <maximumf>, %521, %cst_238 [2] : vector<4x8x48xf32> to vector<4x8xf32>
    %523 = vector.shape_cast %522 : vector<4x8xf32> to vector<4x8x1xf32>
    %524 = vector.broadcast %523 : vector<4x8x1xf32> to vector<4x8x48xf32>
    %525 = arith.subf %521, %524 : vector<4x8x48xf32>
    %526 = math.exp %525 : vector<4x8x48xf32>
    "tpu.trace_start"() <{level = 10 : i32, message = "gln,gne->gle"}> : () -> ()
    %cst_239 = arith.constant dense<0.000000e+00> : vector<4x8x32xf32>
    %527 = tpu.matmul %526, %515, %cst_239 {dimension_numbers = #tpu.dot_dimension_numbers<[2], [1], [1], [2], [0, 0, 0, 1, 1, 2], [0], [0]>} : vector<4x8x48xf32>, vector<4x48x32xf32>, vector<4x8x32xf32> -> vector<4x8x32xf32>
    "tpu.trace_stop"() : () -> ()
    %528 = vector.shape_cast %526 : vector<4x8x48xf32> to vector<32x48xf32>
    %cst_240 = arith.constant dense<0.000000e+00> : vector<32x32xf32>
    %529 = tpu.matmul %528, %2, %cst_240 {dimension_numbers = #tpu.dot_dimension_numbers<[1], [0], [0], [1], [0, 0, 1, 1], [], []>} : vector<32x48xf32>, vector<48x32xf32>, vector<32x32xf32> -> vector<32x32xf32>
    %530 = vector.shape_cast %529 : vector<32x32xf32> to vector<4x8x32xf32>
    %cst_241 = arith.constant 9.99999968E-21 : f32
    %531 = vector.broadcast %cst_241 : f32 to vector<4x8x32xf32>
    %532 = arith.maximumf %530, %531 : vector<4x8x32xf32>
    %533 = tpu.reciprocal %532 {approx = true} : vector<4x8x32xf32> -> vector<4x8x32xf32>
    %534 = arith.mulf %527, %533 : vector<4x8x32xf32>
    %535 = vector.shape_cast %481 : vector<1x32xf32> to vector<1x1x32xf32>
    %536 = vector.shape_cast %535 : vector<1x1x32xf32> to vector<1x1x32xf32>
    %537 = vector.broadcast %536 : vector<1x1x32xf32> to vector<4x4x32xf32>
    %538 = tpu.concatenate %537, %493, %537, %493, %537, %493, %537, %493 in 1 : vector<4x4x32xf32>, vector<4x8x32xf32>, vector<4x4x32xf32>, vector<4x8x32xf32>, vector<4x4x32xf32>, vector<4x8x32xf32>, vector<4x4x32xf32>, vector<4x8x32xf32> -> vector<4x48x32xf32>
    %539 = vector.shape_cast %2 : vector<48x32xf32> to vector<1x48x32xf32>
    %540 = vector.broadcast %539 : vector<1x48x32xf32> to vector<4x48x32xf32>
    %541 = arith.mulf %538, %540 : vector<4x48x32xf32>
    %542 = tpu.concatenate %537, %503, %537, %503, %537, %503, %537, %503 in 1 : vector<4x4x32xf32>, vector<4x8x32xf32>, vector<4x4x32xf32>, vector<4x8x32xf32>, vector<4x4x32xf32>, vector<4x8x32xf32>, vector<4x4x32xf32>, vector<4x8x32xf32> -> vector<4x48x32xf32>
    %543 = vector.shape_cast %2 : vector<48x32xf32> to vector<1x48x32xf32>
    %544 = vector.broadcast %543 : vector<1x48x32xf32> to vector<4x48x32xf32>
    %545 = arith.mulf %542, %544 : vector<4x48x32xf32>
    %cst_242 = arith.constant 0.353553385 : f32
    %546 = vector.broadcast %cst_242 : f32 to vector<4x8x32xf32>
    %547 = arith.mulf %503, %546 : vector<4x8x32xf32>
    "tpu.trace_start"() <{level = 10 : i32, message = "gld,gnd->gln"}> : () -> ()
    %cst_243 = arith.constant dense<0.000000e+00> : vector<4x8x48xf32>
    %548 = tpu.matmul %547, %541, %cst_243 {dimension_numbers = #tpu.dot_dimension_numbers<[2], [2], [1], [1], [0, 0, 0, 1, 1, 1], [0], [0]>} : vector<4x8x32xf32>, vector<4x48x32xf32>, vector<4x8x48xf32> -> vector<4x8x48xf32>
    "tpu.trace_stop"() : () -> ()
    %549 = vector.shape_cast %3 : vector<8x48xf32> to vector<1x8x48xf32>
    %550 = vector.broadcast %549 : vector<1x8x48xf32> to vector<4x8x48xf32>
    %551 = arith.addf %548, %550 : vector<4x8x48xf32>
    %cst_244 = arith.constant dense<0xFF800000> : vector<4x8xf32>
    %552 = vector.multi_reduction <maximumf>, %551, %cst_244 [2] : vector<4x8x48xf32> to vector<4x8xf32>
    %553 = vector.shape_cast %552 : vector<4x8xf32> to vector<4x8x1xf32>
    %554 = vector.broadcast %553 : vector<4x8x1xf32> to vector<4x8x48xf32>
    %555 = arith.subf %551, %554 : vector<4x8x48xf32>
    %556 = math.exp %555 : vector<4x8x48xf32>
    "tpu.trace_start"() <{level = 10 : i32, message = "gln,gne->gle"}> : () -> ()
    %cst_245 = arith.constant dense<0.000000e+00> : vector<4x8x32xf32>
    %557 = tpu.matmul %556, %545, %cst_245 {dimension_numbers = #tpu.dot_dimension_numbers<[2], [1], [1], [2], [0, 0, 0, 1, 1, 2], [0], [0]>} : vector<4x8x48xf32>, vector<4x48x32xf32>, vector<4x8x32xf32> -> vector<4x8x32xf32>
    "tpu.trace_stop"() : () -> ()
    %558 = vector.shape_cast %556 : vector<4x8x48xf32> to vector<32x48xf32>
    %cst_246 = arith.constant dense<0.000000e+00> : vector<32x32xf32>
    %559 = tpu.matmul %558, %2, %cst_246 {dimension_numbers = #tpu.dot_dimension_numbers<[1], [0], [0], [1], [0, 0, 1, 1], [], []>} : vector<32x48xf32>, vector<48x32xf32>, vector<32x32xf32> -> vector<32x32xf32>
    %560 = vector.shape_cast %559 : vector<32x32xf32> to vector<4x8x32xf32>
    %cst_247 = arith.constant 9.99999968E-21 : f32
    %561 = vector.broadcast %cst_247 : f32 to vector<4x8x32xf32>
    %562 = arith.maximumf %560, %561 : vector<4x8x32xf32>
    %563 = tpu.reciprocal %562 {approx = true} : vector<4x8x32xf32> -> vector<4x8x32xf32>
    %564 = arith.mulf %557, %563 : vector<4x8x32xf32>
    %565 = tpu.concatenate %564, %564, %564, %564 in 1 : vector<4x8x32xf32>, vector<4x8x32xf32>, vector<4x8x32xf32>, vector<4x8x32xf32> -> vector<4x32x32xf32>
    %566 = vector.shape_cast %4 : vector<32x32xf32> to vector<1x32x32xf32>
    %567 = vector.broadcast %566 : vector<1x32x32xf32> to vector<4x32x32xf32>
    %568 = arith.mulf %565, %567 : vector<4x32x32xf32>
    %569 = tpu.concatenate %508, %508, %508, %508 in 1 : vector<4x8x32xf32>, vector<4x8x32xf32>, vector<4x8x32xf32>, vector<4x8x32xf32> -> vector<4x32x32xf32>
    %570 = vector.shape_cast %4 : vector<32x32xf32> to vector<1x32x32xf32>
    %571 = vector.broadcast %570 : vector<1x32x32xf32> to vector<4x32x32xf32>
    %572 = arith.mulf %569, %571 : vector<4x32x32xf32>
    %cst_248 = arith.constant 0.353553385 : f32
    %573 = vector.broadcast %cst_248 : f32 to vector<4x8x32xf32>
    %574 = arith.mulf %534, %573 : vector<4x8x32xf32>
    "tpu.trace_start"() <{level = 10 : i32, message = "gld,gnd->gln"}> : () -> ()
    %cst_249 = arith.constant dense<0.000000e+00> : vector<4x8x32xf32>
    %575 = tpu.matmul %574, %568, %cst_249 {dimension_numbers = #tpu.dot_dimension_numbers<[2], [2], [1], [1], [0, 0, 0, 1, 1, 1], [0], [0]>} : vector<4x8x32xf32>, vector<4x32x32xf32>, vector<4x8x32xf32> -> vector<4x8x32xf32>
    "tpu.trace_stop"() : () -> ()
    %cst_250 = arith.constant dense<0xFF800000> : vector<4x8xf32>
    %576 = vector.multi_reduction <maximumf>, %575, %cst_250 [2] : vector<4x8x32xf32> to vector<4x8xf32>
    %577 = vector.shape_cast %576 : vector<4x8xf32> to vector<4x8x1xf32>
    %578 = vector.broadcast %577 : vector<4x8x1xf32> to vector<4x8x32xf32>
    %579 = arith.subf %575, %578 : vector<4x8x32xf32>
    %580 = math.exp %579 : vector<4x8x32xf32>
    "tpu.trace_start"() <{level = 10 : i32, message = "gln,gne->gle"}> : () -> ()
    %cst_251 = arith.constant dense<0.000000e+00> : vector<4x8x32xf32>
    %581 = tpu.matmul %580, %572, %cst_251 {dimension_numbers = #tpu.dot_dimension_numbers<[2], [1], [1], [2], [0, 0, 0, 1, 1, 2], [0], [0]>} : vector<4x8x32xf32>, vector<4x32x32xf32>, vector<4x8x32xf32> -> vector<4x8x32xf32>
    "tpu.trace_stop"() : () -> ()
    %582 = vector.shape_cast %580 : vector<4x8x32xf32> to vector<32x32xf32>
    %cst_252 = arith.constant dense<0.000000e+00> : vector<32x32xf32>
    %583 = tpu.matmul %582, %4, %cst_252 {dimension_numbers = #tpu.dot_dimension_numbers<[1], [0], [0], [1], [0, 0, 1, 1], [], []>} : vector<32x32xf32>, vector<32x32xf32>, vector<32x32xf32> -> vector<32x32xf32>
    %584 = vector.shape_cast %583 : vector<32x32xf32> to vector<4x8x32xf32>
    %cst_253 = arith.constant 9.99999968E-21 : f32
    %585 = vector.broadcast %cst_253 : f32 to vector<4x8x32xf32>
    %586 = arith.maximumf %584, %585 : vector<4x8x32xf32>
    %587 = tpu.reciprocal %586 {approx = true} : vector<4x8x32xf32> -> vector<4x8x32xf32>
    %588 = arith.mulf %581, %587 : vector<4x8x32xf32>
    %c0_254 = arith.constant 0 : index
    %c0_255 = arith.constant 0 : index
    %589 = vector.load %arg34[%c0_254, %c0_255] : memref<1x32xf32, #tpu.memory_space<vmem>>, vector<1x32xf32>
    %c0_256 = arith.constant 0 : index
    %c0_257 = arith.constant 0 : index
    %590 = vector.load %arg35[%c0_256, %c0_257] : memref<1x32xf32, #tpu.memory_space<vmem>>, vector<1x32xf32>
    %591 = arith.addf %471, %588 : vector<4x8x32xf32>
    %cst_258 = arith.constant dense<0.000000e+00> : vector<4x8xf32>
    %592 = vector.multi_reduction <add>, %591, %cst_258 [2] : vector<4x8x32xf32> to vector<4x8xf32>
    %593 = vector.shape_cast %592 : vector<4x8xf32> to vector<4x8x1xf32>
    %cst_259 = arith.constant 3.200000e+01 : f32
    %594 = vector.broadcast %cst_259 : f32 to vector<4x8x1xf32>
    %595 = arith.divf %593, %594 : vector<4x8x1xf32>
    %596 = vector.broadcast %595 : vector<4x8x1xf32> to vector<4x8x32xf32>
    %597 = arith.subf %591, %596 : vector<4x8x32xf32>
    %598 = arith.mulf %597, %597 : vector<4x8x32xf32>
    %cst_260 = arith.constant dense<0.000000e+00> : vector<4x8xf32>
    %599 = vector.multi_reduction <add>, %598, %cst_260 [2] : vector<4x8x32xf32> to vector<4x8xf32>
    %600 = vector.shape_cast %599 : vector<4x8xf32> to vector<4x8x1xf32>
    %cst_261 = arith.constant 3.200000e+01 : f32
    %601 = vector.broadcast %cst_261 : f32 to vector<4x8x1xf32>
    %602 = arith.divf %600, %601 : vector<4x8x1xf32>
    %603 = vector.broadcast %595 : vector<4x8x1xf32> to vector<4x8x32xf32>
    %604 = arith.subf %591, %603 : vector<4x8x32xf32>
    %cst_262 = arith.constant 9.99999974E-6 : f32
    %605 = vector.broadcast %cst_262 : f32 to vector<4x8x1xf32>
    %606 = arith.addf %602, %605 : vector<4x8x1xf32>
    %607 = math.rsqrt %606 : vector<4x8x1xf32>
    %608 = vector.broadcast %607 : vector<4x8x1xf32> to vector<4x8x32xf32>
    %609 = arith.mulf %604, %608 : vector<4x8x32xf32>
    %610 = vector.shape_cast %589 : vector<1x32xf32> to vector<1x1x32xf32>
    %611 = vector.broadcast %610 : vector<1x1x32xf32> to vector<4x8x32xf32>
    %612 = arith.mulf %609, %611 : vector<4x8x32xf32>
    %613 = vector.shape_cast %590 : vector<1x32xf32> to vector<1x1x32xf32>
    %614 = vector.broadcast %613 : vector<1x1x32xf32> to vector<4x8x32xf32>
    %615 = arith.addf %612, %614 : vector<4x8x32xf32>
    %c0_263 = arith.constant 0 : index
    %c0_264 = arith.constant 0 : index
    %616 = vector.load %arg36[%c0_263, %c0_264] : memref<32x128xf32, #tpu.memory_space<vmem>>, vector<32x128xf32>
    %c0_265 = arith.constant 0 : index
    %c0_266 = arith.constant 0 : index
    %617 = vector.load %arg37[%c0_265, %c0_266] : memref<1x128xf32, #tpu.memory_space<vmem>>, vector<1x128xf32>
    %618 = vector.shape_cast %615 : vector<4x8x32xf32> to vector<32x32xf32>
    %cst_267 = arith.constant dense<0.000000e+00> : vector<32x128xf32>
    %619 = tpu.matmul %618, %616, %cst_267 {dimension_numbers = #tpu.dot_dimension_numbers<[1], [0], [0], [1], [0, 0, 1, 1], [], []>} : vector<32x32xf32>, vector<32x128xf32>, vector<32x128xf32> -> vector<32x128xf32>
    %620 = vector.broadcast %617 : vector<1x128xf32> to vector<32x128xf32>
    %621 = arith.addf %619, %620 : vector<32x128xf32>
    %622 = vector.shape_cast %621 : vector<32x128xf32> to vector<4x8x128xf32>
    %cst_268 = arith.constant 5.000000e-01 : f32
    %623 = vector.broadcast %cst_268 : f32 to vector<4x8x128xf32>
    %624 = arith.mulf %623, %622 : vector<4x8x128xf32>
    %cst_269 = arith.constant 0.707106769 : f32
    %625 = vector.broadcast %cst_269 : f32 to vector<4x8x128xf32>
    %626 = arith.mulf %622, %625 : vector<4x8x128xf32>
    %627 = math.absf %626 : vector<4x8x128xf32>
    %cst_270 = arith.constant 0.327591091 : f32
    %628 = vector.broadcast %cst_270 : f32 to vector<4x8x128xf32>
    %629 = arith.mulf %628, %627 : vector<4x8x128xf32>
    %cst_271 = arith.constant 1.000000e+00 : f32
    %630 = vector.broadcast %cst_271 : f32 to vector<4x8x128xf32>
    %631 = arith.addf %630, %629 : vector<4x8x128xf32>
    %632 = tpu.reciprocal %631 {approx = true} : vector<4x8x128xf32> -> vector<4x8x128xf32>
    %cst_272 = arith.constant 1.06140542 : f32
    %633 = vector.broadcast %cst_272 : f32 to vector<4x8x128xf32>
    %634 = arith.mulf %633, %632 : vector<4x8x128xf32>
    %cst_273 = arith.constant -1.45315206 : f32
    %635 = vector.broadcast %cst_273 : f32 to vector<4x8x128xf32>
    %636 = arith.addf %634, %635 : vector<4x8x128xf32>
    %637 = arith.mulf %636, %632 : vector<4x8x128xf32>
    %cst_274 = arith.constant 1.42141378 : f32
    %638 = vector.broadcast %cst_274 : f32 to vector<4x8x128xf32>
    %639 = arith.addf %637, %638 : vector<4x8x128xf32>
    %640 = arith.mulf %639, %632 : vector<4x8x128xf32>
    %cst_275 = arith.constant -0.284496725 : f32
    %641 = vector.broadcast %cst_275 : f32 to vector<4x8x128xf32>
    %642 = arith.addf %640, %641 : vector<4x8x128xf32>
    %643 = arith.mulf %642, %632 : vector<4x8x128xf32>
    %cst_276 = arith.constant 0.254829586 : f32
    %644 = vector.broadcast %cst_276 : f32 to vector<4x8x128xf32>
    %645 = arith.addf %643, %644 : vector<4x8x128xf32>
    %646 = arith.mulf %645, %632 : vector<4x8x128xf32>
    %cst_277 = arith.constant 0.000000e+00 : f32
    %647 = vector.broadcast %cst_277 : f32 to vector<4x8x128xf32>
    %648 = arith.subf %647, %627 : vector<4x8x128xf32>
    %649 = arith.mulf %648, %627 : vector<4x8x128xf32>
    %650 = math.exp %649 : vector<4x8x128xf32>
    %651 = arith.mulf %646, %650 : vector<4x8x128xf32>
    %cst_278 = arith.constant 1.000000e+00 : f32
    %652 = vector.broadcast %cst_278 : f32 to vector<4x8x128xf32>
    %653 = arith.subf %652, %651 : vector<4x8x128xf32>
    %cst_279 = arith.constant 0.000000e+00 : f32
    %654 = vector.broadcast %cst_279 : f32 to vector<4x8x128xf32>
    %655 = arith.cmpf oge, %626, %654 : vector<4x8x128xf32>
    %cst_280 = arith.constant 0.000000e+00 : f32
    %656 = vector.broadcast %cst_280 : f32 to vector<4x8x128xf32>
    %657 = arith.subf %656, %653 : vector<4x8x128xf32>
    %658 = arith.select %655, %653, %657 : vector<4x8x128xi1>, vector<4x8x128xf32>
    %cst_281 = arith.constant 1.000000e+00 : f32
    %659 = vector.broadcast %cst_281 : f32 to vector<4x8x128xf32>
    %660 = arith.addf %659, %658 : vector<4x8x128xf32>
    %661 = arith.mulf %624, %660 : vector<4x8x128xf32>
    %c0_282 = arith.constant 0 : index
    %c0_283 = arith.constant 0 : index
    %662 = vector.load %arg38[%c0_282, %c0_283] : memref<128x32xf32, #tpu.memory_space<vmem>>, vector<128x32xf32>
    %c0_284 = arith.constant 0 : index
    %c0_285 = arith.constant 0 : index
    %663 = vector.load %arg39[%c0_284, %c0_285] : memref<1x32xf32, #tpu.memory_space<vmem>>, vector<1x32xf32>
    %664 = vector.shape_cast %661 : vector<4x8x128xf32> to vector<32x128xf32>
    %cst_286 = arith.constant dense<0.000000e+00> : vector<32x32xf32>
    %665 = tpu.matmul %664, %662, %cst_286 {dimension_numbers = #tpu.dot_dimension_numbers<[1], [0], [0], [1], [0, 0, 1, 1], [], []>} : vector<32x128xf32>, vector<128x32xf32>, vector<32x32xf32> -> vector<32x32xf32>
    %666 = vector.broadcast %663 : vector<1x32xf32> to vector<32x32xf32>
    %667 = arith.addf %665, %666 : vector<32x32xf32>
    %668 = vector.shape_cast %667 : vector<32x32xf32> to vector<4x8x32xf32>
    %c0_287 = arith.constant 0 : index
    %c0_288 = arith.constant 0 : index
    %669 = vector.load %arg40[%c0_287, %c0_288] : memref<1x32xf32, #tpu.memory_space<vmem>>, vector<1x32xf32>
    %c0_289 = arith.constant 0 : index
    %c0_290 = arith.constant 0 : index
    %670 = vector.load %arg41[%c0_289, %c0_290] : memref<1x32xf32, #tpu.memory_space<vmem>>, vector<1x32xf32>
    %671 = arith.addf %615, %668 : vector<4x8x32xf32>
    %cst_291 = arith.constant dense<0.000000e+00> : vector<4x8xf32>
    %672 = vector.multi_reduction <add>, %671, %cst_291 [2] : vector<4x8x32xf32> to vector<4x8xf32>
    %673 = vector.shape_cast %672 : vector<4x8xf32> to vector<4x8x1xf32>
    %cst_292 = arith.constant 3.200000e+01 : f32
    %674 = vector.broadcast %cst_292 : f32 to vector<4x8x1xf32>
    %675 = arith.divf %673, %674 : vector<4x8x1xf32>
    %676 = vector.broadcast %675 : vector<4x8x1xf32> to vector<4x8x32xf32>
    %677 = arith.subf %671, %676 : vector<4x8x32xf32>
    %678 = arith.mulf %677, %677 : vector<4x8x32xf32>
    %cst_293 = arith.constant dense<0.000000e+00> : vector<4x8xf32>
    %679 = vector.multi_reduction <add>, %678, %cst_293 [2] : vector<4x8x32xf32> to vector<4x8xf32>
    %680 = vector.shape_cast %679 : vector<4x8xf32> to vector<4x8x1xf32>
    %cst_294 = arith.constant 3.200000e+01 : f32
    %681 = vector.broadcast %cst_294 : f32 to vector<4x8x1xf32>
    %682 = arith.divf %680, %681 : vector<4x8x1xf32>
    %683 = vector.broadcast %675 : vector<4x8x1xf32> to vector<4x8x32xf32>
    %684 = arith.subf %671, %683 : vector<4x8x32xf32>
    %cst_295 = arith.constant 9.99999974E-6 : f32
    %685 = vector.broadcast %cst_295 : f32 to vector<4x8x1xf32>
    %686 = arith.addf %682, %685 : vector<4x8x1xf32>
    %687 = math.rsqrt %686 : vector<4x8x1xf32>
    %688 = vector.broadcast %687 : vector<4x8x1xf32> to vector<4x8x32xf32>
    %689 = arith.mulf %684, %688 : vector<4x8x32xf32>
    %690 = vector.shape_cast %669 : vector<1x32xf32> to vector<1x1x32xf32>
    %691 = vector.broadcast %690 : vector<1x1x32xf32> to vector<4x8x32xf32>
    %692 = arith.mulf %689, %691 : vector<4x8x32xf32>
    %693 = vector.shape_cast %670 : vector<1x32xf32> to vector<1x1x32xf32>
    %694 = vector.broadcast %693 : vector<1x1x32xf32> to vector<4x8x32xf32>
    %695 = arith.addf %692, %694 : vector<4x8x32xf32>
    %c0_296 = arith.constant 0 : index
    %c0_297 = arith.constant 0 : index
    %c0_298 = arith.constant 0 : index
    %c0_299 = arith.constant 0 : index
    %696 = vector.load %arg45[%c0_296, %c0_297, %c0_298, %c0_299] : memref<1x4x8x32xf32, #tpu.memory_space<vmem>>, vector<1x4x8x32xf32>
    %697 = vector.shape_cast %696 : vector<1x4x8x32xf32> to vector<4x8x32xf32>
    %698 = vector.shape_cast %695 : vector<4x8x32xf32> to vector<1x4x8x32xf32>
    tpu.vector_store %arg45[%c0_296, %c0_297, %c0_298, %c0_299], %698 {strides = array<i32>} : memref<1x4x8x32xf32, #tpu.memory_space<vmem>>, vector<1x4x8x32xf32>,
    %c0_300 = arith.constant 0 : index
    %c0_301 = arith.constant 0 : index
    %699 = vector.load %arg42[%c0_300, %c0_301] : memref<32x3xf32, #tpu.memory_space<vmem>>, vector<32x3xf32>
    %c0_302 = arith.constant 0 : index
    %c0_303 = arith.constant 0 : index
    %700 = vector.load %arg43[%c0_302, %c0_303] : memref<1x3xf32, #tpu.memory_space<vmem>>, vector<1x3xf32>
    %701 = vector.shape_cast %695 : vector<4x8x32xf32> to vector<32x32xf32>
    %cst_304 = arith.constant dense<0.000000e+00> : vector<32x3xf32>
    %702 = tpu.matmul %701, %699, %cst_304 {dimension_numbers = #tpu.dot_dimension_numbers<[1], [0], [0], [1], [0, 0, 1, 1], [], []>} : vector<32x32xf32>, vector<32x3xf32>, vector<32x3xf32> -> vector<32x3xf32>
    %703 = vector.broadcast %700 : vector<1x3xf32> to vector<32x3xf32>
    %704 = arith.addf %702, %703 : vector<32x3xf32>
    %705 = vector.shape_cast %704 : vector<32x3xf32> to vector<4x8x3xf32>
    %c0_305 = arith.constant 0 : index
    %c0_306 = arith.constant 0 : index
    %c0_307 = arith.constant 0 : index
    %c0_308 = arith.constant 0 : index
    %706 = vector.load %arg46[%c0_305, %c0_306, %c0_307, %c0_308] : memref<1x4x8x3xf32, #tpu.memory_space<vmem>>, vector<1x4x8x3xf32>
    %707 = vector.shape_cast %706 : vector<1x4x8x3xf32> to vector<4x8x3xf32>
    %708 = vector.shape_cast %705 : vector<4x8x3xf32> to vector<1x4x8x3xf32>
    tpu.vector_store %arg46[%c0_305, %c0_306, %c0_307, %c0_308], %708 {strides = array<i32>} : memref<1x4x8x3xf32, #tpu.memory_space<vmem>>, vector<1x4x8x3xf32>,
    %cst_309 = arith.constant 1.000000e+00 : f32
    %709 = vector.broadcast %cst_309 : f32 to vector<4x8x1xf32>
    %c0_310 = arith.constant 0 : index
    %c0_311 = arith.constant 0 : index
    %c0_312 = arith.constant 0 : index
    %c0_313 = arith.constant 0 : index
    %710 = vector.load %arg44[%c0_310, %c0_311, %c0_312, %c0_313] : memref<1x4x8x1xf32, #tpu.memory_space<vmem>>, vector<1x4x8x1xf32>
    %711 = vector.shape_cast %710 : vector<1x4x8x1xf32> to vector<4x8x1xf32>
    %712 = vector.shape_cast %709 : vector<4x8x1xf32> to vector<1x4x8x1xf32>
    tpu.vector_store %arg44[%c0_310, %c0_311, %c0_312, %c0_313], %712 {strides = array<i32>} : memref<1x4x8x1xf32, #tpu.memory_space<vmem>>, vector<1x4x8x1xf32>,
    return
  }
  func.func @transform_0(%arg0: i32) -> (i32, i32, i32, i32) {
    %c0_i32 = arith.constant 0 : i32
    %c0_i32_0 = arith.constant 0 : i32
    %c0_i32_1 = arith.constant 0 : i32
    %c0_i32_2 = arith.constant 0 : i32
    return %arg0, %c0_i32, %c0_i32_0, %c0_i32_1 : i32, i32, i32, i32
  }
  func.func @transform_1(%arg0: i32) -> (i32, i32) {
    %c0_i32 = arith.constant 0 : i32
    %c0_i32_0 = arith.constant 0 : i32
    %c0_i32_1 = arith.constant 0 : i32
    return %c0_i32, %c0_i32_0 : i32, i32
  }
  func.func @transform_2(%arg0: i32) -> (i32, i32) {
    %c0_i32 = arith.constant 0 : i32
    %c0_i32_0 = arith.constant 0 : i32
    %c0_i32_1 = arith.constant 0 : i32
    return %c0_i32, %c0_i32_0 : i32, i32
  }
  func.func @transform_3(%arg0: i32) -> (i32, i32) {
    %c0_i32 = arith.constant 0 : i32
    %c0_i32_0 = arith.constant 0 : i32
    %c0_i32_1 = arith.constant 0 : i32
    return %c0_i32, %c0_i32_0 : i32, i32
  }
  func.func @transform_4(%arg0: i32) -> (i32, i32) {
    %c0_i32 = arith.constant 0 : i32
    %c0_i32_0 = arith.constant 0 : i32
    %c0_i32_1 = arith.constant 0 : i32
    return %c0_i32, %c0_i32_0 : i32, i32
  }
  func.func @transform_5(%arg0: i32) -> (i32, i32) {
    %c0_i32 = arith.constant 0 : i32
    %c0_i32_0 = arith.constant 0 : i32
    %c0_i32_1 = arith.constant 0 : i32
    return %c0_i32, %c0_i32_0 : i32, i32
  }
  func.func @transform_6(%arg0: i32) -> (i32, i32) {
    %c0_i32 = arith.constant 0 : i32
    %c0_i32_0 = arith.constant 0 : i32
    %c0_i32_1 = arith.constant 0 : i32
    return %c0_i32, %c0_i32_0 : i32, i32
  }
  func.func @transform_7(%arg0: i32) -> (i32, i32) {
    %c0_i32 = arith.constant 0 : i32
    %c0_i32_0 = arith.constant 0 : i32
    %c0_i32_1 = arith.constant 0 : i32
    return %c0_i32, %c0_i32_0 : i32, i32
  }
  func.func @transform_8(%arg0: i32) -> (i32, i32, i32) {
    %c0_i32 = arith.constant 0 : i32
    %c0_i32_0 = arith.constant 0 : i32
    %c0_i32_1 = arith.constant 0 : i32
    %c0_i32_2 = arith.constant 0 : i32
    return %c0_i32, %c0_i32_0, %c0_i32_1 : i32, i32, i32
  }
  func.func @transform_9(%arg0: i32) -> (i32, i32, i32) {
    %c0_i32 = arith.constant 0 : i32
    %c0_i32_0 = arith.constant 0 : i32
    %c0_i32_1 = arith.constant 0 : i32
    %c0_i32_2 = arith.constant 0 : i32
    return %c0_i32, %c0_i32_0, %c0_i32_1 : i32, i32, i32
  }
  func.func @transform_10(%arg0: i32) -> (i32, i32, i32) {
    %c0_i32 = arith.constant 0 : i32
    %c0_i32_0 = arith.constant 0 : i32
    %c0_i32_1 = arith.constant 0 : i32
    %c0_i32_2 = arith.constant 0 : i32
    return %c0_i32, %c0_i32_0, %c0_i32_1 : i32, i32, i32
  }
  func.func @transform_11(%arg0: i32) -> (i32, i32, i32) {
    %c0_i32 = arith.constant 0 : i32
    %c0_i32_0 = arith.constant 0 : i32
    %c0_i32_1 = arith.constant 0 : i32
    %c0_i32_2 = arith.constant 0 : i32
    return %c0_i32, %c0_i32_0, %c0_i32_1 : i32, i32, i32
  }
  func.func @transform_12(%arg0: i32) -> (i32, i32) {
    %c0_i32 = arith.constant 0 : i32
    %c0_i32_0 = arith.constant 0 : i32
    %c0_i32_1 = arith.constant 0 : i32
    return %c0_i32, %c0_i32_0 : i32, i32
  }
  func.func @transform_13(%arg0: i32) -> (i32, i32) {
    %c0_i32 = arith.constant 0 : i32
    %c0_i32_0 = arith.constant 0 : i32
    %c0_i32_1 = arith.constant 0 : i32
    return %c0_i32, %c0_i32_0 : i32, i32
  }
  func.func @transform_14(%arg0: i32) -> (i32, i32) {
    %c0_i32 = arith.constant 0 : i32
    %c0_i32_0 = arith.constant 0 : i32
    %c0_i32_1 = arith.constant 0 : i32
    return %c0_i32, %c0_i32_0 : i32, i32
  }
  func.func @transform_15(%arg0: i32) -> (i32, i32) {
    %c0_i32 = arith.constant 0 : i32
    %c0_i32_0 = arith.constant 0 : i32
    %c0_i32_1 = arith.constant 0 : i32
    return %c0_i32, %c0_i32_0 : i32, i32
  }
  func.func @transform_16(%arg0: i32) -> (i32, i32) {
    %c0_i32 = arith.constant 0 : i32
    %c0_i32_0 = arith.constant 0 : i32
    %c0_i32_1 = arith.constant 0 : i32
    return %c0_i32, %c0_i32_0 : i32, i32
  }
  func.func @transform_17(%arg0: i32) -> (i32, i32) {
    %c0_i32 = arith.constant 0 : i32
    %c0_i32_0 = arith.constant 0 : i32
    %c0_i32_1 = arith.constant 0 : i32
    return %c0_i32, %c0_i32_0 : i32, i32
  }
  func.func @transform_18(%arg0: i32) -> (i32, i32) {
    %c0_i32 = arith.constant 0 : i32
    %c0_i32_0 = arith.constant 0 : i32
    %c0_i32_1 = arith.constant 0 : i32
    return %c0_i32, %c0_i32_0 : i32, i32
  }
  func.func @transform_19(%arg0: i32) -> (i32, i32) {
    %c0_i32 = arith.constant 0 : i32
    %c0_i32_0 = arith.constant 0 : i32
    %c0_i32_1 = arith.constant 0 : i32
    return %c0_i32, %c0_i32_0 : i32, i32
  }
  func.func @transform_20(%arg0: i32) -> (i32, i32) {
    %c0_i32 = arith.constant 0 : i32
    %c0_i32_0 = arith.constant 0 : i32
    %c0_i32_1 = arith.constant 0 : i32
    return %c0_i32, %c0_i32_0 : i32, i32
  }
  func.func @transform_21(%arg0: i32) -> (i32, i32) {
    %c0_i32 = arith.constant 0 : i32
    %c0_i32_0 = arith.constant 0 : i32
    %c0_i32_1 = arith.constant 0 : i32
    return %c0_i32, %c0_i32_0 : i32, i32
  }
  func.func @transform_22(%arg0: i32) -> (i32, i32) {
    %c0_i32 = arith.constant 0 : i32
    %c0_i32_0 = arith.constant 0 : i32
    %c0_i32_1 = arith.constant 0 : i32
    return %c0_i32, %c0_i32_0 : i32, i32
  }
  func.func @transform_23(%arg0: i32) -> (i32, i32, i32) {
    %c0_i32 = arith.constant 0 : i32
    %c0_i32_0 = arith.constant 0 : i32
    %c0_i32_1 = arith.constant 0 : i32
    %c0_i32_2 = arith.constant 0 : i32
    return %c0_i32, %c0_i32_0, %c0_i32_1 : i32, i32, i32
  }
  func.func @transform_24(%arg0: i32) -> (i32, i32, i32) {
    %c0_i32 = arith.constant 0 : i32
    %c0_i32_0 = arith.constant 0 : i32
    %c0_i32_1 = arith.constant 0 : i32
    %c0_i32_2 = arith.constant 0 : i32
    return %c0_i32, %c0_i32_0, %c0_i32_1 : i32, i32, i32
  }
  func.func @transform_25(%arg0: i32) -> (i32, i32, i32) {
    %c0_i32 = arith.constant 0 : i32
    %c0_i32_0 = arith.constant 0 : i32
    %c0_i32_1 = arith.constant 0 : i32
    %c0_i32_2 = arith.constant 0 : i32
    return %c0_i32, %c0_i32_0, %c0_i32_1 : i32, i32, i32
  }
  func.func @transform_26(%arg0: i32) -> (i32, i32, i32) {
    %c0_i32 = arith.constant 0 : i32
    %c0_i32_0 = arith.constant 0 : i32
    %c0_i32_1 = arith.constant 0 : i32
    %c0_i32_2 = arith.constant 0 : i32
    return %c0_i32, %c0_i32_0, %c0_i32_1 : i32, i32, i32
  }
  func.func @transform_27(%arg0: i32) -> (i32, i32) {
    %c0_i32 = arith.constant 0 : i32
    %c0_i32_0 = arith.constant 0 : i32
    %c0_i32_1 = arith.constant 0 : i32
    return %c0_i32, %c0_i32_0 : i32, i32
  }
  func.func @transform_28(%arg0: i32) -> (i32, i32) {
    %c0_i32 = arith.constant 0 : i32
    %c0_i32_0 = arith.constant 0 : i32
    %c0_i32_1 = arith.constant 0 : i32
    return %c0_i32, %c0_i32_0 : i32, i32
  }
  func.func @transform_29(%arg0: i32) -> (i32, i32) {
    %c0_i32 = arith.constant 0 : i32
    %c0_i32_0 = arith.constant 0 : i32
    %c0_i32_1 = arith.constant 0 : i32
    return %c0_i32, %c0_i32_0 : i32, i32
  }
  func.func @transform_30(%arg0: i32) -> (i32, i32) {
    %c0_i32 = arith.constant 0 : i32
    %c0_i32_0 = arith.constant 0 : i32
    %c0_i32_1 = arith.constant 0 : i32
    return %c0_i32, %c0_i32_0 : i32, i32
  }
  func.func @transform_31(%arg0: i32) -> (i32, i32, i32) {
    %c0_i32 = arith.constant 0 : i32
    %c0_i32_0 = arith.constant 0 : i32
    %c0_i32_1 = arith.constant 0 : i32
    %c0_i32_2 = arith.constant 0 : i32
    return %c0_i32, %c0_i32_0, %c0_i32_1 : i32, i32, i32
  }
  func.func @transform_32(%arg0: i32) -> (i32, i32, i32) {
    %c0_i32 = arith.constant 0 : i32
    %c0_i32_0 = arith.constant 0 : i32
    %c0_i32_1 = arith.constant 0 : i32
    %c0_i32_2 = arith.constant 0 : i32
    return %c0_i32, %c0_i32_0, %c0_i32_1 : i32, i32, i32
  }
  func.func @transform_33(%arg0: i32) -> (i32, i32) {
    %c0_i32 = arith.constant 0 : i32
    %c0_i32_0 = arith.constant 0 : i32
    %c0_i32_1 = arith.constant 0 : i32
    return %c0_i32, %c0_i32_0 : i32, i32
  }
  func.func @transform_34(%arg0: i32) -> (i32, i32) {
    %c0_i32 = arith.constant 0 : i32
    %c0_i32_0 = arith.constant 0 : i32
    %c0_i32_1 = arith.constant 0 : i32
    return %c0_i32, %c0_i32_0 : i32, i32
  }
  func.func @transform_35(%arg0: i32) -> (i32, i32) {
    %c0_i32 = arith.constant 0 : i32
    %c0_i32_0 = arith.constant 0 : i32
    %c0_i32_1 = arith.constant 0 : i32
    return %c0_i32, %c0_i32_0 : i32, i32
  }
  func.func @transform_36(%arg0: i32) -> (i32, i32) {
    %c0_i32 = arith.constant 0 : i32
    %c0_i32_0 = arith.constant 0 : i32
    %c0_i32_1 = arith.constant 0 : i32
    return %c0_i32, %c0_i32_0 : i32, i32
  }
  func.func @transform_37(%arg0: i32) -> (i32, i32) {
    %c0_i32 = arith.constant 0 : i32
    %c0_i32_0 = arith.constant 0 : i32
    %c0_i32_1 = arith.constant 0 : i32
    return %c0_i32, %c0_i32_0 : i32, i32
  }
  func.func @transform_38(%arg0: i32) -> (i32, i32) {
    %c0_i32 = arith.constant 0 : i32
    %c0_i32_0 = arith.constant 0 : i32
    %c0_i32_1 = arith.constant 0 : i32
    return %c0_i32, %c0_i32_0 : i32, i32
  }
  func.func @transform_39(%arg0: i32) -> (i32, i32) {
    %c0_i32 = arith.constant 0 : i32
    %c0_i32_0 = arith.constant 0 : i32
    %c0_i32_1 = arith.constant 0 : i32
    return %c0_i32, %c0_i32_0 : i32, i32
  }
  func.func @transform_40(%arg0: i32) -> (i32, i32) {
    %c0_i32 = arith.constant 0 : i32
    %c0_i32_0 = arith.constant 0 : i32
    %c0_i32_1 = arith.constant 0 : i32
    return %c0_i32, %c0_i32_0 : i32, i32
  }
  func.func @transform_41(%arg0: i32) -> (i32, i32) {
    %c0_i32 = arith.constant 0 : i32
    %c0_i32_0 = arith.constant 0 : i32
    %c0_i32_1 = arith.constant 0 : i32
    return %c0_i32, %c0_i32_0 : i32, i32
  }
  func.func @transform_42(%arg0: i32) -> (i32, i32) {
    %c0_i32 = arith.constant 0 : i32
    %c0_i32_0 = arith.constant 0 : i32
    %c0_i32_1 = arith.constant 0 : i32
    return %c0_i32, %c0_i32_0 : i32, i32
  }
  func.func @transform_43(%arg0: i32) -> (i32, i32, i32, i32) {
    %c0_i32 = arith.constant 0 : i32
    %c0_i32_0 = arith.constant 0 : i32
    %c0_i32_1 = arith.constant 0 : i32
    %c0_i32_2 = arith.constant 0 : i32
    return %arg0, %c0_i32, %c0_i32_0, %c0_i32_1 : i32, i32, i32, i32
  }
  func.func @transform_44(%arg0: i32) -> (i32, i32, i32, i32) {
    %c0_i32 = arith.constant 0 : i32
    %c0_i32_0 = arith.constant 0 : i32
    %c0_i32_1 = arith.constant 0 : i32
    %c0_i32_2 = arith.constant 0 : i32
    return %arg0, %c0_i32, %c0_i32_0, %c0_i32_1 : i32, i32, i32, i32
  }
  func.func @transform_45(%arg0: i32) -> (i32, i32, i32, i32) {
    %c0_i32 = arith.constant 0 : i32
    %c0_i32_0 = arith.constant 0 : i32
    %c0_i32_1 = arith.constant 0 : i32
    %c0_i32_2 = arith.constant 0 : i32
    return %arg0, %c0_i32, %c0_i32_0, %c0_i32_1 : i32, i32, i32, i32
  }
}

</mosaic_0001>

<bundles_post_ra>
// kernel: relation_aware_transformer.1
= control target key start
LH: loop header
LB: loop body
LE: loop exit
PB: predicated region body
PF: predicated region fallthrough
CT: control target
= control target key end

     0   :  { %s19236_s6 = smov 1   ;;  %s19237_s10 = smov 2   ;;  %s22888_s0 = inlined_call_operand.smem [shape: u32[46], index: -1, kind: input, shape index: {}] }
   0x1   :  { %s19295_s5 = sld [smem:[%s22888_s0]]   ;;  %s19238_s14 = smov 3  }
   0x2   :  { %s19300_s9 = sld [smem:[%s22888_s0 + %s19236_s6]]   ;;  %s19239_s18 = smov 4  }
   0x3   :  { %s19305_s13 = sld [smem:[%s22888_s0 + %s19237_s10]]   ;;  %s19240_s22 = smov 5  }
   0x4   :  { %s19310_s17 = sld [smem:[%s22888_s0 + %s19238_s14]]   ;;  %s19241_s26 = smov 6  }
   0x5   :  { %s19315_s21 = sld [smem:[%s22888_s0 + %s19239_s18]]   ;;  %s19242_s30 = smov 7  }
   0x6   :  { %s19320_s25 = sld [smem:[%s22888_s0 + %s19240_s22]]   ;;  %s19243_s4 = smov 8  }
   0x7   :  { %22916 = sst [smem:[#allocation5_spill]] %s19295_s5  ;;  %s19244_s10 = smov 9  }
   0x8   :  { %22917 = sst [smem:[#allocation6_spill]] %s19300_s9  ;;  %s19245_s15 = smov 10  }
   0x9   :  { %22918 = sst [smem:[#allocation7_spill]] %s19305_s13  ;;  %s19246_s20 = smov 11  }
   0xa   :  { %22919 = sst [smem:[#allocation8_spill]] %s19310_s17  ;;  %s19248_s1 = smov 13  }
   0xb   :  { %s19325_s29 = sld [smem:[%s22888_s0 + %s19241_s26]]   ;;  %s19247_s26 = smov 12  }
   0xc   :  { %s19330_s3 = sld [smem:[%s22888_s0 + %s19242_s30]]   ;;  %s19249_s7 = smov 14  }
   0xd   :  { %s19335_s8 = sld [smem:[%s22888_s0 + %s19243_s4]]   ;;  %s19251_s22 = smov 16  }
   0xe   :  { %s19340_s14 = sld [smem:[%s22888_s0 + %s19244_s10]]   ;;  %s19252_s28 = smov 17  }
   0xf   :  { %s19345_s19 = sld [smem:[%s22888_s0 + %s19245_s15]]   ;;  %s19250_s15 = smov 15  }
  0x10   :  { %s19350_s24 = sld [smem:[%s22888_s0 + %s19246_s20]]  }
  0x11   :  { %s19355_s30 = sld [smem:[%s22888_s0 + %s19247_s26]]  }
  0x12   :  { %22920 = sst [smem:[#allocation9_spill]] %s19330_s3 }
  0x13   :  { %22921 = sst [smem:[#allocation10_spill]] %s19335_s8 }
  0x14   :  { %22922 = sst [smem:[#allocation11_spill]] %s19340_s14 }
  0x15   :  { %s19360_s6 = sld [smem:[%s22888_s0 + %s19248_s1]]  }
  0x16   :  { %s19365_s12 = sld [smem:[%s22888_s0 + %s19249_s7]]   ;;  %s19253_s7 = smov 18  }
  0x17   :  { %s19370_s20 = sld [smem:[%s22888_s0 + %s19250_s15]]   ;;  %s19254_s15 = smov 19  }
  0x18   :  { %s19375_s27 = sld [smem:[%s22888_s0 + %s19251_s22]]   ;;  %s19255_s22 = smov 20  }
  0x19   :  { %s19380_s4 = sld [smem:[%s22888_s0 + %s19252_s28]]   ;;  %s19256_s28 = smov 21  }
  0x1b   :  { %22923 = sst [smem:[#allocation12_spill]] %s19360_s6 }
  0x1c   :  { %22924 = sst [smem:[#allocation13_spill]] %s19365_s12 }
  0x1d   :  { %22925 = sst [smem:[#allocation14_spill]] %s19370_s20 }
  0x1e   :  { %22926 = sst [smem:[#allocation15_spill]] %s19375_s27 }
  0x1f   :  { %22927 = sst [smem:[#allocation16_spill]] %s19380_s4 }
  0x20   :  { %s19385_s12 = sld [smem:[%s22888_s0 + %s19253_s7]]   ;;  %s19257_s7 = smov 22  }
  0x21   :  { %s19390_s20 = sld [smem:[%s22888_s0 + %s19254_s15]]   ;;  %s19258_s15 = smov 23  }
  0x22   :  { %s19395_s27 = sld [smem:[%s22888_s0 + %s19255_s22]]   ;;  %s19259_s22 = smov 24  }
  0x23   :  { %s19400_s4 = sld [smem:[%s22888_s0 + %s19256_s28]]   ;;  %s19260_s28 = smov 25  }
  0x26   :  { %22928 = sst [smem:[#allocation17_spill]] %s19385_s12 }
  0x27   :  { %22929 = sst [smem:[#allocation18_spill]] %s19390_s20 }
  0x28   :  { %22930 = sst [smem:[#allocation19_spill]] %s19395_s27 }
  0x29   :  { %22931 = sst [smem:[#allocation20_spill]] %s19400_s4 }
  0x2a   :  { %s19405_s12 = sld [smem:[%s22888_s0 + %s19257_s7]]   ;;  %s19261_s7 = smov 26  }
  0x2b   :  { %s19410_s20 = sld [smem:[%s22888_s0 + %s19258_s15]]   ;;  %s19262_s15 = smov 27  }
  0x2c   :  { %s19415_s27 = sld [smem:[%s22888_s0 + %s19259_s22]]   ;;  %s19263_s22 = smov 28  }
  0x2d   :  { %s19420_s4 = sld [smem:[%s22888_s0 + %s19260_s28]]   ;;  %s19264_s28 = smov 29  }
  0x30   :  { %22932 = sst [smem:[#allocation21_spill]] %s19405_s12 }
  0x31   :  { %22933 = sst [smem:[#allocation22_spill]] %s19410_s20 }
  0x32   :  { %22934 = sst [smem:[#allocation23_spill]] %s19415_s27 }
  0x33   :  { %22935 = sst [smem:[#allocation24_spill]] %s19420_s4 }
  0x34   :  { %s19425_s12 = sld [smem:[%s22888_s0 + %s19261_s7]]   ;;  %s19265_s7 = smov 30  }
  0x35   :  { %s19430_s20 = sld [smem:[%s22888_s0 + %s19262_s15]]   ;;  %s19266_s15 = smov 31  }
  0x36   :  { %s19435_s27 = sld [smem:[%s22888_s0 + %s19263_s22]]   ;;  %s19267_s22 = smov 32  }
  0x37   :  { %s19440_s4 = sld [smem:[%s22888_s0 + %s19264_s28]]   ;;  %s19268_s28 = smov 33  }
  0x3a   :  { %22936 = sst [smem:[#allocation25_spill]] %s19425_s12 }
  0x3b   :  { %22937 = sst [smem:[#allocation26_spill]] %s19430_s20 }
  0x3c   :  { %22938 = sst [smem:[#allocation27_spill]] %s19435_s27 }
  0x3d   :  { %22939 = sst [smem:[#allocation28_spill]] %s19440_s4 }
  0x3e   :  { %s19445_s12 = sld [smem:[%s22888_s0 + %s19265_s7]]   ;;  %s19269_s7 = smov 34  }
  0x3f   :  { %s19450_s20 = sld [smem:[%s22888_s0 + %s19266_s15]]   ;;  %s19270_s15 = smov 35  }
  0x40   :  { %s19455_s27 = sld [smem:[%s22888_s0 + %s19267_s22]]   ;;  %s19271_s22 = smov 36  }
  0x41   :  { %s19460_s4 = sld [smem:[%s22888_s0 + %s19268_s28]]   ;;  %s19272_s28 = smov 37  }
  0x44   :  { %22940 = sst [smem:[#allocation29_spill]] %s19445_s12 }
  0x45   :  { %22941 = sst [smem:[#allocation30_spill]] %s19450_s20 }
  0x46   :  { %22942 = sst [smem:[#allocation31_spill]] %s19455_s27 }
  0x47   :  { %22943 = sst [smem:[#allocation32_spill]] %s19460_s4 }
  0x48   :  { %s19465_s12 = sld [smem:[%s22888_s0 + %s19269_s7]]   ;;  %s19273_s7 = smov 38  }
  0x49   :  { %s19470_s20 = sld [smem:[%s22888_s0 + %s19270_s15]]   ;;  %s19274_s15 = smov 39  }
  0x4a   :  { %s19475_s27 = sld [smem:[%s22888_s0 + %s19271_s22]]   ;;  %s19275_s22 = smov 40  }
  0x4b   :  { %s19480_s4 = sld [smem:[%s22888_s0 + %s19272_s28]]   ;;  %s19276_s28 = smov 41  }
  0x4e   :  { %22944 = sst [smem:[#allocation33_spill]] %s19465_s12 }
  0x4f   :  { %22945 = sst [smem:[#allocation34_spill]] %s19470_s20 }
  0x50   :  { %22946 = sst [smem:[#allocation35_spill]] %s19475_s27 }
  0x51   :  { %22947 = sst [smem:[#allocation36_spill]] %s19480_s4 }
  0x52   :  { %s19485_s12 = sld [smem:[%s22888_s0 + %s19273_s7]]   ;;  %s19277_s7 = smov 42  }
  0x53   :  { %s19490_s20 = sld [smem:[%s22888_s0 + %s19274_s15]]   ;;  %s19278_s15 = smov 43  }
  0x54   :  { %s19495_s27 = sld [smem:[%s22888_s0 + %s19275_s22]]   ;;  %s19279_s22 = smov 44  }
  0x55   :  { %s19500_s4 = sld [smem:[%s22888_s0 + %s19276_s28]]   ;;  %s19280_s28 = smov 45  }
  0x58   :  { %22948 = sst [smem:[#allocation37_spill]] %s19485_s12 }
  0x59   :  { %22949 = sst [smem:[#allocation38_spill]] %s19490_s20 }
  0x5a   :  { %22950 = sst [smem:[#allocation39_spill]] %s19495_s27 }
  0x5b   :  { %22951 = sst [smem:[#allocation40_spill]] %s19500_s4 }
  0x5c   :  { %s19505_s12 = sld [smem:[%s22888_s0 + %s19277_s7]]  }
  0x5d   :  { %s19510_s20 = sld [smem:[%s22888_s0 + %s19278_s15]]  }
  0x5e   :  { %s19515_s27 = sld [smem:[%s22888_s0 + %s19279_s22]]  }
  0x5f   :  { %s19520_s4 = sld [smem:[%s22888_s0 + %s19280_s28]]  }
  0x60   :  { %97 = vsyncpa [#allocation3], 0 }
  0x61   :  { %99 = vsyncpa [#allocation3 + $0x1], 0  ;;  %s19522_s7 = smov 0   ;;  %s19524_s10 = smov 0  }
  0x62   :  { %s19526_s11 = smov 0   ;;  %s19528_s15 = smov 0  }
  0x63 LB: > { %s22952_s17 = sld [smem:[#allocation8_spill]]  ;;  %s19543_s0 = sadd.s32 4294967295, %s19234_s15   ;;  %s19222_s7 = sphi %s19522_s7, %s22990_s7   ;;  %s19234_s15 = sphi %s19528_s15, %s22993_s15   ;;  %s19230_s11 = sphi %s19526_s11, %s22992_s11   ;;  %s19226_s10 = sphi %s19524_s10, %s22991_s10  }
  0x64   : > { %s22953_s14 = sld [smem:[#allocation11_spill]]  ;;  %s15455_s16 = sadd.s32 4294967294, %s19234_s15  }
  0x65   : > { %s22954_s13 = sld [smem:[#allocation7_spill]]  ;;  %s19547_s18 = sadd.s32 1, %s19234_s15  }
  0x66   : > { %s22955_s9 = sld [smem:[#allocation6_spill]]  ;;  %s1046_s22 = sadd.s32 1, %s19230_s11 }
  0x67   : > { %s22956_s8 = sld [smem:[#allocation10_spill]]  ;;  %s1043_s23 = ssub.s32 %s19234_s15, %s19547_s18 }
  0x68   : > { %p1056_p0 = scmp.ne.s32.totalorder %s19230_s11, %s19226_s10  ;;  %p1044_p1 = scmp.eq.s32.totalorder %s1043_s23, 0 }
  0x69   : > { %p1057_p2 = scmp.eq.s32.totalorder %s19543_s0, 3  ;;  %p1062_p3 = scmp.ne.s32.totalorder %s19226_s10, %s19222_s7 }
  0x6a   : > { %p1063_p4 = scmp.eq.s32.totalorder %s15455_s16, 3  ;;  %p15458_p7 = scmp.ge.s32.totalorder %s19234_s15, 1 }
  0x6b   : > { %s19558_s26 = scalar_select %p1044_p1, %s19230_s11, %s1046_s22  }
  0x6c   : > { %p19560_p5 = por %p1057_p2, %p1056_p0  ;;  %p19564_p6 = por %p1063_p4, %p1062_p3 }
  0x6d   : > { %p1241_p8 = scmp.lt.s32.totalorder %s19234_s15, 5 }
  0x6f   : > { %p1242_p9 = pnand %p15458_p7, %p1241_p8 }
  0x70   : > { %s22959_s3 = sld [smem:[#allocation9_spill]] (!%p1242_p9)  ;;  %p1359_p10 = scmp.lt.s32.totalorder (!%p1242_p9), %s19543_s0, 3 }
  0x71   : > { %1245 = sbr.rel (%p1242_p9) target bundleno = 10393 (0x2899), region = 192  ;;  %s22960_s5 = sld [smem:[#allocation5_spill]] (!%p1242_p9) }
  0x72   : > { %s22961_s6 = sld [smem:[#allocation12_spill]] (!%p1242_p9) }
  0x76   : > { %v1407_v0 = vld [vmem:[%s22956_s8 + $0x18] sm:$0xff]  ;;  %v1406_v1 = vld [vmem:[%s22956_s8 + $0x10] sm:$0xff]  ;;  %v1405_v2 = vld [vmem:[%s22956_s8 + $0x8] sm:$0xff]  ;;  %s1360_s2 = scalar_select %p1359_p10, %s19543_s0, 3  ;;  %vm15263_vm0 = vcmask 7168   ;;  %vm1429_vm1 = vcmask 261120  }
  0x77   : > { %16945 = vmatprep.subr.mxu0 %v1407_v0  ;;  %v1404_v3 = vld [vmem:[%s22956_s8] sm:$0xff]  ;;  %v15469_v5 = vld [vmem:[%s22956_s8 + $0x38] sm:$0xff]  ;;  %v19281_v7 = vmov 1.0   ;;  %v15468_v14 = vld [vmem:[%s22956_s8 + $0x30] sm:$0xff]  ;;  %v19282_v22 = vmov 0.0   ;;  %vm19283_vm2 = vmmov 0  }
  0x78   : > { %16946 = vmatpush3.msra.mxu0 %v1407_v0  ;;  %s19576_s16 = sshll.u32 %s1360_s2, 5  ;;  %v1399_v4 = vld [vmem:[%s22959_s3] sm:$0xff]  ;;  %v15467_v16 = vld [vmem:[%s22956_s8 + $0x28] sm:$0xff]  ;;  %v15473_v18 = vld [vmem:[%s22956_s8 + $0x58] sm:$0xff]  ;;  %16987 = vmatprep.subr.mxu1 %v19282_v22  ;;  %vm1721_vm3 = vcmask 1043456   ;;  %vm2122_vm4 = vcmask 392192  }
  0x79   : > { %16947 = vmatprep.subr.mxu0 %v1406_v1  ;;  %s19581_s22 = scalar_lea.vmem %s22960_s5, %s19576_s16  ;;  %s1368_s23 = scalar_lea.vmem %s19510_s20, %s19576_s16  ;;  %v15466_v17 = vld [vmem:[%s22956_s8 + $0x20] sm:$0xff]  ;;  %v15472_v19 = vld [vmem:[%s22956_s8 + $0x50] sm:$0xff]  ;;  %v15471_v20 = vld [vmem:[%s22956_s8 + $0x48] sm:$0xff]  ;;  %16999 = vmatprep.mubr.msk.f32.mxu1 %vm19283_vm2, %v19282_v22  ;;  %vm5312_vm5 = vcmask 125952   ;;  %vm5361_vm6 = vcmask 130048  }
  0x7a   : > { %16948 = vmatpush3.msra.mxu0 %v1406_v1  ;;  %v1374_v6 = vld [vmem:[%s19581_s22] sm:$0xff]  ;;  %15264 = vst.msk [vmem:[%s1368_s23] sm:$0xff] %vm15263_vm0, %v19281_v7  ;;  %15265 = vst.msk [vmem:[%s1368_s23 + $0x8] sm:$0xff] %vm15263_vm0, %v19281_v7  ;;  %v1375_v8 = vld [vmem:[%s19581_s22 + $0x8] sm:$0xff]  ;;  %s22962_s2 = sld [smem:[#allocation15_spill]] }
  0x7b   : > { %16949 = vmatprep.subr.mxu0 %v1405_v2  ;;  %15266 = vst.msk [vmem:[%s1368_s23 + $0x10] sm:$0xff] %vm15263_vm0, %v19281_v7  ;;  %15267 = vst.msk [vmem:[%s1368_s23 + $0x18] sm:$0xff] %vm15263_vm0, %v19281_v7  ;;  %v1376_v9 = vld [vmem:[%s19581_s22 + $0x10] sm:$0xff]  ;;  %v19593_v10 = vadd.f32 %v1399_v4, %v1374_v6  ;;  %v19595_v11 = vadd.f32 %v1399_v4, %v1375_v8  ;;  %v1377_v13 = vld [vmem:[%s19581_s22 + $0x18] sm:$0xff]  ;;  %s22963_s23 = sld [smem:[#allocation22_spill]] }
  0x7c   : > { %16950 = vmatpush3.msra.mxu0 %v1405_v2  ;;  %v19597_v12 = vadd.f32 %v1399_v4, %v1376_v9  ;;  %v19605_v15 = vadd.f32 %v1399_v4, %v1377_v13  ;;  %v15470_v21 = vld [vmem:[%s22956_s8 + $0x40] sm:$0xff]  ;;  %v19643_v24 = vld [vmem:[%s22955_s9 + $0x28] sm:$0xff]  ;;  %v19669_v37 = vld [vmem:[%s22955_s9 + $0x18] sm:$0xff]  ;;  %s22964_s3 = sld [smem:[#allocation13_spill]] }
  0x7d   : > { %16951 = vmatprep.subr.mxu0 %v1404_v3  ;;  %16953 = vmatprep.mubr.msk.f32.mxu0 %vm1429_vm1, %v19593_v10  ;;  %v19640_v23 = vld [vmem:[%s22953_s14] ss:$0 sm:$0xff]  ;;  %v19686_v42 = vld [vmem:[%s22955_s9 + $0x10] sm:$0xff]  ;;  %v19703_v45 = vld [vmem:[%s22955_s9 + $0x8] sm:$0xff]  ;;  %s22965_s5 = sld [smem:[#allocation14_spill]] }
  0x7e   : > { %16952 = vmatpush3.msra.mxu0 %v1404_v3  ;;  %v19650_v30 = vld [vmem:[%s22955_s9 + $0x20] sm:$0xff] }
  0x7f   : > { %16959 = vmatprep.subr.mxu0 %v15469_v5  ;;  %16954 = vmatmul.mubr.msk.f32.vlgmr.msra.gmra.mxu0 %vm1429_vm1, %v19595_v11  ;;  %v19719_v51 = vld [vmem:[%s22955_s9] sm:$0xff] }
  0x80   : > { %16956 = vmatprep.mubr.msk.f32.mxu0 %vm1429_vm1, %v19597_v12  ;;  %16960 = vmatpush3.msra.mxu0 %v15469_v5 }
  0x81   : > { %16961 = vmatprep.subr.mxu0 %v15468_v14 }
  0x82   : > { %16962 = vmatpush3.msra.mxu0 %v15468_v14 }
  0x83   : > { %16957 = vmatmul.mubr.msk.f32.gmra.mxu0 %vm1429_vm1, %v19605_v15  ;;  %16963 = vmatprep.subr.mxu0 %v15467_v16 }
  0x84   : > { %16964 = vmatpush3.msra.mxu0 %v15467_v16  ;;  %16967 = vmatprep.mubr.msk.f32.mxu0 %vm1429_vm1, %v19593_v10 }
  0x85   : > { %16965 = vmatprep.subr.mxu0 %v15466_v17 }
  0x86   : > { %16966 = vmatpush3.msra.mxu0 %v15466_v17 }
  0x87   : > { %16968 = vmatmul.mubr.msk.f32.vlgmr.msra.gmra.mxu0 %vm1429_vm1, %v19595_v11  ;;  %16973 = vmatprep.subr.mxu0 %v15473_v18 }
  0x88   : > { %16974 = vmatpush3.msra.mxu0 %v15473_v18  ;;  %16970 = vmatprep.mubr.msk.f32.mxu0 %vm1429_vm1, %v19597_v12 }
  0x89   : > { %16975 = vmatprep.subr.mxu0 %v15472_v19 }
  0x8a   : > { %16976 = vmatpush3.msra.mxu0 %v15472_v19 }
  0x8b   : > { %16971 = vmatmul.mubr.msk.f32.gmra.mxu0 %vm1429_vm1, %v19605_v15  ;;  %16977 = vmatprep.subr.mxu0 %v15471_v20 }
  0x8c   : > { %16978 = vmatpush3.msra.mxu0 %v15471_v20  ;;  %16981 = vmatprep.mubr.msk.f32.mxu0 %vm1429_vm1, %v19593_v10 }
  0x8d   : > { %16979 = vmatprep.subr.mxu0 %v15470_v21 }
  0x8e   : > { %16980 = vmatpush3.msra.mxu0 %v15470_v21 }
  0x8f   : > { %16982 = vmatmul.mubr.msk.f32.vlgmr.msra.gmra.mxu0 %vm1429_vm1, %v19595_v11  ;;  %17002 = vmatprep.subr.mxu0 %v19282_v22 }
  0x90   : > { %16984 = vmatprep.mubr.msk.f32.mxu0 %vm1429_vm1, %v19597_v12 }
  0x93   : > { %16985 = vmatmul.mubr.msk.f32.gmra.mxu0 %vm1429_vm1, %v19605_v15 }
  0x94   : > { %17014 = vmatprep.mubr.msk.f32.mxu0 %vm19283_vm2, %v19282_v22 }
 0x13f   : > { %v16955_v25 = vpop.f32.mrf.mxu0 }
 0x140   : > { %v1514_v26 = vadd.f32 %v16955_v25, %v19640_v23 }
 0x141   : > { %v1508_v27 = vpop.f32.mrf.mxu0 }
 0x142   : > { %v1714_v28 = vrot.slane %v1514_v26, 4  ;;  %v19647_v29 = vmul.f32 %v1514_v26, %v19643_v24  ;;  %v1509_v31 = vadd.f32 %v19640_v23, %v1508_v27  ;;  %v19698_v44 = vmul.f32 %v1514_v26, %v19686_v42 }
 0x143   : > { %v16958_v46 = vpop.f32.mrf.mxu0  ;;  %v1755_v57 = vmul.f32 0.35355338, %v1514_v26  ;;  %v19873_v26 = vld [vmem:[%s22953_s14 + $0x2] ss:$0 sm:$0xff] }
 0x144   : > { %17003 = vmatpush3.xpose.msk.msra.mxu0 %vm1429_vm1, %v19647_v29  ;;  %v1727_v32 = vsel %vm1721_vm3, %v1714_v28, %v19640_v23  ;;  %v1713_v33 = vrot.slane %v1509_v31, 4  ;;  %v19658_v34 = vmul.f32 %v1509_v31, %v19643_v24  ;;  %v1723_v38 = vsel %vm1721_vm3, %v19640_v23, %v1714_v28 }
 0x145   : > { %17004 = vmatprep.subr.mxu0 %v19282_v22  ;;  %v19662_v35 = vmul.f32 %v1727_v32, %v19650_v30  ;;  %v19681_v40 = vmul.f32 %v1723_v38, %v19669_v37  ;;  %v19709_v47 = vmul.f32 %v1509_v31, %v19686_v42  ;;  %v1524_v48 = vadd.f32 %v16958_v46, %v19640_v23  ;;  %v1518_v50 = vpop.f32.mrf.mxu0 }
 0x146   : > { %16988 = vmatpush3.xpose.msk.msra.mxu1 %vm1429_vm1, %v19658_v34  ;;  %v1726_v36 = vsel %vm1721_vm3, %v1713_v33, %v19640_v23  ;;  %v1722_v41 = vsel %vm1721_vm3, %v19640_v23, %v1713_v33  ;;  %v19714_v49 = vmul.f32 %v1727_v32, %v19703_v45  ;;  %v1519_v54 = vadd.f32 %v19640_v23, %v1518_v50 }
 0x147   : > { %16989 = vmatprep.subr.mxu1 %v19282_v22  ;;  %v19677_v39 = vmul.f32 %v1726_v36, %v19650_v30  ;;  %v19694_v43 = vmul.f32 %v1722_v41, %v19669_v37  ;;  %v1716_v52 = vrot.slane %v1524_v48, 4  ;;  %v19725_v53 = vmul.f32 %v1726_v36, %v19703_v45  ;;  %v19827_v17 = vpop.f32.mrf.mxu0 }
 0x148   : > { %17005 = vmatpush3.xpose.msk.msra.mxu0 %vm1429_vm1, %v19662_v35  ;;  %v19730_v55 = vmul.f32 %v1723_v38, %v19719_v51  ;;  %v19735_v56 = vmul.f32 %v1524_v48, %v19643_v24  ;;  %v19741_v58 = vmul.f32 %v1722_v41, %v19719_v51  ;;  %v1715_v60 = vrot.slane %v1519_v54, 4 }
 0x149   : > { %17006 = vmatprep.subr.mxu0 %v19282_v22  ;;  %v1729_v59 = vsel %vm1721_vm3, %v1716_v52, %v19640_v23  ;;  %v1754_v61 = vmul.f32 0.35355338, %v1509_v31  ;;  %v19756_v63 = vmul.f32 %v1519_v54, %v19643_v24  ;;  %v1725_v1 = vsel %vm1721_vm3, %v19640_v23, %v1716_v52  ;;  %v19839_v19 = vpop.f32.mrf.mxu0  ;;  %v19881_v31 = vld [vmem:[%s22954_s13] sm:$0xff] }
 0x14a   : > { %16990 = vmatpush3.xpose.msk.msra.mxu1 %vm1429_vm1, %v19677_v39  ;;  %v19753_v62 = vmul.f32 %v1729_v59, %v19650_v30  ;;  %v1728_v0 = vsel %vm1721_vm3, %v1715_v60, %v19640_v23  ;;  %v19778_v3 = vmul.f32 %v1725_v1, %v19669_v37  ;;  %v1724_v4 = vsel %vm1721_vm3, %v19640_v23, %v1715_v60 }
 0x14b   : > { %16991 = vmatprep.subr.mxu1 %v19282_v22  ;;  %v19774_v2 = vmul.f32 %v1728_v0, %v19650_v30  ;;  %v19788_v5 = vmul.f32 %v1724_v4, %v19669_v37  ;;  %v19792_v6 = vmul.f32 %v1524_v48, %v19686_v42  ;;  %v19800_v7 = vmul.f32 %v1519_v54, %v19686_v42  ;;  %v19849_v20 = vpop.f32.mrf.mxu0 }
 0x14c   : > { %17007 = vmatpush3.xpose.msk.msra.mxu0 %vm1429_vm1, %v19681_v40  ;;  %v19804_v8 = vmul.f32 %v1729_v59, %v19703_v45  ;;  %v19812_v9 = vmul.f32 %v1728_v0, %v19703_v45  ;;  %v19816_v13 = vmul.f32 %v1725_v1, %v19719_v51  ;;  %v1757_v14 = vmul.f32 0.35355338, %v1524_v48 }
 0x14d   : > { %17008 = vmatprep.subr.mxu0 %v19282_v22  ;;  %v19824_v16 = vmul.f32 %v1724_v4, %v19719_v51  ;;  %v1756_v18 = vmul.f32 0.35355338, %v1519_v54  ;;  %v19859_v21 = vpop.f32.mrf.mxu0 }
 0x14e   : > { %16992 = vmatpush3.xpose.msk.msra.mxu1 %vm1429_vm1, %v19694_v43 }
 0x14f   : > { %16993 = vmatprep.subr.mxu1 %v19282_v22  ;;  %v19867_v23 = vpop.f32.mrf.mxu0 }
 0x150   : > { %17009 = vmatpush3.xpose.msk.msra.mxu0 %vm1429_vm1, %v19698_v44 }
 0x151   : > { %17010 = vmatprep.subr.mxu0 %v19282_v22  ;;  %v19870_v25 = vpop.f32.mrf.mxu0 }
 0x152   : > { %16994 = vmatpush3.xpose.msk.msra.mxu1 %vm1429_vm1, %v19709_v47 }
 0x153   : > { %16995 = vmatprep.subr.mxu1 %v19282_v22  ;;  %v16986_v27 = vpop.f32.mrf.mxu0 }
 0x154   : > { %17011 = vmatpush3.xpose.msk.msra.mxu0 %vm1429_vm1, %v19714_v49  ;;  %v19876_v28 = vadd.f32 %v16986_v27, %v19873_v26 }
 0x155   : > { %17012 = vmatprep.subr.mxu0 %v19282_v22 }
 0x156   : > { %16996 = vmatpush3.xpose.msk.msra.mxu1 %vm1429_vm1, %v19725_v53 }
 0x157   : > { %16997 = vmatprep.subr.mxu1 %v19282_v22 }
 0x158   : > { %17013 = vmatpush3.xpose.msk.msra.mxu0 %vm1429_vm1, %v19730_v55 }
 0x159   : > { %17032 = vmatprep.subr.mxu0 %v19282_v22 }
 0x15a   : > { %16998 = vmatpush3.xpose.msk.msra.mxu1 %vm1429_vm1, %v19741_v58 }
 0x15b   : > { %17015 = vmatmul.mubr.msk.f32.vlgmr.msra.gmra.mxu0 %vm1429_vm1, %v1755_v57  ;;  %17017 = vmatprep.subr.mxu1 %v19282_v22 }
 0x15c   : > { %17033 = vmatpush3.xpose.msk.msra.mxu0 %vm1429_vm1, %v19735_v56  ;;  %17044 = vmatprep.mubr.msk.f32.mxu0 %vm19283_vm2, %v19282_v22 }
 0x15d   : > { %17034 = vmatprep.subr.mxu0 %v19282_v22  ;;  %17000 = vmatmul.mubr.msk.f32.vlgmr.msra.gmra.mxu1 %vm1429_vm1, %v1754_v61 }
 0x15e   : > { %17018 = vmatpush3.xpose.msk.msra.mxu1 %vm1429_vm1, %v19756_v63  ;;  %17029 = vmatprep.mubr.msk.f32.mxu1 %vm19283_vm2, %v19282_v22 }
 0x15f   : > { %17019 = vmatprep.subr.mxu1 %v19282_v22 }
 0x160   : > { %17035 = vmatpush3.xpose.msk.msra.mxu0 %vm1429_vm1, %v19753_v62 }
 0x161   : > { %17036 = vmatprep.subr.mxu0 %v19282_v22 }
 0x162   : > { %17020 = vmatpush3.xpose.msk.msra.mxu1 %vm1429_vm1, %v19774_v2 }
 0x163   : > { %17021 = vmatprep.subr.mxu1 %v19282_v22 }
 0x164   : > { %17037 = vmatpush3.xpose.msk.msra.mxu0 %vm1429_vm1, %v19778_v3 }
 0x165   : > { %17038 = vmatprep.subr.mxu0 %v19282_v22 }
 0x166   : > { %17022 = vmatpush3.xpose.msk.msra.mxu1 %vm1429_vm1, %v19788_v5 }
 0x167   : > { %17023 = vmatprep.subr.mxu1 %v19282_v22 }
 0x168   : > { %17039 = vmatpush3.xpose.msk.msra.mxu0 %vm1429_vm1, %v19792_v6 }
 0x169   : > { %17040 = vmatprep.subr.mxu0 %v19282_v22 }
 0x16a   : > { %17024 = vmatpush3.xpose.msk.msra.mxu1 %vm1429_vm1, %v19800_v7 }
 0x16b   : > { %17025 = vmatprep.subr.mxu1 %v19282_v22 }
 0x16c   : > { %17041 = vmatpush3.xpose.msk.msra.mxu0 %vm1429_vm1, %v19804_v8 }
 0x16d   : > { %17042 = vmatprep.subr.mxu0 %v19282_v22 }
 0x16e   : > { %17026 = vmatpush3.xpose.msk.msra.mxu1 %vm1429_vm1, %v19812_v9 }
 0x16f   : > { %17027 = vmatprep.subr.mxu1 %v19282_v22 }
 0x170   : > { %17043 = vmatpush3.xpose.msk.msra.mxu0 %vm1429_vm1, %v19816_v13 }
 0x171   : > { %17062 = vmatprep.subr.mxu0 %v19282_v22 }
 0x172   : > { %17028 = vmatpush3.xpose.msk.msra.mxu1 %vm1429_vm1, %v19824_v16 }
 0x173   : > { %17045 = vmatmul.mubr.msk.f32.vlgmr.msra.gmra.mxu0 %vm1429_vm1, %v1757_v14  ;;  %17047 = vmatprep.subr.mxu1 %v19282_v22 }
 0x174   : > { %17063 = vmatpush3.msra.mxu0 %v19647_v29  ;;  %17074 = vmatprep.mubr.msk.f32.mxu0 %vm19283_vm2, %v19282_v22  ;;  %v19878_v29 = vpop.f32.mrf.mxu0 }
 0x175   : > { %17064 = vmatprep.subr.mxu0 %v19282_v22  ;;  %17030 = vmatmul.mubr.msk.f32.vlgmr.msra.gmra.mxu1 %vm1429_vm1, %v1756_v18 }
 0x176   : > { %17065 = vmatpush3.msra.mxu0 %v19662_v35  ;;  %17048 = vmatpush3.msra.mxu1 %v19658_v34 }
 0x177   : > { %17066 = vmatprep.subr.mxu0 %v19282_v22  ;;  %17049 = vmatprep.subr.mxu1 %v19282_v22 }
 0x178   : > { %17067 = vmatpush3.msra.mxu0 %v19681_v40  ;;  %17050 = vmatpush3.msra.mxu1 %v19677_v39 }
 0x179   : > { %17068 = vmatprep.subr.mxu0 %v19282_v22  ;;  %17051 = vmatprep.subr.mxu1 %v19282_v22 }
 0x17a   : > { %17069 = vmatpush3.msra.mxu0 %v19698_v44  ;;  %17052 = vmatpush3.msra.mxu1 %v19694_v43 }
 0x17b   : > { %17070 = vmatprep.subr.mxu0 %v19282_v22  ;;  %17053 = vmatprep.subr.mxu1 %v19282_v22 }
 0x17c   : > { %17071 = vmatpush3.msra.mxu0 %v19714_v49  ;;  %17054 = vmatpush3.msra.mxu1 %v19709_v47 }
 0x17d   : > { %17072 = vmatprep.subr.mxu0 %v19282_v22  ;;  %17055 = vmatprep.subr.mxu1 %v19282_v22 }
 0x17e   : > { %17073 = vmatpush3.msra.mxu0 %v19730_v55  ;;  %17056 = vmatpush3.msra.mxu1 %v19725_v53 }
 0x17f   : > { %17092 = vmatprep.subr.mxu0 %v19282_v22  ;;  %17057 = vmatprep.subr.mxu1 %v19282_v22 }
 0x180   : > { %17059 = vmatprep.mubr.msk.f32.mxu1 %vm19283_vm2, %v19282_v22  ;;  %17058 = vmatpush3.msra.mxu1 %v19741_v58 }
 0x181   : > { %17077 = vmatprep.subr.mxu1 %v19282_v22 }
 0x21b   : > { %v1936_v32 = vpop.f32.mrf.mxu0 }
 0x21c   : > { %v1937_v33 = vadd.f32 %v1936_v32, %v19881_v31 }
 0x21d   : > { %v17016_v34 = vpop.f32.mrf.mxu0  ;;  %v1845_v35 = vpop.f32.mrf.mxu1 }
 0x21e   : > { %v2126_v36 = vsel %vm2122_vm4, %v1937_v33, -inf  ;;  %v1846_v38 = vadd.f32 %v1845_v35, %v19881_v31 }
 0x21f   : > { %2127 = vmax.xlane.f32.xlu0 %v2126_v36  ;;  %v17001_v39 = vpop.f32.mrf.mxu1 }
 0x220   : > { %v2123_v40 = vsel %vm2122_vm4, %v1846_v38, -inf }
 0x221   : > { %2124 = vmax.xlane.f32.xlu1 %v2123_v40 }
 0x233   : > { %v2118_v41 = vpop.f32.mrf.mxu0 }
 0x234   : > { %v2119_v43 = vadd.f32 %v2118_v41, %v19881_v31 }
 0x235   : > { %v17046_v44 = vpop.f32.mrf.mxu0  ;;  %v2027_v46 = vpop.f32.mrf.mxu1 }
 0x236   : > { %v2132_v47 = vsel %vm2122_vm4, %v2119_v43, -inf  ;;  %v2028_v48 = vadd.f32 %v2027_v46, %v19881_v31 }
 0x237   : > { %2133 = vmax.xlane.f32.xlu0 %v2132_v47  ;;  %v17031_v49 = vpop.f32.mrf.mxu1 }
 0x238   : > { %v2129_v50 = vsel %vm2122_vm4, %v2028_v48, -inf }
 0x239   : > { %2130 = vmax.xlane.f32.xlu1 %v2129_v50 }
 0x2a8   : > { %v2128_v52 = vpop.xlane.xlu0 %2127 }
 0x2a9   : > { %v2136_v53 = vsub.f32 %v1937_v33, %v2128_v52 }
 0x2aa   : > { %v2125_v55 = vpop.xlane.xlu1 %2124 }
 0x2ab   : > { %v2141_v54 = vmul.f32 1.442695, %v2136_v53  ;;  %v2135_v57 = vsub.f32 %v1846_v38, %v2125_v55 }
 0x2ad   : > { %18852 = vpow2.f32 %v2141_v54  ;;  %v2139_v58 = vmul.f32 1.442695, %v2135_v57 }
 0x2af   : > { %18854 = vpow2.f32 %v2139_v58 }
 0x2ba   : > { %v19891_v59 = vpop.eup %18852 }
 0x2bb   : > { %17075 = vmatmul.mubr.msk.f32.vlgmr.msra.gmra.mxu0 %vm2122_vm4, %v19891_v59 }
 0x2bc   : > { %17093 = vmatpush3.msra.mxu0 %v19735_v56  ;;  %17104 = vmatprep.mubr.msk.f32.mxu0 %vm19283_vm2, %v19282_v22  ;;  %v18855_v60 = vpop.eup %18854 }
 0x2bd   : > { %17094 = vmatprep.subr.mxu0 %v19282_v22  ;;  %17060 = vmatmul.mubr.msk.f32.vlgmr.msra.gmra.mxu1 %vm2122_vm4, %v18855_v60 }
 0x2be   : > { %17095 = vmatpush3.msra.mxu0 %v19753_v62  ;;  %17078 = vmatpush3.msra.mxu1 %v19756_v63 }
 0x2bf   : > { %17096 = vmatprep.subr.mxu0 %v19282_v22  ;;  %17079 = vmatprep.subr.mxu1 %v19282_v22 }
 0x2c0   : > { %17097 = vmatpush3.msra.mxu0 %v19778_v3  ;;  %v2134_v61 = vpop.xlane.xlu0 %2133  ;;  %17080 = vmatpush3.msra.mxu1 %v19774_v2  ;;  %v19920_v2 = vld [vmem:[%s22953_s14 + $0x1] ss:$0 sm:$0xff]  ;;  %s19284_s14 = smov [#allocation2]  }
 0x2c1   : > { %17098 = vmatprep.subr.mxu0 %v19282_v22  ;;  %v2138_v56 = vsub.f32 %v2119_v43, %v2134_v61  ;;  %17081 = vmatprep.subr.mxu1 %v19282_v22  ;;  %v1600_v3 = vadd.f32 %v19920_v2, %v19839_v19  ;;  %v19955_v14 = vadd.f32 %v19827_v17, %v19920_v2 }
 0x2c2   : > { %17099 = vmatpush3.msra.mxu0 %v19792_v6  ;;  %17082 = vmatpush3.msra.mxu1 %v19788_v5  ;;  %v2131_v63 = vpop.xlane.xlu1 %2130  ;;  %v1610_v33 = vadd.f32 %v19920_v2, %v19859_v21 }
 0x2c3   : > { %v2145_v62 = vmul.f32 1.442695, %v2138_v56  ;;  %17100 = vmatprep.subr.mxu0 %v19282_v22  ;;  %17083 = vmatprep.subr.mxu1 %v19282_v22  ;;  %v2137_v0 = vsub.f32 %v2028_v48, %v2131_v63  ;;  %v2540_v4 = vrot.slane %v1600_v3, 4  ;;  %v19930_v6 = vmul.f32 %v1600_v3, %v19643_v24 }
 0x2c4   : > { %17101 = vmatpush3.msra.mxu0 %v19804_v8  ;;  %17084 = vmatpush3.msra.mxu1 %v19800_v7  ;;  %v2541_v18 = vrot.slane %v19955_v14, 4  ;;  %v19969_v17 = vmul.f32 %v1600_v3, %v19686_v42  ;;  %v19978_v19 = vmul.f32 %v19955_v14, %v19643_v24  ;;  %v2542_v36 = vrot.slane %v1610_v33, 4 }
 0x2c5   : > { %18856 = vpow2.f32 %v2145_v62  ;;  %17102 = vmatprep.subr.mxu0 %v19282_v22  ;;  %v2143_v1 = vmul.f32 1.442695, %v2137_v0  ;;  %17085 = vmatprep.subr.mxu1 %v19282_v22  ;;  %v2552_v7 = vsel %vm1721_vm3, %v2540_v4, %v19920_v2  ;;  %v2580_v38 = vmul.f32 0.35355338, %v1600_v3 }
 0x2c6   : > { %17103 = vmatpush3.msra.mxu0 %v19816_v13  ;;  %17086 = vmatpush3.msra.mxu1 %v19812_v9  ;;  %v19942_v9 = vmul.f32 %v2552_v7, %v19650_v30  ;;  %v2548_v13 = vsel %vm1721_vm3, %v19920_v2, %v2540_v4  ;;  %v19986_v27 = vmul.f32 %v2552_v7, %v19703_v45  ;;  %v2582_v61 = vmul.f32 0.35355338, %v1610_v33 }
 0x2c7   : > { %17125 = vmatprep.subr.mxu0 %v19282_v22  ;;  %18858 = vpow2.f32 %v2143_v1  ;;  %17087 = vmatprep.subr.mxu1 %v19282_v22  ;;  %v2553_v32 = vsel %vm1721_vm3, %v2541_v18, %v19920_v2  ;;  %v20004_v35 = vmul.f32 %v2548_v13, %v19719_v51  ;;  %v2549_v21 = vsel %vm1721_vm3, %v19920_v2, %v2541_v18 }
 0x2c8   : > { %17089 = vmatprep.mubr.msk.f32.mxu1 %vm19283_vm2, %v19282_v22  ;;  %17088 = vmatpush3.msra.mxu1 %v19824_v16  ;;  %v19959_v16 = vmul.f32 %v2548_v13, %v19669_v37  ;;  %v19999_v34 = vmul.f32 %v2553_v32, %v19650_v30  ;;  %v20016_v39 = vmul.f32 %v2549_v21, %v19669_v37 }
 0x2c9   : > { %17107 = vmatprep.subr.mxu1 %v19643_v24  ;;  %v20020_v40 = vmul.f32 %v1610_v33, %v19643_v24  ;;  %v2554_v41 = vsel %vm1721_vm3, %v2542_v36, %v19920_v2  ;;  %v20032_v43 = vmul.f32 %v19955_v14, %v19686_v42  ;;  %v2550_v46 = vsel %vm1721_vm3, %v19920_v2, %v2542_v36 }
 0x2ca   : > { %v20038_v44 = vmul.f32 %v2554_v41, %v19650_v30  ;;  %v20048_v47 = vmul.f32 %v2553_v32, %v19703_v45  ;;  %v1615_v48 = vadd.f32 %v19849_v20, %v19920_v2  ;;  %v20054_v49 = vmul.f32 %v2550_v46, %v19669_v37 }
 0x2cb   : > { %v20062_v50 = vmul.f32 %v2549_v21, %v19719_v51  ;;  %v20066_v53 = vmul.f32 %v1610_v33, %v19686_v42  ;;  %v2581_v20 = vmul.f32 0.35355338, %v19955_v14  ;;  %v20080_v55 = vmul.f32 %v2554_v41, %v19703_v45 }
 0x2cc   : > { %v2543_v52 = vrot.slane %v1615_v48, 4  ;;  %v20075_v54 = vmul.f32 %v1615_v48, %v19643_v24  ;;  %v20115_v62 = vmul.f32 %v1615_v48, %v19686_v42  ;;  %v2583_v1 = vmul.f32 0.35355338, %v1615_v48 }
 0x2ce   : > { %v2555_v57 = vsel %vm1721_vm3, %v2543_v52, %v19920_v2 }
 0x2cf   : > { %v20092_v58 = vmul.f32 %v2555_v57, %v19650_v30  ;;  %v20128_v63 = vmul.f32 %v2555_v57, %v19703_v45 }
 0x2d2   : > { %v18857_v5 = vpop.eup %18856 }
 0x2d3   : > { %17105 = vmatmul.mubr.msk.f32.vlgmr.msra.gmra.mxu0 %vm2122_vm4, %v18857_v5 }
 0x2d4   : > { %17126 = vmatpush3.xpose.msk.msra.mxu0 %vm1429_vm1, %v19930_v6  ;;  %17137 = vmatprep.mubr.msk.f32.mxu0 %vm19283_vm2, %v19282_v22  ;;  %v18859_v8 = vpop.eup %18858 }
 0x2d5   : > { %17127 = vmatprep.subr.mxu0 %v19282_v22  ;;  %17090 = vmatmul.mubr.msk.f32.vlgmr.msra.gmra.mxu1 %vm2122_vm4, %v18859_v8 }
 0x2d6   : > { %17108 = vmatpush3.msra.mxu1 %v19643_v24  ;;  %17119 = vmatprep.mubr.msk.f32.mxu1 %vm2122_vm4, %v18855_v60  ;;  %v2551_v60 = vsel %vm1721_vm3, %v19920_v2, %v2543_v52 }
 0x2d7   : > { %17109 = vmatprep.subr.mxu1 %v19650_v30  ;;  %v20106_v56 = vmul.f32 %v2551_v60, %v19669_v37  ;;  %v20138_v0 = vmul.f32 %v2551_v60, %v19719_v51 }
 0x2d8   : > { %17128 = vmatpush3.xpose.msk.msra.mxu0 %vm1429_vm1, %v19942_v9  ;;  %17110 = vmatpush3.msra.mxu1 %v19650_v30 }
 0x2d9   : > { %17129 = vmatprep.subr.mxu0 %v19282_v22  ;;  %17111 = vmatprep.subr.mxu1 %v19669_v37 }
 0x2da   : > { %17112 = vmatpush3.msra.mxu1 %v19669_v37 }
 0x2db   : > { %17113 = vmatprep.subr.mxu1 %v19686_v42 }
 0x2dc   : > { %17130 = vmatpush3.xpose.msk.msra.mxu0 %vm1429_vm1, %v19959_v16  ;;  %17114 = vmatpush3.msra.mxu1 %v19686_v42 }
 0x2dd   : > { %17131 = vmatprep.subr.mxu0 %v19282_v22  ;;  %17115 = vmatprep.subr.mxu1 %v19703_v45 }
 0x2de   : > { %17116 = vmatpush3.msra.mxu1 %v19703_v45 }
 0x2df   : > { %17117 = vmatprep.subr.mxu1 %v19719_v51 }
 0x2e0   : > { %17132 = vmatpush3.xpose.msk.msra.mxu0 %vm1429_vm1, %v19969_v17  ;;  %17118 = vmatpush3.msra.mxu1 %v19719_v51 }
 0x2e1   : > { %17133 = vmatprep.subr.mxu0 %v19282_v22  ;;  %17120 = vmatmul.mubr.msk.f32.vlgmr.msra.gmra.mxu1 %vm2122_vm4, %v19891_v59  ;;  %v20096_v59 = vmul.f32 %v2550_v46, %v19719_v51 }
 0x2e2   : > { %17140 = vmatprep.subr.mxu1 %v19282_v22  ;;  %17122 = vmatprep.mubr.msk.f32.mxu1 %vm2122_vm4, %v18859_v8 }
 0x2e3   : > { %17141 = vmatpush3.xpose.msk.msra.mxu1 %vm1429_vm1, %v19978_v19 }
 0x2e4   : > { %17134 = vmatpush3.xpose.msk.msra.mxu0 %vm1429_vm1, %v19986_v27  ;;  %17142 = vmatprep.subr.mxu1 %v19282_v22 }
 0x2e5   : > { %17135 = vmatprep.subr.mxu0 %v19282_v22  ;;  %17123 = vmatmul.mubr.msk.f32.gmra.mxu1 %vm2122_vm4, %v18857_v5 }
 0x2e6   : > { %17152 = vmatprep.mubr.msk.f32.mxu1 %vm19283_vm2, %v19282_v22 }
 0x2e7   : > { %17143 = vmatpush3.xpose.msk.msra.mxu1 %vm1429_vm1, %v19999_v34 }
 0x2e8   : > { %17136 = vmatpush3.xpose.msk.msra.mxu0 %vm1429_vm1, %v20004_v35  ;;  %17144 = vmatprep.subr.mxu1 %v19282_v22 }
 0x2e9   : > { %17155 = vmatprep.subr.mxu0 %v19282_v22 }
 0x2eb   : > { %17145 = vmatpush3.xpose.msk.msra.mxu1 %vm1429_vm1, %v20016_v39  ;;  %17138 = vmatmul.mubr.msk.f32.vlgmr.msra.gmra.mxu0 %vm1429_vm1, %v2580_v38 }
 0x2ec   : > { %17156 = vmatpush3.xpose.msk.msra.mxu0 %vm1429_vm1, %v20020_v40  ;;  %17146 = vmatprep.subr.mxu1 %v19282_v22 }
 0x2ed   : > { %17157 = vmatprep.subr.mxu0 %v19282_v22  ;;  %17167 = vmatprep.mubr.msk.f32.mxu0 %vm19283_vm2, %v19282_v22 }
 0x2ef   : > { %17147 = vmatpush3.xpose.msk.msra.mxu1 %vm1429_vm1, %v20032_v43 }
 0x2f0   : > { %17158 = vmatpush3.xpose.msk.msra.mxu0 %vm1429_vm1, %v20038_v44  ;;  %17148 = vmatprep.subr.mxu1 %v19282_v22 }
 0x2f1   : > { %17159 = vmatprep.subr.mxu0 %v19282_v22 }
 0x2f3   : > { %17149 = vmatpush3.xpose.msk.msra.mxu1 %vm1429_vm1, %v20048_v47 }
 0x2f4   : > { %17160 = vmatpush3.xpose.msk.msra.mxu0 %vm1429_vm1, %v20054_v49  ;;  %17150 = vmatprep.subr.mxu1 %v19282_v22 }
 0x2f5   : > { %17161 = vmatprep.subr.mxu0 %v19282_v22 }
 0x2f7   : > { %17151 = vmatpush3.xpose.msk.msra.mxu1 %vm1429_vm1, %v20062_v50 }
 0x2f8   : > { %17162 = vmatpush3.xpose.msk.msra.mxu0 %vm1429_vm1, %v20066_v53  ;;  %17170 = vmatprep.subr.mxu1 %v19282_v22 }
 0x2f9   : > { %17163 = vmatprep.subr.mxu0 %v19282_v22 }
 0x2fa   : > { %17153 = vmatmul.mubr.msk.f32.vlgmr.msra.gmra.mxu1 %vm1429_vm1, %v2581_v20 }
 0x2fb   : > { %17171 = vmatpush3.xpose.msk.msra.mxu1 %vm1429_vm1, %v20075_v54  ;;  %17182 = vmatprep.mubr.msk.f32.mxu1 %vm19283_vm2, %v19282_v22 }
 0x2fc   : > { %17164 = vmatpush3.xpose.msk.msra.mxu0 %vm1429_vm1, %v20080_v55  ;;  %17172 = vmatprep.subr.mxu1 %v19282_v22 }
 0x2fd   : > { %17165 = vmatprep.subr.mxu0 %v19282_v22 }
 0x2ff   : > { %17173 = vmatpush3.xpose.msk.msra.mxu1 %vm1429_vm1, %v20092_v58 }
 0x300   : > { %17166 = vmatpush3.xpose.msk.msra.mxu0 %vm1429_vm1, %v20096_v59  ;;  %17174 = vmatprep.subr.mxu1 %v19282_v22 }
 0x301   : > { %17185 = vmatprep.subr.mxu0 %v19282_v22 }
 0x303   : > { %17175 = vmatpush3.xpose.msk.msra.mxu1 %vm1429_vm1, %v20106_v56  ;;  %17168 = vmatmul.mubr.msk.f32.vlgmr.msra.gmra.mxu0 %vm1429_vm1, %v2582_v61 }
 0x304   : > { %17186 = vmatpush3.msra.mxu0 %v19930_v6  ;;  %17176 = vmatprep.subr.mxu1 %v19282_v22 }
 0x305   : > { %17187 = vmatprep.subr.mxu0 %v19282_v22  ;;  %17197 = vmatprep.mubr.msk.f32.mxu0 %vm19283_vm2, %v19282_v22 }
 0x306   : > { %17188 = vmatpush3.msra.mxu0 %v19942_v9 }
 0x307   : > { %17177 = vmatpush3.xpose.msk.msra.mxu1 %vm1429_vm1, %v20115_v62  ;;  %17189 = vmatprep.subr.mxu0 %v19282_v22 }
 0x308   : > { %17190 = vmatpush3.msra.mxu0 %v19959_v16  ;;  %17178 = vmatprep.subr.mxu1 %v19282_v22 }
 0x309   : > { %17191 = vmatprep.subr.mxu0 %v19282_v22 }
 0x30a   : > { %17192 = vmatpush3.msra.mxu0 %v19969_v17 }
 0x30b   : > { %17179 = vmatpush3.xpose.msk.msra.mxu1 %vm1429_vm1, %v20128_v63  ;;  %17193 = vmatprep.subr.mxu0 %v19282_v22 }
 0x30c   : > { %17194 = vmatpush3.msra.mxu0 %v19986_v27  ;;  %17180 = vmatprep.subr.mxu1 %v19282_v22 }
 0x30d   : > { %17195 = vmatprep.subr.mxu0 %v19282_v22 }
 0x30e   : > { %17196 = vmatpush3.msra.mxu0 %v20004_v35 }
 0x30f   : > { %17181 = vmatpush3.xpose.msk.msra.mxu1 %vm1429_vm1, %v20138_v0  ;;  %17215 = vmatprep.subr.mxu0 %v19282_v22 }
 0x310   : > { %17200 = vmatprep.subr.mxu1 %v19282_v22 }
 0x312   : > { %17183 = vmatmul.mubr.msk.f32.vlgmr.msra.gmra.mxu1 %vm1429_vm1, %v2583_v1 }
 0x313   : > { %17201 = vmatpush3.msra.mxu1 %v19978_v19  ;;  %17212 = vmatprep.mubr.msk.f32.mxu1 %vm19283_vm2, %v19282_v22 }
 0x314   : > { %17202 = vmatprep.subr.mxu1 %v19282_v22 }
 0x315   : > { %17203 = vmatpush3.msra.mxu1 %v19999_v34 }
 0x316   : > { %17204 = vmatprep.subr.mxu1 %v19282_v22 }
 0x317   : > { %17205 = vmatpush3.msra.mxu1 %v20016_v39 }
 0x318   : > { %17206 = vmatprep.subr.mxu1 %v19282_v22 }
 0x319   : > { %17207 = vmatpush3.msra.mxu1 %v20032_v43 }
 0x31a   : > { %17208 = vmatprep.subr.mxu1 %v19282_v22 }
 0x31b   : > { %17209 = vmatpush3.msra.mxu1 %v20048_v47 }
 0x31c   : > { %17210 = vmatprep.subr.mxu1 %v19282_v22 }
 0x31d   : > { %17211 = vmatpush3.msra.mxu1 %v20062_v50 }
 0x31e   : > { %17230 = vmatprep.subr.mxu1 %v19282_v22 }
 0x37b   : > { %v2289_v2 = vpop.f32.mrf.mxu0 }
 0x37d   : > { %v17076_v3 = vpop.f32.mrf.mxu0  ;;  %v20160_v4 = vpop.f32.mrf.mxu1 }
 0x37f   : > { %v17061_v5 = vpop.f32.mrf.mxu1 }
 0x393   : > { %v2435_v6 = vpop.f32.mrf.mxu0 }
 0x395   : > { %v17106_v7 = vpop.f32.mrf.mxu0  ;;  %v20162_v8 = vpop.f32.mrf.mxu1 }
 0x397   : > { %v17091_v9 = vpop.f32.mrf.mxu1 }
 0x3a1   : > { %v17121_v13 = vpop.f32.mrf.mxu1 }
 0x3a2   : > { %v2525_v14 = vmax.f32 %v17121_v13, 1e-20 }
 0x3a3   : > { %v20164_v16 = vpop.f32.mrf.mxu1 }
 0x3a4   : > { %18860 = vrcp.f32 %v2525_v14 }
 0x3a5   : > { %v17124_v18 = vpop.f32.mrf.mxu1 }
 0x3a6   : > { %v2527_v17 = vmax.f32 %v17124_v18, 1e-20 }
 0x3a7   : > { %v20172_v38 = vpop.f32.mrf.mxu1 }
 0x3a8   : > { %18862 = vrcp.f32 %v2527_v17 }
 0x3ab   : > { %v2671_v19 = vpop.f32.mrf.mxu0 }
 0x3ac   : > { %v2672_v27 = vadd.f32 %v2671_v19, %v19881_v31 }
 0x3ad   : > { %v17139_v32 = vpop.f32.mrf.mxu0 }
 0x3ae   : > { %v2948_v33 = vsel %vm2122_vm4, %v2672_v27, -inf }
 0x3af   : > { %2949 = vmax.xlane.f32.xlu0 %v2948_v33 }
 0x3b1   : > { %v18861_v34 = vpop.eup %18860 }
 0x3b2   : > { %v20168_v35 = vmul.f32 %v18861_v34, %v2289_v2 }
 0x3b5   : > { %v18863_v21 = vpop.eup %18862 }
 0x3b6   : > { %v20170_v36 = vmul.f32 %v18863_v21, %v2435_v6 }
 0x3ba   : > { %v2762_v39 = vpop.f32.mrf.mxu1 }
 0x3bb   : > { %v2763_v41 = vadd.f32 %v2762_v39, %v19881_v31  ;;  %v20234_v39 = vld [vmem:[%s22952_s17 + $0x18] sm:$0xff] }
 0x3bc   : > { %v17154_v43 = vpop.f32.mrf.mxu1 }
 0x3bd   : > { %v2951_v46 = vsel %vm2122_vm4, %v2763_v41, -inf }
 0x3be   : > { %2952 = vmax.xlane.f32.xlu0 %v2951_v46 }
 0x3c3   : > { %v2853_v47 = vpop.f32.mrf.mxu0 }
 0x3c4   : > { %v2854_v48 = vadd.f32 %v2853_v47, %v19881_v31 }
 0x3c5   : > { %v17169_v50 = vpop.f32.mrf.mxu0 }
 0x3c6   : > { %v2954_v52 = vsel %vm2122_vm4, %v2854_v48, -inf  ;;  %v20250_v50 = vld [vmem:[%s22952_s17 + $0x8] sm:$0xff] }
 0x3c7   : > { %2955 = vmax.xlane.f32.xlu1 %v2954_v52 }
 0x3d2   : > { %v2944_v20 = vpop.f32.mrf.mxu1 }
 0x3d3   : > { %v2945_v57 = vadd.f32 %v2944_v20, %v19881_v31 }
 0x3d4   : > { %v17184_v60 = vpop.f32.mrf.mxu1 }
 0x3d5   : > { %v2957_v61 = vsel %vm2122_vm4, %v2945_v57, -inf }
 0x3d6   : > { %2958 = vmax.xlane.f32.xlu1 %v2957_v61 }
 0x438   : > { %v2950_v1 = vpop.xlane.xlu0 %2949 }
 0x439   : > { %v2960_v2 = vsub.f32 %v2672_v27, %v2950_v1  ;;  %v2524_v27 = vmax.f32 %v20164_v16, 1e-20  ;;  %v20241_v16 = vld [vmem:[%s22952_s17 + $0x10] sm:$0xff] }
 0x43b   : > { %v2964_v3 = vmul.f32 1.442695, %v2960_v2  ;;  %v20260_v2 = vld [vmem:[%s22952_s17] sm:$0xff] }
 0x43d   : > { %18864 = vpow2.f32 %v2964_v3 }
 0x447   : > { %v2953_v5 = vpop.xlane.xlu0 %2952 }
 0x448   : > { %v2961_v6 = vsub.f32 %v2763_v41, %v2953_v5 }
 0x44a   : > { %v18865_v7 = vpop.eup %18864  ;;  %v2966_v9 = vmul.f32 1.442695, %v2961_v6 }
 0x44b   : > { %17198 = vmatmul.mubr.msk.f32.vlgmr.msra.gmra.mxu0 %vm2122_vm4, %v18865_v7 }
 0x44c   : > { %18866 = vpow2.f32 %v2966_v9  ;;  %17216 = vmatpush3.msra.mxu0 %v20020_v40  ;;  %17227 = vmatprep.mubr.msk.f32.mxu0 %vm19283_vm2, %v19282_v22  ;;  %v3394_v9 = vmul.f32 0.35355338, %v20168_v35 }
 0x44d   : > { %17217 = vmatprep.subr.mxu0 %v19282_v22 }
 0x44e   : > { %17218 = vmatpush3.msra.mxu0 %v20038_v44 }
 0x44f   : > { %17219 = vmatprep.subr.mxu0 %v19282_v22 }
 0x450   : > { %17220 = vmatpush3.msra.mxu0 %v20054_v49  ;;  %v2956_v31 = vpop.xlane.xlu1 %2955 }
 0x451   : > { %17221 = vmatprep.subr.mxu0 %v19282_v22  ;;  %v2962_v13 = vsub.f32 %v2854_v48, %v2956_v31 }
 0x452   : > { %17222 = vmatpush3.msra.mxu0 %v20066_v53 }
 0x453   : > { %v2968_v14 = vmul.f32 1.442695, %v2962_v13  ;;  %17223 = vmatprep.subr.mxu0 %v19282_v22 }
 0x454   : > { %17224 = vmatpush3.msra.mxu0 %v20080_v55 }
 0x455   : > { %18868 = vpow2.f32 %v2968_v14  ;;  %17225 = vmatprep.subr.mxu0 %v19282_v22 }
 0x456   : > { %17226 = vmatpush3.msra.mxu0 %v20096_v59 }
 0x457   : > { %17245 = vmatprep.subr.mxu0 %v19643_v24 }
 0x459   : > { %v18867_v40 = vpop.eup %18866 }
 0x45a   : > { %17213 = vmatmul.mubr.msk.f32.vlgmr.msra.gmra.mxu1 %vm2122_vm4, %v18867_v40 }
 0x45b   : > { %17231 = vmatpush3.msra.mxu1 %v20075_v54  ;;  %17242 = vmatprep.mubr.msk.f32.mxu1 %vm19283_vm2, %v19282_v22 }
 0x45c   : > { %17232 = vmatprep.subr.mxu1 %v19282_v22 }
 0x45d   : > { %17233 = vmatpush3.msra.mxu1 %v20092_v58 }
 0x45e   : > { %17234 = vmatprep.subr.mxu1 %v19282_v22 }
 0x45f   : > { %17235 = vmatpush3.msra.mxu1 %v20106_v56  ;;  %v2959_v44 = vpop.xlane.xlu1 %2958 }
 0x460   : > { %17236 = vmatprep.subr.mxu1 %v19282_v22  ;;  %v2963_v49 = vsub.f32 %v2945_v57, %v2959_v44  ;;  %v2526_v57 = vmax.f32 %v20172_v38, 1e-20 }
 0x461   : > { %17237 = vmatpush3.msra.mxu1 %v20115_v62 }
 0x462   : > { %v18869_v53 = vpop.eup %18868  ;;  %v2970_v55 = vmul.f32 1.442695, %v2963_v49  ;;  %17238 = vmatprep.subr.mxu1 %v19282_v22 }
 0x463   : > { %17239 = vmatpush3.msra.mxu1 %v20128_v63  ;;  %17228 = vmatmul.mubr.msk.f32.vlgmr.msra.gmra.mxu0 %vm2122_vm4, %v18869_v53 }
 0x464   : > { %18870 = vpow2.f32 %v2970_v55  ;;  %17240 = vmatprep.subr.mxu1 %v19282_v22  ;;  %17246 = vmatpush3.msra.mxu0 %v19643_v24 }
 0x465   : > { %17241 = vmatpush3.msra.mxu1 %v20138_v0  ;;  %17247 = vmatprep.subr.mxu0 %v19650_v30 }
 0x466   : > { %17257 = vmatprep.mubr.msk.f32.mxu0 %vm2122_vm4, %v18865_v7  ;;  %17248 = vmatpush3.msra.mxu0 %v19650_v30 }
 0x467   : > { %17249 = vmatprep.subr.mxu0 %v19669_v37  ;;  %17263 = vmatprep.subr.mxu1 %v19282_v22 }
 0x468   : > { %17250 = vmatpush3.msra.mxu0 %v19669_v37 }
 0x469   : > { %17251 = vmatprep.subr.mxu0 %v19686_v42 }
 0x46a   : > { %17252 = vmatpush3.msra.mxu0 %v19686_v42 }
 0x46b   : > { %17253 = vmatprep.subr.mxu0 %v19703_v45 }
 0x46c   : > { %17254 = vmatpush3.msra.mxu0 %v19703_v45 }
 0x46d   : > { %17255 = vmatprep.subr.mxu0 %v19719_v51 }
 0x46e   : > { %17256 = vmatpush3.msra.mxu0 %v19719_v51 }
 0x46f   : > { %17258 = vmatmul.mubr.msk.f32.vlgmr.msra.gmra.mxu0 %vm2122_vm4, %v18867_v40  ;;  %17274 = vmatprep.subr.mxu0 %v19282_v22 }
 0x470   : > { %17260 = vmatprep.mubr.msk.f32.mxu0 %vm2122_vm4, %v18869_v53  ;;  %v1696_v53 = vadd.f32 %v19867_v23, %v19873_v26 }
 0x471   : > { %v18871_v24 = vpop.eup %18870 }
 0x472   : > { %17243 = vmatmul.mubr.msk.f32.vlgmr.msra.gmra.mxu1 %vm2122_vm4, %v18871_v24  ;;  %v3384_v23 = vmul.f32 %v1696_v53, %v20234_v39 }
 0x473   : > { %17261 = vmatmul.mubr.msk.f32.gmra.mxu0 %vm2122_vm4, %v18871_v24  ;;  %17271 = vmatprep.mubr.msk.f32.mxu1 %vm19283_vm2, %v19282_v22 }
 0x474   : > { %17282 = vmatprep.mubr.msk.f32.mxu0 %vm19283_vm2, %v19282_v22 }
 0x50b   : > { %v3041_v30 = vpop.f32.mrf.mxu0 }
 0x50d   : > { %v17199_v37 = vpop.f32.mrf.mxu0 }
 0x51a   : > { %v3114_v42 = vpop.f32.mrf.mxu1 }
 0x51c   : > { %v17214_v45 = vpop.f32.mrf.mxu1 }
 0x523   : > { %v3187_v51 = vpop.f32.mrf.mxu0 }
 0x525   : > { %v17229_v54 = vpop.f32.mrf.mxu0 }
 0x52f   : > { %v17259_v58 = vpop.f32.mrf.mxu0 }
 0x530   : > { %v3350_v59 = vmax.f32 %v17259_v58, 1e-20  ;;  %v3381_v58 = vmul.f32 %v1696_v53, %v20260_v2 }
 0x531   : > { %v3330_v56 = vpop.f32.mrf.mxu0 }
 0x532   : > { %18872 = vrcp.f32 %v3350_v59  ;;  %v3349_v62 = vmax.f32 %v3330_v56, 1e-20  ;;  %v3260_v63 = vpop.f32.mrf.mxu1 }
 0x533   : > { %v17262_v18 = vpop.f32.mrf.mxu0 }
 0x534   : > { %18874 = vrcp.f32 %v3349_v62  ;;  %v17244_v0 = vpop.f32.mrf.mxu1  ;;  %v3352_v19 = vmax.f32 %v17262_v18, 1e-20 }
 0x535   : > { %v3340_v17 = vpop.f32.mrf.mxu0 }
 0x536   : > { %v3351_v32 = vmax.f32 %v3340_v17, 1e-20  ;;  %18876 = vrcp.f32 %v3352_v19 }
 0x537   : > { %18878 = vrcp.f32 %v2524_v27 }
 0x538   : > { %18880 = vrcp.f32 %v3351_v32 }
 0x539   : > { %18882 = vrcp.f32 %v2526_v57 }
 0x53f   : > { %v18873_v33 = vpop.eup %18872 }
 0x540   : > { %v3358_v34 = vmul.f32 %v18873_v33, %v3114_v42  ;;  %v3396_v42 = vmul.f32 0.35355338, %v20170_v36 }
 0x541   : > { %v18875_v21 = vpop.eup %18874 }
 0x542   : > { %v3357_v41 = vmul.f32 %v18875_v21, %v3041_v30  ;;  %v3368_v43 = vmul.f32 %v3358_v34, %v20234_v39  ;;  %v3367_v47 = vmul.f32 %v3358_v34, %v20241_v16  ;;  %v3366_v52 = vmul.f32 %v3358_v34, %v20250_v50 }
 0x543   : > { %v18877_v20 = vpop.eup %18876  ;;  %v3365_v5 = vmul.f32 %v3358_v34, %v20260_v2  ;;  %v1691_v30 = vadd.f32 %v19873_v26, %v19870_v25 }
 0x544   : > { %17275 = vmatpush3.xpose.msk.msra.mxu0 %vm1429_vm1, %v3368_v43  ;;  %v3364_v46 = vmul.f32 %v3357_v41, %v20234_v39  ;;  %v3363_v48 = vmul.f32 %v3357_v41, %v20241_v16  ;;  %v18879_v60 = vpop.eup %18878  ;;  %v3362_v61 = vmul.f32 %v3357_v41, %v20250_v50  ;;  %v3360_v3 = vmul.f32 %v18877_v20, %v3260_v63 }
 0x545   : > { %17276 = vmatprep.subr.mxu0 %v19282_v22  ;;  %v18881_v1 = vpop.eup %18880  ;;  %v2532_v38 = vmul.f32 %v18879_v60, %v20160_v4  ;;  %v3361_v7 = vmul.f32 %v3357_v41, %v20260_v2  ;;  %v3380_v25 = vmul.f32 %v1691_v30, %v20234_v39  ;;  %v3379_v36 = vmul.f32 %v1691_v30, %v20241_v16 }
 0x546   : > { %17264 = vmatpush3.xpose.msk.msra.mxu1 %vm1429_vm1, %v3364_v46  ;;  %v3359_v6 = vmul.f32 %v18881_v1, %v3187_v51  ;;  %v3376_v31 = vmul.f32 %v3360_v3, %v20234_v39  ;;  %v3375_v35 = vmul.f32 %v3360_v3, %v20241_v16  ;;  %v3374_v40 = vmul.f32 %v3360_v3, %v20250_v50  ;;  %v18883_v44 = vpop.eup %18882 }
 0x547   : > { %17265 = vmatprep.subr.mxu1 %v19282_v22  ;;  %v3393_v13 = vmul.f32 0.35355338, %v2532_v38  ;;  %v3373_v55 = vmul.f32 %v3360_v3, %v20260_v2  ;;  %v2534_v24 = vmul.f32 %v18883_v44, %v20162_v8  ;;  %v3383_v8 = vmul.f32 %v1696_v53, %v20241_v16 }
 0x548   : > { %17277 = vmatpush3.xpose.msk.msra.mxu0 %vm1429_vm1, %v3367_v47  ;;  %v3372_v4 = vmul.f32 %v3359_v6, %v20234_v39  ;;  %v3371_v14 = vmul.f32 %v3359_v6, %v20241_v16  ;;  %v3370_v49 = vmul.f32 %v3359_v6, %v20250_v50  ;;  %v3369_v37 = vmul.f32 %v3359_v6, %v20260_v2 }
 0x549   : > { %17278 = vmatprep.subr.mxu0 %v19282_v22  ;;  %v3395_v45 = vmul.f32 0.35355338, %v2534_v24  ;;  %v3382_v51 = vmul.f32 %v1696_v53, %v20250_v50  ;;  %v3378_v54 = vmul.f32 %v1691_v30, %v20250_v50  ;;  %v3377_v59 = vmul.f32 %v1691_v30, %v20260_v2 }
 0x54a   : > { %17266 = vmatpush3.xpose.msk.msra.mxu1 %vm1429_vm1, %v3363_v48  ;;  %v1701_v20 = vadd.f32 %v19873_v26, %v19878_v29 }
 0x54b   : > { %17267 = vmatprep.subr.mxu1 %v19282_v22 }
 0x54c   : > { %17279 = vmatpush3.xpose.msk.msra.mxu0 %vm1429_vm1, %v3366_v52  ;;  %v3388_v1 = vmul.f32 %v1701_v20, %v20234_v39  ;;  %v3387_v38 = vmul.f32 %v1701_v20, %v20241_v16  ;;  %v3386_v29 = vmul.f32 %v1701_v20, %v20250_v50 }
 0x54d   : > { %17280 = vmatprep.subr.mxu0 %v19282_v22 }
 0x54e   : > { %17268 = vmatpush3.xpose.msk.msra.mxu1 %vm1429_vm1, %v3362_v61 }
 0x54f   : > { %17269 = vmatprep.subr.mxu1 %v19282_v22 }
 0x550   : > { %17281 = vmatpush3.xpose.msk.msra.mxu0 %vm1429_vm1, %v3365_v5 }
 0x551   : > { %17296 = vmatprep.subr.mxu0 %v19282_v22 }
 0x552   : > { %17270 = vmatpush3.xpose.msk.msra.mxu1 %vm1429_vm1, %v3361_v7  ;;  %v3392_v7 = vmul.f32 %v19876_v28, %v20234_v39 }
 0x553   : > { %17283 = vmatmul.mubr.msk.f32.vlgmr.msra.gmra.mxu0 %vm1429_vm1, %v3394_v9  ;;  %17285 = vmatprep.subr.mxu1 %v19282_v22 }
 0x554   : > { %17297 = vmatpush3.xpose.msk.msra.mxu0 %vm1429_vm1, %v3376_v31  ;;  %17304 = vmatprep.mubr.msk.f32.mxu0 %vm19283_vm2, %v19282_v22  ;;  %v3385_v31 = vmul.f32 %v1701_v20, %v20260_v2 }
 0x555   : > { %17272 = vmatmul.mubr.msk.f32.vlgmr.msra.gmra.mxu1 %vm1429_vm1, %v3393_v13  ;;  %17298 = vmatprep.subr.mxu0 %v19282_v22  ;;  %v3391_v13 = vmul.f32 %v19876_v28, %v20241_v16 }
 0x556   : > { %17286 = vmatpush3.xpose.msk.msra.mxu1 %vm1429_vm1, %v3372_v4  ;;  %17293 = vmatprep.mubr.msk.f32.mxu1 %vm19283_vm2, %v19282_v22  ;;  %v3390_v4 = vmul.f32 %v19876_v28, %v20250_v50 }
 0x557   : > { %17287 = vmatprep.subr.mxu1 %v19282_v22 }
 0x558   : > { %17299 = vmatpush3.xpose.msk.msra.mxu0 %vm1429_vm1, %v3375_v35  ;;  %v3389_v35 = vmul.f32 %v19876_v28, %v20260_v2  ;;  %v1391_v28 = vld [vmem:[%s19320_s25] sm:$0xff] }
 0x559   : > { %17300 = vmatprep.subr.mxu0 %v19282_v22 }
 0x55a   : > { %17288 = vmatpush3.xpose.msk.msra.mxu1 %vm1429_vm1, %v3371_v14 }
 0x55b   : > { %17289 = vmatprep.subr.mxu1 %v19282_v22 }
 0x55c   : > { %17301 = vmatpush3.xpose.msk.msra.mxu0 %vm1429_vm1, %v3374_v40 }
 0x55d   : > { %17302 = vmatprep.subr.mxu0 %v19282_v22 }
 0x55e   : > { %17290 = vmatpush3.xpose.msk.msra.mxu1 %vm1429_vm1, %v3370_v49 }
 0x55f   : > { %17291 = vmatprep.subr.mxu1 %v19282_v22 }
 0x560   : > { %17303 = vmatpush3.xpose.msk.msra.mxu0 %vm1429_vm1, %v3373_v55 }
 0x561   : > { %17318 = vmatprep.subr.mxu0 %v19282_v22 }
 0x562   : > { %17292 = vmatpush3.xpose.msk.msra.mxu1 %vm1429_vm1, %v3369_v37 }
 0x563   : > { %17305 = vmatmul.mubr.msk.f32.vlgmr.msra.gmra.mxu0 %vm1429_vm1, %v3396_v42  ;;  %17307 = vmatprep.subr.mxu1 %v19282_v22 }
 0x564   : > { %17319 = vmatpush3.msra.mxu0 %v3384_v23  ;;  %17326 = vmatprep.mubr.msk.f32.mxu0 %vm19283_vm2, %v19282_v22 }
 0x565   : > { %17294 = vmatmul.mubr.msk.f32.vlgmr.msra.gmra.mxu1 %vm1429_vm1, %v3395_v45  ;;  %17320 = vmatprep.subr.mxu0 %v19282_v22 }
 0x566   : > { %17308 = vmatpush3.msra.mxu1 %v3380_v25  ;;  %17321 = vmatpush3.msra.mxu0 %v3383_v8 }
 0x567   : > { %17309 = vmatprep.subr.mxu1 %v19282_v22  ;;  %17322 = vmatprep.subr.mxu0 %v19282_v22 }
 0x568   : > { %17310 = vmatpush3.msra.mxu1 %v3379_v36  ;;  %17323 = vmatpush3.msra.mxu0 %v3382_v51 }
 0x569   : > { %17311 = vmatprep.subr.mxu1 %v19282_v22  ;;  %17324 = vmatprep.subr.mxu0 %v19282_v22 }
 0x56a   : > { %17312 = vmatpush3.msra.mxu1 %v3378_v54  ;;  %17325 = vmatpush3.msra.mxu0 %v3381_v58 }
 0x56b   : > { %17313 = vmatprep.subr.mxu1 %v19282_v22  ;;  %17315 = vmatprep.mubr.msk.f32.mxu1 %vm19283_vm2, %v19282_v22 }
 0x56c   : > { %17314 = vmatpush3.msra.mxu1 %v3377_v59  ;;  %17340 = vmatprep.subr.mxu0 %v19282_v22 }
 0x56d   : > { %17329 = vmatprep.subr.mxu1 %v19282_v22 }
 0x613   : > { %v3563_v56 = vpop.f32.mrf.mxu0 }
 0x614   : > { %v3740_v17 = vsel %vm1429_vm1, %v3563_v56, -inf }
 0x615   : > { %v3478_v62 = vpop.f32.mrf.mxu1  ;;  %v17284_v63 = vpop.f32.mrf.mxu0 }
 0x616   : > { %v3737_v0 = vsel %vm1429_vm1, %v3478_v62, -inf }
 0x617   : > { %3738 = vmax.xlane.f32.xlu0 %v3737_v0  ;;  %v17273_v18 = vpop.f32.mrf.mxu1 }
 0x61b   : > { %3741 = vmax.xlane.f32.xlu0 %v3740_v17  ;;  %v1392_v17 = vld [vmem:[%s19320_s25 + $0x8] sm:$0xff] }
 0x623   : > { %v3733_v19 = vpop.f32.mrf.mxu0 }
 0x624   : > { %v3746_v21 = vsel %vm1429_vm1, %v3733_v19, -inf }
 0x625   : > { %v3648_v27 = vpop.f32.mrf.mxu1  ;;  %v17306_v32 = vpop.f32.mrf.mxu0 }
 0x626   : > { %v3743_v33 = vsel %vm1429_vm1, %v3648_v27, -inf  ;;  %v15602_v32 = vld [vmem:[%s19345_s19 + $0x30] sm:$0xff] }
 0x627   : > { %3744 = vmax.xlane.f32.xlu1 %v3743_v33  ;;  %v17295_v34 = vpop.f32.mrf.mxu1  ;;  %v1394_v33 = vld [vmem:[%s19320_s25 + $0x18] sm:$0xff] }
 0x628   : > { %v4253_v34 = vld [vmem:[%s19345_s19 + $0x8] sm:$0xff] }
 0x62b   : > { %3747 = vmax.xlane.f32.xlu1 %v3746_v21  ;;  %v15601_v21 = vld [vmem:[%s19345_s19 + $0x28] sm:$0xff] }
 0x6a0   : > { %v3739_v41 = vpop.xlane.xlu0 %3738 }
 0x6a1   : > { %v3749_v43 = vsub.f32 %v3478_v62, %v3739_v41  ;;  %v4252_v41 = vld [vmem:[%s19345_s19] sm:$0xff] }
 0x6a3   : > { %v3753_v46 = vmul.f32 1.442695, %v3749_v43  ;;  %v15600_v43 = vld [vmem:[%s19345_s19 + $0x20] sm:$0xff] }
 0x6a4   : > { %v3742_v47 = vpop.xlane.xlu0 %3741 }
 0x6a5   : > { %18884 = vpow2.f32 %v3753_v46  ;;  %v3750_v48 = vsub.f32 %v3563_v56, %v3742_v47  ;;  %v15613_v46 = vld [vmem:[%s19345_s19 + $0x58] sm:$0xff] }
 0x6a7   : > { %v3755_v52 = vmul.f32 1.442695, %v3750_v48 }
 0x6a9   : > { %18886 = vpow2.f32 %v3755_v52  ;;  %v15612_v52 = vld [vmem:[%s19345_s19 + $0x50] sm:$0xff] }
 0x6b0   : > { %v3745_v57 = vpop.xlane.xlu1 %3744 }
 0x6b1   : > { %v3751_v60 = vsub.f32 %v3648_v27, %v3745_v57  ;;  %v1393_v27 = vld [vmem:[%s19320_s25 + $0x10] sm:$0xff]  ;;  %v15611_v57 = vld [vmem:[%s19345_s19 + $0x48] sm:$0xff] }
 0x6b2   : > { %v18885_v61 = vpop.eup %18884 }
 0x6b3   : > { %v3757_v3 = vmul.f32 1.442695, %v3751_v60  ;;  %17316 = vmatmul.mubr.msk.f32.vlgmr.msra.gmra.mxu1 %vm1429_vm1, %v18885_v61 }
 0x6b4   : > { %17330 = vmatpush3.msra.mxu1 %v3388_v1  ;;  %v3748_v5 = vpop.xlane.xlu1 %3747  ;;  %17337 = vmatprep.mubr.msk.f32.mxu1 %vm19283_vm2, %v19282_v22 }
 0x6b5   : > { %18888 = vpow2.f32 %v3757_v3  ;;  %17331 = vmatprep.subr.mxu1 %v19282_v22  ;;  %v3752_v6 = vsub.f32 %v3733_v19, %v3748_v5  ;;  %v15603_v19 = vld [vmem:[%s19345_s19 + $0x38] sm:$0xff] }
 0x6b6   : > { %v18887_v26 = vpop.eup %18886  ;;  %17332 = vmatpush3.msra.mxu1 %v3387_v38 }
 0x6b7   : > { %v3759_v9 = vmul.f32 1.442695, %v3752_v6  ;;  %17333 = vmatprep.subr.mxu1 %v19282_v22  ;;  %17327 = vmatmul.mubr.msk.f32.vlgmr.msra.gmra.mxu0 %vm1429_vm1, %v18887_v26  ;;  %v15605_v6 = vld [vmem:[%s19350_s24 + $0x1] ss:$0 sm:$0xff] }
 0x6b8   : > { %17334 = vmatpush3.msra.mxu1 %v3386_v29  ;;  %17341 = vmatpush3.msra.mxu0 %v3392_v7 }
 0x6b9   : > { %18890 = vpow2.f32 %v3759_v9  ;;  %17335 = vmatprep.subr.mxu1 %v19282_v22  ;;  %17342 = vmatprep.subr.mxu0 %v19282_v22  ;;  %v20416_v9 = vld [vmem:[%s19350_s24] ss:$0 sm:$0xff] }
 0x6ba   : > { %17336 = vmatpush3.msra.mxu1 %v3385_v31  ;;  %17343 = vmatpush3.msra.mxu0 %v3391_v13 }
 0x6bb   : > { %17344 = vmatprep.subr.mxu0 %v19282_v22  ;;  %17351 = vmatprep.subr.mxu1 %v20234_v39 }
 0x6bc   : > { %17345 = vmatpush3.msra.mxu0 %v3390_v4  ;;  %17348 = vmatprep.mubr.msk.f32.mxu0 %vm19283_vm2, %v19282_v22 }
 0x6bd   : > { %17346 = vmatprep.subr.mxu0 %v19282_v22 }
 0x6be   : > { %17347 = vmatpush3.msra.mxu0 %v3389_v35  ;;  %v20419_v35 = vld [vmem:[%s19315_s21 + $0x8] sm:$0xff] }
 0x6c2   : > { %v18889_v14 = vpop.eup %18888 }
 0x6c3   : > { %17338 = vmatmul.mubr.msk.f32.vlgmr.msra.gmra.mxu1 %vm1429_vm1, %v18889_v14 }
 0x6c4   : > { %17352 = vmatpush3.msra.mxu1 %v20234_v39  ;;  %17359 = vmatprep.mubr.msk.f32.mxu1 %vm1429_vm1, %v18885_v61  ;;  %v4255_v39 = vld [vmem:[%s19345_s19 + $0x18] sm:$0xff]  ;;  %v15610_v61 = vld [vmem:[%s19345_s19 + $0x40] sm:$0xff] }
 0x6c5   : > { %17353 = vmatprep.subr.mxu1 %v20241_v16 }
 0x6c6   : > { %v18891_v40 = vpop.eup %18890  ;;  %17354 = vmatpush3.msra.mxu1 %v20241_v16  ;;  %v4254_v16 = vld [vmem:[%s19345_s19 + $0x10] sm:$0xff] }
 0x6c7   : > { %17355 = vmatprep.subr.mxu1 %v20250_v50  ;;  %17349 = vmatmul.mubr.msk.f32.vlgmr.msra.gmra.mxu0 %vm1429_vm1, %v18891_v40 }
 0x6c8   : > { %17356 = vmatpush3.msra.mxu1 %v20250_v50  ;;  %17373 = vmatprep.mubr.msk.f32.mxu0 %vm1429_vm1, %v1391_v28  ;;  %v20423_v28 = vld [vmem:[%s19350_s24 + $0x2] ss:$0 sm:$0xff] }
 0x6c9   : > { %17357 = vmatprep.subr.mxu1 %v20260_v2 }
 0x6ca   : > { %17358 = vmatpush3.msra.mxu1 %v20260_v2 }
 0x6cb   : > { %17360 = vmatmul.mubr.msk.f32.vlgmr.msra.gmra.mxu1 %vm1429_vm1, %v18887_v26  ;;  %17379 = vmatprep.subr.mxu1 %v4255_v39 }
 0x6cc   : > { %17362 = vmatprep.mubr.msk.f32.mxu1 %vm1429_vm1, %v18889_v14  ;;  %17380 = vmatpush3.msra.mxu1 %v4255_v39 }
 0x6cd   : > { %17381 = vmatprep.subr.mxu1 %v4254_v16 }
 0x6ce   : > { %17382 = vmatpush3.msra.mxu1 %v4254_v16 }
 0x6cf   : > { %17363 = vmatmul.mubr.msk.f32.gmra.mxu1 %vm1429_vm1, %v18891_v40  ;;  %17383 = vmatprep.subr.mxu1 %v4253_v34 }
 0x6d0   : > { %17384 = vmatpush3.msra.mxu1 %v4253_v34 }
 0x6d1   : > { %17385 = vmatprep.subr.mxu1 %v4252_v41 }
 0x6d2   : > { %17386 = vmatpush3.msra.mxu1 %v4252_v41 }
 0x6d3   : > { %17407 = vmatprep.subr.mxu1 %v15613_v46 }
 0x773   : > { %v3830_v50 = vpop.f32.mrf.mxu1 }
 0x775   : > { %v17317_v44 = vpop.f32.mrf.mxu1 }
 0x777   : > { %v3903_v49 = vpop.f32.mrf.mxu0 }
 0x779   : > { %v17328_v53 = vpop.f32.mrf.mxu0 }
 0x783   : > { %v3976_v2 = vpop.f32.mrf.mxu1 }
 0x785   : > { %v17339_v55 = vpop.f32.mrf.mxu1 }
 0x786   : > { %v20433_v55 = vld [vmem:[%s19315_s21] sm:$0xff] }
 0x787   : > { %v4049_v24 = vpop.f32.mrf.mxu0 }
 0x789   : > { %v17350_v30 = vpop.f32.mrf.mxu0 }
 0x78b   : > { %v17361_v37 = vpop.f32.mrf.mxu1 }
 0x78c   : > { %v4139_v23 = vmax.f32 %v17361_v37, 1e-20 }
 0x78d   : > { %v4119_v42 = vpop.f32.mrf.mxu1 }
 0x78e   : > { %v4138_v36 = vmax.f32 %v4119_v42, 1e-20 }
 0x78f   : > { %v17364_v45 = vpop.f32.mrf.mxu1 }
 0x790   : > { %v4141_v25 = vmax.f32 %v17364_v45, 1e-20 }
 0x791   : > { %v4129_v8 = vpop.f32.mrf.mxu1 }
 0x792   : > { %18892 = vrcp.f32 %v4141_v25  ;;  %v4140_v51 = vmax.f32 %v4129_v8, 1e-20 }
 0x793   : > { %18894 = vrcp.f32 %v4139_v23 }
 0x794   : > { %18896 = vrcp.f32 %v4140_v51 }
 0x795   : > { %18898 = vrcp.f32 %v4138_v36 }
 0x79f   : > { %v18893_v54 = vpop.eup %18892 }
 0x7a0   : > { %v18895_v58 = vpop.eup %18894  ;;  %v4149_v59 = vmul.f32 %v18893_v54, %v4049_v24 }
 0x7a1   : > { %v18897_v56 = vpop.eup %18896  ;;  %v4147_v0 = vmul.f32 %v18895_v58, %v3903_v49 }
 0x7a2   : > { %17365 = vmatprep.subr.mxu0 %v4149_v59  ;;  %v4148_v62 = vmul.f32 %v18897_v56, %v3976_v2  ;;  %v18899_v63 = vpop.eup %18898 }
 0x7a3   : > { %17366 = vmatpush3.msra.mxu0 %v4149_v59  ;;  %v4146_v18 = vmul.f32 %v18899_v63, %v3830_v50 }
 0x7a4   : > { %17367 = vmatprep.subr.mxu0 %v4148_v62 }
 0x7a5   : > { %17368 = vmatpush3.msra.mxu0 %v4148_v62 }
 0x7a6   : > { %17369 = vmatprep.subr.mxu0 %v4147_v0 }
 0x7a7   : > { %17370 = vmatpush3.msra.mxu0 %v4147_v0 }
 0x7a8   : > { %17371 = vmatprep.subr.mxu0 %v4146_v18 }
 0x7a9   : > { %17372 = vmatpush3.msra.mxu0 %v4146_v18 }
 0x7aa   : > { %17374 = vmatmul.mubr.msk.f32.vlgmr.msra.gmra.mxu0 %vm1429_vm1, %v1392_v17  ;;  %17393 = vmatprep.subr.mxu0 %v15603_v19 }
 0x7ab   : > { %17376 = vmatprep.mubr.msk.f32.mxu0 %vm1429_vm1, %v1393_v27  ;;  %17394 = vmatpush3.msra.mxu0 %v15603_v19 }
 0x7ac   : > { %17395 = vmatprep.subr.mxu0 %v15602_v32 }
 0x7ad   : > { %17396 = vmatpush3.msra.mxu0 %v15602_v32 }
 0x7ae   : > { %17377 = vmatmul.mubr.msk.f32.gmra.mxu0 %vm1429_vm1, %v1394_v33  ;;  %17397 = vmatprep.subr.mxu0 %v15601_v21 }
 0x7af   : > { %17398 = vmatpush3.msra.mxu0 %v15601_v21 }
 0x7b0   : > { %17399 = vmatprep.subr.mxu0 %v15600_v43 }
 0x7b1   : > { %17400 = vmatpush3.msra.mxu0 %v15600_v43 }
 0x7b2   : > { %17421 = vmatprep.subr.mxu0 %v19282_v22 }
 0x86a   : > { %v17375_v47 = vpop.f32.mrf.mxu0 }
 0x86c   : > { %v4233_v48 = vpop.f32.mrf.mxu0 }
 0x86d   : > { %17387 = vmatprep.mubr.msk.f32.mxu1 %vm1429_vm1, %v4233_v48  ;;  %17401 = vmatprep.mubr.msk.f32.mxu0 %vm1429_vm1, %v4233_v48 }
 0x86e   : > { %v17378_v20 = vpop.f32.mrf.mxu0  ;;  %17388 = vmatmul.mubr.msk.f32.vlgmr.msra.gmra.mxu1 %vm1429_vm1, %v17375_v47  ;;  %17402 = vmatmul.mubr.msk.f32.vlgmr.msra.gmra.mxu0 %vm1429_vm1, %v17375_v47 }
 0x86f   : > { %17408 = vmatpush3.msra.mxu1 %v15613_v46 }
 0x870   : > { %v4243_v60 = vpop.f32.mrf.mxu0  ;;  %17409 = vmatprep.subr.mxu1 %v15612_v52 }
 0x871   : > { %17390 = vmatprep.mubr.msk.f32.mxu1 %vm1429_vm1, %v4243_v60  ;;  %17410 = vmatpush3.msra.mxu1 %v15612_v52 }
 0x872   : > { %17391 = vmatmul.mubr.msk.f32.gmra.mxu1 %vm1429_vm1, %v17378_v20  ;;  %17411 = vmatprep.subr.mxu1 %v15611_v57 }
 0x873   : > { %17412 = vmatpush3.msra.mxu1 %v15611_v57  ;;  %17415 = vmatprep.mubr.msk.f32.mxu1 %vm1429_vm1, %v4233_v48 }
 0x874   : > { %17413 = vmatprep.subr.mxu1 %v15610_v61  ;;  %17404 = vmatprep.mubr.msk.f32.mxu0 %vm1429_vm1, %v4243_v60 }
 0x875   : > { %17414 = vmatpush3.msra.mxu1 %v15610_v61  ;;  %17405 = vmatmul.mubr.msk.f32.gmra.mxu0 %vm1429_vm1, %v17378_v20 }
 0x876   : > { %17416 = vmatmul.mubr.msk.f32.vlgmr.msra.gmra.mxu1 %vm1429_vm1, %v17375_v47  ;;  %17428 = vmatprep.subr.mxu1 %v19282_v22 }
 0x877   : > { %17418 = vmatprep.mubr.msk.f32.mxu1 %vm1429_vm1, %v4243_v60  ;;  %17425 = vmatprep.mubr.msk.f32.mxu0 %vm19283_vm2, %v19282_v22 }
 0x87a   : > { %17419 = vmatmul.mubr.msk.f32.gmra.mxu1 %vm1429_vm1, %v17378_v20 }
 0x87b   : > { %17432 = vmatprep.mubr.msk.f32.mxu1 %vm19283_vm2, %v19282_v22 }
 0x92e   : > { %v17389_v1 = vpop.f32.mrf.mxu1  ;;  %v17403_v3 = vpop.f32.mrf.mxu0 }
 0x92f   : > { %v4457_v31 = vadd.f32 %v17403_v3, %v15605_v6  ;;  %v4347_v36 = vadd.f32 %v17389_v1, %v20416_v9 }
 0x930   : > { %v4341_v5 = vpop.f32.mrf.mxu1  ;;  %v4451_v38 = vpop.f32.mrf.mxu0 }
 0x931   : > { %v4452_v26 = vadd.f32 %v15605_v6, %v4451_v38  ;;  %v4342_v14 = vadd.f32 %v20416_v9, %v4341_v5  ;;  %v4594_v49 = vcombine.low %v4457_v31, %v4457_v31  ;;  %v4475_v37 = vcombine.high %v4457_v31, %v4457_v31 }
 0x932   : > { %v20413_v29 = vpop.f32.mrf.mxu1  ;;  %v4365_v63 = vcombine.high %v4347_v36, %v4347_v36  ;;  %v4674_v34 = vmul.f32 0.35355338, %v4347_v36 }
 0x933   : > { %v4474_v13 = vcombine.high %v4452_v26, %v4452_v26  ;;  %v4592_v4 = vcombine.low %v4452_v26, %v4452_v26  ;;  %v4364_v24 = vcombine.high %v4342_v14, %v4342_v14  ;;  %v4610_v45 = vsel %vm1721_vm3, %v4457_v31, %v4594_v49 }
 0x934   : > { %v4351_v7 = vpop.f32.mrf.mxu1  ;;  %v4623_v54 = vmul.f32 %v4475_v37, %v20419_v35  ;;  %v4672_v58 = vmul.f32 0.35355338, %v4342_v14  ;;  %v4621_v59 = vmul.f32 %v4610_v45, %v20419_v35  ;;  %v4622_v0 = vmul.f32 %v4475_v37, %v20433_v55 }
 0x935   : > { %v17406_v39 = vpop.f32.mrf.mxu0  ;;  %v4608_v16 = vsel %vm1721_vm3, %v4452_v26, %v4592_v4  ;;  %v4619_v50 = vmul.f32 %v4474_v13, %v20419_v35  ;;  %v4618_v42 = vmul.f32 %v4474_v13, %v20433_v55  ;;  %v4673_v51 = vmul.f32 0.35355338, %v4364_v24 }
 0x936   : > { %v17417_v40 = vpop.f32.mrf.mxu1  ;;  %v4617_v44 = vmul.f32 %v4608_v16, %v20419_v35  ;;  %v4616_v23 = vmul.f32 %v4608_v16, %v20433_v55  ;;  %v4620_v17 = vmul.f32 %v4610_v45, %v20433_v55  ;;  %v4467_v19 = vadd.f32 %v17406_v39, %v15605_v6 }
 0x937   : > { %v20429_v53 = vadd.f32 %v17417_v40, %v20423_v28  ;;  %17429 = vmatpush3.xpose.msk.msra.mxu1 %vm1429_vm1, %v4619_v50  ;;  %v4461_v30 = vpop.f32.mrf.mxu0  ;;  %v4675_v32 = vmul.f32 0.35355338, %v4365_v63  ;;  %v4352_v33 = vadd.f32 %v20416_v9, %v4351_v7  ;;  %v4357_v60 = vadd.f32 %v20413_v29, %v20416_v9 }
 0x938   : > { %v4561_v2 = vpop.f32.mrf.mxu1  ;;  %17422 = vmatpush3.xpose.msk.msra.mxu0 %vm1429_vm1, %v4617_v44  ;;  %17430 = vmatprep.subr.mxu1 %v19282_v22  ;;  %v4462_v25 = vadd.f32 %v15605_v6, %v4461_v30  ;;  %v4598_v43 = vcombine.low %v4467_v19, %v4467_v19  ;;  %v4477_v47 = vcombine.high %v4467_v19, %v4467_v19 }
 0x939   : > { %17423 = vmatprep.subr.mxu0 %v19282_v22  ;;  %v4366_v46 = vcombine.high %v4352_v33, %v4352_v33  ;;  %v4562_v57 = vadd.f32 %v20423_v28, %v4561_v2  ;;  %v4676_v1 = vmul.f32 0.35355338, %v4352_v33  ;;  %v4367_v6 = vcombine.high %v4357_v60, %v4357_v60 }
 0x93a   : > { %v17420_v8 = vpop.f32.mrf.mxu1  ;;  %v4596_v62 = vcombine.low %v4462_v25, %v4462_v25  ;;  %v4476_v18 = vcombine.high %v4462_v25, %v4462_v25  ;;  %v4614_v20 = vsel %vm1721_vm3, %v4467_v19, %v4598_v43  ;;  %v4631_v3 = vmul.f32 %v4477_v47, %v20419_v35 }
 0x93b   : > { %17431 = vmatpush3.xpose.msk.msra.mxu1 %vm1429_vm1, %v4618_v42  ;;  %v20448_v56 = vadd.f32 %v17420_v8, %v20423_v28  ;;  %v4677_v61 = vmul.f32 0.35355338, %v4366_v46  ;;  %v4629_v5 = vmul.f32 %v4614_v20, %v20419_v35  ;;  %v4632_v38 = vcombine.low %v4562_v57, %v4562_v57 }
 0x93c   : > { %17424 = vmatpush3.xpose.msk.msra.mxu0 %vm1429_vm1, %v4616_v23  ;;  %17442 = vmatprep.subr.mxu1 %v19282_v22  ;;  %v4612_v27 = vsel %vm1721_vm3, %v4462_v25, %v4596_v62  ;;  %v4627_v21 = vmul.f32 %v4476_v18, %v20419_v35  ;;  %v4626_v48 = vmul.f32 %v4476_v18, %v20433_v55  ;;  %v4679_v31 = vmul.f32 0.35355338, %v4367_v6  ;;  %v4571_v16 = vpop.f32.mrf.mxu1 }
 0x93d   : > { %17435 = vmatprep.subr.mxu0 %v19282_v22  ;;  %v4625_v41 = vmul.f32 %v4612_v27, %v20419_v35  ;;  %v4624_v52 = vmul.f32 %v4612_v27, %v20433_v55  ;;  %v4630_v26 = vmul.f32 %v4477_v47, %v20433_v55  ;;  %v4584_v29 = vcombine.high %v4562_v57, %v4562_v57 }
 0x93e   : > { %17433 = vmatmul.mubr.msk.f32.vlgmr.msra.gmra.mxu1 %vm1429_vm1, %v4673_v51  ;;  %v4628_v7 = vmul.f32 %v4614_v20, %v20433_v55  ;;  %v4648_v9 = vsel %vm1721_vm3, %v4562_v57, %v4632_v38  ;;  %v4678_v13 = vmul.f32 0.35355338, %v4357_v60  ;;  %v4634_v43 = vcombine.low %v20429_v53, %v20429_v53 }
 0x93f   : > { %17426 = vmatmul.mubr.msk.f32.vlgmr.msra.gmra.mxu0 %vm1429_vm1, %v4672_v58  ;;  %17443 = vmatpush3.xpose.msk.msra.mxu1 %vm1429_vm1, %v4623_v54  ;;  %v4659_v4 = vmul.f32 %v4584_v29, %v20419_v35  ;;  %v4657_v14 = vmul.f32 %v4648_v9, %v20419_v35  ;;  %v4658_v40 = vmul.f32 %v4584_v29, %v20433_v55 }
 0x940   : > { %17436 = vmatpush3.xpose.msk.msra.mxu0 %vm1429_vm1, %v4621_v59  ;;  %17444 = vmatprep.subr.mxu1 %v19282_v22  ;;  %v4656_v39 = vmul.f32 %v4648_v9, %v20433_v55  ;;  %v4650_v47 = vsel %vm1721_vm3, %v20429_v53, %v4634_v43 }
 0x941   : > { %17437 = vmatprep.subr.mxu0 %v19282_v22  ;;  %17446 = vmatprep.mubr.msk.f32.mxu1 %vm19283_vm2, %v19282_v22  ;;  %v4661_v60 = vmul.f32 %v4650_v47, %v20419_v35 }
 0x942   : > { %17439 = vmatprep.mubr.msk.f32.mxu0 %vm19283_vm2, %v19282_v22 }
 0x943   : > { %17445 = vmatpush3.xpose.msk.msra.mxu1 %vm1429_vm1, %v4622_v0 }
 0x944   : > { %17438 = vmatpush3.xpose.msk.msra.mxu0 %vm1429_vm1, %v4620_v17  ;;  %17456 = vmatprep.subr.mxu1 %v19282_v22 }
 0x945   : > { %17449 = vmatprep.subr.mxu0 %v19282_v22 }
 0x946   : > { %17447 = vmatmul.mubr.msk.f32.vlgmr.msra.gmra.mxu1 %vm1429_vm1, %v4675_v32 }
 0x947   : > { %17440 = vmatmul.mubr.msk.f32.vlgmr.msra.gmra.mxu0 %vm1429_vm1, %v4674_v34  ;;  %17457 = vmatpush3.xpose.msk.msra.mxu1 %vm1429_vm1, %v4627_v21 }
 0x948   : > { %17450 = vmatpush3.xpose.msk.msra.mxu0 %vm1429_vm1, %v4625_v41  ;;  %17458 = vmatprep.subr.mxu1 %v19282_v22 }
 0x949   : > { %17451 = vmatprep.subr.mxu0 %v19282_v22  ;;  %17460 = vmatprep.mubr.msk.f32.mxu1 %vm19283_vm2, %v19282_v22 }
 0x94a   : > { %17453 = vmatprep.mubr.msk.f32.mxu0 %vm19283_vm2, %v19282_v22 }
 0x94b   : > { %17459 = vmatpush3.xpose.msk.msra.mxu1 %vm1429_vm1, %v4626_v48  ;;  %v20543_v48 = vadd.f32 %v20423_v28, %v4571_v16 }
 0x94c   : > { %17452 = vmatpush3.xpose.msk.msra.mxu0 %vm1429_vm1, %v4624_v52  ;;  %17470 = vmatprep.subr.mxu1 %v19282_v22 }
 0x94d   : > { %17463 = vmatprep.subr.mxu0 %v19282_v22 }
 0x94e   : > { %17461 = vmatmul.mubr.msk.f32.vlgmr.msra.gmra.mxu1 %vm1429_vm1, %v4677_v61  ;;  %v4636_v61 = vcombine.low %v20543_v48, %v20543_v48 }
 0x94f   : > { %17454 = vmatmul.mubr.msk.f32.vlgmr.msra.gmra.mxu0 %vm1429_vm1, %v4676_v1  ;;  %17471 = vmatpush3.xpose.msk.msra.mxu1 %vm1429_vm1, %v4631_v3  ;;  %v4660_v3 = vmul.f32 %v4650_v47, %v20433_v55 }
 0x950   : > { %17464 = vmatpush3.xpose.msk.msra.mxu0 %vm1429_vm1, %v4629_v5  ;;  %17472 = vmatprep.subr.mxu1 %v19282_v22  ;;  %v4652_v38 = vsel %vm1721_vm3, %v20543_v48, %v4636_v61 }
 0x951   : > { %17465 = vmatprep.subr.mxu0 %v19282_v22  ;;  %17474 = vmatprep.mubr.msk.f32.mxu1 %vm19283_vm2, %v19282_v22 }
 0x952   : > { %17467 = vmatprep.mubr.msk.f32.mxu0 %vm19283_vm2, %v19282_v22 }
 0x953   : > { %17473 = vmatpush3.xpose.msk.msra.mxu1 %vm1429_vm1, %v4630_v26 }
 0x954   : > { %17466 = vmatpush3.xpose.msk.msra.mxu0 %vm1429_vm1, %v4628_v7  ;;  %17484 = vmatprep.subr.mxu1 %v19282_v22 }
 0x955   : > { %17477 = vmatprep.subr.mxu0 %v19282_v22 }
 0x956   : > { %17475 = vmatmul.mubr.msk.f32.vlgmr.msra.gmra.mxu1 %vm1429_vm1, %v4679_v31 }
 0x957   : > { %17468 = vmatmul.mubr.msk.f32.vlgmr.msra.gmra.mxu0 %vm1429_vm1, %v4678_v13  ;;  %17485 = vmatpush3.msra.mxu1 %v4659_v4  ;;  %v4665_v13 = vmul.f32 %v4652_v38, %v20419_v35  ;;  %v4638_v4 = vcombine.low %v20448_v56, %v20448_v56 }
 0x958   : > { %17478 = vmatpush3.msra.mxu0 %v4657_v14  ;;  %17486 = vmatprep.subr.mxu1 %v19282_v22 }
 0x959   : > { %17479 = vmatprep.subr.mxu0 %v19282_v22  ;;  %17487 = vmatpush3.msra.mxu1 %v4658_v40  ;;  %v4664_v40 = vmul.f32 %v4652_v38, %v20433_v55 }
 0x95a   : > { %17480 = vmatpush3.msra.mxu0 %v4656_v39  ;;  %17481 = vmatprep.mubr.msk.f32.mxu0 %vm19283_vm2, %v19282_v22 }
 0x95b   : > { %17491 = vmatprep.subr.mxu0 %v19282_v22  ;;  %17488 = vmatprep.mubr.msk.f32.mxu1 %vm19283_vm2, %v19282_v22 }
 0x95c   : > { %17498 = vmatprep.subr.mxu1 %v19282_v22 }
 0x9fe   : > { %v4834_v50 = vpop.f32.mrf.mxu1 }
 0x9ff   : > { %v4755_v44 = vpop.f32.mrf.mxu0  ;;  %v5316_v58 = vsel %vm5312_vm5, %v4834_v50, -inf }
 0xa00   : > { %v17434_v49 = vpop.f32.mrf.mxu1  ;;  %v5313_v2 = vsel %vm5312_vm5, %v4755_v44, -inf }
 0xa01   : > { %5314 = vmax.xlane.f32.xlu0 %v5313_v2  ;;  %v17427_v24 = vpop.f32.mrf.mxu0 }
 0xa06   : > { %v20525_v30 = vpop.f32.mrf.mxu1 }
 0xa07   : > { %v4913_v37 = vpop.f32.mrf.mxu0  ;;  %v5322_v19 = vsel %vm5312_vm5, %v20525_v30, -inf }
 0xa08   : > { %v17448_v42 = vpop.f32.mrf.mxu1  ;;  %v5319_v23 = vsel %vm5312_vm5, %v4913_v37, -inf }
 0xa09   : > { %5320 = vmax.xlane.f32.xlu1 %v5319_v23  ;;  %v17441_v45 = vpop.f32.mrf.mxu0  ;;  %v4585_v42 = vcombine.high %v20429_v53, %v20429_v53 }
 0xa0b   : > { %v4662_v53 = vmul.f32 %v4585_v42, %v20433_v55 }
 0xa0e   : > { %v5150_v25 = vpop.f32.mrf.mxu1 }
 0xa0f   : > { %v5071_v8 = vpop.f32.mrf.mxu0  ;;  %v5328_v18 = vsel %vm5312_vm5, %v5150_v25, -inf }
 0xa10   : > { %v17462_v36 = vpop.f32.mrf.mxu1  ;;  %v5325_v51 = vsel %vm5312_vm5, %v5071_v8, -inf }
 0xa11   : > { %5326 = vmax.xlane.f32.xlu0 %v5325_v51  ;;  %v17455_v54 = vpop.f32.mrf.mxu0  ;;  %v4586_v51 = vcombine.high %v20543_v48, %v20543_v48 }
 0xa15   : > { %5317 = vmax.xlane.f32.xlu0 %v5316_v58 }
 0xa16   : > { %v20530_v59 = vpop.f32.mrf.mxu1 }
 0xa17   : > { %v5229_v62 = vpop.f32.mrf.mxu0  ;;  %v5334_v27 = vsel %vm5312_vm5, %v20530_v59, -inf }
 0xa18   : > { %v17476_v63 = vpop.f32.mrf.mxu1  ;;  %v5331_v0 = vsel %vm5312_vm5, %v5229_v62, -inf }
 0xa19   : > { %5332 = vmax.xlane.f32.xlu1 %v5331_v0  ;;  %v17469_v17 = vpop.f32.mrf.mxu0  ;;  %5329 = vmax.xlane.f32.xlu0 %v5328_v18  ;;  %v4667_v63 = vmul.f32 %v4586_v51, %v20419_v35  ;;  %v4666_v18 = vmul.f32 %v4586_v51, %v20433_v55 }
 0xa1d   : > { %5323 = vmax.xlane.f32.xlu1 %v5322_v19 }
 0xa21   : > { %5335 = vmax.xlane.f32.xlu1 %v5334_v27 }
 0xa8a   : > { %v5315_v32 = vpop.xlane.xlu0 %5314 }
 0xa8b   : > { %v5337_v33 = vsub.f32 %v4755_v44, %v5315_v32  ;;  %v4654_v44 = vsel %vm1721_vm3, %v20448_v56, %v4638_v4 }
 0xa8c   : > { %v4669_v23 = vmul.f32 %v4654_v44, %v20419_v35 }
 0xa8d   : > { %v5345_v34 = vmul.f32 1.442695, %v5337_v33  ;;  %v4152_v33 = vld [vmem:[%s19355_s30 + $0x10] sm:$0xff] }
 0xa8f   : > { %18900 = vpow2.f32 %v5345_v34  ;;  %v4151_v34 = vld [vmem:[%s19355_s30 + $0x8] sm:$0xff] }
 0xa92   : > { %v5321_v21 = vpop.xlane.xlu1 %5320 }
 0xa93   : > { %v5339_v41 = vsub.f32 %v4913_v37, %v5321_v21 }
 0xa95   : > { %v5349_v46 = vmul.f32 1.442695, %v5339_v41 }
 0xa97   : > { %18902 = vpow2.f32 %v5349_v46 }
 0xa9a   : > { %v5327_v52 = vpop.xlane.xlu0 %5326 }
 0xa9b   : > { %v5341_v20 = vsub.f32 %v5071_v8, %v5327_v52  ;;  %v4663_v8 = vmul.f32 %v4585_v42, %v20419_v35 }
 0xa9c   : > { %v20545_v57 = vpop.eup %18900 }
 0xa9d   : > { %v5353_v1 = vmul.f32 1.442695, %v5341_v20  ;;  %17482 = vmatmul.mubr.msk.f32.vlgmr.msra.gmra.mxu0 %vm5361_vm6, %v20545_v57 }
 0xa9e   : > { %17492 = vmatpush3.msra.mxu0 %v4661_v60  ;;  %v5318_v5 = vpop.xlane.xlu0 %5317  ;;  %17495 = vmatprep.mubr.msk.f32.mxu0 %vm19283_vm2, %v19282_v22 }
 0xa9f   : > { %18904 = vpow2.f32 %v5353_v1  ;;  %17493 = vmatprep.subr.mxu0 %v19282_v22  ;;  %v5338_v28 = vsub.f32 %v4834_v50, %v5318_v5 }
 0xaa0   : > { %17494 = vmatpush3.msra.mxu0 %v4660_v3 }
 0xaa1   : > { %v5347_v6 = vmul.f32 1.442695, %v5338_v28  ;;  %17505 = vmatprep.subr.mxu0 %v19282_v22 }
 0xaa2   : > { %v5333_v26 = vpop.xlane.xlu1 %5332  ;;  %v5330_v29 = vpop.xlane.xlu0 %5329 }
 0xaa3   : > { %18906 = vpow2.f32 %v5347_v6  ;;  %v5343_v7 = vsub.f32 %v5229_v62, %v5333_v26  ;;  %v5342_v9 = vsub.f32 %v5150_v25, %v5330_v29  ;;  %v4587_v62 = vcombine.high %v20448_v56, %v20448_v56 }
 0xaa4   : > { %v18903_v31 = vpop.eup %18902 }
 0xaa5   : > { %v5357_v14 = vmul.f32 1.442695, %v5343_v7  ;;  %17496 = vmatmul.mubr.msk.f32.vlgmr.msra.gmra.mxu0 %vm5361_vm6, %v18903_v31  ;;  %v5355_v39 = vmul.f32 1.442695, %v5342_v9  ;;  %v4671_v19 = vmul.f32 %v4587_v62, %v20419_v35  ;;  %v4670_v32 = vmul.f32 %v4587_v62, %v20433_v55 }
 0xaa6   : > { %17506 = vmatpush3.msra.mxu0 %v4665_v13  ;;  %v5324_v16 = vpop.xlane.xlu1 %5323  ;;  %17509 = vmatprep.mubr.msk.f32.mxu0 %vm19283_vm2, %v19282_v22 }
 0xaa7   : > { %18908 = vpow2.f32 %v5357_v14  ;;  %17507 = vmatprep.subr.mxu0 %v19282_v22  ;;  %v5340_v50 = vsub.f32 %v20525_v30, %v5324_v16  ;;  %v4668_v30 = vmul.f32 %v4654_v44, %v20433_v55 }
 0xaa8   : > { %17508 = vmatpush3.msra.mxu0 %v4664_v40  ;;  %18910 = vpow2.f32 %v5355_v39 }
 0xaa9   : > { %v5351_v49 = vmul.f32 1.442695, %v5340_v50  ;;  %17519 = vmatprep.subr.mxu0 %v19282_v22 }
 0xaaa   : > { %v5336_v2 = vpop.xlane.xlu1 %5335 }
 0xaab   : > { %18912 = vpow2.f32 %v5351_v49  ;;  %v5344_v24 = vsub.f32 %v20530_v59, %v5336_v2 }
 0xaac   : > { %v18905_v37 = vpop.eup %18904 }
 0xaad   : > { %v5359_v45 = vmul.f32 1.442695, %v5344_v24  ;;  %17510 = vmatmul.mubr.msk.f32.vlgmr.msra.gmra.mxu0 %vm5361_vm6, %v18905_v37 }
 0xaae   : > { %17520 = vmatpush3.msra.mxu0 %v4669_v23  ;;  %17523 = vmatprep.mubr.msk.f32.mxu0 %vm19283_vm2, %v19282_v22 }
 0xaaf   : > { %18914 = vpow2.f32 %v5359_v45  ;;  %17521 = vmatprep.subr.mxu0 %v19282_v22 }
 0xab0   : > { %v18907_v25 = vpop.eup %18906  ;;  %17522 = vmatpush3.msra.mxu0 %v4668_v30 }
 0xab1   : > { %17489 = vmatmul.mubr.msk.f32.vlgmr.msra.gmra.mxu1 %vm5361_vm6, %v18907_v25  ;;  %17533 = vmatprep.subr.mxu0 %v20419_v35  ;;  %v5946_v54 = vcombine.low %v20545_v57, %v18907_v25 }
 0xab2   : > { %17499 = vmatpush3.msra.mxu1 %v4663_v8  ;;  %17502 = vmatprep.mubr.msk.f32.mxu1 %vm19283_vm2, %v19282_v22 }
 0xab3   : > { %17500 = vmatprep.subr.mxu1 %v19282_v22 }
 0xab4   : > { %v18909_v36 = vpop.eup %18908  ;;  %17501 = vmatpush3.msra.mxu1 %v4662_v53 }
 0xab5   : > { %17524 = vmatmul.mubr.msk.f32.vlgmr.msra.gmra.mxu0 %vm5361_vm6, %v18909_v36  ;;  %17512 = vmatprep.subr.mxu1 %v19282_v22  ;;  %v18911_v58 = vpop.eup %18910 }
 0xab6   : > { %17537 = vmatprep.mubr.msk.f32.mxu0 %vm5361_vm6, %v5946_v54  ;;  %17534 = vmatpush3.msra.mxu0 %v20419_v35  ;;  %v5948_v17 = vcombine.low %v18905_v37, %v18911_v58  ;;  %v4153_v35 = vld [vmem:[%s19355_s30 + $0x18] sm:$0xff] }
 0xab7   : > { %17535 = vmatprep.subr.mxu0 %v20433_v55 }
 0xab8   : > { %v18913_v59 = vpop.eup %18912  ;;  %17536 = vmatpush3.msra.mxu0 %v20433_v55  ;;  %v4150_v55 = vld [vmem:[%s19355_s30] sm:$0xff] }
 0xab9   : > { %17503 = vmatmul.mubr.msk.f32.vlgmr.msra.gmra.mxu1 %vm5361_vm6, %v18913_v59  ;;  %v5947_v0 = vcombine.low %v18903_v31, %v18913_v59 }
 0xaba   : > { %17513 = vmatpush3.msra.mxu1 %v4667_v63  ;;  %17516 = vmatprep.mubr.msk.f32.mxu1 %vm19283_vm2, %v19282_v22 }
 0xabb   : > { %17514 = vmatprep.subr.mxu1 %v19282_v22  ;;  %17538 = vmatmul.mubr.msk.f32.vlgmr.msra.gmra.mxu0 %vm5361_vm6, %v5947_v0 }
 0xabc   : > { %v18915_v56 = vpop.eup %18914  ;;  %17515 = vmatpush3.msra.mxu1 %v4666_v18  ;;  %17540 = vmatprep.mubr.msk.f32.mxu0 %vm5361_vm6, %v5948_v17 }
 0xabd   : > { %17526 = vmatprep.subr.mxu1 %v19282_v22  ;;  %17517 = vmatmul.mubr.msk.f32.vlgmr.msra.gmra.mxu1 %vm5361_vm6, %v18911_v58  ;;  %v5949_v27 = vcombine.low %v18909_v36, %v18915_v56 }
 0xabe   : > { %17527 = vmatpush3.msra.mxu1 %v4671_v19  ;;  %17530 = vmatprep.mubr.msk.f32.mxu1 %vm19283_vm2, %v19282_v22  ;;  %v1395_v19 = vld [vmem:[%s19325_s29] sm:$0xff] }
 0xabf   : > { %17528 = vmatprep.subr.mxu1 %v19282_v22  ;;  %17541 = vmatmul.mubr.msk.f32.gmra.mxu0 %vm5361_vm6, %v5949_v27 }
 0xac0   : > { %17529 = vmatpush3.msra.mxu1 %v4670_v32  ;;  %17565 = vmatprep.mubr.msk.f32.mxu0 %vm1429_vm1, %v1395_v19 }
 0xac1   : > { %17531 = vmatmul.mubr.msk.f32.vlgmr.msra.gmra.mxu1 %vm5361_vm6, %v18915_v56  ;;  %17543 = vmatprep.subr.mxu1 %v4153_v35 }
 0xac2   : > { %17544 = vmatpush3.msra.mxu1 %v4153_v35  ;;  %v15664_v35 = vld [vmem:[%s22961_s6] ss:$0 sm:$0xff]  ;;  %s22978_s6 = sld [smem:[#allocation19_spill]] }
 0xac3   : > { %17545 = vmatprep.subr.mxu1 %v4152_v33 }
 0xac4   : > { %17546 = vmatpush3.msra.mxu1 %v4152_v33 }
 0xac5   : > { %17547 = vmatprep.subr.mxu1 %v4151_v34 }
 0xac6   : > { %17548 = vmatpush3.msra.mxu1 %v4151_v34 }
 0xac7   : > { %17549 = vmatprep.subr.mxu1 %v4150_v55 }
 0xac8   : > { %17550 = vmatpush3.msra.mxu1 %v4150_v55 }
 0xb5d   : > { %v5431_v21 = vpop.f32.mrf.mxu0 }
 0xb5f   : > { %v17483_v41 = vpop.f32.mrf.mxu0 }
 0xb65   : > { %v5577_v43 = vpop.f32.mrf.mxu0 }
 0xb67   : > { %v17497_v46 = vpop.f32.mrf.mxu0 }
 0xb68   : > { %v1396_v46 = vld [vmem:[%s19325_s29 + $0x8] sm:$0xff] }
 0xb6d   : > { %v5723_v47 = vpop.f32.mrf.mxu0 }
 0xb6f   : > { %v17511_v48 = vpop.f32.mrf.mxu0 }
 0xb70   : > { %v1398_v48 = vld [vmem:[%s19325_s29 + $0x18] sm:$0xff] }
 0xb71   : > { %v5504_v52 = vpop.f32.mrf.mxu1 }
 0xb73   : > { %v17490_v20 = vpop.f32.mrf.mxu1 }
 0xb75   : > { %v5869_v57 = vpop.f32.mrf.mxu0 }
 0xb77   : > { %v17525_v60 = vpop.f32.mrf.mxu0 }
 0xb79   : > { %v5650_v61 = vpop.f32.mrf.mxu1 }
 0xb7b   : > { %v17504_v1 = vpop.f32.mrf.mxu1  ;;  %v17539_v3 = vpop.f32.mrf.mxu0 }
 0xb7c   : > { %v6048_v5 = vcombine.high %v17539_v3, %v17539_v3  ;;  %v6057_v28 = vmax.f32 %v17539_v3, 1e-20 }
 0xb7d   : > { %v5796_v38 = vpop.f32.mrf.mxu1  ;;  %v6024_v6 = vpop.f32.mrf.mxu0 }
 0xb7e   : > { %v6058_v26 = vmax.f32 %v6048_v5, 1e-20  ;;  %v6047_v29 = vcombine.high %v6024_v6, %v6024_v6  ;;  %v6055_v7 = vmax.f32 %v6024_v6, 1e-20  ;;  %18916 = vrcp.f32 %v6057_v28 }
 0xb7f   : > { %v17518_v9 = vpop.f32.mrf.mxu1  ;;  %v17542_v31 = vpop.f32.mrf.mxu0 }
 0xb80   : > { %18918 = vrcp.f32 %v6058_v26  ;;  %v6056_v13 = vmax.f32 %v6047_v29, 1e-20  ;;  %v6050_v4 = vcombine.high %v17542_v31, %v17542_v31  ;;  %v6061_v14 = vmax.f32 %v17542_v31, 1e-20 }
 0xb81   : > { %18920 = vrcp.f32 %v6055_v7  ;;  %v5942_v40 = vpop.f32.mrf.mxu1  ;;  %v6034_v39 = vpop.f32.mrf.mxu0 }
 0xb82   : > { %18922 = vrcp.f32 %v6056_v13  ;;  %v6062_v16 = vmax.f32 %v6050_v4, 1e-20  ;;  %v6049_v50 = vcombine.high %v6034_v39, %v6034_v39  ;;  %v6059_v44 = vmax.f32 %v6034_v39, 1e-20 }
 0xb83   : > { %18924 = vrcp.f32 %v6061_v14  ;;  %v17532_v49 = vpop.f32.mrf.mxu1 }
 0xb84   : > { %18926 = vrcp.f32 %v6062_v16  ;;  %v6060_v2 = vmax.f32 %v6049_v50, 1e-20 }
 0xb85   : > { %18928 = vrcp.f32 %v6059_v44 }
 0xb86   : > { %18930 = vrcp.f32 %v6060_v2 }
 0xb8b   : > { %v18917_v24 = vpop.eup %18916 }
 0xb8c   : > { %v6073_v36 = vmul.f32 %v18917_v24, %v5577_v43 }
 0xb8d   : > { %v18919_v37 = vpop.eup %18918 }
 0xb8e   : > { %v18921_v42 = vpop.eup %18920  ;;  %v6074_v45 = vmul.f32 %v18919_v37, %v5650_v61 }
 0xb8f   : > { %v18923_v23 = vpop.eup %18922  ;;  %v6071_v25 = vmul.f32 %v18921_v42, %v5431_v21  ;;  %v6369_v42 = vld [vmem:[%s22962_s2 + $0x18] sm:$0xff] }
 0xb90   : > { %v18925_v30 = vpop.eup %18924  ;;  %v6072_v8 = vmul.f32 %v18923_v23, %v5504_v52  ;;  %v6094_v62 = vcombine.low %v6073_v36, %v6074_v45  ;;  %v6368_v23 = vld [vmem:[%s22962_s2 + $0x10] sm:$0xff]  ;;  %17571 = vmatprep.subr.mxu1 %v6369_v42  ;;  %v6367_v45 = vld [vmem:[%s22962_s2 + $0x8] sm:$0xff] }
 0xb91   : > { %v18927_v53 = vpop.eup %18926  ;;  %v6077_v18 = vmul.f32 %v18925_v30, %v5869_v57  ;;  %v6366_v30 = vld [vmem:[%s22962_s2] sm:$0xff]  ;;  %s22966_s2 = sld [smem:[#allocation21_spill]] }
 0xb92   : > { %v18929_v51 = vpop.eup %18928  ;;  %v6093_v54 = vcombine.low %v6071_v25, %v6072_v8  ;;  %v6078_v59 = vmul.f32 %v18927_v53, %v5942_v40  ;;  %v6772_v25 = vld [vmem:[%s22963_s23 + $0x18] sm:$0xff] }
 0xb93   : > { %v18931_v58 = vpop.eup %18930  ;;  %v6075_v63 = vmul.f32 %v18929_v51, %v5723_v47  ;;  %v1397_v47 = vld [vmem:[%s19325_s29 + $0x10] sm:$0xff] }
 0xb94   : > { %17551 = vmatprep.mubr.msk.f32.mxu1 %vm1429_vm1, %v6093_v54  ;;  %v6076_v0 = vmul.f32 %v18931_v58, %v5796_v38  ;;  %v6096_v56 = vcombine.low %v6077_v18, %v6078_v59 }
 0xb95   : > { %17552 = vmatmul.mubr.msk.f32.vlgmr.msra.gmra.mxu1 %vm1429_vm1, %v6094_v62 }
 0xb96   : > { %v6095_v17 = vcombine.low %v6075_v63, %v6076_v0  ;;  %17572 = vmatpush3.msra.mxu1 %v6369_v42 }
 0xb97   : > { %17573 = vmatprep.subr.mxu1 %v6368_v23 }
 0xb98   : > { %17554 = vmatprep.mubr.msk.f32.mxu1 %vm1429_vm1, %v6095_v17  ;;  %17574 = vmatpush3.msra.mxu1 %v6368_v23 }
 0xb99   : > { %17555 = vmatmul.mubr.msk.f32.gmra.mxu1 %vm1429_vm1, %v6096_v56  ;;  %17575 = vmatprep.subr.mxu1 %v6367_v45 }
 0xb9a   : > { %17576 = vmatpush3.msra.mxu1 %v6367_v45 }
 0xb9b   : > { %17577 = vmatprep.subr.mxu1 %v6366_v30 }
 0xb9c   : > { %17578 = vmatpush3.msra.mxu1 %v6366_v30 }
 0xb9d   : > { %17623 = vmatprep.subr.mxu1 %v6772_v25 }
 0xc55   : > { %v17553_v27 = vpop.f32.mrf.mxu1 }
 0xc56   : > { %v6177_v41 = vadd.f32 %v17553_v27, %v15664_v35  ;;  %v15673_v27 = vld [vmem:[%s22964_s3] ss:$0 sm:$0xff]  ;;  %s22968_s3 = sld [smem:[#allocation16_spill]] }
 0xc57   : > { %v6171_v32 = vpop.f32.mrf.mxu1 }
 0xc58   : > { %v6172_v43 = vadd.f32 %v15664_v35, %v6171_v32 }
 0xc59   : > { %v17556_v33 = vpop.f32.mrf.mxu1 }
 0xc5a   : > { %v6187_v34 = vadd.f32 %v17556_v33, %v15664_v35 }
 0xc5b   : > { %v6181_v55 = vpop.f32.mrf.mxu1 }
 0xc5c   : > { %v6182_v21 = vadd.f32 %v15664_v35, %v6181_v55  ;;  %17557 = vmatprep.subr.mxu0 %v6187_v34  ;;  %v15674_v55 = vld [vmem:[%s22965_s5] ss:$0 sm:$0xff]  ;;  %s22967_s5 = sld [smem:[#allocation17_spill]] }
 0xc5d   : > { %17558 = vmatpush3.msra.mxu0 %v6187_v34 }
 0xc5e   : > { %17559 = vmatprep.subr.mxu0 %v6182_v21 }
 0xc5f   : > { %17560 = vmatpush3.msra.mxu0 %v6182_v21 }
 0xc60   : > { %17561 = vmatprep.subr.mxu0 %v6177_v41 }
 0xc61   : > { %17562 = vmatpush3.msra.mxu0 %v6177_v41 }
 0xc62   : > { %17563 = vmatprep.subr.mxu0 %v6172_v43  ;;  %v6585_v42 = vld [vmem:[%s22967_s5 + $0x38] sm:$0xff]  ;;  %v6584_v23 = vld [vmem:[%s22967_s5 + $0x30] sm:$0xff]  ;;  %v6583_v45 = vld [vmem:[%s22967_s5 + $0x28] sm:$0xff] }
 0xc63   : > { %17564 = vmatpush3.msra.mxu0 %v6172_v43  ;;  %v6582_v30 = vld [vmem:[%s22967_s5 + $0x20] sm:$0xff] }
 0xc64   : > { %17566 = vmatmul.mubr.msk.f32.vlgmr.msra.gmra.mxu0 %vm1429_vm1, %v1396_v46 }
 0xc65   : > { %17568 = vmatprep.mubr.msk.f32.mxu0 %vm1429_vm1, %v1397_v47 }
 0xc68   : > { %17569 = vmatmul.mubr.msk.f32.gmra.mxu0 %vm1429_vm1, %v1398_v48  ;;  %v6764_v48 = vld [vmem:[%s22966_s2] sm:$0xff]  ;;  %s22970_s2 = sld [smem:[#allocation24_spill]] }
 0xd24   : > { %v17567_v52 = vpop.f32.mrf.mxu0 }
 0xd25   : > { %v6290_v20 = vadd.f32 %v17567_v52, %v19595_v11 }
 0xd26   : > { %v6268_v57 = vpop.f32.mrf.mxu0 }
 0xd27   : > { %v6289_v60 = vadd.f32 %v6268_v57, %v19593_v10  ;;  %v6296_v61 = vsel %vm1429_vm1, %v6290_v20, 0.0  ;;  %v6771_v57 = vld [vmem:[%s22963_s23 + $0x10] sm:$0xff] }
 0xd28   : > { %6297 = vadd.xlane.f32.xlu1 %v6296_v61  ;;  %v17570_v1 = vpop.f32.mrf.mxu0 }
 0xd29   : > { %v6292_v3 = vadd.f32 %v17570_v1, %v19605_v15  ;;  %v6293_v5 = vsel %vm1429_vm1, %v6289_v60, 0.0  ;;  %v6770_v1 = vld [vmem:[%s22963_s23 + $0x8] sm:$0xff] }
 0xd2a   : > { %6294 = vadd.xlane.f32.xlu0 %v6293_v5  ;;  %v6278_v28 = vpop.f32.mrf.mxu0 }
 0xd2b   : > { %v6291_v38 = vadd.f32 %v6278_v28, %v19597_v12  ;;  %v6302_v6 = vsel %vm1429_vm1, %v6292_v3, 0.0 }
 0xd2c   : > { %6303 = vadd.xlane.f32.xlu1 %v6302_v6  ;;  %v19133_v6 = vld [vmem:[%s19581_s22 + $0x8] sm:$0xff] }
 0xd2d   : > { %v6299_v11 = vsel %vm1429_vm1, %v6291_v38, 0.0 }
 0xd2e   : > { %6300 = vadd.xlane.f32.xlu0 %v6299_v11  ;;  %v20673_v11 = vadd.f32 %v19133_v6, %v6764_v48 }
 0xdb1   : > { %v6298_v26 = vpop.xlane.xlu1 %6297 }
 0xdb2   : > { %v6307_v10 = vmul.f32 0.03125, %v6298_v26  ;;  %v19134_v26 = vld [vmem:[%s19581_s22 + $0x10] sm:$0xff] }
 0xdb3   : > { %v6295_v29 = vpop.xlane.xlu0 %6294 }
 0xdb4   : > { %v6311_v7 = vsub.f32 %v6290_v20, %v6307_v10  ;;  %v6306_v9 = vmul.f32 0.03125, %v6295_v29  ;;  %v20680_v10 = vadd.f32 %v19134_v26, %v6764_v48  ;;  %v15686_v29 = vld [vmem:[%s22963_s23 + $0x38] sm:$0xff] }
 0xdb5   : > { %v6304_v31 = vpop.xlane.xlu1 %6303 }
 0xdb6   : > { %v6310_v13 = vsub.f32 %v6289_v60, %v6306_v9  ;;  %v6309_v15 = vmul.f32 0.03125, %v6304_v31  ;;  %v6315_v4 = vmul.f32 %v6311_v7, %v6311_v7  ;;  %v15685_v31 = vld [vmem:[%s22963_s23 + $0x30] sm:$0xff] }
 0xdb7   : > { %v6301_v14 = vpop.xlane.xlu0 %6300 }
 0xdb8   : > { %v6313_v40 = vsub.f32 %v6292_v3, %v6309_v15  ;;  %v6308_v12 = vmul.f32 0.03125, %v6301_v14  ;;  %v6321_v39 = vsel %vm1429_vm1, %v6315_v4, 0.0  ;;  %v6314_v16 = vmul.f32 %v6310_v13, %v6310_v13  ;;  %v19132_v3 = vld [vmem:[%s19581_s22] sm:$0xff]  ;;  %v15690_v4 = vld [vmem:[%s22963_s23 + $0x58] sm:$0xff]  ;;  %v15689_v14 = vld [vmem:[%s22963_s23 + $0x50] sm:$0xff] }
 0xdb9   : > { %6322 = vadd.xlane.f32.xlu1 %v6321_v39  ;;  %v20665_v5 = vadd.f32 %v19132_v3, %v6764_v48  ;;  %v15683_v15 = vld [vmem:[%s22963_s23 + $0x20] sm:$0xff]  ;;  %v6593_v39 = vld [vmem:[%s22967_s5 + $0x78] sm:$0xff] }
 0xdba   : > { %v6312_v50 = vsub.f32 %v6291_v38, %v6308_v12  ;;  %v6318_v44 = vsel %vm1429_vm1, %v6314_v16, 0.0  ;;  %v6317_v49 = vmul.f32 %v6313_v40, %v6313_v40  ;;  %v6769_v38 = vld [vmem:[%s22963_s23] sm:$0xff]  ;;  %17585 = vmatprep.subr.mxu0 %v6593_v39  ;;  %v6592_v16 = vld [vmem:[%s22967_s5 + $0x70] sm:$0xff] }
 0xdbb   : > { %6319 = vadd.xlane.f32.xlu0 %v6318_v44  ;;  %v15687_v12 = vld [vmem:[%s22963_s23 + $0x40] sm:$0xff]  ;;  %17586 = vmatpush3.msra.mxu0 %v6593_v39 }
 0xdbc   : > { %v6327_v2 = vsel %vm1429_vm1, %v6317_v49, 0.0  ;;  %v6316_v24 = vmul.f32 %v6312_v50, %v6312_v50  ;;  %17587 = vmatprep.subr.mxu0 %v6592_v16  ;;  %v6590_v44 = vld [vmem:[%s22967_s5 + $0x60] sm:$0xff]  ;;  %v6589_v49 = vld [vmem:[%s22967_s5 + $0x58] sm:$0xff] }
 0xdbd   : > { %6328 = vadd.xlane.f32.xlu1 %v6327_v2  ;;  %17588 = vmatpush3.msra.mxu0 %v6592_v16  ;;  %v6588_v2 = vld [vmem:[%s22967_s5 + $0x50] sm:$0xff] }
 0xdbe   : > { %v6324_v37 = vsel %vm1429_vm1, %v6316_v24, 0.0  ;;  %v6587_v24 = vld [vmem:[%s22967_s5 + $0x48] sm:$0xff] }
 0xdbf   : > { %6325 = vadd.xlane.f32.xlu0 %v6324_v37  ;;  %v6586_v37 = vld [vmem:[%s22967_s5 + $0x40] sm:$0xff] }
 0xe42   : > { %v6323_v8 = vpop.xlane.xlu1 %6322 }
 0xe43   : > { %v6331_v53 = vmul.f32 0.03125, %v6323_v8  ;;  %v6580_v8 = vld [vmem:[%s22967_s5 + $0x10] sm:$0xff] }
 0xe44   : > { %v6320_v36 = vpop.xlane.xlu0 %6319 }
 0xe45   : > { %v6335_v51 = vadd.f32 1e-05, %v6331_v53  ;;  %v6330_v54 = vmul.f32 0.03125, %v6320_v36  ;;  %v6579_v53 = vld [vmem:[%s22967_s5 + $0x8] sm:$0xff]  ;;  %v6578_v36 = vld [vmem:[%s22967_s5] sm:$0xff] }
 0xe46   : > { %v6329_v58 = vpop.xlane.xlu1 %6328 }
 0xe47   : > { %18932 = vrsqrt.f32 %v6335_v51  ;;  %v6334_v59 = vadd.f32 1e-05, %v6330_v54  ;;  %v6333_v62 = vmul.f32 0.03125, %v6329_v58  ;;  %v15675_v51 = vld [vmem:[%s22968_s3] ss:$0 sm:$0xff]  ;;  %s22971_s3 = sld [smem:[#allocation25_spill]] }
 0xe48   : > { %v6326_v63 = vpop.xlane.xlu0 %6325 }
 0xe49   : > { %18934 = vrsqrt.f32 %v6334_v59  ;;  %v6337_v0 = vadd.f32 1e-05, %v6333_v62  ;;  %v6332_v18 = vmul.f32 0.03125, %v6326_v63 }
 0xe4b   : > { %18936 = vrsqrt.f32 %v6337_v0  ;;  %v6336_v17 = vadd.f32 1e-05, %v6332_v18 }
 0xe4d   : > { %18938 = vrsqrt.f32 %v6336_v17 }
 0xe54   : > { %v18933_v56 = vpop.eup %18932 }
 0xe55   : > { %v6343_v19 = vmul.f32 %v18933_v56, %v6311_v7  ;;  %v19135_v7 = vld [vmem:[%s19581_s22 + $0x18] sm:$0xff]  ;;  %s22969_s22 = sld [smem:[#allocation23_spill]] }
 0xe56   : > { %v18935_v32 = vpop.eup %18934  ;;  %v20686_v9 = vadd.f32 %v19135_v7, %v6764_v48  ;;  %v20770_v7 = vld [vmem:[%s22955_s9 + $0x28] sm:$0xff] }
 0xe57   : > { %v6342_v35 = vmul.f32 %v18935_v32, %v6310_v13  ;;  %v6353_v34 = vmul.f32 %v15673_v27, %v6343_v19  ;;  %v15684_v13 = vld [vmem:[%s22963_s23 + $0x28] sm:$0xff] }
 0xe58   : > { %v18937_v33 = vpop.eup %18936 }
 0xe59   : > { %v6352_v21 = vmul.f32 %v15673_v27, %v6342_v35  ;;  %v6345_v41 = vmul.f32 %v18937_v33, %v6313_v40  ;;  %v20654_v52 = vadd.f32 %v15674_v55, %v6353_v34  ;;  %v15688_v40 = vld [vmem:[%s22963_s23 + $0x48] sm:$0xff] }
 0xe5a   : > { %v18939_v43 = vpop.eup %18938 }
 0xe5b   : > { %v20651_v46 = vadd.f32 %v15674_v55, %v6352_v21  ;;  %v6344_v47 = vmul.f32 %v18939_v43, %v6312_v50  ;;  %v6355_v20 = vmul.f32 %v15673_v27, %v6345_v41  ;;  %v6591_v50 = vld [vmem:[%s22967_s5 + $0x68] sm:$0xff] }
 0xe5c   : > { %17589 = vmatprep.subr.mxu0 %v6591_v50 }
 0xe5d   : > { %17579 = vmatprep.mubr.msk.f32.mxu1 %vm1429_vm1, %v20651_v46  ;;  %v6354_v60 = vmul.f32 %v15673_v27, %v6344_v47  ;;  %v20667_v28 = vadd.f32 %v15674_v55, %v6355_v20  ;;  %17590 = vmatpush3.msra.mxu0 %v6591_v50  ;;  %v20762_v47 = vld [vmem:[%s22969_s22] ss:$0 sm:$0xff] }
 0xe5e   : > { %17580 = vmatmul.mubr.msk.f32.vlgmr.msra.gmra.mxu1 %vm1429_vm1, %v20654_v52  ;;  %17591 = vmatprep.subr.mxu0 %v6590_v44 }
 0xe5f   : > { %17624 = vmatpush3.msra.mxu1 %v6772_v25  ;;  %v20661_v61 = vadd.f32 %v15674_v55, %v6354_v60  ;;  %17592 = vmatpush3.msra.mxu0 %v6590_v44  ;;  %v6581_v25 = vld [vmem:[%s22967_s5 + $0x18] sm:$0xff]  ;;  %s22977_s5 = sld [smem:[#allocation29_spill]] }
 0xe60   : > { %17625 = vmatprep.subr.mxu1 %v6771_v57  ;;  %17593 = vmatprep.subr.mxu0 %v6589_v49  ;;  %v20794_v44 = vld [vmem:[%s22955_s9 + $0x18] sm:$0xff] }
 0xe61   : > { %17582 = vmatprep.mubr.msk.f32.mxu1 %vm1429_vm1, %v20661_v61  ;;  %17626 = vmatpush3.msra.mxu1 %v6771_v57 }
 0xe62   : > { %17583 = vmatmul.mubr.msk.f32.gmra.mxu1 %vm1429_vm1, %v20667_v28  ;;  %17627 = vmatprep.subr.mxu1 %v6770_v1 }
 0xe63   : > { %17628 = vmatpush3.msra.mxu1 %v6770_v1  ;;  %17631 = vmatprep.mubr.msk.f32.mxu1 %vm1429_vm1, %v20665_v5 }
 0xe64   : > { %17629 = vmatprep.subr.mxu1 %v6769_v38  ;;  %17594 = vmatpush3.msra.mxu0 %v6589_v49 }
 0xe65   : > { %17630 = vmatpush3.msra.mxu1 %v6769_v38  ;;  %17595 = vmatprep.subr.mxu0 %v6588_v2 }
 0xe66   : > { %17632 = vmatmul.mubr.msk.f32.vlgmr.msra.gmra.mxu1 %vm1429_vm1, %v20673_v11  ;;  %17637 = vmatprep.subr.mxu1 %v15686_v29 }
 0xe67   : > { %17634 = vmatprep.mubr.msk.f32.mxu1 %vm1429_vm1, %v20680_v10  ;;  %17638 = vmatpush3.msra.mxu1 %v15686_v29 }
 0xe68   : > { %17639 = vmatprep.subr.mxu1 %v15685_v31  ;;  %17596 = vmatpush3.msra.mxu0 %v6588_v2 }
 0xe69   : > { %17640 = vmatpush3.msra.mxu1 %v15685_v31  ;;  %17597 = vmatprep.subr.mxu0 %v6587_v24 }
 0xe6a   : > { %17635 = vmatmul.mubr.msk.f32.gmra.mxu1 %vm1429_vm1, %v20686_v9  ;;  %17641 = vmatprep.subr.mxu1 %v15684_v13 }
 0xe6b   : > { %17645 = vmatprep.mubr.msk.f32.mxu1 %vm1429_vm1, %v20665_v5  ;;  %17642 = vmatpush3.msra.mxu1 %v15684_v13 }
 0xe6c   : > { %17643 = vmatprep.subr.mxu1 %v15683_v15  ;;  %17598 = vmatpush3.msra.mxu0 %v6587_v24 }
 0xe6d   : > { %17644 = vmatpush3.msra.mxu1 %v15683_v15  ;;  %17599 = vmatprep.subr.mxu0 %v6586_v37 }
 0xe6e   : > { %17651 = vmatprep.subr.mxu1 %v15690_v4  ;;  %17646 = vmatmul.mubr.msk.f32.vlgmr.msra.gmra.mxu1 %vm1429_vm1, %v20673_v11 }
 0xe6f   : > { %17652 = vmatpush3.msra.mxu1 %v15690_v4  ;;  %17648 = vmatprep.mubr.msk.f32.mxu1 %vm1429_vm1, %v20680_v10  ;;  %v20781_v4 = vld [vmem:[%s22955_s9 + $0x20] sm:$0xff] }
 0xe70   : > { %17653 = vmatprep.subr.mxu1 %v15689_v14  ;;  %17600 = vmatpush3.msra.mxu0 %v6586_v37 }
 0xe71   : > { %17654 = vmatpush3.msra.mxu1 %v15689_v14  ;;  %17601 = vmatprep.subr.mxu0 %v6585_v42 }
 0xe72   : > { %17649 = vmatmul.mubr.msk.f32.gmra.mxu1 %vm1429_vm1, %v20686_v9  ;;  %17655 = vmatprep.subr.mxu1 %v15688_v40 }
 0xe73   : > { %17659 = vmatprep.mubr.msk.f32.mxu1 %vm1429_vm1, %v20665_v5  ;;  %17656 = vmatpush3.msra.mxu1 %v15688_v40 }
 0xe74   : > { %17657 = vmatprep.subr.mxu1 %v15687_v12  ;;  %17602 = vmatpush3.msra.mxu0 %v6585_v42 }
 0xe75   : > { %17658 = vmatpush3.msra.mxu1 %v15687_v12  ;;  %17603 = vmatprep.subr.mxu0 %v6584_v23 }
 0xe76   : > { %17665 = vmatprep.subr.mxu1 %v19282_v22  ;;  %17660 = vmatmul.mubr.msk.f32.vlgmr.msra.gmra.mxu1 %vm1429_vm1, %v20673_v11 }
 0xe77   : > { %17662 = vmatprep.mubr.msk.f32.mxu1 %vm1429_vm1, %v20680_v10  ;;  %17604 = vmatpush3.msra.mxu0 %v6584_v23 }
 0xe78   : > { %17605 = vmatprep.subr.mxu0 %v6583_v45 }
 0xe79   : > { %17606 = vmatpush3.msra.mxu0 %v6583_v45 }
 0xe7a   : > { %17663 = vmatmul.mubr.msk.f32.gmra.mxu1 %vm1429_vm1, %v20686_v9  ;;  %17607 = vmatprep.subr.mxu0 %v6582_v30 }
 0xe7b   : > { %17677 = vmatprep.mubr.msk.f32.mxu1 %vm19283_vm2, %v19282_v22  ;;  %17608 = vmatpush3.msra.mxu0 %v6582_v30 }
 0xe7c   : > { %17609 = vmatprep.subr.mxu0 %v6581_v25 }
 0xe7d   : > { %17610 = vmatpush3.msra.mxu0 %v6581_v25 }
 0xe7e   : > { %17611 = vmatprep.subr.mxu0 %v6580_v8 }
 0xe7f   : > { %17612 = vmatpush3.msra.mxu0 %v6580_v8  ;;  %v20806_v8 = vld [vmem:[%s22955_s9 + $0x10] sm:$0xff] }
 0xe80   : > { %17613 = vmatprep.subr.mxu0 %v6579_v53 }
 0xe81   : > { %17614 = vmatpush3.msra.mxu0 %v6579_v53 }
 0xe82   : > { %17615 = vmatprep.subr.mxu0 %v6578_v36 }
 0xe83   : > { %17616 = vmatpush3.msra.mxu0 %v6578_v36 }
 0xe84   : > { %17680 = vmatprep.subr.mxu0 %v19282_v22 }
 0xf1e   : > { %v17581_v54 = vpop.f32.mrf.mxu1 }
 0xf1f   : > { %v20736_v58 = vadd.f32 %v17581_v54, %v15675_v51 }
 0xf20   : > { %v6455_v59 = vpop.f32.mrf.mxu1 }
 0xf21   : > { %v20739_v62 = vmul.f32 0.70710677, %v20736_v58  ;;  %v20741_v63 = vadd.f32 %v15675_v51, %v6455_v59 }
 0xf22   : > { %v17584_v0 = vpop.f32.mrf.mxu1 }
 0xf23   : > { %v6483_v18 = vand.u32 2147483647, %v20739_v62  ;;  %v20745_v17 = vmul.f32 0.70710677, %v20741_v63  ;;  %v20747_v56 = vadd.f32 %v17584_v0, %v15675_v51  ;;  %vm6559_vm7 = vcmp.ge.f32.partialorder %v20739_v62, 0.0 }
 0xf24   : > { %v6465_v19 = vpop.f32.mrf.mxu1 }
 0xf25   : > { %v6487_v27 = vmul.f32 0.3275911, %v6483_v18  ;;  %v6482_v32 = vand.u32 2147483647, %v20745_v17  ;;  %v20751_v35 = vmul.f32 0.70710677, %v20747_v56  ;;  %v20753_v33 = vadd.f32 %v15675_v51, %v6465_v19 }
 0xf26   : > { %v20755_v34 = vpop.f32.mrf.mxu1  ;;  %v6535_v26 = vsub.f32 0.0, %v6483_v18  ;;  %vm6558_vm8 = vcmp.ge.f32.partialorder %v20745_v17, 0.0  ;;  %v6475_v17 = vmul.f32 0.5, %v20736_v58 }
 0xf27   : > { %v6491_v55 = vadd.f32 1.0, %v6487_v27  ;;  %v6486_v21 = vmul.f32 0.3275911, %v6482_v32  ;;  %v6485_v41 = vand.u32 2147483647, %v20751_v35  ;;  %v6534_v15 = vsub.f32 0.0, %v6482_v32 }
 0xf28   : > { %v20759_v43 = vmul.f32 0.70710677, %v20753_v33  ;;  %v6872_v48 = vpop.f32.mrf.mxu1  ;;  %v6539_v40 = vmul.f32 %v6535_v26, %v6483_v18  ;;  %vm6561_vm9 = vcmp.ge.f32.partialorder %v20751_v35, 0.0 }
 0xf29   : > { %18940 = vrcp.f32 %v6491_v55  ;;  %v6490_v20 = vadd.f32 1.0, %v6486_v21  ;;  %v6489_v57 = vmul.f32 0.3275911, %v6485_v41  ;;  %v20766_v1 = vadd.f32 %v20762_v47, %v6872_v48  ;;  %v20825_v21 = vld [vmem:[%s22955_s9 + $0x8] sm:$0xff] }
 0xf2a   : > { %v6484_v60 = vand.u32 2147483647, %v20759_v43  ;;  %v6537_v39 = vsub.f32 0.0, %v6485_v41  ;;  %v6538_v50 = vmul.f32 %v6534_v15, %v6482_v32  ;;  %v6544_v24 = vmul.f32 1.442695, %v6539_v40  ;;  %v20801_v23 = vpop.f32.mrf.mxu1  ;;  %v20841_v15 = vld [vmem:[%s22955_s9] sm:$0xff] }
 0xf2b   : > { %18942 = vrcp.f32 %v6490_v20  ;;  %v6493_v3 = vadd.f32 1.0, %v6489_v57  ;;  %v7077_v29 = vrot.slane %v20766_v1, 4  ;;  %v20774_v31 = vmul.f32 %v20770_v7, %v20766_v1 }
 0xf2c   : > { %v6488_v38 = vmul.f32 0.3275911, %v6484_v60  ;;  %v6536_v37 = vsub.f32 0.0, %v6484_v60  ;;  %v6541_v42 = vmul.f32 %v6537_v39, %v6485_v41  ;;  %v6542_v25 = vmul.f32 1.442695, %v6538_v50  ;;  %v6882_v18 = vpop.f32.mrf.mxu1 }
 0xf2d   : > { %18944 = vrcp.f32 %v6493_v3  ;;  %v7089_v13 = vsel %vm1721_vm3, %v7077_v29, %v20762_v47  ;;  %17666 = vmatpush3.xpose.msk.msra.mxu1 %vm1429_vm1, %v20774_v31  ;;  %v7085_v12 = vsel %vm1721_vm3, %v20762_v47, %v7077_v29  ;;  %v20810_v53 = vmul.f32 %v20806_v8, %v20766_v1 }
 0xf2e   : > { %v6492_v6 = vadd.f32 1.0, %v6488_v38  ;;  %v20784_v14 = vmul.f32 %v20781_v4, %v7089_v13  ;;  %17667 = vmatprep.subr.mxu1 %v19282_v22  ;;  %v20797_v49 = vmul.f32 %v20794_v44, %v7085_v12  ;;  %v6540_v59 = vmul.f32 %v6536_v37, %v6484_v60 }
 0xf2f   : > { %v6548_v0 = vmul.f32 1.442695, %v6541_v42  ;;  %v20828_v41 = vmul.f32 %v20825_v21, %v7089_v13  ;;  %v20834_v3 = vadd.f32 %v20762_v47, %v6882_v18  ;;  %v20844_v40 = vmul.f32 %v20841_v15, %v7085_v12 }
 0xf30   : > { %18946 = vrcp.f32 %v6492_v6  ;;  %v6546_v60 = vmul.f32 1.442695, %v6540_v59  ;;  %vm6560_vm10 = vcmp.ge.f32.partialorder %v20759_v43, 0.0  ;;  %v6477_v43 = vmul.f32 0.5, %v20747_v56 }
 0xf31   : > { %17668 = vmatpush3.xpose.msk.msra.mxu1 %vm1429_vm1, %v20784_v14  ;;  %18948 = vpow2.f32 %v6544_v24  ;;  %v7079_v24 = vrot.slane %v20834_v3, 4  ;;  %v7119_v56 = vmul.f32 0.35355338, %v20834_v3 }
 0xf32   : > { %17669 = vmatprep.subr.mxu1 %v19282_v22  ;;  %18950 = vpow2.f32 %v6542_v25 }
 0xf33   : > { %18952 = vpow2.f32 %v6548_v0 }
 0xf34   : > { %18954 = vpow2.f32 %v6546_v60 }
 0xf35   : > { %17670 = vmatpush3.xpose.msk.msra.mxu1 %vm1429_vm1, %v20797_v49 }
 0xf36   : > { %v20789_v16 = vpop.eup %18940  ;;  %17671 = vmatprep.subr.mxu1 %v19282_v22 }
 0xf37   : > { %v6499_v2 = vmul.f32 1.0614054, %v20789_v16 }
 0xf38   : > { %v20803_v45 = vpop.eup %18942 }
 0xf39   : > { %v6503_v30 = vadd.f32 -1.4531521, %v6499_v2  ;;  %v6498_v36 = vmul.f32 1.0614054, %v20803_v45  ;;  %17672 = vmatpush3.xpose.msk.msra.mxu1 %vm1429_vm1, %v20810_v53 }
 0xf3a   : > { %v20815_v51 = vpop.eup %18944  ;;  %17673 = vmatprep.subr.mxu1 %v19282_v22 }
 0xf3b   : > { %v6507_v54 = vmul.f32 %v20789_v16, %v6503_v30  ;;  %v6502_v19 = vadd.f32 -1.4531521, %v6498_v36  ;;  %v6501_v27 = vmul.f32 1.0614054, %v20815_v51  ;;  %v7117_v36 = vmul.f32 0.35355338, %v20766_v1 }
 0xf3d   : > { %v6511_v32 = vadd.f32 1.4214138, %v6507_v54  ;;  %v20820_v55 = vpop.eup %18946  ;;  %v6506_v48 = vmul.f32 %v20803_v45, %v6502_v19  ;;  %v6505_v20 = vadd.f32 -1.4531521, %v6501_v27  ;;  %17674 = vmatpush3.xpose.msk.msra.mxu1 %vm1429_vm1, %v20828_v41  ;;  %v20855_v54 = vmul.f32 %v20770_v7, %v20834_v3 }
 0xf3e   : > { %v6500_v38 = vmul.f32 1.0614054, %v20820_v55  ;;  %17675 = vmatprep.subr.mxu1 %v19282_v22  ;;  %v7091_v19 = vsel %vm1721_vm3, %v7079_v24, %v20762_v47  ;;  %v18949_v27 = vpop.eup %18948 }
 0xf3f   : > { %v6515_v57 = vmul.f32 %v20789_v16, %v6511_v32  ;;  %v6510_v6 = vadd.f32 1.4214138, %v6506_v48  ;;  %v6509_v26 = vmul.f32 %v20815_v51, %v6505_v20  ;;  %v20912_v35 = vmul.f32 %v20825_v21, %v7091_v19 }
 0xf40   : > { %v6504_v13 = vadd.f32 -1.4531521, %v6500_v38 }
 0xf41   : > { %v6519_v29 = vadd.f32 -0.28449672, %v6515_v57  ;;  %v6514_v39 = vmul.f32 %v20803_v45, %v6510_v6  ;;  %v6513_v50 = vadd.f32 1.4214138, %v6509_v26  ;;  %17676 = vmatpush3.xpose.msk.msra.mxu1 %vm1429_vm1, %v20844_v40  ;;  %v18951_v6 = vpop.eup %18950 }
 0xf42   : > { %v6508_v37 = vmul.f32 %v20820_v55, %v6504_v13  ;;  %17695 = vmatprep.subr.mxu1 %v19282_v22 }
 0xf43   : > { %v6523_v2 = vmul.f32 %v20789_v16, %v6519_v29  ;;  %v6518_v42 = vadd.f32 -0.28449672, %v6514_v39  ;;  %v6517_v30 = vmul.f32 %v20815_v51, %v6513_v50  ;;  %v7087_v29 = vsel %vm1721_vm3, %v20762_v47, %v7079_v24 }
 0xf44   : > { %v6512_v12 = vadd.f32 1.4214138, %v6508_v37  ;;  %17678 = vmatmul.mubr.msk.f32.vlgmr.msra.gmra.mxu1 %vm1429_vm1, %v7117_v36  ;;  %v20888_v24 = vadd.f32 %v20755_v34, %v20762_v47 }
 0xf45   : > { %v6527_v25 = vadd.f32 0.2548296, %v6523_v2  ;;  %v6522_v59 = vmul.f32 %v20803_v45, %v6518_v42  ;;  %v6521_v0 = vadd.f32 -0.28449672, %v6517_v30  ;;  %17696 = vmatpush3.xpose.msk.msra.mxu1 %vm1429_vm1, %v20855_v54  ;;  %17707 = vmatprep.mubr.msk.f32.mxu1 %vm19283_vm2, %v19282_v22  ;;  %v18953_v2 = vpop.eup %18952 }
 0xf46   : > { %v6516_v1 = vmul.f32 %v20820_v55, %v6512_v12  ;;  %17697 = vmatprep.subr.mxu1 %v19282_v22  ;;  %v18955_v12 = vpop.eup %18954 }
 0xf47   : > { %v6531_v18 = vmul.f32 %v20789_v16, %v6527_v25  ;;  %v6526_v32 = vadd.f32 0.2548296, %v6522_v59  ;;  %v6525_v48 = vmul.f32 %v20815_v51, %v6521_v0  ;;  %v20870_v16 = vmul.f32 %v20781_v4, %v7091_v19 }
 0xf48   : > { %v6520_v57 = vadd.f32 -0.28449672, %v6516_v1  ;;  %v6474_v0 = vmul.f32 0.5, %v20741_v63  ;;  %v20924_v19 = vmul.f32 %v20841_v15, %v7087_v29 }
 0xf49   : > { %v6551_v20 = vmul.f32 %v18949_v27, %v6531_v18  ;;  %v6530_v60 = vmul.f32 %v20803_v45, %v6526_v32  ;;  %v6529_v38 = vadd.f32 0.2548296, %v6525_v48  ;;  %17698 = vmatpush3.xpose.msk.msra.mxu1 %vm1429_vm1, %v20870_v16  ;;  %v20884_v45 = vmul.f32 %v20794_v44, %v7087_v29 }
 0xf4a   : > { %v6524_v13 = vmul.f32 %v20820_v55, %v6520_v57  ;;  %17699 = vmatprep.subr.mxu1 %v19282_v22  ;;  %v20896_v27 = vmul.f32 %v20806_v8, %v20834_v3  ;;  %v20906_v57 = vmul.f32 %v20770_v7, %v20888_v24  ;;  %v7101_v3 = vmul.f32 %v20806_v8, %v20888_v24 }
 0xf4b   : > { %v6555_v26 = vsub.f32 1.0, %v6551_v20  ;;  %v6550_v39 = vmul.f32 %v18951_v6, %v6530_v60  ;;  %v6533_v50 = vmul.f32 %v20815_v51, %v6529_v38 }
 0xf4c   : > { %v6528_v42 = vadd.f32 0.2548296, %v6524_v13 }
 0xf4d   : > { %v6563_v37 = vsub.f32 0.0, %v6555_v26  ;;  %v6554_v30 = vsub.f32 1.0, %v6550_v39  ;;  %v6553_v25 = vmul.f32 %v18953_v2, %v6533_v50  ;;  %17700 = vmatpush3.xpose.msk.msra.mxu1 %vm1429_vm1, %v20884_v45  ;;  %v6476_v39 = vmul.f32 0.5, %v20753_v33 }
 0xf4e   : > { %v6532_v51 = vmul.f32 %v20820_v55, %v6528_v42  ;;  %v7078_v55 = vrot.slane %v20888_v24, 4  ;;  %17701 = vmatprep.subr.mxu1 %v19282_v22 }
 0xf4f   : > { %v6567_v36 = vsel %vm6559_vm7, %v6555_v26, %v6563_v37  ;;  %v6562_v59 = vsub.f32 0.0, %v6554_v30  ;;  %v6557_v62 = vsub.f32 1.0, %v6553_v25 }
 0xf50   : > { %v6552_v18 = vmul.f32 %v18955_v12, %v6532_v51  ;;  %v6571_v1 = vadd.f32 1.0, %v6567_v36  ;;  %v7090_v13 = vsel %vm1721_vm3, %v7078_v55, %v20762_v47  ;;  %v7086_v42 = vsel %vm1721_vm3, %v20762_v47, %v7078_v55 }
 0xf51   : > { %v6566_v34 = vsel %vm6558_vm8, %v6554_v30, %v6562_v59  ;;  %v6565_v32 = vsub.f32 0.0, %v6557_v62  ;;  %17702 = vmatpush3.xpose.msk.msra.mxu1 %vm1429_vm1, %v20896_v27  ;;  %v20928_v37 = vmul.f32 %v20781_v4, %v7090_v13  ;;  %v20941_v29 = vmul.f32 %v20794_v44, %v7086_v42  ;;  %v20963_v30 = vpop.f32.mrf.mxu1 }
 0xf52   : > { %v6570_v63 = vadd.f32 1.0, %v6566_v34  ;;  %v6556_v48 = vsub.f32 1.0, %v6552_v18  ;;  %v6575_v6 = vmul.f32 %v6571_v1, %v6475_v17  ;;  %17703 = vmatprep.subr.mxu1 %v19282_v22  ;;  %v7118_v51 = vmul.f32 0.35355338, %v20888_v24 }
 0xf53   : > { %v6569_v20 = vsel %vm6561_vm9, %v6557_v62, %v6565_v32  ;;  %v20968_v25 = vpop.f32.mrf.mxu1 }
 0xf54   : > { %v6574_v60 = vmul.f32 %v6570_v63, %v6474_v0  ;;  %v6564_v38 = vsub.f32 0.0, %v6556_v48  ;;  %v6573_v26 = vadd.f32 1.0, %v6569_v20  ;;  %v21005_v0 = vld [vmem:[%s22969_s22 + $0x2] ss:$0 sm:$0xff] }
 0xf55   : > { %17704 = vmatpush3.xpose.msk.msra.mxu1 %vm1429_vm1, %v20912_v35 }
 0xf56   : > { %17617 = vmatprep.mubr.f32.mxu0 %v6574_v60  ;;  %v6568_v58 = vsel %vm6560_vm10, %v6556_v48, %v6564_v38  ;;  %17705 = vmatprep.subr.mxu1 %v19282_v22  ;;  %v6577_v33 = vmul.f32 %v6573_v26, %v6477_v43 }
 0xf57   : > { %17618 = vmatmul.mubr.f32.vlgmr.msra.gmra.mxu0 %v6575_v6  ;;  %v6572_v50 = vadd.f32 1.0, %v6568_v58 }
 0xf58   : > { %17681 = vmatpush3.xpose.msk.msra.mxu0 %vm1429_vm1, %v20906_v57 }
 0xf59   : > { %v6576_v2 = vmul.f32 %v6572_v50, %v6476_v39  ;;  %17682 = vmatprep.subr.mxu0 %v19282_v22  ;;  %17706 = vmatpush3.xpose.msk.msra.mxu1 %vm1429_vm1, %v20924_v19  ;;  %v21060_v39 = vld [vmem:[%s22954_s13] sm:$0xff] }
 0xf5a   : > { %17725 = vmatprep.subr.mxu1 %v19282_v22 }
 0xf5b   : > { %17620 = vmatprep.mubr.f32.mxu0 %v6576_v2 }
 0xf5c   : > { %17621 = vmatmul.mubr.f32.gmra.mxu0 %v6577_v33  ;;  %17708 = vmatmul.mubr.msk.f32.vlgmr.msra.gmra.mxu1 %vm1429_vm1, %v7119_v56 }
 0xf5d   : > { %17683 = vmatpush3.xpose.msk.msra.mxu0 %vm1429_vm1, %v20928_v37  ;;  %17692 = vmatprep.mubr.msk.f32.mxu0 %vm19283_vm2, %v19282_v22 }
 0xf5e   : > { %17684 = vmatprep.subr.mxu0 %v19282_v22  ;;  %17726 = vmatpush3.msra.mxu1 %v20774_v31  ;;  %v6888_v31 = vadd.f32 %v20801_v23, %v20762_v47  ;;  %v20974_v23 = vpop.f32.mrf.mxu1 }
 0xf5f   : > { %17727 = vmatprep.subr.mxu1 %v19282_v22  ;;  %17737 = vmatprep.mubr.msk.f32.mxu1 %vm19283_vm2, %v19282_v22 }
 0xf60   : > { %17728 = vmatpush3.msra.mxu1 %v20784_v14  ;;  %v7100_v14 = vmul.f32 %v20825_v21, %v7090_v13  ;;  %v20978_v36 = vpop.f32.mrf.mxu1  ;;  %v7120_v63 = vmul.f32 0.35355338, %v6888_v31 }
 0xf61   : > { %17685 = vmatpush3.xpose.msk.msra.mxu0 %vm1429_vm1, %v20941_v29  ;;  %17729 = vmatprep.subr.mxu1 %v19282_v22 }
 0xf62   : > { %17686 = vmatprep.subr.mxu0 %v19282_v22  ;;  %17730 = vmatpush3.msra.mxu1 %v20797_v49  ;;  %v7080_v49 = vrot.slane %v6888_v31, 4 }
 0xf63   : > { %17731 = vmatprep.subr.mxu1 %v19282_v22 }
 0xf64   : > { %17732 = vmatpush3.msra.mxu1 %v20810_v53  ;;  %v7099_v53 = vmul.f32 %v20841_v15, %v7086_v42  ;;  %v7092_v12 = vsel %vm1721_vm3, %v7080_v49, %v20762_v47  ;;  %v7088_v62 = vsel %vm1721_vm3, %v20762_v47, %v7080_v49  ;;  %v21020_v47 = vmul.f32 %v20806_v8, %v6888_v31 }
 0xf65   : > { %17687 = vmatpush3.xpose.msk.msra.mxu0 %vm1429_vm1, %v7101_v3  ;;  %17733 = vmatprep.subr.mxu1 %v19282_v22  ;;  %v20995_v59 = vmul.f32 %v20781_v4, %v7092_v12  ;;  %v21014_v34 = vmul.f32 %v20794_v44, %v7088_v62  ;;  %v21026_v32 = vmul.f32 %v20825_v21, %v7092_v12 }
 0xf66   : > { %17688 = vmatprep.subr.mxu0 %v19282_v22  ;;  %17734 = vmatpush3.msra.mxu1 %v20828_v41  ;;  %v20982_v41 = vmul.f32 %v20770_v7, %v6888_v31  ;;  %v21032_v55 = vmul.f32 %v20841_v15, %v7088_v62 }
 0xf67   : > { %17735 = vmatprep.subr.mxu1 %v19282_v22 }
 0xf68   : > { %17736 = vmatpush3.msra.mxu1 %v20844_v40  ;;  %v20990_v40 = vpop.f32.mrf.mxu1 }
 0xf69   : > { %17689 = vmatpush3.xpose.msk.msra.mxu0 %vm1429_vm1, %v7100_v14  ;;  %17755 = vmatprep.subr.mxu1 %v19282_v22 }
 0xf6a   : > { %17690 = vmatprep.subr.mxu0 %v19282_v22  ;;  %v21000_v24 = vpop.f32.mrf.mxu1 }
 0xf6c   : > { %v17664_v18 = vpop.f32.mrf.mxu1 }
 0xf6d   : > { %17691 = vmatpush3.xpose.msk.msra.mxu0 %vm1429_vm1, %v7099_v53  ;;  %v21010_v1 = vadd.f32 %v17664_v18, %v21005_v0 }
 0xf6e   : > { %17710 = vmatprep.subr.mxu0 %v19282_v22  ;;  %v21049_v48 = vpop.f32.mrf.mxu1 }
 0xf70   : > { %17693 = vmatmul.mubr.msk.f32.vlgmr.msra.gmra.mxu0 %vm1429_vm1, %v7118_v51 }
 0xf71   : > { %17711 = vmatpush3.xpose.msk.msra.mxu0 %vm1429_vm1, %v20982_v41  ;;  %17722 = vmatprep.mubr.msk.f32.mxu0 %vm19283_vm2, %v19282_v22 }
 0xf72   : > { %17712 = vmatprep.subr.mxu0 %v19282_v22 }
 0xf75   : > { %17713 = vmatpush3.xpose.msk.msra.mxu0 %vm1429_vm1, %v20995_v59 }
 0xf76   : > { %17714 = vmatprep.subr.mxu0 %v19282_v22 }
 0xf79   : > { %17715 = vmatpush3.xpose.msk.msra.mxu0 %vm1429_vm1, %v21014_v34 }
 0xf7a   : > { %17716 = vmatprep.subr.mxu0 %v19282_v22 }
 0xf7d   : > { %17717 = vmatpush3.xpose.msk.msra.mxu0 %vm1429_vm1, %v21020_v47 }
 0xf7e   : > { %17718 = vmatprep.subr.mxu0 %v19282_v22 }
 0xf81   : > { %17719 = vmatpush3.xpose.msk.msra.mxu0 %vm1429_vm1, %v21026_v32 }
 0xf82   : > { %17720 = vmatprep.subr.mxu0 %v19282_v22 }
 0xf85   : > { %17721 = vmatpush3.xpose.msk.msra.mxu0 %vm1429_vm1, %v21032_v55 }
 0xf86   : > { %17740 = vmatprep.subr.mxu0 %v19282_v22 }
 0xf88   : > { %17723 = vmatmul.mubr.msk.f32.vlgmr.msra.gmra.mxu0 %vm1429_vm1, %v7120_v63 }
 0xf89   : > { %17741 = vmatpush3.msra.mxu0 %v20906_v57  ;;  %17752 = vmatprep.mubr.msk.f32.mxu0 %vm19283_vm2, %v19282_v22 }
 0xf8a   : > { %17742 = vmatprep.subr.mxu0 %v19282_v22 }
 0xf8b   : > { %17743 = vmatpush3.msra.mxu0 %v20928_v37 }
 0xf8c   : > { %17744 = vmatprep.subr.mxu0 %v19282_v22 }
 0xf8d   : > { %17745 = vmatpush3.msra.mxu0 %v20941_v29 }
 0xf8e   : > { %17746 = vmatprep.subr.mxu0 %v19282_v22 }
 0xf8f   : > { %17747 = vmatpush3.msra.mxu0 %v7101_v3 }
 0xf90   : > { %17748 = vmatprep.subr.mxu0 %v19282_v22 }
 0xf91   : > { %17749 = vmatpush3.msra.mxu0 %v7100_v14 }
 0xf92   : > { %17750 = vmatprep.subr.mxu0 %v19282_v22 }
 0xf93   : > { %17751 = vmatpush3.msra.mxu0 %v7099_v53 }
 0xf94   : > { %17770 = vmatprep.subr.mxu0 %v19282_v22 }
0x1004   : > { %v7208_v17 = vpop.f32.mrf.mxu1 }
0x1005   : > { %v7209_v2 = vadd.f32 %v21060_v39, %v7208_v17 }
0x1006   : > { %v17679_v20 = vpop.f32.mrf.mxu1 }
0x1007   : > { %v7485_v33 = vsel %vm2122_vm4, %v7209_v2, -inf }
0x1017   : > { %v21051_v60 = vpop.f32.mrf.mxu0 }
0x1019   : > { %v21053_v6 = vpop.f32.mrf.mxu0 }
0x101c   : > { %v7390_v57 = vpop.f32.mrf.mxu1  ;;  %v21055_v58 = vpop.f32.mrf.mxu0 }
0x101d   : > { %v7391_v3 = vadd.f32 %v21060_v39, %v7390_v57 }
0x101e   : > { %v17709_v38 = vpop.f32.mrf.mxu1  ;;  %v21057_v26 = vpop.f32.mrf.mxu0 }
0x101f   : > { %v7491_v14 = vsel %vm2122_vm4, %v7391_v3, -inf }
0x1030   : > { %v7299_v13 = vpop.f32.mrf.mxu0 }
0x1031   : > { %v7300_v50 = vadd.f32 %v21060_v39, %v7299_v13 }
0x1032   : > { %v17694_v43 = vpop.f32.mrf.mxu0 }
0x1033   : > { %v7488_v37 = vsel %vm2122_vm4, %v7300_v50, -inf }
0x1034   : > { %7489 = vmax.xlane.f32.xlu0 %v7488_v37 }
0x1038   : > { %7486 = vmax.xlane.f32.xlu0 %v7485_v33 }
0x1048   : > { %v7481_v56 = vpop.f32.mrf.mxu0 }
0x1049   : > { %v7482_v42 = vadd.f32 %v21060_v39, %v7481_v56 }
0x104a   : > { %v17724_v29 = vpop.f32.mrf.mxu0 }
0x104b   : > { %v7494_v31 = vsel %vm2122_vm4, %v7482_v42, -inf }
0x104c   : > { %7495 = vmax.xlane.f32.xlu1 %v7494_v31 }
0x1050   : > { %7492 = vmax.xlane.f32.xlu1 %v7491_v14 }
0x10bd   : > { %v7490_v49 = vpop.xlane.xlu0 %7489 }
0x10be   : > { %v7498_v53 = vsub.f32 %v7300_v50, %v7490_v49 }
0x10c0   : > { %v7503_v51 = vmul.f32 1.442695, %v7498_v53 }
0x10c1   : > { %v7487_v12 = vpop.xlane.xlu0 %7486 }
0x10c2   : > { %18956 = vpow2.f32 %v7503_v51  ;;  %v7497_v62 = vsub.f32 %v7209_v2, %v7487_v12 }
0x10c4   : > { %v7501_v18 = vmul.f32 1.442695, %v7497_v62 }
0x10c6   : > { %18958 = vpow2.f32 %v7501_v18 }
0x10cf   : > { %v21070_v63 = vpop.eup %18956 }
0x10d0   : > { %17753 = vmatmul.mubr.msk.f32.vlgmr.msra.gmra.mxu0 %vm2122_vm4, %v21070_v63 }
0x10d1   : > { %17771 = vmatpush3.msra.mxu0 %v20982_v41  ;;  %17782 = vmatprep.mubr.msk.f32.mxu0 %vm19283_vm2, %v19282_v22 }
0x10d2   : > { %17772 = vmatprep.subr.mxu0 %v19282_v22 }
0x10d3   : > { %v18959_v17 = vpop.eup %18958  ;;  %17773 = vmatpush3.msra.mxu0 %v20995_v59 }
0x10d4   : > { %17774 = vmatprep.subr.mxu0 %v19282_v22  ;;  %17738 = vmatmul.mubr.msk.f32.vlgmr.msra.gmra.mxu1 %vm2122_vm4, %v18959_v17 }
0x10d5   : > { %17756 = vmatpush3.msra.mxu1 %v20855_v54  ;;  %17775 = vmatpush3.msra.mxu0 %v21014_v34  ;;  %v7496_v20 = vpop.xlane.xlu1 %7495 }
0x10d6   : > { %17757 = vmatprep.subr.mxu1 %v19282_v22  ;;  %17776 = vmatprep.subr.mxu0 %v19282_v22  ;;  %v7500_v41 = vsub.f32 %v7482_v42, %v7496_v20 }
0x10d7   : > { %17758 = vmatpush3.msra.mxu1 %v20870_v16  ;;  %17777 = vmatpush3.msra.mxu0 %v21020_v47  ;;  %v21098_v47 = vld [vmem:[%s22969_s22 + $0x1] ss:$0 sm:$0xff] }
0x10d8   : > { %v7507_v59 = vmul.f32 1.442695, %v7500_v41  ;;  %17759 = vmatprep.subr.mxu1 %v19282_v22  ;;  %17778 = vmatprep.subr.mxu0 %v19282_v22  ;;  %v21138_v13 = vadd.f32 %v20963_v30, %v21098_v47  ;;  %v21166_v37 = vadd.f32 %v21098_v47, %v20978_v36 }
0x10d9   : > { %17760 = vmatpush3.msra.mxu1 %v20884_v45  ;;  %17779 = vmatpush3.msra.mxu0 %v21026_v32  ;;  %v7493_v54 = vpop.xlane.xlu1 %7492  ;;  %v6964_v45 = vadd.f32 %v21098_v47, %v20968_v25 }
0x10da   : > { %18960 = vpow2.f32 %v7507_v59  ;;  %17761 = vmatprep.subr.mxu1 %v19282_v22  ;;  %17780 = vmatprep.subr.mxu0 %v19282_v22  ;;  %v7499_v34 = vsub.f32 %v7391_v3, %v7493_v54  ;;  %v7903_v43 = vrot.slane %v21138_v13, 4  ;;  %v21162_v2 = vmul.f32 %v20770_v7, %v21138_v13 }
0x10db   : > { %17762 = vmatpush3.msra.mxu1 %v20896_v27  ;;  %17781 = vmatpush3.msra.mxu0 %v21032_v55  ;;  %v7902_v27 = vrot.slane %v6964_v45, 4  ;;  %v21109_v55 = vmul.f32 %v20770_v7, %v6964_v45  ;;  %v21146_v50 = vmul.f32 %v20806_v8, %v6964_v45  ;;  %v7904_v56 = vrot.slane %v21166_v37, 4 }
0x10dc   : > { %v7505_v16 = vmul.f32 1.442695, %v7499_v34  ;;  %17763 = vmatprep.subr.mxu1 %v19282_v22  ;;  %17803 = vmatprep.subr.mxu0 %v19282_v22  ;;  %v7915_v33 = vsel %vm1721_vm3, %v7903_v43, %v21098_v47  ;;  %v7911_v29 = vsel %vm1721_vm3, %v21098_v47, %v7903_v43  ;;  %v7942_v3 = vmul.f32 0.35355338, %v6964_v45 }
0x10dd   : > { %17764 = vmatpush3.msra.mxu1 %v20912_v35  ;;  %17767 = vmatprep.mubr.msk.f32.mxu1 %vm19283_vm2, %v19282_v22  ;;  %v7914_v35 = vsel %vm1721_vm3, %v7902_v27, %v21098_v47  ;;  %v7910_v57 = vsel %vm1721_vm3, %v21098_v47, %v7902_v27  ;;  %v21186_v42 = vmul.f32 %v20781_v4, %v7915_v33  ;;  %v7944_v27 = vmul.f32 0.35355338, %v21166_v37 }
0x10de   : > { %18962 = vpow2.f32 %v7505_v16  ;;  %17765 = vmatprep.subr.mxu1 %v19282_v22  ;;  %v21120_v25 = vmul.f32 %v20781_v4, %v7914_v35  ;;  %v21133_v38 = vmul.f32 %v20794_v44, %v7910_v57  ;;  %v21158_v30 = vmul.f32 %v20825_v21, %v7914_v35 }
0x10df   : > { %17766 = vmatpush3.msra.mxu1 %v20924_v19  ;;  %v21181_v36 = vmul.f32 %v20841_v15, %v7910_v57  ;;  %v21199_v31 = vmul.f32 %v20770_v7, %v21166_v37  ;;  %v21204_v14 = vmul.f32 %v20794_v44, %v7911_v29  ;;  %v7916_v49 = vsel %vm1721_vm3, %v7904_v56, %v21098_v47 }
0x10e0   : > { %17785 = vmatprep.subr.mxu1 %v20770_v7  ;;  %v21217_v53 = vmul.f32 %v20781_v4, %v7916_v49  ;;  %v21221_v51 = vmul.f32 %v20806_v8, %v21138_v13  ;;  %v7912_v12 = vsel %vm1721_vm3, %v21098_v47, %v7904_v56  ;;  %v21235_v18 = vmul.f32 %v20825_v21, %v7915_v33 }
0x10e1   : > { %v21232_v62 = vmul.f32 %v20794_v44, %v7912_v12  ;;  %v7924_v20 = vmul.f32 %v20841_v15, %v7911_v29  ;;  %v21257_v59 = vmul.f32 %v20825_v21, %v7916_v49  ;;  %v21272_v16 = vmul.f32 %v20841_v15, %v7912_v12 }
0x10e7   : > { %v18961_v32 = vpop.eup %18960 }
0x10e8   : > { %17783 = vmatmul.mubr.msk.f32.vlgmr.msra.gmra.mxu0 %vm2122_vm4, %v18961_v32 }
0x10e9   : > { %17804 = vmatpush3.xpose.msk.msra.mxu0 %vm1429_vm1, %v21109_v55  ;;  %17815 = vmatprep.mubr.msk.f32.mxu0 %vm19283_vm2, %v19282_v22 }
0x10ea   : > { %17805 = vmatprep.subr.mxu0 %v19282_v22 }
0x10eb   : > { %v18963_v19 = vpop.eup %18962 }
0x10ec   : > { %17768 = vmatmul.mubr.msk.f32.vlgmr.msra.gmra.mxu1 %vm2122_vm4, %v18963_v19 }
0x10ed   : > { %17786 = vmatpush3.msra.mxu1 %v20770_v7  ;;  %17806 = vmatpush3.xpose.msk.msra.mxu0 %vm1429_vm1, %v21120_v25 }
0x10ee   : > { %17787 = vmatprep.subr.mxu1 %v20781_v4  ;;  %17797 = vmatprep.mubr.msk.f32.mxu1 %vm2122_vm4, %v18959_v17  ;;  %v21246_v17 = vmul.f32 %v20806_v8, %v21166_v37 }
0x10ef   : > { %17788 = vmatpush3.msra.mxu1 %v20781_v4  ;;  %17807 = vmatprep.subr.mxu0 %v19282_v22 }
0x10f0   : > { %17789 = vmatprep.subr.mxu1 %v20794_v44 }
0x10f1   : > { %17790 = vmatpush3.msra.mxu1 %v20794_v44  ;;  %17808 = vmatpush3.xpose.msk.msra.mxu0 %vm1429_vm1, %v21133_v38 }
0x10f2   : > { %17791 = vmatprep.subr.mxu1 %v20806_v8  ;;  %17809 = vmatprep.subr.mxu0 %v19282_v22 }
0x10f3   : > { %17792 = vmatpush3.msra.mxu1 %v20806_v8 }
0x10f4   : > { %17793 = vmatprep.subr.mxu1 %v20825_v21 }
0x10f5   : > { %17794 = vmatpush3.msra.mxu1 %v20825_v21  ;;  %17810 = vmatpush3.xpose.msk.msra.mxu0 %vm1429_vm1, %v21146_v50 }
0x10f6   : > { %17795 = vmatprep.subr.mxu1 %v20841_v15  ;;  %17811 = vmatprep.subr.mxu0 %v19282_v22 }
0x10f7   : > { %17796 = vmatpush3.msra.mxu1 %v20841_v15 }
0x10f8   : > { %17798 = vmatmul.mubr.msk.f32.vlgmr.msra.gmra.mxu1 %vm2122_vm4, %v21070_v63  ;;  %17818 = vmatprep.subr.mxu1 %v19282_v22  ;;  %v6979_v63 = vadd.f32 %v20974_v23, %v21098_v47  ;;  %v7943_v23 = vmul.f32 0.35355338, %v21138_v13 }
0x10f9   : > { %17800 = vmatprep.mubr.msk.f32.mxu1 %vm2122_vm4, %v18963_v19  ;;  %17812 = vmatpush3.xpose.msk.msra.mxu0 %vm1429_vm1, %v21158_v30 }
0x10fa   : > { %17819 = vmatpush3.xpose.msk.msra.mxu1 %vm1429_vm1, %v21162_v2  ;;  %17813 = vmatprep.subr.mxu0 %v19282_v22  ;;  %v7905_v41 = vrot.slane %v6979_v63, 4  ;;  %v21260_v54 = vmul.f32 %v20770_v7, %v6979_v63 }
0x10fb   : > { %17820 = vmatprep.subr.mxu1 %v19282_v22 }
0x10fc   : > { %17801 = vmatmul.mubr.msk.f32.gmra.mxu1 %vm2122_vm4, %v18961_v32  ;;  %v7917_v34 = vsel %vm1721_vm3, %v7905_v41, %v21098_v47  ;;  %v7913_v45 = vsel %vm1721_vm3, %v21098_v47, %v7905_v41  ;;  %v21301_v47 = vmul.f32 %v20806_v8, %v6979_v63 }
0x10fd   : > { %17814 = vmatpush3.xpose.msk.msra.mxu0 %vm1429_vm1, %v21181_v36  ;;  %17830 = vmatprep.mubr.msk.f32.mxu1 %vm19283_vm2, %v19282_v22  ;;  %v21277_v7 = vmul.f32 %v20781_v4, %v7917_v34  ;;  %v21290_v4 = vmul.f32 %v20794_v44, %v7913_v45  ;;  %v21312_v44 = vmul.f32 %v20825_v21, %v7917_v34  ;;  %v7945_v21 = vmul.f32 0.35355338, %v6979_v63 }
0x10fe   : > { %17821 = vmatpush3.xpose.msk.msra.mxu1 %vm1429_vm1, %v21186_v42  ;;  %17833 = vmatprep.subr.mxu0 %v19282_v22  ;;  %v21321_v8 = vmul.f32 %v20841_v15, %v7913_v45 }
0x10ff   : > { %17822 = vmatprep.subr.mxu1 %v19282_v22 }
0x1100   : > { %17816 = vmatmul.mubr.msk.f32.vlgmr.msra.gmra.mxu0 %vm1429_vm1, %v7942_v3 }
0x1101   : > { %17834 = vmatpush3.xpose.msk.msra.mxu0 %vm1429_vm1, %v21199_v31  ;;  %17845 = vmatprep.mubr.msk.f32.mxu0 %vm19283_vm2, %v19282_v22 }
0x1102   : > { %17823 = vmatpush3.xpose.msk.msra.mxu1 %vm1429_vm1, %v21204_v14  ;;  %17835 = vmatprep.subr.mxu0 %v19282_v22 }
0x1103   : > { %17824 = vmatprep.subr.mxu1 %v19282_v22 }
0x1105   : > { %17836 = vmatpush3.xpose.msk.msra.mxu0 %vm1429_vm1, %v21217_v53 }
0x1106   : > { %17825 = vmatpush3.xpose.msk.msra.mxu1 %vm1429_vm1, %v21221_v51  ;;  %17837 = vmatprep.subr.mxu0 %v19282_v22 }
0x1107   : > { %17826 = vmatprep.subr.mxu1 %v19282_v22 }
0x1109   : > { %17838 = vmatpush3.xpose.msk.msra.mxu0 %vm1429_vm1, %v21232_v62 }
0x110a   : > { %17827 = vmatpush3.xpose.msk.msra.mxu1 %vm1429_vm1, %v21235_v18  ;;  %17839 = vmatprep.subr.mxu0 %v19282_v22 }
0x110b   : > { %17828 = vmatprep.subr.mxu1 %v19282_v22 }
0x110d   : > { %17840 = vmatpush3.xpose.msk.msra.mxu0 %vm1429_vm1, %v21246_v17 }
0x110e   : > { %17829 = vmatpush3.xpose.msk.msra.mxu1 %vm1429_vm1, %v7924_v20  ;;  %17841 = vmatprep.subr.mxu0 %v19282_v22 }
0x110f   : > { %17848 = vmatprep.subr.mxu1 %v19282_v22 }
0x1111   : > { %17831 = vmatmul.mubr.msk.f32.vlgmr.msra.gmra.mxu1 %vm1429_vm1, %v7943_v23  ;;  %17842 = vmatpush3.xpose.msk.msra.mxu0 %vm1429_vm1, %v21257_v59 }
0x1112   : > { %17849 = vmatpush3.xpose.msk.msra.mxu1 %vm1429_vm1, %v21260_v54  ;;  %17843 = vmatprep.subr.mxu0 %v19282_v22 }
0x1113   : > { %17850 = vmatprep.subr.mxu1 %v19282_v22  ;;  %17860 = vmatprep.mubr.msk.f32.mxu1 %vm19283_vm2, %v19282_v22 }
0x1115   : > { %17844 = vmatpush3.xpose.msk.msra.mxu0 %vm1429_vm1, %v21272_v16 }
0x1116   : > { %17851 = vmatpush3.xpose.msk.msra.mxu1 %vm1429_vm1, %v21277_v7  ;;  %17863 = vmatprep.subr.mxu0 %v19282_v22 }
0x1117   : > { %17852 = vmatprep.subr.mxu1 %v19282_v22 }
0x1118   : > { %17846 = vmatmul.mubr.msk.f32.vlgmr.msra.gmra.mxu0 %vm1429_vm1, %v7944_v27 }
0x1119   : > { %17864 = vmatpush3.msra.mxu0 %v21109_v55  ;;  %17875 = vmatprep.mubr.msk.f32.mxu0 %vm19283_vm2, %v19282_v22 }
0x111a   : > { %17853 = vmatpush3.xpose.msk.msra.mxu1 %vm1429_vm1, %v21290_v4  ;;  %17865 = vmatprep.subr.mxu0 %v19282_v22 }
0x111b   : > { %17866 = vmatpush3.msra.mxu0 %v21120_v25  ;;  %17854 = vmatprep.subr.mxu1 %v19282_v22 }
0x111c   : > { %17867 = vmatprep.subr.mxu0 %v19282_v22 }
0x111d   : > { %17868 = vmatpush3.msra.mxu0 %v21133_v38 }
0x111e   : > { %17855 = vmatpush3.xpose.msk.msra.mxu1 %vm1429_vm1, %v21301_v47  ;;  %17869 = vmatprep.subr.mxu0 %v19282_v22 }
0x111f   : > { %17870 = vmatpush3.msra.mxu0 %v21146_v50  ;;  %17856 = vmatprep.subr.mxu1 %v19282_v22 }
0x1120   : > { %17871 = vmatprep.subr.mxu0 %v19282_v22 }
0x1121   : > { %17872 = vmatpush3.msra.mxu0 %v21158_v30 }
0x1122   : > { %17857 = vmatpush3.xpose.msk.msra.mxu1 %vm1429_vm1, %v21312_v44  ;;  %17873 = vmatprep.subr.mxu0 %v19282_v22 }
0x1123   : > { %17874 = vmatpush3.msra.mxu0 %v21181_v36  ;;  %17858 = vmatprep.subr.mxu1 %v19282_v22 }
0x1124   : > { %17893 = vmatprep.subr.mxu0 %v19282_v22 }
0x1126   : > { %17859 = vmatpush3.xpose.msk.msra.mxu1 %vm1429_vm1, %v21321_v8 }
0x1127   : > { %17878 = vmatprep.subr.mxu1 %v19282_v22 }
0x1129   : > { %17861 = vmatmul.mubr.msk.f32.vlgmr.msra.gmra.mxu1 %vm1429_vm1, %v7945_v21 }
0x112a   : > { %17879 = vmatpush3.msra.mxu1 %v21162_v2  ;;  %17890 = vmatprep.mubr.msk.f32.mxu1 %vm19283_vm2, %v19282_v22 }
0x112b   : > { %17880 = vmatprep.subr.mxu1 %v19282_v22 }
0x112c   : > { %17881 = vmatpush3.msra.mxu1 %v21186_v42 }
0x112d   : > { %17882 = vmatprep.subr.mxu1 %v19282_v22 }
0x112e   : > { %17883 = vmatpush3.msra.mxu1 %v21204_v14 }
0x112f   : > { %17884 = vmatprep.subr.mxu1 %v19282_v22 }
0x1130   : > { %17885 = vmatpush3.msra.mxu1 %v21221_v51 }
0x1131   : > { %17886 = vmatprep.subr.mxu1 %v19282_v22 }
0x1132   : > { %17887 = vmatpush3.msra.mxu1 %v21235_v18 }
0x1133   : > { %17888 = vmatprep.subr.mxu1 %v19282_v22 }
0x1134   : > { %17889 = vmatpush3.msra.mxu1 %v7924_v20 }
0x1135   : > { %17908 = vmatprep.subr.mxu1 %v19282_v22 }
0x1190   : > { %v7651_v32 = vpop.f32.mrf.mxu0 }
0x1192   : > { %v17754_v55 = vpop.f32.mrf.mxu0 }
0x1194   : > { %v7578_v35 = vpop.f32.mrf.mxu1 }
0x1196   : > { %v17739_v19 = vpop.f32.mrf.mxu1 }
0x11a8   : > { %v7797_v25 = vpop.f32.mrf.mxu0 }
0x11aa   : > { %v17784_v57 = vpop.f32.mrf.mxu0 }
0x11ac   : > { %v7724_v38 = vpop.f32.mrf.mxu1 }
0x11ae   : > { %v17769_v13 = vpop.f32.mrf.mxu1 }
0x11b8   : > { %v17799_v50 = vpop.f32.mrf.mxu1 }
0x11b9   : > { %v7887_v43 = vmax.f32 %v17799_v50, 1e-20 }
0x11ba   : > { %v7867_v30 = vpop.f32.mrf.mxu1 }
0x11bb   : > { %18964 = vrcp.f32 %v7887_v43  ;;  %v7886_v2 = vmax.f32 %v7867_v30, 1e-20 }
0x11bc   : > { %v17802_v37 = vpop.f32.mrf.mxu1 }
0x11bd   : > { %18966 = vrcp.f32 %v7886_v2  ;;  %v7889_v33 = vmax.f32 %v17802_v37, 1e-20 }
0x11be   : > { %v7877_v36 = vpop.f32.mrf.mxu1 }
0x11bf   : > { %18968 = vrcp.f32 %v7889_v33  ;;  %v7888_v56 = vmax.f32 %v7877_v36, 1e-20 }
0x11c0   : > { %v8033_v42 = vpop.f32.mrf.mxu0 }
0x11c1   : > { %18970 = vrcp.f32 %v7888_v56  ;;  %v8034_v29 = vadd.f32 %v21060_v39, %v8033_v42 }
0x11c2   : > { %v17817_v3 = vpop.f32.mrf.mxu0 }
0x11c3   : > { %v8310_v14 = vsel %vm2122_vm4, %v8034_v29, -inf }
0x11c4   : > { %8311 = vmax.xlane.f32.xlu0 %v8310_v14 }
0x11c8   : > { %v18965_v49 = vpop.eup %18964 }
0x11c9   : > { %v21343_v51 = vmul.f32 %v18965_v49, %v7651_v32 }
0x11ca   : > { %v18967_v12 = vpop.eup %18966 }
0x11cb   : > { %v21345_v18 = vmul.f32 %v18967_v12, %v7578_v35 }
0x11cc   : > { %v18969_v63 = vpop.eup %18968 }
0x11cd   : > { %v21347_v20 = vmul.f32 %v18969_v63, %v7797_v25 }
0x11ce   : > { %v18971_v41 = vpop.eup %18970 }
0x11cf   : > { %v21349_v23 = vmul.f32 %v18971_v41, %v7724_v38 }
0x11d1   : > { %v8124_v34 = vpop.f32.mrf.mxu1 }
0x11d2   : > { %v8125_v45 = vadd.f32 %v21060_v39, %v8124_v34 }
0x11d3   : > { %v17832_v27 = vpop.f32.mrf.mxu1 }
0x11d4   : > { %v8313_v21 = vsel %vm2122_vm4, %v8125_v45, -inf }
0x11d5   : > { %8314 = vmax.xlane.f32.xlu0 %v8313_v21 }
0x11d8   : > { %v8215_v55 = vpop.f32.mrf.mxu0 }
0x11d9   : > { %v8216_v32 = vadd.f32 %v21060_v39, %v8215_v55 }
0x11da   : > { %v17847_v19 = vpop.f32.mrf.mxu0 }
0x11db   : > { %v8316_v35 = vsel %vm2122_vm4, %v8216_v32, -inf }
0x11dc   : > { %8317 = vmax.xlane.f32.xlu1 %v8316_v35 }
0x11e9   : > { %v8306_v57 = vpop.f32.mrf.mxu1 }
0x11ea   : > { %v8307_v25 = vadd.f32 %v21060_v39, %v8306_v57 }
0x11eb   : > { %v17862_v13 = vpop.f32.mrf.mxu1 }
0x11ec   : > { %v8319_v38 = vsel %vm2122_vm4, %v8307_v25, -inf }
0x11ed   : > { %8320 = vmax.xlane.f32.xlu1 %v8319_v38  ;;  %v21405_v38 = vld [vmem:[%s22952_s17 + $0x18] sm:$0xff] }
0x124d   : > { %v8312_v50 = vpop.xlane.xlu0 %8311 }
0x124e   : > { %v8322_v43 = vsub.f32 %v8034_v29, %v8312_v50 }
0x1250   : > { %v8326_v30 = vmul.f32 1.442695, %v8322_v43 }
0x1252   : > { %18972 = vpow2.f32 %v8326_v30  ;;  %v21413_v30 = vld [vmem:[%s22952_s17 + $0x10] sm:$0xff] }
0x125e   : > { %v8315_v2 = vpop.xlane.xlu0 %8314 }
0x125f   : > { %v18973_v37 = vpop.eup %18972  ;;  %v8323_v33 = vsub.f32 %v8125_v45, %v8315_v2 }
0x1260   : > { %17876 = vmatmul.mubr.msk.f32.vlgmr.msra.gmra.mxu0 %vm2122_vm4, %v18973_v37 }
0x1261   : > { %v8328_v36 = vmul.f32 1.442695, %v8323_v33  ;;  %17894 = vmatpush3.msra.mxu0 %v21199_v31  ;;  %17905 = vmatprep.mubr.msk.f32.mxu0 %vm19283_vm2, %v19282_v22  ;;  %v21422_v33 = vld [vmem:[%s22952_s17 + $0x8] sm:$0xff] }
0x1262   : > { %17895 = vmatprep.subr.mxu0 %v19282_v22 }
0x1263   : > { %18974 = vpow2.f32 %v8328_v36  ;;  %17896 = vmatpush3.msra.mxu0 %v21217_v53  ;;  %v19143_v53 = vld [vmem:[%s22955_s9 + $0x28] sm:$0xff] }
0x1264   : > { %17897 = vmatprep.subr.mxu0 %v19282_v22 }
0x1265   : > { %17898 = vmatpush3.msra.mxu0 %v21232_v62  ;;  %v8318_v39 = vpop.xlane.xlu1 %8317 }
0x1266   : > { %17899 = vmatprep.subr.mxu0 %v19282_v22  ;;  %v8324_v56 = vsub.f32 %v8216_v32, %v8318_v39 }
0x1267   : > { %17900 = vmatpush3.msra.mxu0 %v21246_v17 }
0x1268   : > { %v8330_v31 = vmul.f32 1.442695, %v8324_v56  ;;  %17901 = vmatprep.subr.mxu0 %v19282_v22 }
0x1269   : > { %17902 = vmatpush3.msra.mxu0 %v21257_v59 }
0x126a   : > { %18976 = vpow2.f32 %v8330_v31  ;;  %17903 = vmatprep.subr.mxu0 %v19282_v22 }
0x126b   : > { %17904 = vmatpush3.msra.mxu0 %v21272_v16  ;;  %v19144_v16 = vld [vmem:[%s22955_s9 + $0x20] sm:$0xff] }
0x126c   : > { %17923 = vmatprep.subr.mxu0 %v19143_v53 }
0x1270   : > { %v18975_v42 = vpop.eup %18974 }
0x1271   : > { %17891 = vmatmul.mubr.msk.f32.vlgmr.msra.gmra.mxu1 %vm2122_vm4, %v18975_v42 }
0x1272   : > { %17909 = vmatpush3.msra.mxu1 %v21260_v54  ;;  %17920 = vmatprep.mubr.msk.f32.mxu1 %vm19283_vm2, %v19282_v22 }
0x1273   : > { %17910 = vmatprep.subr.mxu1 %v19282_v22 }
0x1274   : > { %17911 = vmatpush3.msra.mxu1 %v21277_v7  ;;  %v19145_v7 = vld [vmem:[%s22955_s9 + $0x18] sm:$0xff] }
0x1275   : > { %17912 = vmatprep.subr.mxu1 %v19282_v22 }
0x1276   : > { %17913 = vmatpush3.msra.mxu1 %v21290_v4  ;;  %v8321_v62 = vpop.xlane.xlu1 %8320  ;;  %v19146_v4 = vld [vmem:[%s22955_s9 + $0x10] sm:$0xff] }
0x1277   : > { %v18977_v17 = vpop.eup %18976  ;;  %17914 = vmatprep.subr.mxu1 %v19282_v22  ;;  %v8325_v59 = vsub.f32 %v8307_v25, %v8321_v62 }
0x1278   : > { %17915 = vmatpush3.msra.mxu1 %v21301_v47  ;;  %17906 = vmatmul.mubr.msk.f32.vlgmr.msra.gmra.mxu0 %vm2122_vm4, %v18977_v17  ;;  %v19147_v47 = vld [vmem:[%s22955_s9 + $0x8] sm:$0xff] }
0x1279   : > { %v8332_v54 = vmul.f32 1.442695, %v8325_v59  ;;  %17916 = vmatprep.subr.mxu1 %v19282_v22  ;;  %17924 = vmatpush3.msra.mxu0 %v19143_v53 }
0x127a   : > { %17917 = vmatpush3.msra.mxu1 %v21312_v44  ;;  %17925 = vmatprep.subr.mxu0 %v19144_v16 }
0x127b   : > { %18978 = vpow2.f32 %v8332_v54  ;;  %17918 = vmatprep.subr.mxu1 %v19282_v22  ;;  %17935 = vmatprep.mubr.msk.f32.mxu0 %vm2122_vm4, %v18973_v37  ;;  %v8756_v54 = vmul.f32 0.35355338, %v21343_v51 }
0x127c   : > { %17919 = vmatpush3.msra.mxu1 %v21321_v8  ;;  %17926 = vmatpush3.msra.mxu0 %v19144_v16 }
0x127d   : > { %17927 = vmatprep.subr.mxu0 %v19145_v7  ;;  %17941 = vmatprep.subr.mxu1 %v19282_v22 }
0x127e   : > { %17928 = vmatpush3.msra.mxu0 %v19145_v7  ;;  %v8755_v7 = vmul.f32 0.35355338, %v21345_v18 }
0x127f   : > { %17929 = vmatprep.subr.mxu0 %v19146_v4 }
0x1280   : > { %17930 = vmatpush3.msra.mxu0 %v19146_v4 }
0x1281   : > { %17931 = vmatprep.subr.mxu0 %v19147_v47 }
0x1282   : > { %17932 = vmatpush3.msra.mxu0 %v19147_v47 }
0x1283   : > { %17933 = vmatprep.subr.mxu0 %v20841_v15 }
0x1284   : > { %17934 = vmatpush3.msra.mxu0 %v20841_v15 }
0x1285   : > { %17936 = vmatmul.mubr.msk.f32.vlgmr.msra.gmra.mxu0 %vm2122_vm4, %v18975_v42  ;;  %17952 = vmatprep.subr.mxu0 %v19282_v22  ;;  %v21431_v42 = vld [vmem:[%s22952_s17] sm:$0xff] }
0x1286   : > { %17938 = vmatprep.mubr.msk.f32.mxu0 %vm2122_vm4, %v18977_v17 }
0x1288   : > { %v18979_v44 = vpop.eup %18978 }
0x1289   : > { %17921 = vmatmul.mubr.msk.f32.vlgmr.msra.gmra.mxu1 %vm2122_vm4, %v18979_v44  ;;  %17939 = vmatmul.mubr.msk.f32.gmra.mxu0 %vm2122_vm4, %v18979_v44 }
0x128a   : > { %17960 = vmatprep.mubr.msk.f32.mxu0 %vm19283_vm2, %v19282_v22  ;;  %17949 = vmatprep.mubr.msk.f32.mxu1 %vm19283_vm2, %v19282_v22 }
0x1320   : > { %v8403_v8 = vpop.f32.mrf.mxu0 }
0x1322   : > { %v17877_v29 = vpop.f32.mrf.mxu0 }
0x1331   : > { %v8476_v15 = vpop.f32.mrf.mxu1 }
0x1333   : > { %v17892_v3 = vpop.f32.mrf.mxu1 }
0x1338   : > { %v8549_v14 = vpop.f32.mrf.mxu0 }
0x133a   : > { %v17907_v49 = vpop.f32.mrf.mxu0 }
0x133b   : > { %v8757_v49 = vmul.f32 0.35355338, %v21349_v23 }
0x1345   : > { %v17937_v12 = vpop.f32.mrf.mxu0 }
0x1346   : > { %v8712_v63 = vmax.f32 %v17937_v12, 1e-20 }
0x1347   : > { %v8692_v41 = vpop.f32.mrf.mxu0 }
0x1348   : > { %18980 = vrcp.f32 %v8712_v63  ;;  %v8711_v34 = vmax.f32 %v8692_v41, 1e-20 }
0x1349   : > { %v8622_v45 = vpop.f32.mrf.mxu1  ;;  %v17940_v27 = vpop.f32.mrf.mxu0 }
0x134a   : > { %18982 = vrcp.f32 %v8711_v34  ;;  %v8714_v32 = vmax.f32 %v17940_v27, 1e-20 }
0x134b   : > { %v17922_v21 = vpop.f32.mrf.mxu1  ;;  %v8702_v55 = vpop.f32.mrf.mxu0 }
0x134c   : > { %v8713_v19 = vmax.f32 %v8702_v55, 1e-20  ;;  %18984 = vrcp.f32 %v8714_v32 }
0x134e   : > { %18986 = vrcp.f32 %v8713_v19 }
0x1355   : > { %v18981_v35 = vpop.eup %18980 }
0x1356   : > { %v8720_v57 = vmul.f32 %v18981_v35, %v8476_v15  ;;  %v7055_v15 = vadd.f32 %v21005_v0, %v21000_v24 }
0x1357   : > { %v18983_v25 = vpop.eup %18982 }
0x1358   : > { %v8719_v13 = vmul.f32 %v18983_v25, %v8403_v8  ;;  %v8730_v50 = vmul.f32 %v21405_v38, %v8720_v57  ;;  %v8729_v2 = vmul.f32 %v21413_v30, %v8720_v57  ;;  %v8728_v36 = vmul.f32 %v21422_v33, %v8720_v57 }
0x1359   : > { %v18985_v39 = vpop.eup %18984  ;;  %v8727_v62 = vmul.f32 %v21431_v42, %v8720_v57  ;;  %v7060_v8 = vadd.f32 %v20990_v40, %v21005_v0  ;;  %v8742_v24 = vmul.f32 %v21405_v38, %v7055_v15  ;;  %v8740_v63 = vmul.f32 %v21422_v33, %v7055_v15 }
0x135a   : > { %17953 = vmatpush3.xpose.msk.msra.mxu0 %vm1429_vm1, %v8730_v50  ;;  %v8726_v43 = vmul.f32 %v21405_v38, %v8719_v13  ;;  %v8725_v37 = vmul.f32 %v21413_v30, %v8719_v13  ;;  %v8724_v56 = vmul.f32 %v21422_v33, %v8719_v13  ;;  %v8722_v53 = vmul.f32 %v18985_v39, %v8622_v45 }
0x135b   : > { %17954 = vmatprep.subr.mxu0 %v19282_v22  ;;  %v18987_v31 = vpop.eup %18986  ;;  %v8723_v59 = vmul.f32 %v21431_v42, %v8719_v13  ;;  %v8746_v40 = vmul.f32 %v21405_v38, %v7060_v8  ;;  %v8745_v12 = vmul.f32 %v21413_v30, %v7060_v8  ;;  %v8744_v23 = vmul.f32 %v21422_v33, %v7060_v8 }
0x135c   : > { %17942 = vmatpush3.xpose.msk.msra.mxu1 %vm1429_vm1, %v8726_v43  ;;  %v8721_v17 = vmul.f32 %v18987_v31, %v8549_v14  ;;  %v8738_v16 = vmul.f32 %v21405_v38, %v8722_v53  ;;  %v8737_v51 = vmul.f32 %v21413_v30, %v8722_v53  ;;  %v8736_v47 = vmul.f32 %v21422_v33, %v8722_v53 }
0x135d   : > { %17943 = vmatprep.subr.mxu1 %v19282_v22  ;;  %v8735_v29 = vmul.f32 %v21431_v42, %v8722_v53  ;;  %v8758_v14 = vmul.f32 0.35355338, %v21347_v20  ;;  %v8741_v20 = vmul.f32 %v21413_v30, %v7055_v15  ;;  %v8743_v41 = vmul.f32 %v21431_v42, %v7060_v8 }
0x135e   : > { %17955 = vmatpush3.xpose.msk.msra.mxu0 %vm1429_vm1, %v8729_v2  ;;  %v8734_v4 = vmul.f32 %v21405_v38, %v8721_v17  ;;  %v8733_v18 = vmul.f32 %v21413_v30, %v8721_v17  ;;  %v8732_v44 = vmul.f32 %v21422_v33, %v8721_v17  ;;  %v8731_v3 = vmul.f32 %v21431_v42, %v8721_v17 }
0x135f   : > { %17956 = vmatprep.subr.mxu0 %v19282_v22  ;;  %v8739_v34 = vmul.f32 %v21431_v42, %v7055_v15  ;;  %v7065_v53 = vadd.f32 %v21005_v0, %v21049_v48  ;;  %v8753_v8 = vmul.f32 %v21413_v30, %v21010_v1  ;;  %v8751_v15 = vmul.f32 %v21431_v42, %v21010_v1 }
0x1360   : > { %17944 = vmatpush3.xpose.msk.msra.mxu1 %vm1429_vm1, %v8725_v37 }
0x1361   : > { %17945 = vmatprep.subr.mxu1 %v19282_v22  ;;  %v8748_v48 = vmul.f32 %v21422_v33, %v7065_v53 }
0x1362   : > { %17957 = vmatpush3.xpose.msk.msra.mxu0 %vm1429_vm1, %v8728_v36 }
0x1363   : > { %17958 = vmatprep.subr.mxu0 %v19282_v22 }
0x1364   : > { %17946 = vmatpush3.xpose.msk.msra.mxu1 %vm1429_vm1, %v8724_v56 }
0x1365   : > { %17947 = vmatprep.subr.mxu1 %v19282_v22 }
0x1366   : > { %17959 = vmatpush3.xpose.msk.msra.mxu0 %vm1429_vm1, %v8727_v62 }
0x1367   : > { %17974 = vmatprep.subr.mxu0 %v19282_v22 }
0x1368   : > { %17948 = vmatpush3.xpose.msk.msra.mxu1 %vm1429_vm1, %v8723_v59 }
0x1369   : > { %17961 = vmatmul.mubr.msk.f32.vlgmr.msra.gmra.mxu0 %vm1429_vm1, %v8756_v54  ;;  %17963 = vmatprep.subr.mxu1 %v19282_v22  ;;  %v8750_v54 = vmul.f32 %v21405_v38, %v7065_v53 }
0x136a   : > { %17975 = vmatpush3.xpose.msk.msra.mxu0 %vm1429_vm1, %v8738_v16  ;;  %17982 = vmatprep.mubr.msk.f32.mxu0 %vm19283_vm2, %v19282_v22 }
0x136b   : > { %17950 = vmatmul.mubr.msk.f32.vlgmr.msra.gmra.mxu1 %vm1429_vm1, %v8755_v7  ;;  %17976 = vmatprep.subr.mxu0 %v19282_v22 }
0x136c   : > { %17964 = vmatpush3.xpose.msk.msra.mxu1 %vm1429_vm1, %v8734_v4  ;;  %17971 = vmatprep.mubr.msk.f32.mxu1 %vm19283_vm2, %v19282_v22  ;;  %v8749_v4 = vmul.f32 %v21413_v30, %v7065_v53 }
0x136d   : > { %17965 = vmatprep.subr.mxu1 %v19282_v22 }
0x136e   : > { %17977 = vmatpush3.xpose.msk.msra.mxu0 %vm1429_vm1, %v8737_v51 }
0x136f   : > { %17978 = vmatprep.subr.mxu0 %v19282_v22 }
0x1370   : > { %17966 = vmatpush3.xpose.msk.msra.mxu1 %vm1429_vm1, %v8733_v18  ;;  %v8754_v18 = vmul.f32 %v21405_v38, %v21010_v1 }
0x1371   : > { %17967 = vmatprep.subr.mxu1 %v19282_v22 }
0x1372   : > { %17979 = vmatpush3.xpose.msk.msra.mxu0 %vm1429_vm1, %v8736_v47 }
0x1373   : > { %17980 = vmatprep.subr.mxu0 %v19282_v22 }
0x1374   : > { %17968 = vmatpush3.xpose.msk.msra.mxu1 %vm1429_vm1, %v8732_v44  ;;  %v8747_v44 = vmul.f32 %v21431_v42, %v7065_v53  ;;  %v9603_v53 = vld [vmem:[%s22970_s2 + $0x8] sm:$0xff] }
0x1375   : > { %17969 = vmatprep.subr.mxu1 %v19282_v22 }
0x1376   : > { %17981 = vmatpush3.xpose.msk.msra.mxu0 %vm1429_vm1, %v8735_v29  ;;  %v8752_v29 = vmul.f32 %v21422_v33, %v21010_v1  ;;  %v19152_v1 = vld [vmem:[%s19320_s25] sm:$0xff] }
0x1377   : > { %17996 = vmatprep.subr.mxu0 %v19282_v22 }
0x1378   : > { %17970 = vmatpush3.xpose.msk.msra.mxu1 %vm1429_vm1, %v8731_v3 }
0x1379   : > { %17983 = vmatmul.mubr.msk.f32.vlgmr.msra.gmra.mxu0 %vm1429_vm1, %v8758_v14  ;;  %17985 = vmatprep.subr.mxu1 %v19282_v22 }
0x137a   : > { %17997 = vmatpush3.msra.mxu0 %v8746_v40  ;;  %18004 = vmatprep.mubr.msk.f32.mxu0 %vm19283_vm2, %v19282_v22 }
0x137b   : > { %17972 = vmatmul.mubr.msk.f32.vlgmr.msra.gmra.mxu1 %vm1429_vm1, %v8757_v49  ;;  %17998 = vmatprep.subr.mxu0 %v19282_v22 }
0x137c   : > { %17986 = vmatpush3.msra.mxu1 %v8742_v24  ;;  %17999 = vmatpush3.msra.mxu0 %v8745_v12 }
0x137d   : > { %17987 = vmatprep.subr.mxu1 %v19282_v22  ;;  %18000 = vmatprep.subr.mxu0 %v19282_v22 }
0x137e   : > { %17988 = vmatpush3.msra.mxu1 %v8741_v20  ;;  %18001 = vmatpush3.msra.mxu0 %v8744_v23 }
0x137f   : > { %17989 = vmatprep.subr.mxu1 %v19282_v22  ;;  %18002 = vmatprep.subr.mxu0 %v19282_v22 }
0x1380   : > { %17990 = vmatpush3.msra.mxu1 %v8740_v63  ;;  %18003 = vmatpush3.msra.mxu0 %v8743_v41 }
0x1381   : > { %17991 = vmatprep.subr.mxu1 %v19282_v22  ;;  %17993 = vmatprep.mubr.msk.f32.mxu1 %vm19283_vm2, %v19282_v22 }
0x1382   : > { %17992 = vmatpush3.msra.mxu1 %v8739_v34  ;;  %18018 = vmatprep.subr.mxu0 %v19282_v22 }
0x1383   : > { %18007 = vmatprep.subr.mxu1 %v19282_v22 }
0x1429   : > { %v8925_v45 = vpop.f32.mrf.mxu0 }
0x142a   : > { %v9102_v19 = vsel %vm1429_vm1, %v8925_v45, -inf }
0x142b   : > { %v8840_v27 = vpop.f32.mrf.mxu1  ;;  %v17962_v21 = vpop.f32.mrf.mxu0 }
0x142c   : > { %v9099_v55 = vsel %vm1429_vm1, %v8840_v27, -inf }
0x142d   : > { %9100 = vmax.xlane.f32.xlu0 %v9099_v55  ;;  %v17951_v32 = vpop.f32.mrf.mxu1 }
0x1431   : > { %9103 = vmax.xlane.f32.xlu0 %v9102_v19 }
0x1439   : > { %v9095_v35 = vpop.f32.mrf.mxu0 }
0x143a   : > { %v9108_v43 = vsel %vm1429_vm1, %v9095_v35, -inf }
0x143b   : > { %v9010_v57 = vpop.f32.mrf.mxu1  ;;  %v17984_v25 = vpop.f32.mrf.mxu0 }
0x143c   : > { %v9105_v13 = vsel %vm1429_vm1, %v9010_v57, -inf }
0x143d   : > { %9106 = vmax.xlane.f32.xlu1 %v9105_v13  ;;  %v17973_v50 = vpop.f32.mrf.mxu1 }
0x1441   : > { %9109 = vmax.xlane.f32.xlu1 %v9108_v43 }
0x14b6   : > { %v9101_v2 = vpop.xlane.xlu0 %9100 }
0x14b7   : > { %v9111_v37 = vsub.f32 %v8840_v27, %v9101_v2 }
0x14b9   : > { %v9115_v36 = vmul.f32 1.442695, %v9111_v37  ;;  %v15820_v37 = vld [vmem:[%s22970_s2 + $0x38] sm:$0xff] }
0x14ba   : > { %v9104_v39 = vpop.xlane.xlu0 %9103 }
0x14bb   : > { %18988 = vpow2.f32 %v9115_v36  ;;  %v9112_v56 = vsub.f32 %v8925_v45, %v9104_v39  ;;  %v15819_v36 = vld [vmem:[%s22970_s2 + $0x30] sm:$0xff]  ;;  %v19153_v39 = vld [vmem:[%s19320_s25 + $0x8] sm:$0xff] }
0x14bd   : > { %v9117_v31 = vmul.f32 1.442695, %v9112_v56  ;;  %v19154_v56 = vld [vmem:[%s19320_s25 + $0x10] sm:$0xff] }
0x14bf   : > { %18990 = vpow2.f32 %v9117_v31  ;;  %v19155_v31 = vld [vmem:[%s19320_s25 + $0x18] sm:$0xff] }
0x14c6   : > { %v9107_v62 = vpop.xlane.xlu1 %9106 }
0x14c7   : > { %v9113_v17 = vsub.f32 %v9010_v57, %v9107_v62  ;;  %v15818_v62 = vld [vmem:[%s22970_s2 + $0x28] sm:$0xff] }
0x14c8   : > { %v18989_v59 = vpop.eup %18988 }
0x14c9   : > { %v9119_v16 = vmul.f32 1.442695, %v9113_v17  ;;  %17994 = vmatmul.mubr.msk.f32.vlgmr.msra.gmra.mxu1 %vm1429_vm1, %v18989_v59  ;;  %v9602_v17 = vld [vmem:[%s22970_s2] sm:$0xff] }
0x14ca   : > { %18008 = vmatpush3.msra.mxu1 %v8750_v54  ;;  %v9110_v7 = vpop.xlane.xlu1 %9109  ;;  %18015 = vmatprep.mubr.msk.f32.mxu1 %vm19283_vm2, %v19282_v22  ;;  %v15830_v54 = vld [vmem:[%s22970_s2 + $0x58] sm:$0xff] }
0x14cb   : > { %18992 = vpow2.f32 %v9119_v16  ;;  %18009 = vmatprep.subr.mxu1 %v19282_v22  ;;  %v9114_v51 = vsub.f32 %v9095_v35, %v9110_v7 }
0x14cc   : > { %v18991_v0 = vpop.eup %18990  ;;  %18010 = vmatpush3.msra.mxu1 %v8749_v4  ;;  %v15829_v4 = vld [vmem:[%s22970_s2 + $0x50] sm:$0xff] }
0x14cd   : > { %v9121_v47 = vmul.f32 1.442695, %v9114_v51  ;;  %18011 = vmatprep.subr.mxu1 %v19282_v22  ;;  %18005 = vmatmul.mubr.msk.f32.vlgmr.msra.gmra.mxu0 %vm1429_vm1, %v18991_v0 }
0x14ce   : > { %18012 = vmatpush3.msra.mxu1 %v8748_v48  ;;  %18019 = vmatpush3.msra.mxu0 %v8754_v18  ;;  %v15827_v18 = vld [vmem:[%s22970_s2 + $0x40] sm:$0xff] }
0x14cf   : > { %18994 = vpow2.f32 %v9121_v47  ;;  %18013 = vmatprep.subr.mxu1 %v19282_v22  ;;  %18020 = vmatprep.subr.mxu0 %v19282_v22 }
0x14d0   : > { %18014 = vmatpush3.msra.mxu1 %v8747_v44  ;;  %18021 = vmatpush3.msra.mxu0 %v8753_v8 }
0x14d1   : > { %18022 = vmatprep.subr.mxu0 %v19282_v22  ;;  %18029 = vmatprep.subr.mxu1 %v21405_v38 }
0x14d2   : > { %18023 = vmatpush3.msra.mxu0 %v8752_v29  ;;  %18026 = vmatprep.mubr.msk.f32.mxu0 %vm19283_vm2, %v19282_v22 }
0x14d3   : > { %18024 = vmatprep.subr.mxu0 %v19282_v22 }
0x14d4   : > { %18025 = vmatpush3.msra.mxu0 %v8751_v15  ;;  %v15822_v15 = vld [vmem:[%s22971_s3 + $0x1] ss:$0 sm:$0xff] }
0x14d8   : > { %v18993_v3 = vpop.eup %18992 }
0x14d9   : > { %18016 = vmatmul.mubr.msk.f32.vlgmr.msra.gmra.mxu1 %vm1429_vm1, %v18993_v3 }
0x14da   : > { %18030 = vmatpush3.msra.mxu1 %v21405_v38  ;;  %18037 = vmatprep.mubr.msk.f32.mxu1 %vm1429_vm1, %v18989_v59  ;;  %v9605_v38 = vld [vmem:[%s22970_s2 + $0x18] sm:$0xff]  ;;  %v15817_v59 = vld [vmem:[%s22970_s2 + $0x20] sm:$0xff] }
0x14db   : > { %18031 = vmatprep.subr.mxu1 %v21413_v30 }
0x14dc   : > { %v18995_v14 = vpop.eup %18994  ;;  %18032 = vmatpush3.msra.mxu1 %v21413_v30  ;;  %v9604_v30 = vld [vmem:[%s22970_s2 + $0x10] sm:$0xff] }
0x14dd   : > { %18033 = vmatprep.subr.mxu1 %v21422_v33  ;;  %18027 = vmatmul.mubr.msk.f32.vlgmr.msra.gmra.mxu0 %vm1429_vm1, %v18995_v14 }
0x14de   : > { %18034 = vmatpush3.msra.mxu1 %v21422_v33  ;;  %18051 = vmatprep.mubr.msk.f32.mxu0 %vm1429_vm1, %v19152_v1 }
0x14df   : > { %18035 = vmatprep.subr.mxu1 %v21431_v42 }
0x14e0   : > { %18036 = vmatpush3.msra.mxu1 %v21431_v42 }
0x14e1   : > { %18038 = vmatmul.mubr.msk.f32.vlgmr.msra.gmra.mxu1 %vm1429_vm1, %v18991_v0  ;;  %18057 = vmatprep.subr.mxu1 %v9605_v38  ;;  %v15828_v0 = vld [vmem:[%s22970_s2 + $0x48] sm:$0xff]  ;;  %s22972_s2 = sld [smem:[#allocation26_spill]] }
0x14e2   : > { %18040 = vmatprep.mubr.msk.f32.mxu1 %vm1429_vm1, %v18993_v3  ;;  %18058 = vmatpush3.msra.mxu1 %v9605_v38  ;;  %v21586_v38 = vld [vmem:[%s22971_s3] ss:$0 sm:$0xff] }
0x14e3   : > { %18059 = vmatprep.subr.mxu1 %v9604_v30 }
0x14e4   : > { %18060 = vmatpush3.msra.mxu1 %v9604_v30 }
0x14e5   : > { %18041 = vmatmul.mubr.msk.f32.gmra.mxu1 %vm1429_vm1, %v18995_v14  ;;  %18061 = vmatprep.subr.mxu1 %v9603_v53 }
0x14e6   : > { %18062 = vmatpush3.msra.mxu1 %v9603_v53 }
0x14e7   : > { %18063 = vmatprep.subr.mxu1 %v9602_v17 }
0x14e8   : > { %18064 = vmatpush3.msra.mxu1 %v9602_v17 }
0x14e9   : > { %18085 = vmatprep.subr.mxu1 %v15830_v54 }
0x1589   : > { %v9192_v33 = vpop.f32.mrf.mxu1 }
0x158b   : > { %v17995_v40 = vpop.f32.mrf.mxu1 }
0x158d   : > { %v9265_v49 = vpop.f32.mrf.mxu0 }
0x158f   : > { %v18006_v24 = vpop.f32.mrf.mxu0 }
0x1599   : > { %v9338_v12 = vpop.f32.mrf.mxu1 }
0x159b   : > { %v18017_v20 = vpop.f32.mrf.mxu1 }
0x159d   : > { %v9411_v23 = vpop.f32.mrf.mxu0 }
0x159f   : > { %v18028_v42 = vpop.f32.mrf.mxu0 }
0x15a1   : > { %v18039_v63 = vpop.f32.mrf.mxu1 }
0x15a2   : > { %v9501_v34 = vmax.f32 %v18039_v63, 1e-20 }
0x15a3   : > { %v9481_v41 = vpop.f32.mrf.mxu1 }
0x15a4   : > { %v9500_v55 = vmax.f32 %v9481_v41, 1e-20 }
0x15a5   : > { %v18042_v45 = vpop.f32.mrf.mxu1 }
0x15a6   : > { %v9503_v27 = vmax.f32 %v18042_v45, 1e-20 }
0x15a7   : > { %v9491_v21 = vpop.f32.mrf.mxu1 }
0x15a8   : > { %18996 = vrcp.f32 %v9503_v27  ;;  %v9502_v32 = vmax.f32 %v9491_v21, 1e-20  ;;  %v21603_v21 = vld [vmem:[%s19315_s21] sm:$0xff] }
0x15a9   : > { %18998 = vrcp.f32 %v9501_v34 }
0x15aa   : > { %19000 = vrcp.f32 %v9502_v32 }
0x15ab   : > { %19002 = vrcp.f32 %v9500_v55 }
0x15b5   : > { %v18997_v19 = vpop.eup %18996 }
0x15b6   : > { %v18999_v35 = vpop.eup %18998  ;;  %v9511_v57 = vmul.f32 %v18997_v19, %v9411_v23  ;;  %v21593_v23 = vld [vmem:[%s19315_s21 + $0x8] sm:$0xff] }
0x15b7   : > { %v19001_v25 = vpop.eup %19000  ;;  %v9509_v43 = vmul.f32 %v18999_v35, %v9265_v49 }
0x15b8   : > { %18043 = vmatprep.subr.mxu0 %v9511_v57  ;;  %v9510_v13 = vmul.f32 %v19001_v25, %v9338_v12  ;;  %v19003_v50 = vpop.eup %19002 }
0x15b9   : > { %18044 = vmatpush3.msra.mxu0 %v9511_v57  ;;  %v9508_v2 = vmul.f32 %v19003_v50, %v9192_v33 }
0x15ba   : > { %18045 = vmatprep.subr.mxu0 %v9510_v13 }
0x15bb   : > { %18046 = vmatpush3.msra.mxu0 %v9510_v13 }
0x15bc   : > { %18047 = vmatprep.subr.mxu0 %v9509_v43 }
0x15bd   : > { %18048 = vmatpush3.msra.mxu0 %v9509_v43 }
0x15be   : > { %18049 = vmatprep.subr.mxu0 %v9508_v2 }
0x15bf   : > { %18050 = vmatpush3.msra.mxu0 %v9508_v2  ;;  %v21613_v2 = vld [vmem:[%s22971_s3 + $0x2] ss:$0 sm:$0xff]  ;;  %s22974_s3 = sld [smem:[#allocation18_spill]] }
0x15c0   : > { %18052 = vmatmul.mubr.msk.f32.vlgmr.msra.gmra.mxu0 %vm1429_vm1, %v19153_v39  ;;  %18071 = vmatprep.subr.mxu0 %v15820_v37 }
0x15c1   : > { %18054 = vmatprep.mubr.msk.f32.mxu0 %vm1429_vm1, %v19154_v56  ;;  %18072 = vmatpush3.msra.mxu0 %v15820_v37 }
0x15c2   : > { %18073 = vmatprep.subr.mxu0 %v15819_v36 }
0x15c3   : > { %18074 = vmatpush3.msra.mxu0 %v15819_v36 }
0x15c4   : > { %18055 = vmatmul.mubr.msk.f32.gmra.mxu0 %vm1429_vm1, %v19155_v31  ;;  %18075 = vmatprep.subr.mxu0 %v15818_v62 }
0x15c5   : > { %18076 = vmatpush3.msra.mxu0 %v15818_v62 }
0x15c6   : > { %18077 = vmatprep.subr.mxu0 %v15817_v59 }
0x15c7   : > { %18078 = vmatpush3.msra.mxu0 %v15817_v59 }
0x15c8   : > { %18099 = vmatprep.subr.mxu0 %v19282_v22 }
0x1680   : > { %v18053_v16 = vpop.f32.mrf.mxu0 }
0x1682   : > { %v9583_v7 = vpop.f32.mrf.mxu0 }
0x1683   : > { %18065 = vmatprep.mubr.msk.f32.mxu1 %vm1429_vm1, %v9583_v7  ;;  %18079 = vmatprep.mubr.msk.f32.mxu0 %vm1429_vm1, %v9583_v7 }
0x1684   : > { %v18056_v51 = vpop.f32.mrf.mxu0  ;;  %18066 = vmatmul.mubr.msk.f32.vlgmr.msra.gmra.mxu1 %vm1429_vm1, %v18053_v16  ;;  %18080 = vmatmul.mubr.msk.f32.vlgmr.msra.gmra.mxu0 %vm1429_vm1, %v18053_v16 }
0x1685   : > { %18086 = vmatpush3.msra.mxu1 %v15830_v54 }
0x1686   : > { %v9593_v48 = vpop.f32.mrf.mxu0  ;;  %18087 = vmatprep.subr.mxu1 %v15829_v4 }
0x1687   : > { %18068 = vmatprep.mubr.msk.f32.mxu1 %vm1429_vm1, %v9593_v48  ;;  %18088 = vmatpush3.msra.mxu1 %v15829_v4 }
0x1688   : > { %18069 = vmatmul.mubr.msk.f32.gmra.mxu1 %vm1429_vm1, %v18056_v51  ;;  %18089 = vmatprep.subr.mxu1 %v15828_v0 }
0x1689   : > { %18090 = vmatpush3.msra.mxu1 %v15828_v0  ;;  %18093 = vmatprep.mubr.msk.f32.mxu1 %vm1429_vm1, %v9583_v7 }
0x168a   : > { %18091 = vmatprep.subr.mxu1 %v15827_v18  ;;  %18082 = vmatprep.mubr.msk.f32.mxu0 %vm1429_vm1, %v9593_v48 }
0x168b   : > { %18092 = vmatpush3.msra.mxu1 %v15827_v18  ;;  %18083 = vmatmul.mubr.msk.f32.gmra.mxu0 %vm1429_vm1, %v18056_v51 }
0x168c   : > { %18094 = vmatmul.mubr.msk.f32.vlgmr.msra.gmra.mxu1 %vm1429_vm1, %v18053_v16  ;;  %18106 = vmatprep.subr.mxu1 %v19282_v22 }
0x168d   : > { %18096 = vmatprep.mubr.msk.f32.mxu1 %vm1429_vm1, %v9593_v48  ;;  %18103 = vmatprep.mubr.msk.f32.mxu0 %vm19283_vm2, %v19282_v22 }
0x1690   : > { %18097 = vmatmul.mubr.msk.f32.gmra.mxu1 %vm1429_vm1, %v18056_v51 }
0x1691   : > { %18110 = vmatprep.mubr.msk.f32.mxu1 %vm19283_vm2, %v19282_v22 }
0x1744   : > { %v18067_v47 = vpop.f32.mrf.mxu1  ;;  %v18081_v44 = vpop.f32.mrf.mxu0 }
0x1745   : > { %v9807_v30 = vadd.f32 %v18081_v44, %v15822_v15  ;;  %v9697_v50 = vadd.f32 %v18067_v47, %v21586_v38 }
0x1746   : > { %v9691_v8 = vpop.f32.mrf.mxu1  ;;  %v9801_v29 = vpop.f32.mrf.mxu0 }
0x1747   : > { %v9802_v3 = vadd.f32 %v15822_v15, %v9801_v29  ;;  %v9692_v49 = vadd.f32 %v21586_v38, %v9691_v8  ;;  %v9944_v41 = vcombine.low %v9807_v30, %v9807_v30  ;;  %v9825_v32 = vcombine.high %v9807_v30, %v9807_v30 }
0x1748   : > { %v21583_v14 = vpop.f32.mrf.mxu1  ;;  %v9715_v31 = vcombine.high %v9697_v50, %v9697_v50  ;;  %v10024_v16 = vmul.f32 0.35355338, %v9697_v50 }
0x1749   : > { %v9824_v33 = vcombine.high %v9802_v3, %v9802_v3  ;;  %v9942_v40 = vcombine.low %v9802_v3, %v9802_v3  ;;  %v9714_v45 = vcombine.high %v9692_v49, %v9692_v49  ;;  %v9960_v35 = vsel %vm1721_vm3, %v9807_v30, %v9944_v41 }
0x174a   : > { %v9701_v1 = vpop.f32.mrf.mxu1  ;;  %v10022_v43 = vmul.f32 0.35355338, %v9692_v49  ;;  %v9971_v37 = vmul.f32 %v21593_v23, %v9960_v35  ;;  %v9973_v36 = vmul.f32 %v21593_v23, %v9825_v32  ;;  %v9970_v53 = vmul.f32 %v21603_v21, %v9960_v35 }
0x174b   : > { %v18084_v12 = vpop.f32.mrf.mxu0  ;;  %v9958_v20 = vsel %vm1721_vm3, %v9802_v3, %v9942_v40  ;;  %v9969_v42 = vmul.f32 %v21593_v23, %v9824_v33  ;;  %v9968_v55 = vmul.f32 %v21603_v21, %v9824_v33  ;;  %v10023_v13 = vmul.f32 0.35355338, %v9714_v45 }
0x174c   : > { %v21589_v24 = vpop.f32.mrf.mxu1  ;;  %v9967_v63 = vmul.f32 %v21593_v23, %v9958_v20  ;;  %v9966_v19 = vmul.f32 %v21603_v21, %v9958_v20  ;;  %v9972_v62 = vmul.f32 %v21603_v21, %v9825_v32  ;;  %v9817_v59 = vadd.f32 %v18084_v12, %v15822_v15 }
0x174d   : > { %18107 = vmatpush3.xpose.msk.msra.mxu1 %vm1429_vm1, %v9969_v42  ;;  %v9811_v27 = vpop.f32.mrf.mxu0  ;;  %v10025_v7 = vmul.f32 0.35355338, %v9715_v31  ;;  %v9702_v4 = vadd.f32 %v21586_v38, %v9701_v1  ;;  %v21656_v29 = vadd.f32 %v21589_v24, %v21613_v2  ;;  %v9707_v1 = vadd.f32 %v21583_v14, %v21586_v38 }
0x174e   : > { %v21598_v34 = vpop.f32.mrf.mxu1  ;;  %18100 = vmatpush3.xpose.msk.msra.mxu0 %vm1429_vm1, %v9967_v63  ;;  %18108 = vmatprep.subr.mxu1 %v19282_v22  ;;  %v9812_v57 = vadd.f32 %v15822_v15, %v9811_v27  ;;  %v9948_v48 = vcombine.low %v9817_v59, %v9817_v59  ;;  %v9827_v47 = vcombine.high %v9817_v59, %v9817_v59 }
0x174f   : > { %18101 = vmatprep.subr.mxu0 %v19282_v22  ;;  %v9716_v18 = vcombine.high %v9702_v4, %v9702_v4  ;;  %v21661_v3 = vadd.f32 %v21613_v2, %v21598_v34  ;;  %v10026_v30 = vmul.f32 0.35355338, %v9702_v4  ;;  %v9984_v24 = vcombine.low %v21656_v29, %v21656_v29 }
0x1750   : > { %v18098_v25 = vpop.f32.mrf.mxu1  ;;  %v9946_v56 = vcombine.low %v9812_v57, %v9812_v57  ;;  %v9826_v17 = vcombine.high %v9812_v57, %v9812_v57  ;;  %v9964_v15 = vsel %vm1721_vm3, %v9817_v59, %v9948_v48  ;;  %v9981_v49 = vmul.f32 %v21593_v23, %v9827_v47 }
0x1751   : > { %18109 = vmatpush3.xpose.msk.msra.mxu1 %vm1429_vm1, %v9968_v55  ;;  %v21619_v39 = vadd.f32 %v18098_v25, %v21613_v2  ;;  %v10027_v33 = vmul.f32 0.35355338, %v9716_v18  ;;  %v9979_v40 = vmul.f32 %v21593_v23, %v9964_v15  ;;  %v9982_v12 = vcombine.low %v21661_v3, %v21661_v3 }
0x1752   : > { %18102 = vmatpush3.xpose.msk.msra.mxu0 %vm1429_vm1, %v9966_v19  ;;  %18120 = vmatprep.subr.mxu1 %v19282_v22  ;;  %v9962_v54 = vsel %vm1721_vm3, %v9812_v57, %v9946_v56  ;;  %v9977_v0 = vmul.f32 %v21593_v23, %v9826_v17  ;;  %v9976_v8 = vmul.f32 %v21603_v21, %v9826_v17  ;;  %v10028_v41 = vmul.f32 0.35355338, %v9707_v1  ;;  %v9921_v19 = vpop.f32.mrf.mxu1 }
0x1753   : > { %18113 = vmatprep.subr.mxu0 %v19282_v22  ;;  %v9975_v51 = vmul.f32 %v21593_v23, %v9962_v54  ;;  %v9974_v44 = vmul.f32 %v21603_v21, %v9962_v54  ;;  %v9717_v14 = vcombine.high %v9707_v1, %v9707_v1  ;;  %v9978_v38 = vmul.f32 %v21603_v21, %v9964_v15 }
0x1754   : > { %18111 = vmatmul.mubr.msk.f32.vlgmr.msra.gmra.mxu1 %vm1429_vm1, %v10023_v13  ;;  %v9980_v20 = vmul.f32 %v21603_v21, %v9827_v47  ;;  %v10000_v42 = vsel %vm1721_vm3, %v21656_v29, %v9984_v24  ;;  %v9998_v63 = vsel %vm1721_vm3, %v21661_v3, %v9982_v12 }
0x1755   : > { %18104 = vmatmul.mubr.msk.f32.vlgmr.msra.gmra.mxu0 %vm1429_vm1, %v10022_v43  ;;  %18121 = vmatpush3.xpose.msk.msra.mxu1 %vm1429_vm1, %v9973_v36  ;;  %v10029_v34 = vmul.f32 0.35355338, %v9717_v14  ;;  %v10011_v45 = vmul.f32 %v21593_v23, %v10000_v42  ;;  %v10007_v27 = vmul.f32 %v21593_v23, %v9998_v63  ;;  %v10010_v55 = vmul.f32 %v21603_v21, %v10000_v42 }
0x1756   : > { %18114 = vmatpush3.xpose.msk.msra.mxu0 %vm1429_vm1, %v9971_v37  ;;  %18122 = vmatprep.subr.mxu1 %v19282_v22  ;;  %v10006_v32 = vmul.f32 %v21603_v21, %v9998_v63 }
0x1757   : > { %18115 = vmatprep.subr.mxu0 %v19282_v22  ;;  %18124 = vmatprep.mubr.msk.f32.mxu1 %vm19283_vm2, %v19282_v22 }
0x1758   : > { %18117 = vmatprep.mubr.msk.f32.mxu0 %vm19283_vm2, %v19282_v22 }
0x1759   : > { %18123 = vmatpush3.xpose.msk.msra.mxu1 %vm1429_vm1, %v9972_v62 }
0x175a   : > { %18116 = vmatpush3.xpose.msk.msra.mxu0 %vm1429_vm1, %v9970_v53  ;;  %18134 = vmatprep.subr.mxu1 %v19282_v22 }
0x175b   : > { %18127 = vmatprep.subr.mxu0 %v19282_v22 }
0x175c   : > { %18125 = vmatmul.mubr.msk.f32.vlgmr.msra.gmra.mxu1 %vm1429_vm1, %v10025_v7 }
0x175d   : > { %18118 = vmatmul.mubr.msk.f32.vlgmr.msra.gmra.mxu0 %vm1429_vm1, %v10024_v16  ;;  %18135 = vmatpush3.xpose.msk.msra.mxu1 %vm1429_vm1, %v9977_v0 }
0x175e   : > { %18128 = vmatpush3.xpose.msk.msra.mxu0 %vm1429_vm1, %v9975_v51  ;;  %18136 = vmatprep.subr.mxu1 %v19282_v22 }
0x175f   : > { %18129 = vmatprep.subr.mxu0 %v19282_v22  ;;  %18138 = vmatprep.mubr.msk.f32.mxu1 %vm19283_vm2, %v19282_v22 }
0x1760   : > { %18131 = vmatprep.mubr.msk.f32.mxu0 %vm19283_vm2, %v19282_v22 }
0x1761   : > { %18137 = vmatpush3.xpose.msk.msra.mxu1 %vm1429_vm1, %v9976_v8 }
0x1762   : > { %18130 = vmatpush3.xpose.msk.msra.mxu0 %vm1429_vm1, %v9974_v44  ;;  %18148 = vmatprep.subr.mxu1 %v19282_v22 }
0x1763   : > { %18141 = vmatprep.subr.mxu0 %v19282_v22 }
0x1764   : > { %18139 = vmatmul.mubr.msk.f32.vlgmr.msra.gmra.mxu1 %vm1429_vm1, %v10027_v33 }
0x1765   : > { %18132 = vmatmul.mubr.msk.f32.vlgmr.msra.gmra.mxu0 %vm1429_vm1, %v10026_v30  ;;  %18149 = vmatpush3.xpose.msk.msra.mxu1 %vm1429_vm1, %v9981_v49  ;;  %v21724_v30 = vadd.f32 %v21613_v2, %v9921_v19 }
0x1766   : > { %18142 = vmatpush3.xpose.msk.msra.mxu0 %vm1429_vm1, %v9979_v40  ;;  %18150 = vmatprep.subr.mxu1 %v19282_v22 }
0x1767   : > { %18143 = vmatprep.subr.mxu0 %v19282_v22  ;;  %18152 = vmatprep.mubr.msk.f32.mxu1 %vm19283_vm2, %v19282_v22  ;;  %v9986_v49 = vcombine.low %v21724_v30, %v21724_v30 }
0x1768   : > { %18145 = vmatprep.mubr.msk.f32.mxu0 %vm19283_vm2, %v19282_v22 }
0x1769   : > { %18151 = vmatpush3.xpose.msk.msra.mxu1 %vm1429_vm1, %v9980_v20 }
0x176a   : > { %18144 = vmatpush3.xpose.msk.msra.mxu0 %vm1429_vm1, %v9978_v38  ;;  %18169 = vmatprep.subr.mxu1 %v19282_v22  ;;  %v10002_v38 = vsel %vm1721_vm3, %v21724_v30, %v9986_v49 }
0x176b   : > { %18155 = vmatprep.subr.mxu0 %v19282_v22 }
0x176c   : > { %18153 = vmatmul.mubr.msk.f32.vlgmr.msra.gmra.mxu1 %vm1429_vm1, %v10029_v34 }
0x176d   : > { %18146 = vmatmul.mubr.msk.f32.vlgmr.msra.gmra.mxu0 %vm1429_vm1, %v10028_v41  ;;  %18170 = vmatpush3.msra.mxu1 %v10011_v45  ;;  %v10015_v45 = vmul.f32 %v21593_v23, %v10002_v38 }
0x176e   : > { %18156 = vmatpush3.msra.mxu0 %v10007_v27  ;;  %18171 = vmatprep.subr.mxu1 %v19282_v22  ;;  %v9988_v27 = vcombine.low %v21619_v39, %v21619_v39 }
0x176f   : > { %18157 = vmatprep.subr.mxu0 %v19282_v22  ;;  %18172 = vmatpush3.msra.mxu1 %v10010_v55 }
0x1770   : > { %18158 = vmatpush3.msra.mxu0 %v10006_v32  ;;  %18173 = vmatprep.mubr.msk.f32.mxu1 %vm19283_vm2, %v19282_v22  ;;  %v10014_v32 = vmul.f32 %v21603_v21, %v10002_v38  ;;  %v9512_v38 = vld [vmem:[%s22972_s2] sm:$0xff] }
0x1771   : > { %18183 = vmatprep.subr.mxu1 %v19282_v22  ;;  %18159 = vmatprep.mubr.msk.f32.mxu0 %vm19283_vm2, %v19282_v22 }
0x1772   : > { %18162 = vmatprep.subr.mxu0 %v19282_v22 }
0x1814   : > { %v21709_v35 = vpop.f32.mrf.mxu1 }
0x1815   : > { %v10105_v57 = vpop.f32.mrf.mxu0  ;;  %v10665_v18 = vsel %vm5312_vm5, %v21709_v35, -inf }
0x1816   : > { %v18112_v25 = vpop.f32.mrf.mxu1  ;;  %v10662_v54 = vsel %vm5312_vm5, %v10105_v57, -inf }
0x1817   : > { %v18105_v13 = vpop.f32.mrf.mxu0 }
0x181c   : > { %v10342_v50 = vpop.f32.mrf.mxu1 }
0x181d   : > { %v10263_v43 = vpop.f32.mrf.mxu0  ;;  %v10671_v4 = vsel %vm5312_vm5, %v10342_v50, -inf }
0x181e   : > { %v10668_v37 = vsel %vm5312_vm5, %v10263_v43, -inf  ;;  %v18126_v36 = vpop.f32.mrf.mxu1 }
0x181f   : > { %10669 = vmax.xlane.f32.xlu0 %v10668_v37  ;;  %v18119_v56 = vpop.f32.mrf.mxu0 }
0x1824   : > { %v21712_v31 = vpop.f32.mrf.mxu1 }
0x1825   : > { %v10421_v53 = vpop.f32.mrf.mxu0  ;;  %v10677_v44 = vsel %vm5312_vm5, %v21712_v31, -inf }
0x1826   : > { %v10674_v62 = vsel %vm5312_vm5, %v10421_v53, -inf  ;;  %v18140_v17 = vpop.f32.mrf.mxu1 }
0x1827   : > { %10675 = vmax.xlane.f32.xlu1 %v10674_v62  ;;  %v18133_v59 = vpop.f32.mrf.mxu0 }
0x182b   : > { %10663 = vmax.xlane.f32.xlu1 %v10662_v54 }
0x182c   : > { %v10658_v16 = vpop.f32.mrf.mxu1 }
0x182d   : > { %v10579_v7 = vpop.f32.mrf.mxu0  ;;  %v10683_v47 = vsel %vm5312_vm5, %v10658_v16, -inf }
0x182e   : > { %v10680_v51 = vsel %vm5312_vm5, %v10579_v7, -inf  ;;  %v18154_v0 = vpop.f32.mrf.mxu1 }
0x182f   : > { %10672 = vmax.xlane.f32.xlu1 %v10671_v4  ;;  %10681 = vmax.xlane.f32.xlu0 %v10680_v51  ;;  %v18147_v48 = vpop.f32.mrf.mxu0 }
0x1833   : > { %10666 = vmax.xlane.f32.xlu0 %v10665_v18  ;;  %10684 = vmax.xlane.f32.xlu1 %v10683_v47  ;;  %v9936_v18 = vcombine.high %v21724_v30, %v21724_v30 }
0x1835   : > { %v10017_v30 = vmul.f32 %v21593_v23, %v9936_v18 }
0x1837   : > { %10678 = vmax.xlane.f32.xlu0 %v10677_v44 }
0x18a8   : > { %v10670_v8 = vpop.xlane.xlu0 %10669 }
0x18a9   : > { %v10688_v15 = vsub.f32 %v10263_v43, %v10670_v8  ;;  %v10004_v43 = vsel %vm1721_vm3, %v21619_v39, %v9988_v27 }
0x18aa   : > { %v10019_v17 = vmul.f32 %v21593_v23, %v10004_v43  ;;  %v10018_v54 = vmul.f32 %v21603_v21, %v10004_v43 }
0x18ab   : > { %v10698_v1 = vmul.f32 1.442695, %v10688_v15 }
0x18ad   : > { %19004 = vpow2.f32 %v10698_v1  ;;  %v9937_v1 = vcombine.high %v21619_v39, %v21619_v39 }
0x18af   : > { %v10021_v39 = vmul.f32 %v21593_v23, %v9937_v1 }
0x18b0   : > { %v10676_v33 = vpop.xlane.xlu1 %10675 }
0x18b1   : > { %v10690_v40 = vsub.f32 %v10421_v53, %v10676_v33 }
0x18b3   : > { %v10702_v24 = vmul.f32 1.442695, %v10690_v40  ;;  %v10016_v40 = vmul.f32 %v21603_v21, %v9936_v18 }
0x18b4   : > { %v10664_v12 = vpop.xlane.xlu1 %10663 }
0x18b5   : > { %19006 = vpow2.f32 %v10702_v24  ;;  %v10686_v14 = vsub.f32 %v10105_v57, %v10664_v12  ;;  %v10020_v24 = vmul.f32 %v21603_v21, %v9937_v1  ;;  %v19158_v12 = vld [vmem:[%s19325_s29] sm:$0xff] }
0x18b7   : > { %v10694_v20 = vmul.f32 1.442695, %v10686_v14  ;;  %v9514_v14 = vld [vmem:[%s22972_s2 + $0x10] sm:$0xff] }
0x18b8   : > { %v10673_v42 = vpop.xlane.xlu1 %10672  ;;  %v10682_v63 = vpop.xlane.xlu0 %10681 }
0x18b9   : > { %19008 = vpow2.f32 %v10694_v20  ;;  %v10689_v41 = vsub.f32 %v10342_v50, %v10673_v42  ;;  %v10692_v34 = vsub.f32 %v10579_v7, %v10682_v63  ;;  %v9935_v7 = vcombine.high %v21656_v29, %v21656_v29 }
0x18ba   : > { %v21730_v2 = vpop.eup %19004 }
0x18bb   : > { %v10706_v55 = vmul.f32 1.442695, %v10692_v34  ;;  %18174 = vmatmul.mubr.msk.f32.vlgmr.msra.gmra.mxu1 %vm5361_vm6, %v21730_v2  ;;  %v10700_v19 = vmul.f32 1.442695, %v10689_v41  ;;  %v10013_v48 = vmul.f32 %v21593_v23, %v9935_v7  ;;  %v10012_v47 = vmul.f32 %v21603_v21, %v9935_v7 }
0x18bc   : > { %18184 = vmatpush3.msra.mxu1 %v10015_v45  ;;  %v10667_v57 = vpop.xlane.xlu0 %10666  ;;  %v10685_v25 = vpop.xlane.xlu1 %10684  ;;  %18187 = vmatprep.mubr.msk.f32.mxu1 %vm19283_vm2, %v19282_v22 }
0x18bd   : > { %v10687_v13 = vsub.f32 %v21709_v35, %v10667_v57  ;;  %18185 = vmatprep.subr.mxu1 %v19282_v22  ;;  %v10693_v50 = vsub.f32 %v10658_v16, %v10685_v25  ;;  %19010 = vpow2.f32 %v10706_v55  ;;  %v9934_v35 = vcombine.high %v21661_v3, %v21661_v3 }
0x18be   : > { %18186 = vmatpush3.msra.mxu1 %v10014_v32  ;;  %19012 = vpow2.f32 %v10700_v19 }
0x18bf   : > { %v10696_v37 = vmul.f32 1.442695, %v10687_v13  ;;  %18197 = vmatprep.subr.mxu1 %v19282_v22  ;;  %v10708_v36 = vmul.f32 1.442695, %v10693_v50  ;;  %v10009_v16 = vmul.f32 %v21593_v23, %v9934_v35  ;;  %v10008_v3 = vmul.f32 %v21603_v21, %v9934_v35 }
0x18c0   : > { %v10679_v56 = vpop.xlane.xlu0 %10678 }
0x18c1   : > { %19014 = vpow2.f32 %v10696_v37  ;;  %v10691_v53 = vsub.f32 %v21712_v31, %v10679_v56 }
0x18c2   : > { %v19007_v62 = vpop.eup %19006  ;;  %19016 = vpow2.f32 %v10708_v36 }
0x18c3   : > { %v10704_v59 = vmul.f32 1.442695, %v10691_v53  ;;  %18188 = vmatmul.mubr.msk.f32.vlgmr.msra.gmra.mxu1 %vm5361_vm6, %v19007_v62 }
0x18c4   : > { %18198 = vmatpush3.msra.mxu1 %v10019_v17  ;;  %18201 = vmatprep.mubr.msk.f32.mxu1 %vm19283_vm2, %v19282_v22 }
0x18c5   : > { %19018 = vpow2.f32 %v10704_v59  ;;  %18199 = vmatprep.subr.mxu1 %v19282_v22 }
0x18c6   : > { %v19009_v31 = vpop.eup %19008  ;;  %18200 = vmatpush3.msra.mxu1 %v10018_v54 }
0x18c7   : > { %18160 = vmatmul.mubr.msk.f32.vlgmr.msra.gmra.mxu0 %vm5361_vm6, %v19009_v31  ;;  %18211 = vmatprep.subr.mxu1 %v21593_v23 }
0x18c8   : > { %18163 = vmatpush3.msra.mxu0 %v10009_v16  ;;  %18166 = vmatprep.mubr.msk.f32.mxu0 %vm19283_vm2, %v19282_v22 }
0x18c9   : > { %18164 = vmatprep.subr.mxu0 %v19282_v22 }
0x18ca   : > { %18165 = vmatpush3.msra.mxu0 %v10008_v3  ;;  %v19011_v4 = vpop.eup %19010 }
0x18cb   : > { %18176 = vmatprep.subr.mxu0 %v19282_v22  ;;  %18202 = vmatmul.mubr.msk.f32.vlgmr.msra.gmra.mxu1 %vm5361_vm6, %v19011_v4  ;;  %v19013_v51 = vpop.eup %19012 }
0x18cc   : > { %18212 = vmatpush3.msra.mxu1 %v21593_v23  ;;  %v11295_v44 = vcombine.low %v21730_v2, %v19013_v51  ;;  %v9515_v23 = vld [vmem:[%s22972_s2 + $0x18] sm:$0xff] }
0x18cd   : > { %18213 = vmatprep.subr.mxu1 %v21603_v21 }
0x18ce   : > { %v19015_v0 = vpop.eup %19014  ;;  %18214 = vmatpush3.msra.mxu1 %v21603_v21  ;;  %v9513_v21 = vld [vmem:[%s22972_s2 + $0x8] sm:$0xff]  ;;  %s22973_s2 = sld [smem:[#allocation27_spill]] }
0x18cf   : > { %18167 = vmatmul.mubr.msk.f32.vlgmr.msra.gmra.mxu0 %vm5361_vm6, %v19015_v0  ;;  %v11294_v29 = vcombine.low %v19009_v31, %v19015_v0  ;;  %v19017_v8 = vpop.eup %19016 }
0x18d0   : > { %18177 = vmatpush3.msra.mxu0 %v10013_v48  ;;  %18180 = vmatprep.mubr.msk.f32.mxu0 %vm19283_vm2, %v19282_v22  ;;  %v11297_v49 = vcombine.low %v19011_v4, %v19017_v8 }
0x18d1   : > { %18178 = vmatprep.subr.mxu0 %v19282_v22  ;;  %18215 = vmatprep.mubr.msk.f32.mxu1 %vm5361_vm6, %v11294_v29 }
0x18d2   : > { %v19019_v15 = vpop.eup %19018  ;;  %18179 = vmatpush3.msra.mxu0 %v10012_v47  ;;  %18216 = vmatmul.mubr.msk.f32.vlgmr.msra.gmra.mxu1 %vm5361_vm6, %v11295_v44 }
0x18d3   : > { %18190 = vmatprep.subr.mxu0 %v19282_v22  ;;  %18181 = vmatmul.mubr.msk.f32.vlgmr.msra.gmra.mxu0 %vm5361_vm6, %v19013_v51  ;;  %v11296_v33 = vcombine.low %v19007_v62, %v19019_v15 }
0x18d4   : > { %18191 = vmatpush3.msra.mxu0 %v10017_v30  ;;  %18194 = vmatprep.mubr.msk.f32.mxu0 %vm19283_vm2, %v19282_v22 }
0x18d5   : > { %18192 = vmatprep.subr.mxu0 %v19282_v22  ;;  %18218 = vmatprep.mubr.msk.f32.mxu1 %vm5361_vm6, %v11296_v33 }
0x18d6   : > { %18193 = vmatpush3.msra.mxu0 %v10016_v40  ;;  %18219 = vmatmul.mubr.msk.f32.gmra.mxu1 %vm5361_vm6, %v11297_v49 }
0x18d7   : > { %18204 = vmatprep.subr.mxu0 %v19282_v22  ;;  %18195 = vmatmul.mubr.msk.f32.vlgmr.msra.gmra.mxu0 %vm5361_vm6, %v19019_v15 }
0x18d8   : > { %18205 = vmatpush3.msra.mxu0 %v10021_v39  ;;  %18208 = vmatprep.mubr.msk.f32.mxu0 %vm19283_vm2, %v19282_v22 }
0x18d9   : > { %18206 = vmatprep.subr.mxu0 %v19282_v22  ;;  %18243 = vmatprep.mubr.msk.f32.mxu1 %vm1429_vm1, %v19158_v12 }
0x18da   : > { %18207 = vmatpush3.msra.mxu0 %v10020_v24 }
0x18db   : > { %18209 = vmatmul.mubr.msk.f32.vlgmr.msra.gmra.mxu0 %vm5361_vm6, %v19017_v8  ;;  %18221 = vmatprep.subr.mxu0 %v9515_v23 }
0x18dc   : > { %18222 = vmatpush3.msra.mxu0 %v9515_v23 }
0x18dd   : > { %18223 = vmatprep.subr.mxu0 %v9514_v14 }
0x18de   : > { %18224 = vmatpush3.msra.mxu0 %v9514_v14 }
0x18df   : > { %18225 = vmatprep.subr.mxu0 %v9513_v21 }
0x18e0   : > { %18226 = vmatpush3.msra.mxu0 %v9513_v21 }
0x18e1   : > { %18227 = vmatprep.subr.mxu0 %v9512_v38 }
0x18e2   : > { %18228 = vmatpush3.msra.mxu0 %v9512_v38 }
0x197b   : > { %v10925_v20 = vpop.f32.mrf.mxu1 }
0x197d   : > { %v18175_v42 = vpop.f32.mrf.mxu1 }
0x1983   : > { %v11071_v63 = vpop.f32.mrf.mxu1 }
0x1985   : > { %v18189_v41 = vpop.f32.mrf.mxu1 }
0x1987   : > { %v10779_v34 = vpop.f32.mrf.mxu0 }
0x1989   : > { %v18161_v2 = vpop.f32.mrf.mxu0 }
0x198b   : > { %v11217_v45 = vpop.f32.mrf.mxu1 }
0x198d   : > { %v18203_v27 = vpop.f32.mrf.mxu1 }
0x198f   : > { %v10852_v55 = vpop.f32.mrf.mxu0 }
0x1991   : > { %v18168_v32 = vpop.f32.mrf.mxu0 }
0x1992   : > { %v18217_v19 = vpop.f32.mrf.mxu1 }
0x1993   : > { %v11396_v57 = vcombine.high %v18217_v19, %v18217_v19  ;;  %v11405_v25 = vmax.f32 %v18217_v19, 1e-20  ;;  %v10998_v13 = vpop.f32.mrf.mxu0  ;;  %v19159_v19 = vld [vmem:[%s19325_s29 + $0x8] sm:$0xff] }
0x1994   : > { %v11372_v50 = vpop.f32.mrf.mxu1 }
0x1995   : > { %v11406_v43 = vmax.f32 %v11396_v57, 1e-20  ;;  %v11395_v37 = vcombine.high %v11372_v50, %v11372_v50  ;;  %v11403_v36 = vmax.f32 %v11372_v50, 1e-20  ;;  %v18182_v56 = vpop.f32.mrf.mxu0  ;;  %19020 = vrcp.f32 %v11405_v25  ;;  %v19160_v57 = vld [vmem:[%s19325_s29 + $0x10] sm:$0xff]  ;;  %v19161_v25 = vld [vmem:[%s19325_s29 + $0x18] sm:$0xff] }
0x1996   : > { %v18220_v53 = vpop.f32.mrf.mxu1 }
0x1997   : > { %19022 = vrcp.f32 %v11406_v43  ;;  %v11404_v62 = vmax.f32 %v11395_v37, 1e-20  ;;  %v11398_v35 = vcombine.high %v18220_v53, %v18220_v53  ;;  %v11409_v17 = vmax.f32 %v18220_v53, 1e-20  ;;  %v11144_v59 = vpop.f32.mrf.mxu0 }
0x1998   : > { %19024 = vrcp.f32 %v11403_v36  ;;  %v11382_v54 = vpop.f32.mrf.mxu1 }
0x1999   : > { %19026 = vrcp.f32 %v11404_v62  ;;  %v11410_v31 = vmax.f32 %v11398_v35, 1e-20  ;;  %v11397_v16 = vcombine.high %v11382_v54, %v11382_v54  ;;  %v11407_v3 = vmax.f32 %v11382_v54, 1e-20  ;;  %v18196_v7 = vpop.f32.mrf.mxu0 }
0x199a   : > { %19028 = vrcp.f32 %v11409_v17 }
0x199b   : > { %19030 = vrcp.f32 %v11410_v31  ;;  %v11408_v4 = vmax.f32 %v11397_v16, 1e-20  ;;  %v11290_v51 = vpop.f32.mrf.mxu0 }
0x199c   : > { %19032 = vrcp.f32 %v11407_v3 }
0x199d   : > { %19034 = vrcp.f32 %v11408_v4  ;;  %v18210_v0 = vpop.f32.mrf.mxu0 }
0x19a2   : > { %v19021_v48 = vpop.eup %19020 }
0x19a3   : > { %v11421_v33 = vmul.f32 %v19021_v48, %v10925_v20 }
0x19a4   : > { %v19023_v18 = vpop.eup %19022 }
0x19a5   : > { %v19025_v29 = vpop.eup %19024  ;;  %v11422_v44 = vmul.f32 %v19023_v18, %v10998_v13  ;;  %v15680_v13 = vld [vmem:[%s22974_s3] ss:$0 sm:$0xff]  ;;  %s22976_s3 = sld [smem:[#allocation28_spill]] }
0x19a6   : > { %v19027_v47 = vpop.eup %19026  ;;  %v11419_v15 = vmul.f32 %v19025_v29, %v10779_v34  ;;  %v15881_v34 = vld [vmem:[%s22973_s2] ss:$0 sm:$0xff]  ;;  %v6673_v36 = vadd.f32 %v21051_v60, %v15680_v13  ;;  %v6668_v35 = vadd.f32 %v15680_v13, %v21053_v6  ;;  %v6683_v31 = vadd.f32 %v21055_v58, %v15680_v13  ;;  %s22975_s2 = sld [smem:[#allocation30_spill]] }
0x19a7   : > { %v19029_v8 = vpop.eup %19028  ;;  %v11420_v1 = vmul.f32 %v19027_v47, %v10852_v55  ;;  %v11442_v24 = vcombine.low %v11421_v33, %v11422_v44  ;;  %v6678_v16 = vadd.f32 %v15680_v13, %v21057_v26 }
0x19a8   : > { %v19031_v30 = vpop.eup %19030  ;;  %v11425_v21 = vmul.f32 %v19029_v8, %v11217_v45  ;;  %v6688_v6 = vadd.f32 %v6668_v35, %v20651_v46  ;;  %v6691_v7 = vadd.f32 %v6683_v31, %v20667_v28 }
0x19a9   : > { %v19033_v40 = vpop.eup %19032  ;;  %v11441_v49 = vcombine.low %v11419_v15, %v11420_v1  ;;  %v11426_v12 = vmul.f32 %v19031_v30, %v11290_v51 }
0x19aa   : > { %v19035_v39 = vpop.eup %19034  ;;  %v11423_v23 = vmul.f32 %v19033_v40, %v11071_v63  ;;  %v6692_v58 = vsel %vm1429_vm1, %v6688_v6, 0.0 }
0x19ab   : > { %18229 = vmatprep.mubr.msk.f32.mxu0 %vm1429_vm1, %v11441_v49  ;;  %v11424_v14 = vmul.f32 %v19035_v39, %v11144_v59  ;;  %v11444_v42 = vcombine.low %v11425_v21, %v11426_v12 }
0x19ac   : > { %18230 = vmatmul.mubr.msk.f32.vlgmr.msra.gmra.mxu0 %vm1429_vm1, %v11442_v24  ;;  %v21907_v35 = vld [vmem:[%s22975_s2] sm:$0xff] }
0x19ad   : > { %v11443_v38 = vcombine.low %v11423_v23, %v11424_v14 }
0x19af   : > { %18232 = vmatprep.mubr.msk.f32.mxu0 %vm1429_vm1, %v11443_v38 }
0x19b0   : > { %18233 = vmatmul.mubr.msk.f32.gmra.mxu0 %vm1429_vm1, %v11444_v42 }
0x1a6c   : > { %v18231_v20 = vpop.f32.mrf.mxu0 }
0x1a6d   : > { %v11525_v45 = vadd.f32 %v18231_v20, %v15881_v34 }
0x1a6e   : > { %v11519_v41 = vpop.f32.mrf.mxu0 }
0x1a6f   : > { %v11520_v32 = vadd.f32 %v15881_v34, %v11519_v41 }
0x1a70   : > { %v18234_v2 = vpop.f32.mrf.mxu0 }
0x1a71   : > { %v11535_v27 = vadd.f32 %v18234_v2, %v15881_v34 }
0x1a72   : > { %v11529_v55 = vpop.f32.mrf.mxu0 }
0x1a73   : > { %v11530_v63 = vadd.f32 %v15881_v34, %v11529_v55  ;;  %18235 = vmatprep.subr.mxu1 %v11535_v27 }
0x1a74   : > { %18236 = vmatpush3.msra.mxu1 %v11535_v27 }
0x1a75   : > { %18237 = vmatprep.subr.mxu1 %v11530_v63 }
0x1a76   : > { %18238 = vmatpush3.msra.mxu1 %v11530_v63 }
0x1a77   : > { %18239 = vmatprep.subr.mxu1 %v11525_v45 }
0x1a78   : > { %18240 = vmatpush3.msra.mxu1 %v11525_v45 }
0x1a79   : > { %18241 = vmatprep.subr.mxu1 %v11520_v32 }
0x1a7a   : > { %18242 = vmatpush3.msra.mxu1 %v11520_v32 }
0x1a7b   : > { %18244 = vmatmul.mubr.msk.f32.vlgmr.msra.gmra.mxu1 %vm1429_vm1, %v19159_v19 }
0x1a7c   : > { %18246 = vmatprep.mubr.msk.f32.mxu1 %vm1429_vm1, %v19160_v57 }
0x1a7f   : > { %18247 = vmatmul.mubr.msk.f32.gmra.mxu1 %vm1429_vm1, %v19161_v25 }
0x1b3b   : > { %v18245_v50 = vpop.f32.mrf.mxu1 }
0x1b3c   : > { %v11626_v43 = vadd.f32 %v18245_v50, %v20673_v11 }
0x1b3d   : > { %v11604_v37 = vpop.f32.mrf.mxu1 }
0x1b3e   : > { %v11625_v56 = vadd.f32 %v11604_v37, %v20665_v5  ;;  %v11632_v53 = vsel %vm1429_vm1, %v11626_v43, 0.0  ;;  %v6689_v5 = vadd.f32 %v6673_v36, %v20654_v52  ;;  %v6701_v52 = vsel %vm1429_vm1, %v6691_v7, 0.0  ;;  %v21880_v37 = vld [vmem:[%s22975_s2 + $0x38] sm:$0xff]  ;;  %v21887_v36 = vld [vmem:[%s22975_s2 + $0x10] sm:$0xff] }
0x1b3f   : > { %11633 = vadd.xlane.f32.xlu1 %v11632_v53  ;;  %v18248_v62 = vpop.f32.mrf.mxu1  ;;  %18263 = vmatprep.subr.mxu1 %v21880_v37  ;;  %v21897_v53 = vld [vmem:[%s22975_s2 + $0x8] sm:$0xff] }
0x1b40   : > { %v11628_v17 = vadd.f32 %v18248_v62, %v20686_v9  ;;  %v11629_v59 = vsel %vm1429_vm1, %v11625_v56, 0.0  ;;  %v6695_v9 = vsel %vm1429_vm1, %v6689_v5, 0.0  ;;  %18264 = vmatpush3.msra.mxu1 %v21880_v37  ;;  %v21900_v62 = vld [vmem:[%s22975_s2 + $0x28] sm:$0xff] }
0x1b41   : > { %11630 = vadd.xlane.f32.xlu0 %v11629_v59  ;;  %v11614_v54 = vpop.f32.mrf.mxu1 }
0x1b42   : > { %v11627_v11 = vadd.f32 %v11614_v54, %v20680_v10  ;;  %v11638_v60 = vsel %vm1429_vm1, %v11628_v17, 0.0  ;;  %v6690_v10 = vadd.f32 %v6678_v16, %v20661_v61 }
0x1b43   : > { %11639 = vadd.xlane.f32.xlu1 %v11638_v60 }
0x1b44   : > { %v11635_v3 = vsel %vm1429_vm1, %v11627_v11, 0.0  ;;  %v6698_v26 = vsel %vm1429_vm1, %v6690_v10, 0.0 }
0x1b45   : > { %11636 = vadd.xlane.f32.xlu0 %v11635_v3 }
0x1b47   : > { %6696 = vadd.xlane.f32.xlu1 %v6695_v9 }
0x1b49   : > { %6693 = vadd.xlane.f32.xlu0 %v6692_v58 }
0x1b4b   : > { %6702 = vadd.xlane.f32.xlu1 %v6701_v52 }
0x1b4d   : > { %6699 = vadd.xlane.f32.xlu0 %v6698_v26 }
0x1bc8   : > { %v11634_v4 = vpop.xlane.xlu1 %11633 }
0x1bc9   : > { %v11642_v51 = vmul.f32 0.03125, %v11634_v4 }
0x1bca   : > { %v11631_v46 = vpop.xlane.xlu0 %11630 }
0x1bcb   : > { %v21836_v0 = vsub.f32 %v11626_v43, %v11642_v51  ;;  %v11641_v48 = vmul.f32 0.03125, %v11631_v46  ;;  %v21877_v43 = vld [vmem:[%s22975_s2 + $0x18] sm:$0xff] }
0x1bcc   : > { %v11640_v18 = vpop.xlane.xlu1 %11639  ;;  %18249 = vmatprep.subr.mxu0 %v21877_v43 }
0x1bcd   : > { %v21838_v28 = vsub.f32 %v11625_v56, %v11641_v48  ;;  %v11644_v29 = vmul.f32 0.03125, %v11640_v18  ;;  %v11650_v61 = vmul.f32 %v21836_v0, %v21836_v0  ;;  %18250 = vmatpush3.msra.mxu0 %v21877_v43  ;;  %v21890_v56 = vld [vmem:[%s22975_s2 + $0x30] sm:$0xff] }
0x1bce   : > { %v11637_v47 = vpop.xlane.xlu0 %11636  ;;  %18251 = vmatprep.subr.mxu0 %v21887_v36  ;;  %18265 = vmatprep.subr.mxu1 %v21890_v56 }
0x1bcf   : > { %v21842_v44 = vsub.f32 %v11628_v17, %v11644_v29  ;;  %v11643_v8 = vmul.f32 0.03125, %v11637_v47  ;;  %v11656_v15 = vsel %vm1429_vm1, %v11650_v61, 0.0  ;;  %v11649_v1 = vmul.f32 %v21838_v28, %v21838_v28  ;;  %18252 = vmatpush3.msra.mxu0 %v21887_v36  ;;  %18266 = vmatpush3.msra.mxu1 %v21890_v56  ;;  %v21910_v17 = vld [vmem:[%s22975_s2 + $0x20] sm:$0xff] }
0x1bd0   : > { %11657 = vadd.xlane.f32.xlu1 %v11656_v15  ;;  %v6697_v30 = vpop.xlane.xlu1 %6696  ;;  %18253 = vmatprep.subr.mxu0 %v21897_v53 }
0x1bd1   : > { %v21847_v33 = vsub.f32 %v11627_v11, %v11643_v8  ;;  %v6705_v40 = vmul.f32 0.03125, %v6697_v30  ;;  %v11653_v49 = vsel %vm1429_vm1, %v11649_v1, 0.0  ;;  %v11652_v39 = vmul.f32 %v21842_v44, %v21842_v44  ;;  %18267 = vmatprep.subr.mxu1 %v21900_v62  ;;  %18254 = vmatpush3.msra.mxu0 %v21897_v53  ;;  %v15890_v30 = vld [vmem:[%s22976_s3] ss:$0 sm:$0xff]  ;;  %s22981_s3 = sld [smem:[#allocation34_spill]] }
0x1bd2   : > { %v6694_v24 = vpop.xlane.xlu0 %6693  ;;  %11654 = vadd.xlane.f32.xlu0 %v11653_v49  ;;  %18268 = vmatpush3.msra.mxu1 %v21900_v62 }
0x1bd3   : > { %v21852_v12 = vsub.f32 %v6689_v5, %v6705_v40  ;;  %v6704_v23 = vmul.f32 0.03125, %v6694_v24  ;;  %v11662_v14 = vsel %vm1429_vm1, %v11652_v39, 0.0  ;;  %v11651_v21 = vmul.f32 %v21847_v33, %v21847_v33  ;;  %18255 = vmatprep.subr.mxu0 %v21907_v35  ;;  %18269 = vmatprep.subr.mxu1 %v21910_v17 }
0x1bd4   : > { %11663 = vadd.xlane.f32.xlu1 %v11662_v14  ;;  %v6703_v38 = vpop.xlane.xlu1 %6702  ;;  %18256 = vmatpush3.msra.mxu0 %v21907_v35  ;;  %v15891_v14 = vld [vmem:[%s22977_s5] ss:$0 sm:$0xff]  ;;  %s22979_s5 = sld [smem:[#allocation20_spill]] }
0x1bd5   : > { %v21857_v42 = vsub.f32 %v6688_v6, %v6704_v23  ;;  %v6707_v20 = vmul.f32 0.03125, %v6703_v38  ;;  %v11659_v41 = vsel %vm1429_vm1, %v11651_v21, 0.0  ;;  %v6713_v34 = vmul.f32 %v21852_v12, %v21852_v12  ;;  %18270 = vmatpush3.msra.mxu1 %v21910_v17  ;;  %18277 = vmatprep.subr.mxu0 %v21877_v43 }
0x1bd6   : > { %11660 = vadd.xlane.f32.xlu0 %v11659_v41  ;;  %v6700_v2 = vpop.xlane.xlu0 %6699  ;;  %18291 = vmatprep.subr.mxu1 %v21880_v37 }
0x1bd7   : > { %v21862_v27 = vsub.f32 %v6691_v7, %v6707_v20  ;;  %v6706_v55 = vmul.f32 0.03125, %v6700_v2  ;;  %v6719_v63 = vsel %vm1429_vm1, %v6713_v34, 0.0  ;;  %v6712_v45 = vmul.f32 %v21857_v42, %v21857_v42 }
0x1bd8   : > { %6720 = vadd.xlane.f32.xlu1 %v6719_v63  ;;  %v15681_v63 = vld [vmem:[%s22978_s6] ss:$0 sm:$0xff]  ;;  %s22980_s6 = sld [smem:[#allocation31_spill]] }
0x1bd9   : > { %v21867_v32 = vsub.f32 %v6690_v10, %v6706_v55  ;;  %v6716_v19 = vsel %vm1429_vm1, %v6712_v45, 0.0  ;;  %v6715_v57 = vmul.f32 %v21862_v27, %v21862_v27 }
0x1bda   : > { %6717 = vadd.xlane.f32.xlu0 %v6716_v19 }
0x1bdb   : > { %v6725_v25 = vsel %vm1429_vm1, %v6715_v57, 0.0  ;;  %v6714_v13 = vmul.f32 %v21867_v32, %v21867_v32 }
0x1bdc   : > { %6726 = vadd.xlane.f32.xlu1 %v6725_v25 }
0x1bdd   : > { %v6722_v50 = vsel %vm1429_vm1, %v6714_v13, 0.0 }
0x1bde   : > { %6723 = vadd.xlane.f32.xlu0 %v6722_v50 }
0x1c59   : > { %v11658_v59 = vpop.xlane.xlu1 %11657 }
0x1c5a   : > { %v11666_v54 = vmul.f32 0.03125, %v11658_v59 }
0x1c5b   : > { %v11655_v31 = vpop.xlane.xlu0 %11654 }
0x1c5c   : > { %v11670_v11 = vadd.f32 1e-05, %v11666_v54  ;;  %v11665_v60 = vmul.f32 0.03125, %v11655_v31 }
0x1c5d   : > { %v11664_v5 = vpop.xlane.xlu1 %11663 }
0x1c5e   : > { %19036 = vrsqrt.f32 %v11670_v11  ;;  %v11669_v16 = vadd.f32 1e-05, %v11665_v60  ;;  %v11668_v3 = vmul.f32 0.03125, %v11664_v5 }
0x1c5f   : > { %v11661_v6 = vpop.xlane.xlu0 %11660 }
0x1c60   : > { %19038 = vrsqrt.f32 %v11669_v16  ;;  %v11672_v9 = vadd.f32 1e-05, %v11668_v3  ;;  %v11667_v7 = vmul.f32 0.03125, %v11661_v6 }
0x1c61   : > { %v6721_v58 = vpop.xlane.xlu1 %6720 }
0x1c62   : > { %19040 = vrsqrt.f32 %v11672_v9  ;;  %v11671_v10 = vadd.f32 1e-05, %v11667_v7  ;;  %v6729_v52 = vmul.f32 0.03125, %v6721_v58  ;;  %v22007_v58 = vld [vmem:[%s22980_s6] ss:$0 sm:$0xff] }
0x1c63   : > { %v6718_v26 = vpop.xlane.xlu0 %6717 }
0x1c64   : > { %19042 = vrsqrt.f32 %v11671_v10  ;;  %v6733_v4 = vadd.f32 1e-05, %v6729_v52  ;;  %v6728_v51 = vmul.f32 0.03125, %v6718_v26 }
0x1c65   : > { %v6727_v46 = vpop.xlane.xlu1 %6726 }
0x1c66   : > { %19044 = vrsqrt.f32 %v6733_v4  ;;  %v6732_v48 = vadd.f32 1e-05, %v6728_v51  ;;  %v6731_v18 = vmul.f32 0.03125, %v6727_v46 }
0x1c67   : > { %v6724_v29 = vpop.xlane.xlu0 %6723 }
0x1c68   : > { %19046 = vrsqrt.f32 %v6732_v48  ;;  %v6735_v61 = vadd.f32 1e-05, %v6731_v18  ;;  %v6730_v47 = vmul.f32 0.03125, %v6724_v29  ;;  %v22015_v48 = vld [vmem:[%s22955_s9 + $0x28] sm:$0xff] }
0x1c6a   : > { %19048 = vrsqrt.f32 %v6735_v61  ;;  %v6734_v8 = vadd.f32 1e-05, %v6730_v47  ;;  %v22021_v47 = vld [vmem:[%s22980_s6 + $0x1] ss:$0 sm:$0xff] }
0x1c6b   : > { %v19037_v15 = vpop.eup %19036 }
0x1c6c   : > { %v11678_v1 = vmul.f32 %v19037_v15, %v21836_v0  ;;  %19050 = vrsqrt.f32 %v6734_v8  ;;  %v22024_v8 = vld [vmem:[%s22955_s9 + $0x20] sm:$0xff] }
0x1c6d   : > { %v19039_v40 = vpop.eup %19038 }
0x1c6e   : > { %v11677_v49 = vmul.f32 %v19039_v40, %v21838_v28  ;;  %v11688_v24 = vmul.f32 %v15890_v30, %v11678_v1 }
0x1c6f   : > { %v19041_v39 = vpop.eup %19040 }
0x1c70   : > { %v11680_v23 = vmul.f32 %v19041_v39, %v21842_v44  ;;  %v11687_v21 = vmul.f32 %v15890_v30, %v11677_v49  ;;  %v21926_v2 = vadd.f32 %v15891_v14, %v11688_v24 }
0x1c71   : > { %v19043_v38 = vpop.eup %19042 }
0x1c72   : > { %v21923_v20 = vadd.f32 %v15891_v14, %v11687_v21  ;;  %v11679_v41 = vmul.f32 %v19043_v38, %v21847_v33  ;;  %v11690_v28 = vmul.f32 %v15890_v30, %v11680_v23 }
0x1c73   : > { %v19045_v34 = vpop.eup %19044 }
0x1c74   : > { %18257 = vmatprep.mubr.msk.f32.mxu0 %vm1429_vm1, %v21923_v20  ;;  %18271 = vmatprep.mubr.msk.f32.mxu1 %vm1429_vm1, %v21923_v20  ;;  %v11689_v0 = vmul.f32 %v15890_v30, %v11679_v41  ;;  %v6741_v55 = vmul.f32 %v19045_v34, %v21852_v12  ;;  %v21949_v12 = vadd.f32 %v15891_v14, %v11690_v28  ;;  %v22059_v34 = vld [vmem:[%s22955_s9 + $0x18] sm:$0xff] }
0x1c75   : > { %v19047_v44 = vpop.eup %19046  ;;  %18258 = vmatmul.mubr.msk.f32.vlgmr.msra.gmra.mxu0 %vm1429_vm1, %v21926_v2  ;;  %18272 = vmatmul.mubr.msk.f32.vlgmr.msra.gmra.mxu1 %vm1429_vm1, %v21926_v2 }
0x1c76   : > { %18278 = vmatpush3.msra.mxu0 %v21877_v43  ;;  %18292 = vmatpush3.msra.mxu1 %v21880_v37  ;;  %v21939_v33 = vadd.f32 %v15891_v14, %v11689_v0  ;;  %v6740_v45 = vmul.f32 %v19047_v44, %v21857_v42  ;;  %v15682_v42 = vld [vmem:[%s22979_s5] ss:$0 sm:$0xff]  ;;  %v6751_v13 = vmul.f32 %v15681_v63, %v6741_v55  ;;  %s22982_s5 = sld [smem:[#allocation32_spill]] }
0x1c77   : > { %v19049_v19 = vpop.eup %19048  ;;  %18279 = vmatprep.subr.mxu0 %v21887_v36  ;;  %18293 = vmatprep.subr.mxu1 %v21890_v56 }
0x1c78   : > { %18260 = vmatprep.mubr.msk.f32.mxu0 %vm1429_vm1, %v21939_v33  ;;  %18274 = vmatprep.mubr.msk.f32.mxu1 %vm1429_vm1, %v21939_v33  ;;  %v6750_v57 = vmul.f32 %v15681_v63, %v6740_v45  ;;  %v6743_v50 = vmul.f32 %v19049_v19, %v21862_v27  ;;  %v6761_v27 = vadd.f32 %v15682_v42, %v6751_v13  ;;  %v15920_v45 = vld [vmem:[%s22980_s6 + $0x2] ss:$0 sm:$0xff]  ;;  %v22078_v19 = vld [vmem:[%s22955_s9 + $0x10] sm:$0xff] }
0x1c79   : > { %v19051_v25 = vpop.eup %19050  ;;  %18280 = vmatpush3.msra.mxu0 %v21887_v36  ;;  %18294 = vmatpush3.msra.mxu1 %v21890_v56 }
0x1c7a   : > { %18261 = vmatmul.mubr.msk.f32.gmra.mxu0 %vm1429_vm1, %v21949_v12  ;;  %18275 = vmatmul.mubr.msk.f32.gmra.mxu1 %vm1429_vm1, %v21949_v12  ;;  %v6760_v43 = vadd.f32 %v15682_v42, %v6750_v57  ;;  %v6742_v37 = vmul.f32 %v19051_v25, %v21867_v32  ;;  %v15899_v32 = vld [vmem:[%s22975_s2 + $0x58] sm:$0xff]  ;;  %v6753_v59 = vmul.f32 %v15681_v63, %v6743_v50 }
0x1c7b   : > { %18281 = vmatprep.subr.mxu0 %v21897_v53  ;;  %18295 = vmatprep.subr.mxu1 %v21900_v62 }
0x1c7c   : > { %18282 = vmatpush3.msra.mxu0 %v21897_v53  ;;  %18296 = vmatpush3.msra.mxu1 %v21900_v62  ;;  %v6752_v36 = vmul.f32 %v15681_v63, %v6742_v37  ;;  %v15898_v53 = vld [vmem:[%s22975_s2 + $0x50] sm:$0xff]  ;;  %v6763_v62 = vadd.f32 %v15682_v42, %v6753_v59 }
0x1c7d   : > { %18283 = vmatprep.subr.mxu0 %v21907_v35  ;;  %18297 = vmatprep.subr.mxu1 %v21910_v17 }
0x1c7e   : > { %18284 = vmatpush3.msra.mxu0 %v21907_v35  ;;  %18285 = vmatprep.mubr.msk.f32.mxu0 %vm1429_vm1, %v6760_v43  ;;  %v6762_v56 = vadd.f32 %v15682_v42, %v6752_v36  ;;  %v15897_v35 = vld [vmem:[%s22975_s2 + $0x48] sm:$0xff] }
0x1c7f   : > { %18298 = vmatpush3.msra.mxu1 %v21910_v17  ;;  %18299 = vmatprep.mubr.msk.f32.mxu1 %vm1429_vm1, %v6760_v43  ;;  %v15896_v17 = vld [vmem:[%s22975_s2 + $0x40] sm:$0xff]  ;;  %s22983_s2 = sld [smem:[#allocation33_spill]] }
0x1c80   : > { %18286 = vmatmul.mubr.msk.f32.vlgmr.msra.gmra.mxu0 %vm1429_vm1, %v6761_v27  ;;  %18300 = vmatmul.mubr.msk.f32.vlgmr.msra.gmra.mxu1 %vm1429_vm1, %v6761_v27 }
0x1c81   : > { %18305 = vmatprep.subr.mxu0 %v15899_v32  ;;  %18288 = vmatprep.mubr.msk.f32.mxu0 %vm1429_vm1, %v6762_v56 }
0x1c82   : > { %18306 = vmatpush3.msra.mxu0 %v15899_v32  ;;  %18302 = vmatprep.mubr.msk.f32.mxu1 %vm1429_vm1, %v6762_v56 }
0x1c83   : > { %18307 = vmatprep.subr.mxu0 %v15898_v53  ;;  %18319 = vmatprep.subr.mxu1 %v19282_v22 }
0x1c84   : > { %18308 = vmatpush3.msra.mxu0 %v15898_v53  ;;  %18303 = vmatmul.mubr.msk.f32.gmra.mxu1 %vm1429_vm1, %v6763_v62 }
0x1c85   : > { %18289 = vmatmul.mubr.msk.f32.gmra.mxu0 %vm1429_vm1, %v6763_v62  ;;  %18309 = vmatprep.subr.mxu0 %v15897_v35 }
0x1c86   : > { %18310 = vmatpush3.msra.mxu0 %v15897_v35  ;;  %18313 = vmatprep.mubr.msk.f32.mxu0 %vm1429_vm1, %v6760_v43  ;;  %v22101_v43 = vld [vmem:[%s22955_s9 + $0x8] sm:$0xff]  ;;  %v22132_v35 = vld [vmem:[%s22955_s9] sm:$0xff] }
0x1c87   : > { %18311 = vmatprep.subr.mxu0 %v15896_v17  ;;  %18331 = vmatprep.mubr.msk.f32.mxu1 %vm19283_vm2, %v19282_v22 }
0x1c88   : > { %18312 = vmatpush3.msra.mxu0 %v15896_v17 }
0x1c89   : > { %18314 = vmatmul.mubr.msk.f32.vlgmr.msra.gmra.mxu0 %vm1429_vm1, %v6761_v27  ;;  %18334 = vmatprep.subr.mxu0 %v19282_v22 }
0x1c8a   : > { %18316 = vmatprep.mubr.msk.f32.mxu0 %vm1429_vm1, %v6762_v56 }
0x1c8d   : > { %18317 = vmatmul.mubr.msk.f32.gmra.mxu0 %vm1429_vm1, %v6763_v62 }
0x1c8e   : > { %18346 = vmatprep.mubr.msk.f32.mxu0 %vm19283_vm2, %v19282_v22 }
0x1d35   : > { %v21990_v54 = vpop.f32.mrf.mxu0  ;;  %v21992_v31 = vpop.f32.mrf.mxu1 }
0x1d36   : > { %v11810_v62 = vadd.f32 %v21990_v54, %v22007_v58 }
0x1d37   : > { %v21994_v11 = vpop.f32.mrf.mxu0  ;;  %v21996_v60 = vpop.f32.mrf.mxu1 }
0x1d3a   : > { %v21998_v5 = vpop.f32.mrf.mxu0  ;;  %v22000_v16 = vpop.f32.mrf.mxu1 }
0x1d3c   : > { %v22002_v3 = vpop.f32.mrf.mxu0  ;;  %v22004_v6 = vpop.f32.mrf.mxu1 }
0x1d40   : > { %v18287_v9 = vpop.f32.mrf.mxu0  ;;  %v18301_v7 = vpop.f32.mrf.mxu1 }
0x1d41   : > { %v11998_v10 = vadd.f32 %v18287_v9, %v22007_v58  ;;  %v22052_v38 = vadd.f32 %v18301_v7, %v22021_v47 }
0x1d42   : > { %v11992_v52 = vpop.f32.mrf.mxu0  ;;  %v22010_v26 = vpop.f32.mrf.mxu1 }
0x1d43   : > { %v12192_v4 = vrot.slane %v11998_v10, 4  ;;  %v22018_v18 = vmul.f32 %v22015_v48, %v11998_v10  ;;  %v11993_v1 = vadd.f32 %v22007_v58, %v11992_v52  ;;  %v13061_v63 = vrot.slane %v22052_v38, 4 }
0x1d44   : > { %v18304_v29 = vpop.f32.mrf.mxu1  ;;  %v22081_v57 = vmul.f32 %v22078_v19, %v11998_v10 }
0x1d45   : > { %v18290_v51 = vpop.f32.mrf.mxu0  ;;  %v12204_v46 = vsel %vm1721_vm3, %v12192_v4, %v22007_v58  ;;  %18335 = vmatpush3.xpose.msk.msra.mxu0 %vm1429_vm1, %v22018_v18  ;;  %v22033_v30 = vadd.f32 %v18304_v29, %v22021_v47  ;;  %v12191_v49 = vrot.slane %v11993_v1, 4  ;;  %v22039_v39 = vmul.f32 %v22015_v48, %v11993_v1 }
0x1d46   : > { %v22027_v15 = vmul.f32 %v22024_v8, %v12204_v46  ;;  %18336 = vmatprep.subr.mxu0 %v19282_v22  ;;  %v12200_v24 = vsel %vm1721_vm3, %v22007_v58, %v12192_v4  ;;  %v12087_v21 = vpop.f32.mrf.mxu1  ;;  %v22098_v50 = vsel %vm1721_vm3, %v13061_v63, %v22021_v47  ;;  %v22104_v37 = vmul.f32 %v22101_v43, %v12204_v46 }
0x1d47   : > { %v12002_v61 = vpop.f32.mrf.mxu0  ;;  %v12203_v14 = vsel %vm1721_vm3, %v12191_v49, %v22007_v58  ;;  %18320 = vmatpush3.xpose.msk.msra.mxu1 %vm1429_vm1, %v22039_v39  ;;  %v22062_v0 = vmul.f32 %v22059_v34, %v12200_v24  ;;  %v12199_v28 = vsel %vm1721_vm3, %v22007_v58, %v12191_v49  ;;  %v22068_v44 = vadd.f32 %v22021_v47, %v12087_v21 }
0x1d48   : > { %v22055_v41 = vmul.f32 %v22024_v8, %v12203_v14  ;;  %18321 = vmatprep.subr.mxu1 %v19282_v22  ;;  %v22084_v25 = vmul.f32 %v22059_v34, %v12199_v28  ;;  %v22107_v36 = vmul.f32 %v22078_v19, %v11993_v1  ;;  %v13063_v27 = vrot.slane %v22033_v30, 4 }
0x1d49   : > { %v22035_v40 = vpop.f32.mrf.mxu0  ;;  %18337 = vmatpush3.xpose.msk.msra.mxu0 %vm1429_vm1, %v22027_v15  ;;  %v13062_v13 = vrot.slane %v22068_v44, 4  ;;  %v22112_v32 = vsel %vm1721_vm3, %v22021_v47, %v13061_v63  ;;  %v12008_v56 = vadd.f32 %v18290_v51, %v22007_v58  ;;  %v22135_v17 = vmul.f32 %v22132_v35, %v12200_v24 }
0x1d4a   : > { %18338 = vmatprep.subr.mxu0 %v19282_v22  ;;  %v22138_v9 = vmul.f32 %v22101_v43, %v12203_v14  ;;  %v22142_v7 = vsel %vm1721_vm3, %v13063_v27, %v22021_v47  ;;  %v22146_v10 = vsel %vm1721_vm3, %v22021_v47, %v13063_v27  ;;  %v12003_v52 = vadd.f32 %v22007_v58, %v12002_v61 }
0x1d4b   : > { %v22043_v23 = vpop.f32.mrf.mxu0  ;;  %18322 = vmatpush3.xpose.msk.msra.mxu1 %vm1429_vm1, %v22055_v41  ;;  %v22117_v59 = vsel %vm1721_vm3, %v13062_v13, %v22021_v47  ;;  %v22125_v53 = vsel %vm1721_vm3, %v22021_v47, %v13062_v13  ;;  %v12194_v54 = vrot.slane %v12008_v56, 4  ;;  %v12232_v4 = vmul.f32 0.35355338, %v11810_v62 }
0x1d4c   : > { %18323 = vmatprep.subr.mxu1 %v19282_v22  ;;  %v11805_v51 = vadd.f32 %v22007_v58, %v21994_v11  ;;  %v22158_v46 = vmul.f32 %v22132_v35, %v12199_v28  ;;  %v22161_v29 = vmul.f32 %v22015_v48, %v12008_v56  ;;  %v12193_v1 = vrot.slane %v12003_v52, 4 }
0x1d4d   : > { %v18318_v55 = vpop.f32.mrf.mxu0  ;;  %18339 = vmatpush3.xpose.msk.msra.mxu0 %vm1429_vm1, %v22062_v0  ;;  %v12206_v61 = vsel %vm1721_vm3, %v12194_v54, %v22007_v58  ;;  %v22176_v24 = vmul.f32 %v22015_v48, %v12003_v52  ;;  %v12202_v14 = vsel %vm1721_vm3, %v22007_v58, %v12194_v54  ;;  %v22223_v62 = vmul.f32 %v22078_v19, %v12003_v52 }
0x1d4e   : > { %v22086_v42 = vadd.f32 %v18318_v55, %v15920_v45  ;;  %18340 = vmatprep.subr.mxu0 %v19282_v22  ;;  %v12231_v11 = vmul.f32 0.35355338, %v11805_v51  ;;  %v22173_v49 = vmul.f32 %v22024_v8, %v12206_v61  ;;  %v12205_v21 = vsel %vm1721_vm3, %v12193_v1, %v22007_v58 }
0x1d4f   : > { %18324 = vmatpush3.xpose.msk.msra.mxu1 %vm1429_vm1, %v22084_v25  ;;  %v22192_v28 = vmul.f32 %v22059_v34, %v12202_v14  ;;  %v22195_v55 = vmul.f32 %v22024_v8, %v12205_v21  ;;  %v12201_v63 = vsel %vm1721_vm3, %v22007_v58, %v12193_v1  ;;  %v22208_v45 = vmul.f32 %v22078_v19, %v12008_v56 }
0x1d50   : > { %18325 = vmatprep.subr.mxu1 %v19282_v22  ;;  %v22211_v13 = vmul.f32 %v22059_v34, %v12201_v63  ;;  %v22220_v27 = vmul.f32 %v22101_v43, %v12206_v61  ;;  %v11820_v56 = vadd.f32 %v21998_v5, %v22007_v58  ;;  %v22234_v54 = vmul.f32 %v22132_v35, %v12202_v14 }
0x1d51   : > { %18341 = vmatpush3.xpose.msk.msra.mxu0 %vm1429_vm1, %v22081_v57  ;;  %v11815_v5 = vadd.f32 %v22007_v58, %v22002_v3  ;;  %v22248_v51 = vmul.f32 %v22132_v35, %v12201_v63  ;;  %v22283_v3 = vpop.f32.mrf.mxu0 }
0x1d52   : > { %18342 = vmatprep.subr.mxu0 %v19282_v22  ;;  %v12234_v52 = vmul.f32 0.35355338, %v11820_v56 }
0x1d53   : > { %18326 = vmatpush3.xpose.msk.msra.mxu1 %vm1429_vm1, %v22107_v36  ;;  %v12233_v61 = vmul.f32 0.35355338, %v11815_v5 }
0x1d54   : > { %18327 = vmatprep.subr.mxu1 %v19282_v22 }
0x1d55   : > { %18343 = vmatpush3.xpose.msk.msra.mxu0 %vm1429_vm1, %v22104_v37 }
0x1d56   : > { %18344 = vmatprep.subr.mxu0 %v19282_v22 }
0x1d57   : > { %18328 = vmatpush3.xpose.msk.msra.mxu1 %vm1429_vm1, %v22138_v9 }
0x1d58   : > { %18329 = vmatprep.subr.mxu1 %v19282_v22 }
0x1d59   : > { %18345 = vmatpush3.xpose.msk.msra.mxu0 %vm1429_vm1, %v22135_v17 }
0x1d5a   : > { %18364 = vmatprep.subr.mxu0 %v19282_v22 }
0x1d5b   : > { %18330 = vmatpush3.xpose.msk.msra.mxu1 %vm1429_vm1, %v22158_v46 }
0x1d5c   : > { %18347 = vmatmul.mubr.msk.f32.vlgmr.msra.gmra.mxu0 %vm1429_vm1, %v12232_v4  ;;  %18349 = vmatprep.subr.mxu1 %v19282_v22  ;;  %v22237_v4 = vmul.f32 %v22101_v43, %v12205_v21 }
0x1d5d   : > { %18365 = vmatpush3.xpose.msk.msra.mxu0 %vm1429_vm1, %v22161_v29  ;;  %18376 = vmatprep.mubr.msk.f32.mxu0 %vm19283_vm2, %v19282_v22 }
0x1d5e   : > { %18366 = vmatprep.subr.mxu0 %v19282_v22  ;;  %18332 = vmatmul.mubr.msk.f32.vlgmr.msra.gmra.mxu1 %vm1429_vm1, %v12231_v11 }
0x1d5f   : > { %18350 = vmatpush3.xpose.msk.msra.mxu1 %vm1429_vm1, %v22176_v24  ;;  %18361 = vmatprep.mubr.msk.f32.mxu1 %vm19283_vm2, %v19282_v22 }
0x1d60   : > { %18351 = vmatprep.subr.mxu1 %v19282_v22 }
0x1d61   : > { %18367 = vmatpush3.xpose.msk.msra.mxu0 %vm1429_vm1, %v22173_v49 }
0x1d62   : > { %18368 = vmatprep.subr.mxu0 %v19282_v22 }
0x1d63   : > { %18352 = vmatpush3.xpose.msk.msra.mxu1 %vm1429_vm1, %v22195_v55 }
0x1d64   : > { %18353 = vmatprep.subr.mxu1 %v19282_v22 }
0x1d65   : > { %18369 = vmatpush3.xpose.msk.msra.mxu0 %vm1429_vm1, %v22192_v28 }
0x1d66   : > { %18370 = vmatprep.subr.mxu0 %v19282_v22 }
0x1d67   : > { %18354 = vmatpush3.xpose.msk.msra.mxu1 %vm1429_vm1, %v22211_v13 }
0x1d68   : > { %18355 = vmatprep.subr.mxu1 %v19282_v22 }
0x1d69   : > { %18371 = vmatpush3.xpose.msk.msra.mxu0 %vm1429_vm1, %v22208_v45 }
0x1d6a   : > { %18372 = vmatprep.subr.mxu0 %v19282_v22 }
0x1d6b   : > { %18356 = vmatpush3.xpose.msk.msra.mxu1 %vm1429_vm1, %v22223_v62 }
0x1d6c   : > { %18357 = vmatprep.subr.mxu1 %v19282_v22 }
0x1d6d   : > { %18373 = vmatpush3.xpose.msk.msra.mxu0 %vm1429_vm1, %v22220_v27 }
0x1d6e   : > { %18374 = vmatprep.subr.mxu0 %v19282_v22 }
0x1d6f   : > { %18358 = vmatpush3.xpose.msk.msra.mxu1 %vm1429_vm1, %v22237_v4 }
0x1d70   : > { %18359 = vmatprep.subr.mxu1 %v19282_v22 }
0x1d71   : > { %18375 = vmatpush3.xpose.msk.msra.mxu0 %vm1429_vm1, %v22234_v54 }
0x1d72   : > { %18394 = vmatprep.subr.mxu0 %v19282_v22 }
0x1d73   : > { %18360 = vmatpush3.xpose.msk.msra.mxu1 %vm1429_vm1, %v22248_v51 }
0x1d74   : > { %18377 = vmatmul.mubr.msk.f32.vlgmr.msra.gmra.mxu0 %vm1429_vm1, %v12234_v52  ;;  %18379 = vmatprep.subr.mxu1 %v19282_v22 }
0x1d75   : > { %18395 = vmatpush3.msra.mxu0 %v22018_v18  ;;  %18406 = vmatprep.mubr.msk.f32.mxu0 %vm19283_vm2, %v19282_v22  ;;  %v22286_v18 = vld [vmem:[%s22954_s13] sm:$0xff] }
0x1d76   : > { %18396 = vmatprep.subr.mxu0 %v19282_v22  ;;  %18362 = vmatmul.mubr.msk.f32.vlgmr.msra.gmra.mxu1 %vm1429_vm1, %v12233_v61 }
0x1d77   : > { %18397 = vmatpush3.msra.mxu0 %v22027_v15  ;;  %18380 = vmatpush3.msra.mxu1 %v22039_v39 }
0x1d78   : > { %18398 = vmatprep.subr.mxu0 %v19282_v22  ;;  %18381 = vmatprep.subr.mxu1 %v19282_v22 }
0x1d79   : > { %18399 = vmatpush3.msra.mxu0 %v22062_v0  ;;  %18382 = vmatpush3.msra.mxu1 %v22055_v41 }
0x1d7a   : > { %18400 = vmatprep.subr.mxu0 %v19282_v22  ;;  %18383 = vmatprep.subr.mxu1 %v19282_v22 }
0x1d7b   : > { %18401 = vmatpush3.msra.mxu0 %v22081_v57  ;;  %18384 = vmatpush3.msra.mxu1 %v22084_v25 }
0x1d7c   : > { %18402 = vmatprep.subr.mxu0 %v19282_v22  ;;  %18385 = vmatprep.subr.mxu1 %v19282_v22 }
0x1d7d   : > { %18403 = vmatpush3.msra.mxu0 %v22104_v37  ;;  %18386 = vmatpush3.msra.mxu1 %v22107_v36 }
0x1d7e   : > { %18404 = vmatprep.subr.mxu0 %v19282_v22  ;;  %18387 = vmatprep.subr.mxu1 %v19282_v22 }
0x1d7f   : > { %18405 = vmatpush3.msra.mxu0 %v22135_v17  ;;  %18388 = vmatpush3.msra.mxu1 %v22138_v9 }
0x1d80   : > { %18424 = vmatprep.subr.mxu0 %v19282_v22  ;;  %18391 = vmatprep.mubr.msk.f32.mxu1 %vm19283_vm2, %v19282_v22 }
0x1d81   : > { %18389 = vmatprep.subr.mxu1 %v19282_v22 }
0x1d82   : > { %18390 = vmatpush3.msra.mxu1 %v22158_v46 }
0x1d83   : > { %18409 = vmatprep.subr.mxu1 %v19282_v22 }
0x1e1c   : > { %v12413_v58 = vpop.f32.mrf.mxu0 }
0x1e1d   : > { %v12414_v15 = vadd.f32 %v22286_v18, %v12413_v58 }
0x1e1e   : > { %v18348_v39 = vpop.f32.mrf.mxu0  ;;  %v12322_v0 = vpop.f32.mrf.mxu1 }
0x1e1f   : > { %v12602_v41 = vsel %vm2122_vm4, %v12414_v15, -inf  ;;  %v12323_v57 = vadd.f32 %v22286_v18, %v12322_v0 }
0x1e20   : > { %12603 = vmax.xlane.f32.xlu0 %v12602_v41  ;;  %v18333_v25 = vpop.f32.mrf.mxu1 }
0x1e21   : > { %v12599_v37 = vsel %vm2122_vm4, %v12323_v57, -inf }
0x1e24   : > { %12600 = vmax.xlane.f32.xlu0 %v12599_v37 }
0x1e34   : > { %v12595_v36 = vpop.f32.mrf.mxu0 }
0x1e35   : > { %v12596_v17 = vadd.f32 %v22286_v18, %v12595_v36 }
0x1e36   : > { %v18378_v9 = vpop.f32.mrf.mxu0  ;;  %v12504_v1 = vpop.f32.mrf.mxu1 }
0x1e37   : > { %v12608_v46 = vsel %vm2122_vm4, %v12596_v17, -inf  ;;  %v12505_v11 = vadd.f32 %v22286_v18, %v12504_v1 }
0x1e38   : > { %12609 = vmax.xlane.f32.xlu1 %v12608_v46  ;;  %v18363_v14 = vpop.f32.mrf.mxu1  ;;  %v22378_v46 = vadd.f32 %v22021_v47, %v22010_v26 }
0x1e39   : > { %v12605_v21 = vsel %vm2122_vm4, %v12505_v11, -inf }
0x1e3a   : > { %v13100_v26 = vmul.f32 0.35355338, %v22378_v46 }
0x1e3c   : > { %12606 = vmax.xlane.f32.xlu1 %v12605_v21 }
0x1ea9   : > { %v12604_v63 = vpop.xlane.xlu0 %12603 }
0x1eaa   : > { %v12612_v56 = vsub.f32 %v12414_v15, %v12604_v63 }
0x1eac   : > { %v12617_v52 = vmul.f32 1.442695, %v12612_v56 }
0x1ead   : > { %v12601_v5 = vpop.xlane.xlu0 %12600 }
0x1eae   : > { %19052 = vpow2.f32 %v12617_v52  ;;  %v12611_v61 = vsub.f32 %v12323_v57, %v12601_v5  ;;  %v11901_v57 = vadd.f32 %v21992_v31, %v22021_v47 }
0x1eb0   : > { %v12615_v58 = vmul.f32 1.442695, %v12611_v61  ;;  %v13017_v37 = vrot.slane %v11901_v57, 4  ;;  %v13043_v36 = vmul.f32 %v22015_v48, %v11901_v57  ;;  %v13040_v5 = vmul.f32 %v22078_v19, %v11901_v57 }
0x1eb2   : > { %19054 = vpow2.f32 %v12615_v58  ;;  %v13029_v9 = vsel %vm1721_vm3, %v13017_v37, %v22021_v47  ;;  %v13025_v14 = vsel %vm1721_vm3, %v22021_v47, %v13017_v37 }
0x1eb3   : > { %v13042_v1 = vmul.f32 %v22024_v8, %v13029_v9  ;;  %v13041_v63 = vmul.f32 %v22059_v34, %v13025_v14 }
0x1ebb   : > { %v22296_v39 = vpop.eup %19052 }
0x1ebc   : > { %18407 = vmatmul.mubr.msk.f32.vlgmr.msra.gmra.mxu0 %vm2122_vm4, %v22296_v39 }
0x1ebd   : > { %18425 = vmatpush3.msra.mxu0 %v22161_v29  ;;  %18436 = vmatprep.mubr.msk.f32.mxu0 %vm19283_vm2, %v19282_v22 }
0x1ebe   : > { %18426 = vmatprep.subr.mxu0 %v19282_v22 }
0x1ebf   : > { %v19055_v41 = vpop.eup %19054  ;;  %18427 = vmatpush3.msra.mxu0 %v22173_v49 }
0x1ec0   : > { %18428 = vmatprep.subr.mxu0 %v19282_v22  ;;  %18392 = vmatmul.mubr.msk.f32.vlgmr.msra.gmra.mxu1 %vm2122_vm4, %v19055_v41 }
0x1ec1   : > { %18410 = vmatpush3.msra.mxu1 %v22176_v24  ;;  %18429 = vmatpush3.msra.mxu0 %v22192_v28  ;;  %v12610_v15 = vpop.xlane.xlu1 %12609 }
0x1ec2   : > { %18430 = vmatprep.subr.mxu0 %v19282_v22  ;;  %v12614_v29 = vsub.f32 %v12596_v17, %v12610_v15  ;;  %18411 = vmatprep.subr.mxu1 %v19282_v22  ;;  %v11906_v17 = vadd.f32 %v22021_v47, %v22004_v6 }
0x1ec3   : > { %18412 = vmatpush3.msra.mxu1 %v22195_v55  ;;  %18431 = vmatpush3.msra.mxu0 %v22208_v45  ;;  %v11896_v55 = vadd.f32 %v22021_v47, %v21996_v60 }
0x1ec4   : > { %v12621_v0 = vmul.f32 1.442695, %v12614_v29  ;;  %18413 = vmatprep.subr.mxu1 %v19282_v22  ;;  %18432 = vmatprep.subr.mxu0 %v19282_v22  ;;  %v13049_v21 = vmul.f32 %v22015_v48, %v11906_v17  ;;  %v13046_v15 = vmul.f32 %v22078_v19, %v11906_v17  ;;  %v13038_v29 = vmul.f32 %v22132_v35, %v13025_v14 }
0x1ec5   : > { %18414 = vmatpush3.msra.mxu1 %v22211_v13  ;;  %18433 = vmatpush3.msra.mxu0 %v22220_v27  ;;  %v12607_v49 = vpop.xlane.xlu1 %12606  ;;  %v13016_v45 = vrot.slane %v11896_v55, 4  ;;  %v13037_v27 = vmul.f32 %v22015_v48, %v11896_v55  ;;  %v13034_v25 = vmul.f32 %v22078_v19, %v11896_v55  ;;  %v13060_v55 = vrot.slane %v22378_v46, 4 }
0x1ec6   : > { %19056 = vpow2.f32 %v12621_v0  ;;  %18415 = vmatprep.subr.mxu1 %v19282_v22  ;;  %18434 = vmatprep.subr.mxu0 %v19282_v22  ;;  %v12613_v24 = vsub.f32 %v12505_v11, %v12607_v49  ;;  %v13018_v11 = vrot.slane %v11906_v17, 4  ;;  %v13101_v49 = vmul.f32 0.35355338, %v22052_v38 }
0x1ec7   : > { %18416 = vmatpush3.msra.mxu1 %v22223_v62  ;;  %18435 = vmatpush3.msra.mxu0 %v22234_v54  ;;  %v13028_v62 = vsel %vm1721_vm3, %v13016_v45, %v22021_v47  ;;  %v13084_v14 = vmul.f32 %v22078_v19, %v22052_v38 }
0x1ec8   : > { %v12619_v28 = vmul.f32 1.442695, %v12613_v24  ;;  %18417 = vmatprep.subr.mxu1 %v19282_v22  ;;  %18457 = vmatprep.subr.mxu0 %v19282_v22  ;;  %v13036_v60 = vmul.f32 %v22024_v8, %v13028_v62  ;;  %v13033_v31 = vmul.f32 %v22101_v43, %v13028_v62  ;;  %v13030_v56 = vsel %vm1721_vm3, %v13018_v11, %v22021_v47 }
0x1ec9   : > { %18418 = vmatpush3.msra.mxu1 %v22237_v4  ;;  %18421 = vmatprep.mubr.msk.f32.mxu1 %vm19283_vm2, %v19282_v22  ;;  %v13024_v4 = vsel %vm1721_vm3, %v22021_v47, %v13016_v45  ;;  %v13048_v52 = vmul.f32 %v22024_v8, %v13030_v56  ;;  %v13026_v61 = vsel %vm1721_vm3, %v22021_v47, %v13018_v11  ;;  %v13102_v62 = vmul.f32 0.35355338, %v22068_v44 }
0x1eca   : > { %19058 = vpow2.f32 %v12619_v28  ;;  %18419 = vmatprep.subr.mxu1 %v19282_v22  ;;  %v13032_v6 = vmul.f32 %v22132_v35, %v13024_v4  ;;  %v13047_v58 = vmul.f32 %v22059_v34, %v13026_v61  ;;  %v13044_v45 = vmul.f32 %v22132_v35, %v13026_v61 }
0x1ecb   : > { %18420 = vmatpush3.msra.mxu1 %v22248_v51  ;;  %v13035_v51 = vmul.f32 %v22059_v34, %v13024_v4  ;;  %v13085_v11 = vmul.f32 %v22059_v34, %v22112_v32 }
0x1ecc   : > { %18439 = vmatprep.subr.mxu1 %v22015_v48 }
0x1ed3   : > { %v19057_v13 = vpop.eup %19056 }
0x1ed4   : > { %18437 = vmatmul.mubr.msk.f32.vlgmr.msra.gmra.mxu0 %vm2122_vm4, %v19057_v13 }
0x1ed5   : > { %18458 = vmatpush3.xpose.msk.msra.mxu0 %vm1429_vm1, %v13037_v27  ;;  %18469 = vmatprep.mubr.msk.f32.mxu0 %vm19283_vm2, %v19282_v22 }
0x1ed6   : > { %18459 = vmatprep.subr.mxu0 %v19282_v22 }
0x1ed7   : > { %v19059_v54 = vpop.eup %19058 }
0x1ed8   : > { %18422 = vmatmul.mubr.msk.f32.vlgmr.msra.gmra.mxu1 %vm2122_vm4, %v19059_v54 }
0x1ed9   : > { %18440 = vmatpush3.msra.mxu1 %v22015_v48  ;;  %18460 = vmatpush3.xpose.msk.msra.mxu0 %vm1429_vm1, %v13036_v60  ;;  %v13081_v60 = vmul.f32 %v22015_v48, %v22378_v46 }
0x1eda   : > { %18441 = vmatprep.subr.mxu1 %v22024_v8  ;;  %18451 = vmatprep.mubr.msk.f32.mxu1 %vm2122_vm4, %v19055_v41  ;;  %v11911_v41 = vadd.f32 %v22000_v16, %v22021_v47  ;;  %v13045_v16 = vmul.f32 %v22101_v43, %v13030_v56 }
0x1edb   : > { %18442 = vmatpush3.msra.mxu1 %v22024_v8  ;;  %18461 = vmatprep.subr.mxu0 %v19282_v22 }
0x1edc   : > { %18443 = vmatprep.subr.mxu1 %v22059_v34  ;;  %v13019_v0 = vrot.slane %v11911_v41, 4  ;;  %v13055_v24 = vmul.f32 %v22015_v48, %v11911_v41  ;;  %v13052_v37 = vmul.f32 %v22078_v19, %v11911_v41 }
0x1edd   : > { %18444 = vmatpush3.msra.mxu1 %v22059_v34  ;;  %18462 = vmatpush3.xpose.msk.msra.mxu0 %vm1429_vm1, %v13035_v51  ;;  %v13068_v51 = vsel %vm1721_vm3, %v22021_v47, %v13060_v55 }
0x1ede   : > { %18445 = vmatprep.subr.mxu1 %v22078_v19  ;;  %18463 = vmatprep.subr.mxu0 %v19282_v22  ;;  %v13031_v28 = vsel %vm1721_vm3, %v13019_v0, %v22021_v47  ;;  %v13027_v27 = vsel %vm1721_vm3, %v22021_v47, %v13019_v0  ;;  %v13076_v17 = vmul.f32 %v22132_v35, %v13068_v51 }
0x1edf   : > { %18446 = vmatpush3.msra.mxu1 %v22078_v19  ;;  %v13053_v4 = vmul.f32 %v22059_v34, %v13027_v27 }
0x1ee0   : > { %18447 = vmatprep.subr.mxu1 %v22101_v43 }
0x1ee1   : > { %18448 = vmatpush3.msra.mxu1 %v22101_v43  ;;  %18464 = vmatpush3.xpose.msk.msra.mxu0 %vm1429_vm1, %v13034_v25  ;;  %v13079_v25 = vmul.f32 %v22059_v34, %v13068_v51 }
0x1ee2   : > { %18449 = vmatprep.subr.mxu1 %v22132_v35  ;;  %18465 = vmatprep.subr.mxu0 %v19282_v22 }
0x1ee3   : > { %18450 = vmatpush3.msra.mxu1 %v22132_v35 }
0x1ee4   : > { %18452 = vmatmul.mubr.msk.f32.vlgmr.msra.gmra.mxu1 %vm2122_vm4, %v22296_v39  ;;  %18472 = vmatprep.subr.mxu1 %v19282_v22  ;;  %v13039_v39 = vmul.f32 %v22101_v43, %v13029_v9  ;;  %v13050_v9 = vmul.f32 %v22132_v35, %v13027_v27 }
0x1ee5   : > { %18454 = vmatprep.mubr.msk.f32.mxu1 %vm2122_vm4, %v19059_v54  ;;  %18466 = vmatpush3.xpose.msk.msra.mxu0 %vm1429_vm1, %v13033_v31  ;;  %v13072_v54 = vsel %vm1721_vm3, %v13060_v55, %v22021_v47  ;;  %v13078_v47 = vmul.f32 %v22078_v19, %v22378_v46  ;;  %v13103_v46 = vmul.f32 0.35355338, %v22033_v30 }
0x1ee6   : > { %18473 = vmatpush3.xpose.msk.msra.mxu1 %vm1429_vm1, %v13043_v36  ;;  %18467 = vmatprep.subr.mxu0 %v19282_v22  ;;  %v13080_v57 = vmul.f32 %v22024_v8, %v13072_v54  ;;  %v13077_v31 = vmul.f32 %v22101_v43, %v13072_v54  ;;  %v13051_v36 = vmul.f32 %v22101_v43, %v13031_v28 }
0x1ee7   : > { %18474 = vmatprep.subr.mxu1 %v19282_v22 }
0x1ee8   : > { %18455 = vmatmul.mubr.msk.f32.gmra.mxu1 %vm2122_vm4, %v19057_v13  ;;  %v13054_v13 = vmul.f32 %v22024_v8, %v13031_v28 }
0x1ee9   : > { %18468 = vmatpush3.xpose.msk.msra.mxu0 %vm1429_vm1, %v13032_v6  ;;  %18484 = vmatprep.mubr.msk.f32.mxu1 %vm19283_vm2, %v19282_v22  ;;  %v13087_v6 = vmul.f32 %v22015_v48, %v22052_v38 }
0x1eea   : > { %18475 = vmatpush3.xpose.msk.msra.mxu1 %vm1429_vm1, %v13042_v1  ;;  %18487 = vmatprep.subr.mxu0 %v19282_v22  ;;  %v13086_v1 = vmul.f32 %v22024_v8, %v22098_v50 }
0x1eeb   : > { %18476 = vmatprep.subr.mxu1 %v19282_v22 }
0x1eec   : > { %18470 = vmatmul.mubr.msk.f32.vlgmr.msra.gmra.mxu0 %vm1429_vm1, %v13100_v26  ;;  %v13083_v26 = vmul.f32 %v22101_v43, %v22098_v50 }
0x1eed   : > { %18488 = vmatpush3.xpose.msk.msra.mxu0 %vm1429_vm1, %v13049_v21  ;;  %18499 = vmatprep.mubr.msk.f32.mxu0 %vm19283_vm2, %v19282_v22  ;;  %v13082_v21 = vmul.f32 %v22132_v35, %v22112_v32 }
0x1eee   : > { %18477 = vmatpush3.xpose.msk.msra.mxu1 %vm1429_vm1, %v13041_v63  ;;  %18489 = vmatprep.subr.mxu0 %v19282_v22 }
0x1eef   : > { %18478 = vmatprep.subr.mxu1 %v19282_v22 }
0x1ef1   : > { %18490 = vmatpush3.xpose.msk.msra.mxu0 %vm1429_vm1, %v13048_v52 }
0x1ef2   : > { %18479 = vmatpush3.xpose.msk.msra.mxu1 %vm1429_vm1, %v13040_v5  ;;  %18491 = vmatprep.subr.mxu0 %v19282_v22 }
0x1ef3   : > { %18480 = vmatprep.subr.mxu1 %v19282_v22 }
0x1ef5   : > { %18492 = vmatpush3.xpose.msk.msra.mxu0 %vm1429_vm1, %v13047_v58 }
0x1ef6   : > { %18481 = vmatpush3.xpose.msk.msra.mxu1 %vm1429_vm1, %v13039_v39  ;;  %18493 = vmatprep.subr.mxu0 %v19282_v22 }
0x1ef7   : > { %18482 = vmatprep.subr.mxu1 %v19282_v22 }
0x1ef9   : > { %18494 = vmatpush3.xpose.msk.msra.mxu0 %vm1429_vm1, %v13046_v15 }
0x1efa   : > { %18483 = vmatpush3.xpose.msk.msra.mxu1 %vm1429_vm1, %v13038_v29  ;;  %18495 = vmatprep.subr.mxu0 %v19282_v22 }
0x1efb   : > { %18502 = vmatprep.subr.mxu1 %v19282_v22 }
0x1efd   : > { %18485 = vmatmul.mubr.msk.f32.vlgmr.msra.gmra.mxu1 %vm1429_vm1, %v13101_v49  ;;  %18496 = vmatpush3.xpose.msk.msra.mxu0 %vm1429_vm1, %v13045_v16 }
0x1efe   : > { %18503 = vmatpush3.xpose.msk.msra.mxu1 %vm1429_vm1, %v13055_v24  ;;  %18497 = vmatprep.subr.mxu0 %v19282_v22 }
0x1eff   : > { %18504 = vmatprep.subr.mxu1 %v19282_v22  ;;  %18514 = vmatprep.mubr.msk.f32.mxu1 %vm19283_vm2, %v19282_v22 }
0x1f01   : > { %18498 = vmatpush3.xpose.msk.msra.mxu0 %vm1429_vm1, %v13044_v45 }
0x1f02   : > { %18505 = vmatpush3.xpose.msk.msra.mxu1 %vm1429_vm1, %v13054_v13  ;;  %18517 = vmatprep.subr.mxu0 %v19282_v22 }
0x1f03   : > { %18506 = vmatprep.subr.mxu1 %v19282_v22 }
0x1f04   : > { %18500 = vmatmul.mubr.msk.f32.vlgmr.msra.gmra.mxu0 %vm1429_vm1, %v13102_v62 }
0x1f05   : > { %18518 = vmatpush3.msra.mxu0 %v13081_v60  ;;  %18529 = vmatprep.mubr.msk.f32.mxu0 %vm19283_vm2, %v19282_v22 }
0x1f06   : > { %18507 = vmatpush3.xpose.msk.msra.mxu1 %vm1429_vm1, %v13053_v4  ;;  %18519 = vmatprep.subr.mxu0 %v19282_v22 }
0x1f07   : > { %18520 = vmatpush3.msra.mxu0 %v13080_v57  ;;  %18508 = vmatprep.subr.mxu1 %v19282_v22 }
0x1f08   : > { %18521 = vmatprep.subr.mxu0 %v19282_v22 }
0x1f09   : > { %18522 = vmatpush3.msra.mxu0 %v13079_v25 }
0x1f0a   : > { %18509 = vmatpush3.xpose.msk.msra.mxu1 %vm1429_vm1, %v13052_v37  ;;  %18523 = vmatprep.subr.mxu0 %v19282_v22 }
0x1f0b   : > { %18524 = vmatpush3.msra.mxu0 %v13078_v47  ;;  %18510 = vmatprep.subr.mxu1 %v19282_v22 }
0x1f0c   : > { %18525 = vmatprep.subr.mxu0 %v19282_v22 }
0x1f0d   : > { %18526 = vmatpush3.msra.mxu0 %v13077_v31 }
0x1f0e   : > { %18511 = vmatpush3.xpose.msk.msra.mxu1 %vm1429_vm1, %v13051_v36  ;;  %18527 = vmatprep.subr.mxu0 %v19282_v22 }
0x1f0f   : > { %18528 = vmatpush3.msra.mxu0 %v13076_v17  ;;  %18512 = vmatprep.subr.mxu1 %v19282_v22 }
0x1f10   : > { %18547 = vmatprep.subr.mxu0 %v19282_v22 }
0x1f12   : > { %18513 = vmatpush3.xpose.msk.msra.mxu1 %vm1429_vm1, %v13050_v9 }
0x1f13   : > { %18532 = vmatprep.subr.mxu1 %v19282_v22 }
0x1f15   : > { %18515 = vmatmul.mubr.msk.f32.vlgmr.msra.gmra.mxu1 %vm1429_vm1, %v13103_v46 }
0x1f16   : > { %18533 = vmatpush3.msra.mxu1 %v13087_v6  ;;  %18544 = vmatprep.mubr.msk.f32.mxu1 %vm19283_vm2, %v19282_v22 }
0x1f17   : > { %18534 = vmatprep.subr.mxu1 %v19282_v22 }
0x1f18   : > { %18535 = vmatpush3.msra.mxu1 %v13086_v1 }
0x1f19   : > { %18536 = vmatprep.subr.mxu1 %v19282_v22 }
0x1f1a   : > { %18537 = vmatpush3.msra.mxu1 %v13085_v11 }
0x1f1b   : > { %18538 = vmatprep.subr.mxu1 %v19282_v22 }
0x1f1c   : > { %18539 = vmatpush3.msra.mxu1 %v13084_v14 }
0x1f1d   : > { %18540 = vmatprep.subr.mxu1 %v19282_v22 }
0x1f1e   : > { %18541 = vmatpush3.msra.mxu1 %v13083_v26 }
0x1f1f   : > { %18542 = vmatprep.subr.mxu1 %v19282_v22 }
0x1f20   : > { %18543 = vmatpush3.msra.mxu1 %v13082_v21 }
0x1f21   : > { %18562 = vmatprep.subr.mxu1 %v19282_v22 }
0x1f7c   : > { %v12765_v63 = vpop.f32.mrf.mxu0 }
0x1f7e   : > { %v18408_v56 = vpop.f32.mrf.mxu0 }
0x1f80   : > { %v12692_v38 = vpop.f32.mrf.mxu1 }
0x1f82   : > { %v18393_v52 = vpop.f32.mrf.mxu1 }
0x1f94   : > { %v12911_v5 = vpop.f32.mrf.mxu0 }
0x1f96   : > { %v18438_v61 = vpop.f32.mrf.mxu0 }
0x1f98   : > { %v12838_v58 = vpop.f32.mrf.mxu1 }
0x1f9a   : > { %v18423_v39 = vpop.f32.mrf.mxu1 }
0x1fa4   : > { %v18453_v50 = vpop.f32.mrf.mxu1 }
0x1fa5   : > { %v13001_v41 = vmax.f32 %v18453_v50, 1e-20  ;;  %v13090_v50 = vmul.f32 %v22078_v19, %v22068_v44 }
0x1fa6   : > { %v12981_v15 = vpop.f32.mrf.mxu1 }
0x1fa7   : > { %19060 = vrcp.f32 %v13001_v41  ;;  %v13000_v29 = vmax.f32 %v12981_v15, 1e-20  ;;  %v13089_v15 = vmul.f32 %v22101_v43, %v22117_v59 }
0x1fa8   : > { %v18456_v0 = vpop.f32.mrf.mxu1 }
0x1fa9   : > { %19062 = vrcp.f32 %v13000_v29  ;;  %v13003_v32 = vmax.f32 %v18456_v0, 1e-20  ;;  %v13088_v0 = vmul.f32 %v22132_v35, %v22125_v53 }
0x1faa   : > { %v12991_v16 = vpop.f32.mrf.mxu1 }
0x1fab   : > { %19064 = vrcp.f32 %v13003_v32  ;;  %v13002_v49 = vmax.f32 %v12991_v16, 1e-20  ;;  %v13099_v32 = vmul.f32 %v22015_v48, %v22033_v30 }
0x1fac   : > { %v13191_v24 = vpop.f32.mrf.mxu0 }
0x1fad   : > { %19066 = vrcp.f32 %v13002_v49  ;;  %v13192_v28 = vadd.f32 %v22286_v18, %v13191_v24  ;;  %v13096_v49 = vmul.f32 %v22078_v19, %v22033_v30  ;;  %v13094_v30 = vmul.f32 %v22132_v35, %v22146_v10 }
0x1fae   : > { %v18471_v55 = vpop.f32.mrf.mxu0 }
0x1faf   : > { %v13468_v45 = vsel %vm2122_vm4, %v13192_v28, -inf  ;;  %v13095_v55 = vmul.f32 %v22101_v43, %v22142_v7 }
0x1fb0   : > { %13469 = vmax.xlane.f32.xlu0 %v13468_v45 }
0x1fb4   : > { %v19061_v13 = vpop.eup %19060 }
0x1fb5   : > { %v22507_v27 = vmul.f32 %v19061_v13, %v12765_v63 }
0x1fb6   : > { %v19063_v62 = vpop.eup %19062 }
0x1fb7   : > { %v22509_v54 = vmul.f32 %v19063_v62, %v12692_v38 }
0x1fb8   : > { %v19065_v60 = vpop.eup %19064 }
0x1fb9   : > { %v22511_v4 = vmul.f32 %v19065_v60, %v12911_v5  ;;  %v13093_v5 = vmul.f32 %v22015_v48, %v22068_v44 }
0x1fba   : > { %v19067_v51 = vpop.eup %19066 }
0x1fbb   : > { %v22513_v57 = vmul.f32 %v19067_v51, %v12838_v58  ;;  %v13091_v58 = vmul.f32 %v22059_v34, %v22125_v53  ;;  %v13097_v53 = vmul.f32 %v22059_v34, %v22146_v10 }
0x1fbd   : > { %v13282_v25 = vpop.f32.mrf.mxu1 }
0x1fbe   : > { %v13283_v37 = vadd.f32 %v22286_v18, %v13282_v25 }
0x1fbf   : > { %v18486_v47 = vpop.f32.mrf.mxu1 }
0x1fc0   : > { %v13471_v31 = vsel %vm2122_vm4, %v13283_v37, -inf }
0x1fc1   : > { %13472 = vmax.xlane.f32.xlu0 %v13471_v31 }
0x1fc4   : > { %v13373_v36 = vpop.f32.mrf.mxu0 }
0x1fc5   : > { %v13374_v17 = vadd.f32 %v22286_v18, %v13373_v36 }
0x1fc6   : > { %v18501_v9 = vpop.f32.mrf.mxu0 }
0x1fc7   : > { %v13474_v46 = vsel %vm2122_vm4, %v13374_v17, -inf }
0x1fc8   : > { %13475 = vmax.xlane.f32.xlu1 %v13474_v46 }
0x1fd5   : > { %v13464_v6 = vpop.f32.mrf.mxu1 }
0x1fd6   : > { %v13465_v1 = vadd.f32 %v22286_v18, %v13464_v6  ;;  %v13092_v18 = vmul.f32 %v22024_v8, %v22117_v59  ;;  %v13098_v59 = vmul.f32 %v22024_v8, %v22142_v7 }
0x1fd7   : > { %v18516_v11 = vpop.f32.mrf.mxu1 }
0x1fd8   : > { %v13477_v14 = vsel %vm2122_vm4, %v13465_v1, -inf }
0x1fd9   : > { %13478 = vmax.xlane.f32.xlu1 %v13477_v14 }
0x2039   : > { %v13470_v26 = vpop.xlane.xlu0 %13469 }
0x203a   : > { %v13480_v21 = vsub.f32 %v13192_v28, %v13470_v26  ;;  %v22594_v26 = vld [vmem:[%s22952_s17 + $0x10] sm:$0xff] }
0x203c   : > { %v13484_v63 = vmul.f32 1.442695, %v13480_v21 }
0x203e   : > { %19068 = vpow2.f32 %v13484_v63 }
0x204a   : > { %v13473_v56 = vpop.xlane.xlu0 %13472 }
0x204b   : > { %v19069_v38 = vpop.eup %19068  ;;  %v13481_v52 = vsub.f32 %v13283_v37, %v13473_v56  ;;  %v22603_v56 = vld [vmem:[%s22952_s17 + $0x8] sm:$0xff] }
0x204c   : > { %18530 = vmatmul.mubr.msk.f32.vlgmr.msra.gmra.mxu0 %vm2122_vm4, %v19069_v38 }
0x204d   : > { %v13486_v61 = vmul.f32 1.442695, %v13481_v52  ;;  %18548 = vmatpush3.msra.mxu0 %v13093_v5  ;;  %18559 = vmatprep.mubr.msk.f32.mxu0 %vm19283_vm2, %v19282_v22 }
0x204e   : > { %18549 = vmatprep.subr.mxu0 %v19282_v22 }
0x204f   : > { %19070 = vpow2.f32 %v13486_v61  ;;  %18550 = vmatpush3.msra.mxu0 %v13092_v18 }
0x2050   : > { %18551 = vmatprep.subr.mxu0 %v19282_v22 }
0x2051   : > { %18552 = vmatpush3.msra.mxu0 %v13091_v58  ;;  %v13476_v39 = vpop.xlane.xlu1 %13475  ;;  %v22612_v58 = vld [vmem:[%s22952_s17] sm:$0xff] }
0x2052   : > { %18553 = vmatprep.subr.mxu0 %v19282_v22  ;;  %v13482_v41 = vsub.f32 %v13374_v17, %v13476_v39 }
0x2053   : > { %18554 = vmatpush3.msra.mxu0 %v13090_v50 }
0x2054   : > { %v13488_v29 = vmul.f32 1.442695, %v13482_v41  ;;  %18555 = vmatprep.subr.mxu0 %v19282_v22 }
0x2055   : > { %18556 = vmatpush3.msra.mxu0 %v13089_v15  ;;  %v13914_v15 = vmul.f32 0.35355338, %v22507_v27 }
0x2056   : > { %19072 = vpow2.f32 %v13488_v29  ;;  %18557 = vmatprep.subr.mxu0 %v19282_v22 }
0x2057   : > { %18558 = vmatpush3.msra.mxu0 %v13088_v0  ;;  %v13913_v0 = vmul.f32 0.35355338, %v22509_v54 }
0x2058   : > { %18577 = vmatprep.subr.mxu0 %v22015_v48 }
0x205c   : > { %v19071_v44 = vpop.eup %19070 }
0x205d   : > { %18545 = vmatmul.mubr.msk.f32.vlgmr.msra.gmra.mxu1 %vm2122_vm4, %v19071_v44 }
0x205e   : > { %18563 = vmatpush3.msra.mxu1 %v13099_v32  ;;  %18574 = vmatprep.mubr.msk.f32.mxu1 %vm19283_vm2, %v19282_v22 }
0x205f   : > { %18564 = vmatprep.subr.mxu1 %v19282_v22 }
0x2060   : > { %18565 = vmatpush3.msra.mxu1 %v13098_v59 }
0x2061   : > { %18566 = vmatprep.subr.mxu1 %v19282_v22 }
0x2062   : > { %18567 = vmatpush3.msra.mxu1 %v13097_v53  ;;  %v13479_v16 = vpop.xlane.xlu1 %13478  ;;  %v22646_v53 = vld [vmem:[%s22980_s6 + $0x2] ss:$0 sm:$0xff] }
0x2063   : > { %v19073_v24 = vpop.eup %19072  ;;  %18568 = vmatprep.subr.mxu1 %v19282_v22  ;;  %v13483_v28 = vsub.f32 %v13465_v1, %v13479_v16  ;;  %v22586_v1 = vld [vmem:[%s22952_s17 + $0x18] sm:$0xff]  ;;  %v12174_v16 = vadd.f32 %v22646_v53, %v22035_v40  ;;  %s19178_s17 = sshll.u32 %s19284_s14, 4  ;;  %s19179_s17 = int_to_ptr.vmem [resolvable:$false] %s19178_s17 }
0x2064   : > { %18569 = vmatpush3.msra.mxu1 %v13096_v49  ;;  %18560 = vmatmul.mubr.msk.f32.vlgmr.msra.gmra.mxu0 %vm2122_vm4, %v19073_v24 }
0x2065   : > { %v13490_v45 = vmul.f32 1.442695, %v13483_v28  ;;  %18570 = vmatprep.subr.mxu1 %v19282_v22  ;;  %18578 = vmatpush3.msra.mxu0 %v22015_v48  ;;  %v13904_v40 = vmul.f32 %v22586_v1, %v12174_v16 }
0x2066   : > { %18571 = vmatpush3.msra.mxu1 %v13095_v55  ;;  %18579 = vmatprep.subr.mxu0 %v22024_v8  ;;  %v13916_v55 = vmul.f32 0.35355338, %v22511_v4 }
0x2067   : > { %19074 = vpow2.f32 %v13490_v45  ;;  %18572 = vmatprep.subr.mxu1 %v19282_v22  ;;  %18589 = vmatprep.mubr.msk.f32.mxu0 %vm2122_vm4, %v19069_v38  ;;  %v13915_v45 = vmul.f32 0.35355338, %v22513_v57  ;;  %v13902_v57 = vmul.f32 %v22603_v56, %v12174_v16 }
0x2068   : > { %18573 = vmatpush3.msra.mxu1 %v13094_v30  ;;  %18580 = vmatpush3.msra.mxu0 %v22024_v8  ;;  %v13903_v30 = vmul.f32 %v22594_v26, %v12174_v16 }
0x2069   : > { %18581 = vmatprep.subr.mxu0 %v22059_v34  ;;  %18595 = vmatprep.subr.mxu1 %v19282_v22 }
0x206a   : > { %18582 = vmatpush3.msra.mxu0 %v22059_v34 }
0x206b   : > { %18583 = vmatprep.subr.mxu0 %v22078_v19 }
0x206c   : > { %18584 = vmatpush3.msra.mxu0 %v22078_v19 }
0x206d   : > { %18585 = vmatprep.subr.mxu0 %v22101_v43 }
0x206e   : > { %18586 = vmatpush3.msra.mxu0 %v22101_v43 }
0x206f   : > { %18587 = vmatprep.subr.mxu0 %v22132_v35 }
0x2070   : > { %18588 = vmatpush3.msra.mxu0 %v22132_v35 }
0x2071   : > { %18590 = vmatmul.mubr.msk.f32.vlgmr.msra.gmra.mxu0 %vm2122_vm4, %v19071_v44  ;;  %18606 = vmatprep.subr.mxu0 %v19282_v22 }
0x2072   : > { %18592 = vmatprep.mubr.msk.f32.mxu0 %vm2122_vm4, %v19073_v24  ;;  %v12169_v24 = vadd.f32 %v22646_v53, %v22043_v23 }
0x2074   : > { %v19075_v48 = vpop.eup %19074  ;;  %v13900_v23 = vmul.f32 %v22586_v1, %v12169_v24  ;;  %v13899_v4 = vmul.f32 %v22594_v26, %v12169_v24 }
0x2075   : > { %18575 = vmatmul.mubr.msk.f32.vlgmr.msra.gmra.mxu1 %vm2122_vm4, %v19075_v48  ;;  %18593 = vmatmul.mubr.msk.f32.gmra.mxu0 %vm2122_vm4, %v19075_v48  ;;  %v13898_v48 = vmul.f32 %v22603_v56, %v12169_v24 }
0x2076   : > { %18614 = vmatprep.mubr.msk.f32.mxu0 %vm19283_vm2, %v19282_v22  ;;  %18603 = vmatprep.mubr.msk.f32.mxu1 %vm19283_vm2, %v19282_v22 }
0x210c   : > { %v13561_v8 = vpop.f32.mrf.mxu0 }
0x210e   : > { %v18531_v34 = vpop.f32.mrf.mxu0 }
0x210f   : > { %v13897_v34 = vmul.f32 %v22612_v58, %v12169_v24 }
0x211d   : > { %v13634_v19 = vpop.f32.mrf.mxu1 }
0x211f   : > { %v18546_v43 = vpop.f32.mrf.mxu1 }
0x2124   : > { %v13707_v35 = vpop.f32.mrf.mxu0 }
0x2126   : > { %v18561_v7 = vpop.f32.mrf.mxu0 }
0x2131   : > { %v18591_v10 = vpop.f32.mrf.mxu0 }
0x2132   : > { %v13870_v13 = vmax.f32 %v18591_v10, 1e-20 }
0x2133   : > { %v13850_v62 = vpop.f32.mrf.mxu0 }
0x2134   : > { %19076 = vrcp.f32 %v13870_v13  ;;  %v13869_v60 = vmax.f32 %v13850_v62, 1e-20 }
0x2135   : > { %v13780_v51 = vpop.f32.mrf.mxu1  ;;  %v18594_v25 = vpop.f32.mrf.mxu0 }
0x2136   : > { %19078 = vrcp.f32 %v13869_v60  ;;  %v13872_v31 = vmax.f32 %v18594_v25, 1e-20 }
0x2137   : > { %v18576_v37 = vpop.f32.mrf.mxu1  ;;  %v13860_v47 = vpop.f32.mrf.mxu0 }
0x2138   : > { %v13871_v36 = vmax.f32 %v13860_v47, 1e-20  ;;  %19080 = vrcp.f32 %v13872_v31 }
0x213a   : > { %19082 = vrcp.f32 %v13871_v36 }
0x2141   : > { %v19077_v17 = vpop.eup %19076 }
0x2142   : > { %v13878_v9 = vmul.f32 %v19077_v17, %v13634_v19 }
0x2143   : > { %v19079_v46 = vpop.eup %19078 }
0x2144   : > { %v13877_v6 = vmul.f32 %v19079_v46, %v13561_v8  ;;  %v13888_v11 = vmul.f32 %v22586_v1, %v13878_v9  ;;  %v13887_v21 = vmul.f32 %v22594_v26, %v13878_v9  ;;  %v13886_v38 = vmul.f32 %v22603_v56, %v13878_v9 }
0x2145   : > { %v19081_v52 = vpop.eup %19080  ;;  %v13885_v39 = vmul.f32 %v22612_v58, %v13878_v9  ;;  %v13901_v8 = vmul.f32 %v22612_v58, %v12174_v16 }
0x2146   : > { %18607 = vmatpush3.xpose.msk.msra.mxu0 %vm1429_vm1, %v13888_v11  ;;  %v13884_v14 = vmul.f32 %v22586_v1, %v13877_v6  ;;  %v13883_v63 = vmul.f32 %v22594_v26, %v13877_v6  ;;  %v13882_v5 = vmul.f32 %v22603_v56, %v13877_v6  ;;  %v13880_v18 = vmul.f32 %v19081_v52, %v13780_v51 }
0x2147   : > { %18608 = vmatprep.subr.mxu0 %v19282_v22  ;;  %v19083_v61 = vpop.eup %19082  ;;  %v13881_v41 = vmul.f32 %v22612_v58, %v13877_v6  ;;  %v12179_v11 = vadd.f32 %v22646_v53, %v22283_v3 }
0x2148   : > { %18596 = vmatpush3.xpose.msk.msra.mxu1 %vm1429_vm1, %v13884_v14  ;;  %v13879_v50 = vmul.f32 %v19083_v61, %v13707_v35  ;;  %v13896_v29 = vmul.f32 %v22586_v1, %v13880_v18  ;;  %v13895_v27 = vmul.f32 %v22594_v26, %v13880_v18  ;;  %v13894_v32 = vmul.f32 %v22603_v56, %v13880_v18 }
0x2149   : > { %18597 = vmatprep.subr.mxu1 %v19282_v22  ;;  %v13893_v49 = vmul.f32 %v22612_v58, %v13880_v18  ;;  %v13907_v61 = vmul.f32 %v22594_v26, %v12179_v11 }
0x214a   : > { %18609 = vmatpush3.xpose.msk.msra.mxu0 %vm1429_vm1, %v13887_v21  ;;  %v13892_v44 = vmul.f32 %v22586_v1, %v13879_v50  ;;  %v13891_v54 = vmul.f32 %v22594_v26, %v13879_v50  ;;  %v13890_v59 = vmul.f32 %v22603_v56, %v13879_v50  ;;  %v13889_v28 = vmul.f32 %v22612_v58, %v13879_v50 }
0x214b   : > { %18610 = vmatprep.subr.mxu0 %v19282_v22  ;;  %v13912_v50 = vmul.f32 %v22586_v1, %v22086_v42 }
0x214c   : > { %18598 = vmatpush3.xpose.msk.msra.mxu1 %vm1429_vm1, %v13883_v63 }
0x214d   : > { %18599 = vmatprep.subr.mxu1 %v19282_v22 }
0x214e   : > { %18611 = vmatpush3.xpose.msk.msra.mxu0 %vm1429_vm1, %v13886_v38  ;;  %v13908_v38 = vmul.f32 %v22586_v1, %v12179_v11 }
0x214f   : > { %18612 = vmatprep.subr.mxu0 %v19282_v22 }
0x2150   : > { %18600 = vmatpush3.xpose.msk.msra.mxu1 %vm1429_vm1, %v13882_v5 }
0x2151   : > { %18601 = vmatprep.subr.mxu1 %v19282_v22 }
0x2152   : > { %18613 = vmatpush3.xpose.msk.msra.mxu0 %vm1429_vm1, %v13885_v39  ;;  %v13906_v39 = vmul.f32 %v22603_v56, %v12179_v11 }
0x2153   : > { %18628 = vmatprep.subr.mxu0 %v19282_v22 }
0x2154   : > { %18602 = vmatpush3.xpose.msk.msra.mxu1 %vm1429_vm1, %v13881_v41 }
0x2155   : > { %18615 = vmatmul.mubr.msk.f32.vlgmr.msra.gmra.mxu0 %vm1429_vm1, %v13914_v15  ;;  %18617 = vmatprep.subr.mxu1 %v19282_v22  ;;  %v13905_v15 = vmul.f32 %v22612_v58, %v12179_v11 }
0x2156   : > { %18629 = vmatpush3.xpose.msk.msra.mxu0 %vm1429_vm1, %v13896_v29  ;;  %18636 = vmatprep.mubr.msk.f32.mxu0 %vm19283_vm2, %v19282_v22  ;;  %v13911_v29 = vmul.f32 %v22594_v26, %v22086_v42 }
0x2157   : > { %18604 = vmatmul.mubr.msk.f32.vlgmr.msra.gmra.mxu1 %vm1429_vm1, %v13913_v0  ;;  %18630 = vmatprep.subr.mxu0 %v19282_v22  ;;  %v13910_v0 = vmul.f32 %v22603_v56, %v22086_v42 }
0x2158   : > { %18618 = vmatpush3.xpose.msk.msra.mxu1 %vm1429_vm1, %v13892_v44  ;;  %18625 = vmatprep.mubr.msk.f32.mxu1 %vm19283_vm2, %v19282_v22  ;;  %v13909_v44 = vmul.f32 %v22612_v58, %v22086_v42 }
0x2159   : > { %18619 = vmatprep.subr.mxu1 %v19282_v22 }
0x215a   : > { %18631 = vmatpush3.xpose.msk.msra.mxu0 %vm1429_vm1, %v13895_v27 }
0x215b   : > { %18632 = vmatprep.subr.mxu0 %v19282_v22 }
0x215c   : > { %18620 = vmatpush3.xpose.msk.msra.mxu1 %vm1429_vm1, %v13891_v54 }
0x215d   : > { %18621 = vmatprep.subr.mxu1 %v19282_v22 }
0x215e   : > { %18633 = vmatpush3.xpose.msk.msra.mxu0 %vm1429_vm1, %v13894_v32 }
0x215f   : > { %18634 = vmatprep.subr.mxu0 %v19282_v22 }
0x2160   : > { %18622 = vmatpush3.xpose.msk.msra.mxu1 %vm1429_vm1, %v13890_v59 }
0x2161   : > { %18623 = vmatprep.subr.mxu1 %v19282_v22 }
0x2162   : > { %18635 = vmatpush3.xpose.msk.msra.mxu0 %vm1429_vm1, %v13893_v49 }
0x2163   : > { %18650 = vmatprep.subr.mxu0 %v19282_v22 }
0x2164   : > { %18624 = vmatpush3.xpose.msk.msra.mxu1 %vm1429_vm1, %v13889_v28 }
0x2165   : > { %18637 = vmatmul.mubr.msk.f32.vlgmr.msra.gmra.mxu0 %vm1429_vm1, %v13916_v55  ;;  %18639 = vmatprep.subr.mxu1 %v19282_v22 }
0x2166   : > { %18651 = vmatpush3.msra.mxu0 %v13904_v40  ;;  %18658 = vmatprep.mubr.msk.f32.mxu0 %vm19283_vm2, %v19282_v22 }
0x2167   : > { %18626 = vmatmul.mubr.msk.f32.vlgmr.msra.gmra.mxu1 %vm1429_vm1, %v13915_v45  ;;  %18652 = vmatprep.subr.mxu0 %v19282_v22 }
0x2168   : > { %18640 = vmatpush3.msra.mxu1 %v13900_v23  ;;  %18653 = vmatpush3.msra.mxu0 %v13903_v30 }
0x2169   : > { %18641 = vmatprep.subr.mxu1 %v19282_v22  ;;  %18654 = vmatprep.subr.mxu0 %v19282_v22 }
0x216a   : > { %18642 = vmatpush3.msra.mxu1 %v13899_v4  ;;  %18655 = vmatpush3.msra.mxu0 %v13902_v57 }
0x216b   : > { %18643 = vmatprep.subr.mxu1 %v19282_v22  ;;  %18656 = vmatprep.subr.mxu0 %v19282_v22 }
0x216c   : > { %18644 = vmatpush3.msra.mxu1 %v13898_v48  ;;  %18657 = vmatpush3.msra.mxu0 %v13901_v8 }
0x216d   : > { %18645 = vmatprep.subr.mxu1 %v19282_v22  ;;  %18647 = vmatprep.mubr.msk.f32.mxu1 %vm19283_vm2, %v19282_v22 }
0x216e   : > { %18646 = vmatpush3.msra.mxu1 %v13897_v34  ;;  %18672 = vmatprep.subr.mxu0 %v19282_v22 }
0x216f   : > { %18661 = vmatprep.subr.mxu1 %v19282_v22 }
0x2215   : > { %v14083_v19 = vpop.f32.mrf.mxu0 }
0x2216   : > { %v14260_v13 = vsel %vm1429_vm1, %v14083_v19, -inf }
0x2217   : > { %v13998_v43 = vpop.f32.mrf.mxu1  ;;  %v18616_v35 = vpop.f32.mrf.mxu0 }
0x2218   : > { %v14257_v7 = vsel %vm1429_vm1, %v13998_v43, -inf }
0x2219   : > { %14258 = vmax.xlane.f32.xlu0 %v14257_v7  ;;  %v18605_v10 = vpop.f32.mrf.mxu1 }
0x221d   : > { %14261 = vmax.xlane.f32.xlu0 %v14260_v13 }
0x2225   : > { %v14253_v62 = vpop.f32.mrf.mxu0 }
0x2226   : > { %v14266_v47 = vsel %vm1429_vm1, %v14253_v62, -inf }
0x2227   : > { %v14168_v60 = vpop.f32.mrf.mxu1  ;;  %v18638_v51 = vpop.f32.mrf.mxu0 }
0x2228   : > { %v14263_v25 = vsel %vm1429_vm1, %v14168_v60, -inf }
0x2229   : > { %14264 = vmax.xlane.f32.xlu1 %v14263_v25  ;;  %v18627_v37 = vpop.f32.mrf.mxu1 }
0x222d   : > { %14267 = vmax.xlane.f32.xlu1 %v14266_v47 }
0x22a2   : > { %v14259_v31 = vpop.xlane.xlu0 %14258 }
0x22a3   : > { %v14269_v36 = vsub.f32 %v13998_v43, %v14259_v31 }
0x22a5   : > { %v14273_v17 = vmul.f32 1.442695, %v14269_v36 }
0x22a6   : > { %v14262_v9 = vpop.xlane.xlu0 %14261 }
0x22a7   : > { %19084 = vpow2.f32 %v14273_v17  ;;  %v14270_v46 = vsub.f32 %v14083_v19, %v14262_v9 }
0x22a9   : > { %v14275_v6 = vmul.f32 1.442695, %v14270_v46 }
0x22ab   : > { %19086 = vpow2.f32 %v14275_v6 }
0x22b2   : > { %v14265_v14 = vpop.xlane.xlu1 %14264 }
0x22b3   : > { %v14271_v21 = vsub.f32 %v14168_v60, %v14265_v14 }
0x22b4   : > { %v19085_v63 = vpop.eup %19084 }
0x22b5   : > { %v14277_v52 = vmul.f32 1.442695, %v14271_v21  ;;  %18648 = vmatmul.mubr.msk.f32.vlgmr.msra.gmra.mxu1 %vm1429_vm1, %v19085_v63 }
0x22b6   : > { %18662 = vmatpush3.msra.mxu1 %v13908_v38  ;;  %v14268_v5 = vpop.xlane.xlu1 %14267  ;;  %18669 = vmatprep.mubr.msk.f32.mxu1 %vm19283_vm2, %v19282_v22 }
0x22b7   : > { %19088 = vpow2.f32 %v14277_v52  ;;  %18663 = vmatprep.subr.mxu1 %v19282_v22  ;;  %v14272_v18 = vsub.f32 %v14253_v62, %v14268_v5 }
0x22b8   : > { %v19087_v3 = vpop.eup %19086  ;;  %18664 = vmatpush3.msra.mxu1 %v13907_v61  ;;  %v14751_v61 = vld [vmem:[%s22981_s3 + $0x18] sm:$0xff] }
0x22b9   : > { %v14279_v41 = vmul.f32 1.442695, %v14272_v18  ;;  %18665 = vmatprep.subr.mxu1 %v19282_v22  ;;  %18659 = vmatmul.mubr.msk.f32.vlgmr.msra.gmra.mxu0 %vm1429_vm1, %v19087_v3  ;;  %v14750_v18 = vld [vmem:[%s22981_s3 + $0x10] sm:$0xff] }
0x22ba   : > { %18666 = vmatpush3.msra.mxu1 %v13906_v39  ;;  %18673 = vmatpush3.msra.mxu0 %v13912_v50  ;;  %v14748_v39 = vld [vmem:[%s22981_s3] sm:$0xff] }
0x22bb   : > { %19090 = vpow2.f32 %v14279_v41  ;;  %18667 = vmatprep.subr.mxu1 %v19282_v22  ;;  %18674 = vmatprep.subr.mxu0 %v19282_v22 }
0x22bc   : > { %18668 = vmatpush3.msra.mxu1 %v13905_v15  ;;  %18675 = vmatpush3.msra.mxu0 %v13911_v29 }
0x22bd   : > { %18676 = vmatprep.subr.mxu0 %v19282_v22  ;;  %18683 = vmatprep.subr.mxu1 %v22586_v1 }
0x22be   : > { %18677 = vmatpush3.msra.mxu0 %v13910_v0  ;;  %18680 = vmatprep.mubr.msk.f32.mxu0 %vm19283_vm2, %v19282_v22 }
0x22bf   : > { %18678 = vmatprep.subr.mxu0 %v19282_v22 }
0x22c0   : > { %18679 = vmatpush3.msra.mxu0 %v13909_v44 }
0x22c1   : > { %18697 = vmatprep.subr.mxu0 %v14751_v61 }
0x22c4   : > { %v19089_v27 = vpop.eup %19088 }
0x22c5   : > { %18670 = vmatmul.mubr.msk.f32.vlgmr.msra.gmra.mxu1 %vm1429_vm1, %v19089_v27 }
0x22c6   : > { %18684 = vmatpush3.msra.mxu1 %v22586_v1  ;;  %18691 = vmatprep.mubr.msk.f32.mxu1 %vm1429_vm1, %v19085_v63 }
0x22c7   : > { %18685 = vmatprep.subr.mxu1 %v22594_v26 }
0x22c8   : > { %v19091_v54 = vpop.eup %19090  ;;  %18686 = vmatpush3.msra.mxu1 %v22594_v26 }
0x22c9   : > { %18687 = vmatprep.subr.mxu1 %v22603_v56  ;;  %18681 = vmatmul.mubr.msk.f32.vlgmr.msra.gmra.mxu0 %vm1429_vm1, %v19091_v54 }
0x22ca   : > { %18688 = vmatpush3.msra.mxu1 %v22603_v56  ;;  %18698 = vmatpush3.msra.mxu0 %v14751_v61 }
0x22cb   : > { %18689 = vmatprep.subr.mxu1 %v22612_v58  ;;  %18699 = vmatprep.subr.mxu0 %v14750_v18 }
0x22cc   : > { %18690 = vmatpush3.msra.mxu1 %v22612_v58  ;;  %18700 = vmatpush3.msra.mxu0 %v14750_v18 }
0x22cd   : > { %18692 = vmatmul.mubr.msk.f32.vlgmr.msra.gmra.mxu1 %vm1429_vm1, %v19087_v3  ;;  %v14749_v3 = vld [vmem:[%s22981_s3 + $0x8] sm:$0xff]  ;;  %s22984_s3 = sld [smem:[#allocation36_spill]] }
0x22ce   : > { %18694 = vmatprep.mubr.msk.f32.mxu1 %vm1429_vm1, %v19089_v27  ;;  %18701 = vmatprep.subr.mxu0 %v14749_v3 }
0x22cf   : > { %18702 = vmatpush3.msra.mxu0 %v14749_v3 }
0x22d0   : > { %18703 = vmatprep.subr.mxu0 %v14748_v39 }
0x22d1   : > { %18695 = vmatmul.mubr.msk.f32.gmra.mxu1 %vm1429_vm1, %v19091_v54  ;;  %18704 = vmatpush3.msra.mxu0 %v14748_v39 }
0x2375   : > { %v14350_v22 = vpop.f32.mrf.mxu1 }
0x2377   : > { %v18649_v42 = vpop.f32.mrf.mxu1 }
0x2379   : > { %v14423_v1 = vpop.f32.mrf.mxu0 }
0x237b   : > { %v18660_v26 = vpop.f32.mrf.mxu0 }
0x2385   : > { %v14496_v32 = vpop.f32.mrf.mxu1 }
0x2387   : > { %v18671_v59 = vpop.f32.mrf.mxu1 }
0x2389   : > { %v14569_v53 = vpop.f32.mrf.mxu0 }
0x238b   : > { %v18682_v16 = vpop.f32.mrf.mxu0 }
0x238d   : > { %v18693_v49 = vpop.f32.mrf.mxu1 }
0x238e   : > { %v14659_v56 = vmax.f32 %v18693_v49, 1e-20 }
0x238f   : > { %v14639_v24 = vpop.f32.mrf.mxu1 }
0x2390   : > { %19092 = vrcp.f32 %v14659_v56  ;;  %v14658_v28 = vmax.f32 %v14639_v24, 1e-20 }
0x2391   : > { %v18696_v58 = vpop.f32.mrf.mxu1 }
0x2392   : > { %19094 = vrcp.f32 %v14658_v28  ;;  %v14661_v55 = vmax.f32 %v18696_v58, 1e-20  ;;  %v16026_v58 = vld [vmem:[%s22983_s2] ss:$0 sm:$0xff]  ;;  %s22985_s2 = sld [smem:[#allocation35_spill]] }
0x2393   : > { %v14649_v40 = vpop.f32.mrf.mxu1 }
0x2394   : > { %19096 = vrcp.f32 %v14661_v55  ;;  %v14660_v45 = vmax.f32 %v14649_v40, 1e-20 }
0x2396   : > { %19098 = vrcp.f32 %v14660_v45 }
0x239d   : > { %v19093_v23 = vpop.eup %19092 }
0x239e   : > { %v14667_v30 = vmul.f32 %v19093_v23, %v14423_v1 }
0x239f   : > { %v19095_v4 = vpop.eup %19094 }
0x23a0   : > { %v14673_v57 = vadd.f32 %v14667_v30, %v21926_v2  ;;  %v14666_v48 = vmul.f32 %v19095_v4, %v14350_v22 }
0x23a1   : > { %v19097_v8 = vpop.eup %19096 }
0x23a2   : > { %v14679_v34 = vsel %vm1429_vm1, %v14673_v57, 0.0  ;;  %v14672_v19 = vadd.f32 %v14666_v48, %v21923_v20  ;;  %v14669_v43 = vmul.f32 %v19097_v8, %v14569_v53  ;;  %v16025_v53 = vld [vmem:[%s22982_s5] ss:$0 sm:$0xff]  ;;  %s22986_s5 = sld [smem:[#allocation37_spill]] }
0x23a3   : > { %v19099_v35 = vpop.eup %19098  ;;  %14680 = vadd.xlane.f32.xlu1 %v14679_v34  ;;  %v14975_v34 = vld [vmem:[%s22984_s3 + $0x78] sm:$0xff] }
0x23a4   : > { %v14676_v7 = vsel %vm1429_vm1, %v14672_v19, 0.0  ;;  %v14675_v10 = vadd.f32 %v14669_v43, %v21949_v12  ;;  %v14668_v13 = vmul.f32 %v19099_v35, %v14496_v32  ;;  %18711 = vmatprep.subr.mxu1 %v14975_v34  ;;  %v14973_v43 = vld [vmem:[%s22984_s3 + $0x68] sm:$0xff]  ;;  %v14972_v35 = vld [vmem:[%s22984_s3 + $0x60] sm:$0xff] }
0x23a5   : > { %14677 = vadd.xlane.f32.xlu0 %v14676_v7  ;;  %18712 = vmatpush3.msra.mxu1 %v14975_v34  ;;  %v14971_v7 = vld [vmem:[%s22984_s3 + $0x58] sm:$0xff] }
0x23a6   : > { %v14685_v62 = vsel %vm1429_vm1, %v14675_v10, 0.0  ;;  %v14674_v60 = vadd.f32 %v14668_v13, %v21939_v33  ;;  %v14969_v13 = vld [vmem:[%s22984_s3 + $0x48] sm:$0xff] }
0x23a7   : > { %14686 = vadd.xlane.f32.xlu1 %v14685_v62  ;;  %v14968_v62 = vld [vmem:[%s22984_s3 + $0x40] sm:$0xff] }
0x23a8   : > { %v14682_v2 = vsel %vm1429_vm1, %v14674_v60, 0.0 }
0x23a9   : > { %14683 = vadd.xlane.f32.xlu0 %v14682_v2  ;;  %v14966_v2 = vld [vmem:[%s22984_s3 + $0x30] sm:$0xff] }
0x242c   : > { %v14681_v51 = vpop.xlane.xlu1 %14680 }
0x242d   : > { %v14689_v25 = vmul.f32 0.03125, %v14681_v51  ;;  %v14965_v51 = vld [vmem:[%s22984_s3 + $0x28] sm:$0xff] }
0x242e   : > { %v14678_v20 = vpop.xlane.xlu0 %14677 }
0x242f   : > { %v14693_v37 = vsub.f32 %v14673_v57, %v14689_v25  ;;  %v14688_v47 = vmul.f32 0.03125, %v14678_v20  ;;  %v14964_v25 = vld [vmem:[%s22984_s3 + $0x20] sm:$0xff]  ;;  %v14963_v20 = vld [vmem:[%s22984_s3 + $0x18] sm:$0xff] }
0x2430   : > { %v14687_v31 = vpop.xlane.xlu1 %14686 }
0x2431   : > { %v14692_v36 = vsub.f32 %v14672_v19, %v14688_v47  ;;  %v14691_v17 = vmul.f32 0.03125, %v14687_v31  ;;  %v14697_v9 = vmul.f32 %v14693_v37, %v14693_v37  ;;  %v14974_v19 = vld [vmem:[%s22984_s3 + $0x70] sm:$0xff]  ;;  %v14961_v47 = vld [vmem:[%s22984_s3 + $0x8] sm:$0xff]  ;;  %v14960_v31 = vld [vmem:[%s22984_s3] sm:$0xff] }
0x2432   : > { %v14684_v12 = vpop.xlane.xlu0 %14683  ;;  %18713 = vmatprep.subr.mxu1 %v14974_v19 }
0x2433   : > { %v14695_v46 = vsub.f32 %v14675_v10, %v14691_v17  ;;  %v14690_v6 = vmul.f32 0.03125, %v14684_v12  ;;  %v14703_v33 = vsel %vm1429_vm1, %v14697_v9, 0.0  ;;  %v14696_v11 = vmul.f32 %v14692_v36, %v14692_v36  ;;  %18714 = vmatpush3.msra.mxu1 %v14974_v19  ;;  %v14970_v10 = vld [vmem:[%s22984_s3 + $0x50] sm:$0xff] }
0x2434   : > { %14704 = vadd.xlane.f32.xlu1 %v14703_v33  ;;  %18715 = vmatprep.subr.mxu1 %v14973_v43 }
0x2435   : > { %v14694_v14 = vsub.f32 %v14674_v60, %v14690_v6  ;;  %v14700_v21 = vsel %vm1429_vm1, %v14696_v11, 0.0  ;;  %v14699_v63 = vmul.f32 %v14695_v46, %v14695_v46  ;;  %18716 = vmatpush3.msra.mxu1 %v14973_v43  ;;  %v14967_v60 = vld [vmem:[%s22984_s3 + $0x38] sm:$0xff] }
0x2436   : > { %14701 = vadd.xlane.f32.xlu0 %v14700_v21  ;;  %18717 = vmatprep.subr.mxu1 %v14972_v35 }
0x2437   : > { %v14709_v38 = vsel %vm1429_vm1, %v14699_v63, 0.0  ;;  %v14698_v52 = vmul.f32 %v14694_v14, %v14694_v14  ;;  %18718 = vmatpush3.msra.mxu1 %v14972_v35 }
0x2438   : > { %14710 = vadd.xlane.f32.xlu1 %v14709_v38  ;;  %18719 = vmatprep.subr.mxu1 %v14971_v7 }
0x2439   : > { %v14706_v5 = vsel %vm1429_vm1, %v14698_v52, 0.0  ;;  %18720 = vmatpush3.msra.mxu1 %v14971_v7 }
0x243a   : > { %14707 = vadd.xlane.f32.xlu0 %v14706_v5  ;;  %18721 = vmatprep.subr.mxu1 %v14970_v10 }
0x243b   : > { %18722 = vmatpush3.msra.mxu1 %v14970_v10 }
0x243c   : > { %18723 = vmatprep.subr.mxu1 %v14969_v13 }
0x243d   : > { %18724 = vmatpush3.msra.mxu1 %v14969_v13 }
0x243e   : > { %18725 = vmatprep.subr.mxu1 %v14968_v62 }
0x243f   : > { %18726 = vmatpush3.msra.mxu1 %v14968_v62 }
0x2440   : > { %18727 = vmatprep.subr.mxu1 %v14967_v60 }
0x2441   : > { %18728 = vmatpush3.msra.mxu1 %v14967_v60 }
0x2442   : > { %18729 = vmatprep.subr.mxu1 %v14966_v2 }
0x2443   : > { %18730 = vmatpush3.msra.mxu1 %v14966_v2 }
0x2444   : > { %18731 = vmatprep.subr.mxu1 %v14965_v51 }
0x2445   : > { %18732 = vmatpush3.msra.mxu1 %v14965_v51 }
0x2446   : > { %18733 = vmatprep.subr.mxu1 %v14964_v25 }
0x2447   : > { %18734 = vmatpush3.msra.mxu1 %v14964_v25 }
0x2448   : > { %18735 = vmatprep.subr.mxu1 %v14963_v20 }
0x2449   : > { %18736 = vmatpush3.msra.mxu1 %v14963_v20 }
0x24bd   : > { %v14705_v50 = vpop.xlane.xlu1 %14704 }
0x24be   : > { %v14713_v41 = vmul.f32 0.03125, %v14705_v50 }
0x24bf   : > { %v14702_v15 = vpop.xlane.xlu0 %14701 }
0x24c0   : > { %v14717_v29 = vadd.f32 1e-05, %v14713_v41  ;;  %v14712_v0 = vmul.f32 0.03125, %v14702_v15 }
0x24c1   : > { %v14711_v44 = vpop.xlane.xlu1 %14710 }
0x24c2   : > { %19100 = vrsqrt.f32 %v14717_v29  ;;  %v14716_v27 = vadd.f32 1e-05, %v14712_v0  ;;  %v14715_v54 = vmul.f32 0.03125, %v14711_v44 }
0x24c3   : > { %v14708_v22 = vpop.xlane.xlu0 %14707 }
0x24c4   : > { %19102 = vrsqrt.f32 %v14716_v27  ;;  %v14719_v42 = vadd.f32 1e-05, %v14715_v54  ;;  %v14714_v1 = vmul.f32 0.03125, %v14708_v22 }
0x24c6   : > { %19104 = vrsqrt.f32 %v14719_v42  ;;  %v14718_v26 = vadd.f32 1e-05, %v14714_v1 }
0x24c8   : > { %19106 = vrsqrt.f32 %v14718_v26 }
0x24cf   : > { %v19101_v32 = vpop.eup %19100 }
0x24d0   : > { %v14725_v59 = vmul.f32 %v19101_v32, %v14693_v37  ;;  %v14962_v37 = vld [vmem:[%s22984_s3 + $0x10] sm:$0xff]  ;;  %s22989_s3 = sld [smem:[#allocation39_spill]] }
0x24d1   : > { %v19103_v16 = vpop.eup %19102  ;;  %18737 = vmatprep.subr.mxu1 %v14962_v37 }
0x24d2   : > { %v14724_v49 = vmul.f32 %v19103_v16, %v14692_v36  ;;  %v14735_v24 = vmul.f32 %v16025_v53, %v14725_v59  ;;  %18738 = vmatpush3.msra.mxu1 %v14962_v37  ;;  %v16027_v36 = vld [vmem:[%s22985_s2] ss:$0 sm:$0xff]  ;;  %s22987_s2 = sld [smem:[#allocation40_spill]] }
0x24d3   : > { %v19105_v56 = vpop.eup %19104  ;;  %18739 = vmatprep.subr.mxu1 %v14961_v47 }
0x24d4   : > { %v14727_v28 = vmul.f32 %v19105_v56, %v14695_v46  ;;  %v14734_v55 = vmul.f32 %v16025_v53, %v14724_v49  ;;  %v22748_v30 = vadd.f32 %v16026_v58, %v14735_v24  ;;  %18740 = vmatpush3.msra.mxu1 %v14961_v47 }
0x24d5   : > { %v19107_v40 = vpop.eup %19106  ;;  %18741 = vmatprep.subr.mxu1 %v14960_v31 }
0x24d6   : > { %v22746_v45 = vadd.f32 %v16026_v58, %v14734_v55  ;;  %v14726_v23 = vmul.f32 %v19107_v40, %v14694_v14  ;;  %v14737_v4 = vmul.f32 %v16025_v53, %v14727_v28  ;;  %18742 = vmatpush3.msra.mxu1 %v14960_v31 }
0x24d8   : > { %18705 = vmatprep.mubr.msk.f32.mxu0 %vm1429_vm1, %v22746_v45  ;;  %v14736_v57 = vmul.f32 %v16025_v53, %v14726_v23  ;;  %v22756_v8 = vadd.f32 %v16026_v58, %v14737_v4 }
0x24d9   : > { %18706 = vmatmul.mubr.msk.f32.vlgmr.msra.gmra.mxu0 %vm1429_vm1, %v22748_v30 }
0x24da   : > { %v22754_v48 = vadd.f32 %v16026_v58, %v14736_v57 }
0x24dc   : > { %18708 = vmatprep.mubr.msk.f32.mxu0 %vm1429_vm1, %v22754_v48 }
0x24dd   : > { %18709 = vmatmul.mubr.msk.f32.gmra.mxu0 %vm1429_vm1, %v22756_v8 }
0x2599   : > { %v18707_v17 = vpop.f32.mrf.mxu0 }
0x259a   : > { %v22779_v9 = vadd.f32 %v18707_v17, %v16027_v36 }
0x259b   : > { %v14837_v12 = vpop.f32.mrf.mxu0 }
0x259c   : > { %v22782_v46 = vmul.f32 0.70710677, %v22779_v9  ;;  %v22784_v6 = vadd.f32 %v16027_v36, %v14837_v12 }
0x259d   : > { %v18710_v33 = vpop.f32.mrf.mxu0 }
0x259e   : > { %v14865_v11 = vand.u32 2147483647, %v22782_v46  ;;  %v22788_v14 = vmul.f32 0.70710677, %v22784_v6  ;;  %v22790_v21 = vadd.f32 %v18710_v33, %v16027_v36  ;;  %vm14941_vm11 = vcmp.ge.f32.partialorder %v22782_v46, 0.0 }
0x259f   : > { %v14847_v63 = vpop.f32.mrf.mxu0  ;;  %v14857_v46 = vmul.f32 0.5, %v22779_v9  ;;  %v16032_v9 = vld [vmem:[%s22986_s5] ss:$0 sm:$0xff]  ;;  %s22988_s5 = sld [smem:[#allocation38_spill]] }
0x25a0   : > { %v14869_v38 = vmul.f32 0.3275911, %v14865_v11  ;;  %v14864_v52 = vand.u32 2147483647, %v22788_v14  ;;  %v22794_v5 = vmul.f32 0.70710677, %v22790_v21  ;;  %v22796_v61 = vadd.f32 %v16027_v36, %v14847_v63 }
0x25a1   : > { %v14917_v54 = vsub.f32 0.0, %v14865_v11  ;;  %vm14940_vm12 = vcmp.ge.f32.partialorder %v22788_v14, 0.0 }
0x25a2   : > { %v14873_v18 = vadd.f32 1.0, %v14869_v38  ;;  %v14868_v3 = vmul.f32 0.3275911, %v14864_v52  ;;  %v14867_v39 = vand.u32 2147483647, %v22794_v5  ;;  %v14916_v22 = vsub.f32 0.0, %v14864_v52 }
0x25a3   : > { %v22800_v50 = vmul.f32 0.70710677, %v22796_v61  ;;  %v14921_v42 = vmul.f32 %v14917_v54, %v14865_v11  ;;  %vm14943_vm13 = vcmp.ge.f32.partialorder %v22794_v5, 0.0  ;;  %v14859_v5 = vmul.f32 0.5, %v22790_v21 }
0x25a4   : > { %19108 = vrcp.f32 %v14873_v18  ;;  %v14872_v41 = vadd.f32 1.0, %v14868_v3  ;;  %v14871_v15 = vmul.f32 0.3275911, %v14867_v39  ;;  %v14919_v1 = vsub.f32 0.0, %v14867_v39 }
0x25a5   : > { %v14866_v29 = vand.u32 2147483647, %v22800_v50  ;;  %v14920_v32 = vmul.f32 %v14916_v22, %v14864_v52  ;;  %v14926_v53 = vmul.f32 1.442695, %v14921_v42  ;;  %vm14942_vm14 = vcmp.ge.f32.partialorder %v22800_v50, 0.0 }
0x25a6   : > { %19110 = vrcp.f32 %v14872_v41  ;;  %v14875_v0 = vadd.f32 1.0, %v14871_v15  ;;  %v14923_v49 = vmul.f32 %v14919_v1, %v14867_v39 }
0x25a7   : > { %v14870_v44 = vmul.f32 0.3275911, %v14866_v29  ;;  %v14918_v16 = vsub.f32 0.0, %v14866_v29  ;;  %v14924_v28 = vmul.f32 1.442695, %v14920_v32 }
0x25a8   : > { %19112 = vrcp.f32 %v14875_v0  ;;  %v14930_v57 = vmul.f32 1.442695, %v14923_v49 }
0x25a9   : > { %v14874_v27 = vadd.f32 1.0, %v14870_v44  ;;  %v14922_v23 = vmul.f32 %v14918_v16, %v14866_v29 }
0x25ab   : > { %19114 = vrcp.f32 %v14874_v27  ;;  %v14928_v13 = vmul.f32 1.442695, %v14922_v23 }
0x25ac   : > { %19116 = vpow2.f32 %v14926_v53 }
0x25ad   : > { %19118 = vpow2.f32 %v14924_v28 }
0x25ae   : > { %19120 = vpow2.f32 %v14930_v57 }
0x25af   : > { %19122 = vpow2.f32 %v14928_v13  ;;  %v14858_v13 = vmul.f32 0.5, %v22796_v61 }
0x25b1   : > { %v19109_v26 = vpop.eup %19108 }
0x25b2   : > { %v14881_v59 = vmul.f32 1.0614054, %v19109_v26 }
0x25b3   : > { %v19111_v56 = vpop.eup %19110 }
0x25b4   : > { %v14885_v24 = vadd.f32 -1.4531521, %v14881_v59  ;;  %v14880_v58 = vmul.f32 1.0614054, %v19111_v56 }
0x25b5   : > { %v19113_v55 = vpop.eup %19112 }
0x25b6   : > { %v14889_v40 = vmul.f32 %v19109_v26, %v14885_v24  ;;  %v14883_v4 = vmul.f32 1.0614054, %v19113_v55  ;;  %v14884_v34 = vadd.f32 -1.4531521, %v14880_v58 }
0x25b8   : > { %v14893_v19 = vadd.f32 1.4214138, %v14889_v40  ;;  %v19115_v43 = vpop.eup %19114  ;;  %v14887_v35 = vadd.f32 -1.4531521, %v14883_v4  ;;  %v14888_v7 = vmul.f32 %v19111_v56, %v14884_v34 }
0x25b9   : > { %v14882_v62 = vmul.f32 1.0614054, %v19115_v43  ;;  %v19117_v18 = vpop.eup %19116 }
0x25ba   : > { %v14897_v10 = vmul.f32 %v19109_v26, %v14893_v19  ;;  %v14891_v60 = vmul.f32 %v19113_v55, %v14887_v35  ;;  %v14892_v2 = vadd.f32 1.4214138, %v14888_v7  ;;  %v19119_v44 = vpop.eup %19118 }
0x25bb   : > { %v14886_v25 = vadd.f32 -1.4531521, %v14882_v62  ;;  %v19121_v1 = vpop.eup %19120 }
0x25bc   : > { %v14901_v51 = vadd.f32 -0.28449672, %v14897_v10  ;;  %v14895_v20 = vadd.f32 1.4214138, %v14891_v60  ;;  %v14896_v37 = vmul.f32 %v19111_v56, %v14892_v2  ;;  %v19123_v24 = vpop.eup %19122 }
0x25bd   : > { %v14890_v31 = vmul.f32 %v19115_v43, %v14886_v25 }
0x25be   : > { %v14905_v47 = vmul.f32 %v19109_v26, %v14901_v51  ;;  %v14899_v36 = vmul.f32 %v19113_v55, %v14895_v20  ;;  %v14900_v17 = vadd.f32 -0.28449672, %v14896_v37 }
0x25bf   : > { %v14894_v33 = vadd.f32 1.4214138, %v14890_v31 }
0x25c0   : > { %v14909_v12 = vadd.f32 0.2548296, %v14905_v47  ;;  %v14903_v11 = vadd.f32 -0.28449672, %v14899_v36  ;;  %v14904_v63 = vmul.f32 %v19111_v56, %v14900_v17 }
0x25c1   : > { %v14898_v52 = vmul.f32 %v19115_v43, %v14894_v33 }
0x25c2   : > { %v14913_v38 = vmul.f32 %v19109_v26, %v14909_v12  ;;  %v14907_v3 = vmul.f32 %v19113_v55, %v14903_v11  ;;  %v14908_v39 = vadd.f32 0.2548296, %v14904_v63 }
0x25c3   : > { %v14902_v15 = vadd.f32 -0.28449672, %v14898_v52 }
0x25c4   : > { %v14933_v41 = vmul.f32 %v19117_v18, %v14913_v38  ;;  %v14911_v29 = vadd.f32 0.2548296, %v14907_v3  ;;  %v14912_v0 = vmul.f32 %v19111_v56, %v14908_v39 }
0x25c5   : > { %v14906_v54 = vmul.f32 %v19115_v43, %v14902_v15 }
0x25c6   : > { %v14937_v27 = vsub.f32 1.0, %v14933_v41  ;;  %v14915_v22 = vmul.f32 %v19113_v55, %v14911_v29  ;;  %v14932_v42 = vmul.f32 %v19119_v44, %v14912_v0  ;;  %v14856_v55 = vmul.f32 0.5, %v22784_v6 }
0x25c7   : > { %v14910_v59 = vadd.f32 0.2548296, %v14906_v54 }
0x25c8   : > { %v14945_v32 = vsub.f32 0.0, %v14937_v27  ;;  %v14935_v53 = vmul.f32 %v19121_v1, %v14915_v22  ;;  %v14936_v26 = vsub.f32 1.0, %v14932_v42 }
0x25c9   : > { %v14914_v49 = vmul.f32 %v19115_v43, %v14910_v59  ;;  %v15153_v59 = vld [vmem:[%s22987_s2 + $0x18] sm:$0xff] }
0x25ca   : > { %v14949_v16 = vsel %vm14941_vm11, %v14937_v27, %v14945_v32  ;;  %v14939_v28 = vsub.f32 1.0, %v14935_v53  ;;  %v14944_v58 = vsub.f32 0.0, %v14936_v26  ;;  %v15152_v53 = vld [vmem:[%s22987_s2 + $0x10] sm:$0xff]  ;;  %18749 = vmatprep.subr.mxu0 %v15153_v59 }
0x25cb   : > { %v14934_v56 = vmul.f32 %v19123_v24, %v14914_v49  ;;  %v14953_v40 = vadd.f32 1.0, %v14949_v16  ;;  %18750 = vmatpush3.msra.mxu0 %v15153_v59  ;;  %v15150_v16 = vld [vmem:[%s22987_s2] sm:$0xff] }
0x25cc   : > { %v14947_v23 = vsub.f32 0.0, %v14939_v28  ;;  %v14948_v4 = vsel %vm14940_vm12, %v14936_v26, %v14944_v58  ;;  %v15151_v26 = vld [vmem:[%s22987_s2 + $0x8] sm:$0xff]  ;;  %18751 = vmatprep.subr.mxu0 %v15152_v53  ;;  %s1349_s2 = sand.u32 1, %s19226_s10  }
0x25cd   : > { %v14952_v57 = vadd.f32 1.0, %v14948_v4  ;;  %v14938_v34 = vsub.f32 1.0, %v14934_v56  ;;  %v14957_v7 = vmul.f32 %v14953_v40, %v14857_v46  ;;  %18752 = vmatpush3.msra.mxu0 %v15152_v53  ;;  %s15459_s6 = sshll.u32 %s1349_s2, 5  ;;  %s22849_s9 = scalar_lea.sflag [#allocation3], %s1349_s2 }
0x25ce   : > { %v14951_v19 = vsel %vm14943_vm13, %v14939_v28, %v14947_v23  ;;  %18753 = vmatprep.subr.mxu0 %v15151_v26  ;;  %s1351_s8 = scalar_lea.vmem [#allocation2], %s15459_s6  ;;  %s16048_s6 = sshll.u32 %s19543_s0, 9 }
0x25cf   : > { %v14956_v43 = vmul.f32 %v14952_v57, %v14856_v55  ;;  %v14946_v35 = vsub.f32 0.0, %v14938_v34  ;;  %v14955_v14 = vadd.f32 1.0, %v14951_v19  ;;  %18754 = vmatpush3.msra.mxu0 %v15151_v26  ;;  %s19180_s0 = scalar_lea.vmem %s19179_s17, 1024 }
0x25d0   : > { %18755 = vmatprep.subr.mxu0 %v15150_v16 }
0x25d1   : > { %18743 = vmatprep.mubr.f32.mxu1 %v14956_v43  ;;  %v14950_v10 = vsel %vm14942_vm14, %v14938_v34, %v14946_v35  ;;  %v14959_v60 = vmul.f32 %v14955_v14, %v14859_v5  ;;  %18756 = vmatpush3.msra.mxu0 %v15150_v16  ;;  %v16033_v43 = vld [vmem:[%s22988_s5] ss:$0 sm:$0xff]  ;;  %s15295_s5 = sshll.u32 %s1351_s8, 4  ;;  %s22845_s5 = int_to_ptr.vmem [resolvable:$true] %s15295_s5 }
0x25d2   : > { %18744 = vmatmul.mubr.f32.vlgmr.msra.gmra.mxu1 %v14957_v7  ;;  %v14954_v6 = vadd.f32 1.0, %v14950_v10  ;;  %v16034_v14 = vld [vmem:[%s22989_s3] ss:$0 sm:$0xff]  ;;  %s22843_s3 = scalar_lea.hbm %s19515_s27, %s16048_s6  ;;  %s19174_s13 = scalar_lea.vmem %s22845_s5, 512 }
0x25d3   : > { %p19175_p11 = scmp.ne.s32.totalorder %s22845_s5, %s19174_s13  ;;  %p19181_p0 = scmp.lt.s32.totalorder %s22845_s5, %s19179_s17 }
0x25d4   : > { %v14958_v62 = vmul.f32 %v14954_v6, %v14858_v13  ;;  %p19182_p1 = scmp.lt.s32.totalorder %s19180_s0, %s19174_s13 }
0x25d5   : > { %p19176_p12 = pnand %p19175_p11, %p19560_p5 }
0x25d6   : > { %18746 = vmatprep.mubr.f32.mxu1 %v14958_v62  ;;  %p19183_p2 = por %p19182_p1, %p19181_p0 }
0x25d7   : > { %18747 = vmatmul.mubr.f32.gmra.mxu1 %v14959_v60  ;;  %p19177_p13 = pneg %p19176_p12 }
0x25d9   : > { %p19184_p3 = pnand %p19183_p2, %p19177_p13 }
0x2692   : > { %v18745_v2 = vpop.f32.mrf.mxu1 }
0x2693   : > { %v15055_v51 = vadd.f32 %v18745_v2, %v16032_v9 }
0x2694   : > { %v15049_v25 = vpop.f32.mrf.mxu1 }
0x2695   : > { %v15050_v20 = vadd.f32 %v16032_v9, %v15049_v25  ;;  %v15071_v50 = vadd.f32 %v15055_v51, %v22748_v30 }
0x2697   : > { %v18748_v37 = vpop.f32.mrf.mxu1  ;;  %v15077_v47 = vsel %vm1429_vm1, %v15071_v50, 0.0  ;;  %v15070_v61 = vadd.f32 %v15050_v20, %v22746_v45 }
0x2698   : > { %v15065_v31 = vadd.f32 %v18748_v37, %v16032_v9  ;;  %15078 = vadd.xlane.f32.xlu1 %v15077_v47 }
0x2699   : > { %v15059_v36 = vpop.f32.mrf.mxu1  ;;  %v15074_v21 = vsel %vm1429_vm1, %v15070_v61, 0.0 }
0x269a   : > { %v15060_v17 = vadd.f32 %v16032_v9, %v15059_v36  ;;  %15075 = vadd.xlane.f32.xlu0 %v15074_v21  ;;  %v15073_v12 = vadd.f32 %v15065_v31, %v22756_v8 }
0x269c   : > { %v15083_v33 = vsel %vm1429_vm1, %v15073_v12, 0.0  ;;  %v15072_v11 = vadd.f32 %v15060_v17, %v22754_v48 }
0x269d   : > { %15084 = vadd.xlane.f32.xlu1 %v15083_v33 }
0x269e   : > { %v15080_v30 = vsel %vm1429_vm1, %v15072_v11, 0.0 }
0x269f   : > { %15081 = vadd.xlane.f32.xlu0 %v15080_v30 }
0x2721   : > { %v15079_v63 = vpop.xlane.xlu1 %15078 }
0x2722   : > { %v15087_v38 = vmul.f32 0.03125, %v15079_v63 }
0x2723   : > { %v15076_v45 = vpop.xlane.xlu0 %15075 }
0x2724   : > { %v15091_v52 = vsub.f32 %v15071_v50, %v15087_v38  ;;  %v15086_v18 = vmul.f32 0.03125, %v15076_v45 }
0x2726   : > { %v15090_v3 = vsub.f32 %v15070_v61, %v15086_v18  ;;  %v15085_v39 = vpop.xlane.xlu1 %15084  ;;  %v15095_v41 = vmul.f32 %v15091_v52, %v15091_v52 }
0x2727   : > { %v15089_v15 = vmul.f32 0.03125, %v15085_v39 }
0x2728   : > { %v15082_v29 = vpop.xlane.xlu0 %15081  ;;  %v15101_v8 = vsel %vm1429_vm1, %v15095_v41, 0.0  ;;  %v15094_v0 = vmul.f32 %v15090_v3, %v15090_v3 }
0x2729   : > { %v15093_v48 = vsub.f32 %v15073_v12, %v15089_v15  ;;  %v15088_v44 = vmul.f32 0.03125, %v15082_v29  ;;  %15102 = vadd.xlane.f32.xlu1 %v15101_v8 }
0x272a   : > { %v15098_v27 = vsel %vm1429_vm1, %v15094_v0, 0.0 }
0x272b   : > { %v15092_v54 = vsub.f32 %v15072_v11, %v15088_v44  ;;  %15099 = vadd.xlane.f32.xlu0 %v15098_v27  ;;  %v15097_v22 = vmul.f32 %v15093_v48, %v15093_v48 }
0x272d   : > { %v15107_v42 = vsel %vm1429_vm1, %v15097_v22, 0.0  ;;  %v15096_v1 = vmul.f32 %v15092_v54, %v15092_v54 }
0x272e   : > { %15108 = vadd.xlane.f32.xlu1 %v15107_v42 }
0x272f   : > { %v15104_v32 = vsel %vm1429_vm1, %v15096_v1, 0.0 }
0x2730   : > { %15105 = vadd.xlane.f32.xlu0 %v15104_v32 }
0x27b2   : > { %v15103_v49 = vpop.xlane.xlu1 %15102 }
0x27b3   : > { %v15111_v24 = vmul.f32 0.03125, %v15103_v49 }
0x27b4   : > { %v15100_v28 = vpop.xlane.xlu0 %15099 }
0x27b5   : > { %v15115_v58 = vadd.f32 1e-05, %v15111_v24  ;;  %v15110_v56 = vmul.f32 0.03125, %v15100_v28 }
0x27b7   : > { %19124 = vrsqrt.f32 %v15115_v58  ;;  %v15114_v40 = vadd.f32 1e-05, %v15110_v56  ;;  %v15109_v23 = vpop.xlane.xlu1 %15108 }
0x27b8   : > { %v15113_v4 = vmul.f32 0.03125, %v15109_v23 }
0x27b9   : > { %19126 = vrsqrt.f32 %v15114_v40  ;;  %v15106_v55 = vpop.xlane.xlu0 %15105 }
0x27ba   : > { %v15117_v57 = vadd.f32 1e-05, %v15113_v4  ;;  %v15112_v34 = vmul.f32 0.03125, %v15106_v55 }
0x27bc   : > { %19128 = vrsqrt.f32 %v15117_v57  ;;  %v15116_v46 = vadd.f32 1e-05, %v15112_v34 }
0x27be   : > { %19130 = vrsqrt.f32 %v15116_v46 }
0x27c4   : > { %v19125_v19 = vpop.eup %19124 }
0x27c5   : > { %v15123_v35 = vmul.f32 %v19125_v19, %v15091_v52 }
0x27c6   : > { %v19127_v7 = vpop.eup %19126 }
0x27c7   : > { %v15122_v10 = vmul.f32 %v19127_v7, %v15090_v3  ;;  %v15133_v13 = vmul.f32 %v16033_v43, %v15123_v35 }
0x27c9   : > { %v19129_v6 = vpop.eup %19128  ;;  %v15132_v5 = vmul.f32 %v16033_v43, %v15122_v10  ;;  %v15143_v62 = vadd.f32 %v16034_v14, %v15133_v13 }
0x27ca   : > { %v15125_v60 = vmul.f32 %v19129_v6, %v15093_v48 }
0x27cb   : > { %v19131_v9 = vpop.eup %19130  ;;  %v15142_v2 = vadd.f32 %v16034_v14, %v15132_v5  ;;  %15147 = vst.msk [vmem:[%s1351_s8 + $0x8] sm:$0xff] %vm1429_vm1, %v15143_v62 }
0x27cc   : > { %v15124_v51 = vmul.f32 %v19131_v9, %v15092_v54  ;;  %v15135_v25 = vmul.f32 %v16033_v43, %v15125_v60 }
0x27cd   : > { %15146 = vst.msk [vmem:[%s1351_s8] sm:$0xff] %vm1429_vm1, %v15142_v2  ;;  %18757 = vmatprep.mubr.msk.f32.mxu0 %vm1429_vm1, %v15142_v2 }
0x27ce   : > { %18758 = vmatmul.mubr.msk.f32.vlgmr.msra.gmra.mxu0 %vm1429_vm1, %v15143_v62  ;;  %v15134_v20 = vmul.f32 %v16033_v43, %v15124_v51  ;;  %v15145_v50 = vadd.f32 %v16034_v14, %v15135_v25 }
0x27d0   : > { %v15144_v37 = vadd.f32 %v16034_v14, %v15134_v20  ;;  %15149 = vst.msk [vmem:[%s1351_s8 + $0x18] sm:$0xff] %vm1429_vm1, %v15145_v50 }
0x27d2   : > { %15148 = vst.msk [vmem:[%s1351_s8 + $0x10] sm:$0xff] %vm1429_vm1, %v15144_v37  ;;  %18760 = vmatprep.mubr.msk.f32.mxu0 %vm1429_vm1, %v15144_v37 }
0x27d3   : > { %18761 = vmatmul.mubr.msk.f32.gmra.mxu0 %vm1429_vm1, %v15145_v50 }
0x27d4   : > { %19187 = shalt.err (!%p19184_p3)
}
0x27d5   : > { %s19188_s8 = scalar_lea.hbm %s22843_s3, 512  ;;  %s19192_s2 = scalar_lea.hbm %s19515_s27, 2048 }
0x27d6   : > { %p19189_p4 = scmp.ne.s32.totalorder %s22843_s3, %s19188_s8  ;;  %p19193_p9 = scmp.lt.s32.totalorder %s22843_s3, %s19515_s27 }
0x27d7   : > { %p19194_p10 = scmp.lt.s32.totalorder %s19192_s2, %s19188_s8 }
0x27d8   : > { %p19190_p7 = pnand %p19189_p4, %p19560_p5 }
0x27d9   : > { %p19195_p11 = por %p19194_p10, %p19193_p9 }
0x27da   : > { %p19191_p8 = pneg %p19190_p7 }
0x27dc   : > { %p19196_p12 = pnand %p19195_p11, %p19191_p8 }
0x27de   : > { %19199 = shalt.err (!%p19196_p12)
}
0x27df   : > { %s19285_s13 = smov 128   ;;  %s19286_s17 = smov 8   ;;  %v16035_v47 = vld [vmem:[%s19505_s12] ss:$0 sm:$0xff]  ;;  %vm15258_vm15 = vcmask 23552  }
0x27e0   : > { %18763 = dma.vmem_to_hbm [thread:$0]  (%p19560_p5), %s22845_s5, 512, %s22843_s3, %s22849_s9, %s19285_s13, %s19285_s13, %s19286_s17  }
0x27e1   : > { %s1373_s14 = scalar_lea.vmem %s19520_s4, %s19576_s16 }
0x288e   : > { %v18759_v61 = vpop.f32.mrf.mxu0 }
0x288f   : > { %v15245_v31 = vadd.f32 %v18759_v61, %v16035_v47 }
0x2890   : > { %v15239_v36 = vpop.f32.mrf.mxu0 }
0x2891   : > { %15260 = vst.msk [vmem:[%s1373_s14 + $0x8] sm:$0xff] %vm15258_vm15, %v15245_v31  ;;  %v15240_v21 = vadd.f32 %v16035_v47, %v15239_v36 }
0x2893   : > { %15259 = vst.msk [vmem:[%s1373_s14] sm:$0xff] %vm15258_vm15, %v15240_v21  ;;  %v18762_v17 = vpop.f32.mrf.mxu0 }
0x2894   : > { %v15255_v12 = vadd.f32 %v18762_v17, %v16035_v47 }
0x2895   : > { %v15249_v33 = vpop.f32.mrf.mxu0 }
0x2896   : > { %15262 = vst.msk [vmem:[%s1373_s14 + $0x18] sm:$0xff] %vm15258_vm15, %v15255_v12  ;;  %v15250_v11 = vadd.f32 %v16035_v47, %v15249_v33 }
0x2898   : > { %15261 = vst.msk [vmem:[%s1373_s14 + $0x10] sm:$0xff] %vm15258_vm15, %v15250_v11 }
0x2899 PF: > { %p18769_p5 = scmp.ge.s32.totalorder %s19234_s15, 2  ;;  %s15321_s9 = sand.u32 1, %s19222_s7  }
0x289a   : > { %s15322_s28 = scalar_lea.sflag [#allocation3], %s15321_s9 }
0x289b   : > { %p18766_p13 = pnand %p18769_p5, %p19564_p6 }
0x289d   : > { %p18767_p0 = pneg %p18766_p13 }
0x289f   : > { %19217 = dma.done.wait (%p18767_p0), %s15322_s28, 512  }
0x28a0   : > { %19219 = vsyncadd (%p18767_p0), %s15322_s28, 4294966784  ;;  %p102_p1 = scmp.ge.s32.totalorder %s19547_s18, 6   ;;  %s22990_s7 = smov %s19226_s10 }
0x28a1   : > { %s22991_s10 = smov %s19230_s11  ;;  %s22992_s11 = smov %s19558_s26 }
0x28a2   : > { %s22993_s15 = smov %s19547_s18  ;;  %104 = sbr.rel (!%p102_p1) target bundleno = 99 (0x63), region = 316 }
0x28a7   :  { %15335 = vsyncpa [#allocation3], 1 }
0x28a8   :  { %15337 = vsyncpa [#allocation3 + $0x1], 1 }

</bundles_post_ra>
